<compile_context>
chip_gen: v7x
topology: tpu7x:2x2x1
jax: 0.10.0
libtpu: 0.0.40
codegen_flags: <defaults>
</compile_context>

<pallas_src>
import functools

import jax
import jax.numpy as jnp
from jax.experimental import pallas as pl
from jax.experimental.pallas import tpu as pltpu

PROJECTION_DIM = 128       # contrastive_config['projection_dim']
ENC_FEATURES = 1000        # logical encoder output dim expected by nn.Linear(1000, 512)
ENC_FEATURES_PAD = 1024    # padded to a multiple of 128 lanes; padded cols/rows are zero
HIDDEN = 512               # projector hidden dim
K_TILE = 512               # contraction tile for the streamed (large-in_dim) path
# Use the single-step fully-resident kernel while the encoder weight fits comfortably
# in VMEM next to the projector weights and double buffers (v7x: 64 MiB physical).
SMALL_PATH_MAX_WENC_BYTES = 8 * 1024 * 1024


# ----------------------------------------------------------------------------------- #
# Kernels
# ----------------------------------------------------------------------------------- #
def _fused_resident_kernel(x1_ref, x2_ref, wenc_ref, benc_ref, w1_ref, b1_ref,
                           w2_ref, b2_ref, z1_ref, z2_ref):
    """Single-step fused forward: everything VMEM-resident, both views share weights."""
    wenc = wenc_ref[...]
    w1 = w1_ref[...]
    w2 = w2_ref[...]
    benc = benc_ref[...].astype(jnp.float32)
    b1 = b1_ref[...].astype(jnp.float32)
    b2 = b2_ref[...].astype(jnp.float32)

    def proj(x):
        feat = jnp.dot(x, wenc, preferred_element_type=jnp.float32) + benc
        h = jnp.maximum(
            jnp.dot(feat.astype(jnp.bfloat16), w1,
                    preferred_element_type=jnp.float32) + b1, 0.0)
        return jnp.dot(h.astype(jnp.bfloat16), w2,
                       preferred_element_type=jnp.float32) + b2

    z1_ref[...] = proj(x1_ref[...]).astype(z1_ref.dtype)
    z2_ref[...] = proj(x2_ref[...]).astype(z2_ref.dtype)


def _streamed_kernel(x1_ref, x2_ref, wenc_ref, benc_ref, w1_ref, b1_ref, w2_ref, b2_ref,
                     z1_ref, z2_ref, acc1_ref, acc2_ref, *, in_dim, k_tile, d_pad):
    """K-tiled fused forward for large encoder inputs.

    Per grid step k:   acc_v += x_v[:, k*tk:(k+1)*tk] @ Wenc[k*tk:(k+1)*tk, :]  (f32)
    Last step:         feat_v = acc_v + benc;  z_v = relu(feat_v @ W1 + b1) @ W2 + b2
    The ragged last K tile is masked in-kernel (no wrapper-side activation padding).
    """
    k = pl.program_id(0)

    @pl.when(k == 0)
    def _():
        acc1_ref[...] = jnp.zeros_like(acc1_ref)
        acc2_ref[...] = jnp.zeros_like(acc2_ref)

    x1 = x1_ref[...]
    x2 = x2_ref[...]
    if in_dim < d_pad:  # static: zero out-of-range columns of the (partial) last tile
        col = k * k_tile + jax.lax.broadcasted_iota(jnp.int32, x1.shape, 1)
        valid = col < in_dim
        x1 = jnp.where(valid, x1, jnp.zeros_like(x1))
        x2 = jnp.where(valid, x2, jnp.zeros_like(x2))

    w = wenc_ref[...]
    acc1_ref[...] += jnp.dot(x1, w, preferred_element_type=jnp.float32)
    acc2_ref[...] += jnp.dot(x2, w, preferred_element_type=jnp.float32)

    @pl.when(k == pl.num_programs(0) - 1)
    def _():
        w1 = w1_ref[...]
        w2 = w2_ref[...]
        benc = benc_ref[...].astype(jnp.float32)
        b1 = b1_ref[...].astype(jnp.float32)
        b2 = b2_ref[...].astype(jnp.float32)

        def finish(acc_ref, z_ref):
            feat = acc_ref[...] + benc
            h = jnp.maximum(
                jnp.dot(feat.astype(jnp.bfloat16), w1,
                        preferred_element_type=jnp.float32) + b1, 0.0)
            z_ref[...] = (jnp.dot(h.astype(jnp.bfloat16), w2,
                                  preferred_element_type=jnp.float32) + b2
                          ).astype(z_ref.dtype)

        finish(acc1_ref, z1_ref)
        finish(acc2_ref, z2_ref)


# ----------------------------------------------------------------------------------- #
# Wrapper
# ----------------------------------------------------------------------------------- #
def contrastive_forward(x1, x2, params, *, force_streamed=False):
    """ContrastiveModel.forward: returns (z1, z2), each (B, PROJECTION_DIM) float32."""
    wenc, benc, w1, b1, w2, b2 = params
    B = x1.shape[0]
    d_pad = wenc.shape[0]

    # Flatten NCHW row-major (== torch .view(B, -1)); free for contiguous inputs.
    x1f = x1.reshape(B, -1).astype(jnp.bfloat16)
    x2f = x2.reshape(B, -1).astype(jnp.bfloat16)
    in_dim = x1f.shape[1]
    assert in_dim <= d_pad

    wenc_bytes = d_pad * ENC_FEATURES_PAD * 2
    use_resident = (not force_streamed) and wenc_bytes <= SMALL_PATH_MAX_WENC_BYTES

    out_shape = (jax.ShapeDtypeStruct((B, PROJECTION_DIM), jnp.float32),
                 jax.ShapeDtypeStruct((B, PROJECTION_DIM), jnp.float32))
    out_specs = [pl.BlockSpec((B, PROJECTION_DIM), lambda k: (0, 0)),
                 pl.BlockSpec((B, PROJECTION_DIM), lambda k: (0, 0))]
    param_specs = [
        pl.BlockSpec((1, ENC_FEATURES_PAD), lambda k: (0, 0)),       # benc
        pl.BlockSpec((ENC_FEATURES_PAD, HIDDEN), lambda k: (0, 0)),  # W1
        pl.BlockSpec((1, HIDDEN), lambda k: (0, 0)),                 # b1
        pl.BlockSpec((HIDDEN, PROJECTION_DIM), lambda k: (0, 0)),    # W2
        pl.BlockSpec((1, PROJECTION_DIM), lambda k: (0, 0)),         # b2
    ]

    if use_resident:
        # Collapsed K grid: one step, no accumulator scratch, everything resident.
        if in_dim != d_pad:  # only the last <K_TILE columns, usually a no-op
            x1f = jnp.pad(x1f, ((0, 0), (0, d_pad - in_dim)))
            x2f = jnp.pad(x2f, ((0, 0), (0, d_pad - in_dim)))
        grid_spec = pltpu.PrefetchScalarGridSpec(
            num_scalar_prefetch=0,
            grid=(1,),
            in_specs=[pl.BlockSpec((B, d_pad), lambda k: (0, 0)),                # x1
                      pl.BlockSpec((B, d_pad), lambda k: (0, 0)),                # x2
                      pl.BlockSpec((d_pad, ENC_FEATURES_PAD), lambda k: (0, 0)),  # Wenc
                      *param_specs],
            out_specs=out_specs,
        )
        kernel = _fused_resident_kernel
    else:
        # Streamed encoder weight: K_TILE=512 tiles double-buffered by Pallas; the
        # projector weights keep constant index_maps (fetched once, resident).
        assert d_pad % K_TILE == 0
        grid_spec = pltpu.PrefetchScalarGridSpec(
            num_scalar_prefetch=0,
            grid=(d_pad // K_TILE,),
            in_specs=[pl.BlockSpec((B, K_TILE), lambda k: (0, k)),                # x1
                      pl.BlockSpec((B, K_TILE), lambda k: (0, k)),                # x2
                      pl.BlockSpec((K_TILE, ENC_FEATURES_PAD), lambda k: (k, 0)),  # Wenc
                      *param_specs],
            out_specs=out_specs,
            scratch_shapes=[pltpu.VMEM((B, ENC_FEATURES_PAD), jnp.float32),
                            pltpu.VMEM((B, ENC_FEATURES_PAD), jnp.float32)],
        )
        kernel = functools.partial(_streamed_kernel, in_dim=in_dim, k_tile=K_TILE,
                                   d_pad=d_pad)

    # NOTE: on v7x, only add a "parallel" row/batch grid axis once the per-TC row count
    # makes the kernel compute-bound (~M >= 600 total); below that, splitting rows makes
    # each TensorCore re-stream Wenc and loses on HBM bytes. On v5e size M tiles in
    # multiples of 128 (4x128 MXU), on v6e/v7x in multiples of 256.
    z1, z2 = pl.pallas_call(
        kernel,
        out_shape=out_shape,
        grid_spec=grid_spec,
        compiler_params=pltpu.CompilerParams(
            dimension_semantics=("arbitrary",),
            vmem_limit_bytes=32 * 1024 * 1024,
        ),
    )(x1f, x2f, wenc, benc, w1, b1, w2, b2)
    return z1, z2


# ----------------------------------------------------------------------------------- #
# Parameters / reference
# ----------------------------------------------------------------------------------- #
def init_params(key, in_dim):
    """Deterministic parameter init (uniform fan-in scaling, like nn.Linear default).

    Weights are stored in bf16. The encoder weight's contraction dim is padded to a
    multiple of K_TILE with zero rows, and its feature dim (1000) to 1024 with zero
    cols; W1's padded rows are zero, so all padding is exactly inert.
    """
    d_pad = max(K_TILE, pl.cdiv(in_dim, K_TILE) * K_TILE)
    ks = jax.random.split(key, 6)

    def lin(kw, kb, fan_in, fan_out):
        bound = 1.0 / jnp.sqrt(fan_in)
        w = jax.random.uniform(kw, (fan_in, fan_out), jnp.float32, -bound, bound)
        b = jax.random.uniform(kb, (1, fan_out), jnp.float32, -bound, bound)
        return w, b

    # Stand-in encoder: Linear(in_dim -> 1000), zero-padded to (d_pad, 1024).
    wenc_r, benc_r = lin(ks[0], ks[1], in_dim, ENC_FEATURES)
    wenc = jnp.zeros((d_pad, ENC_FEATURES_PAD), jnp.float32)
    wenc = wenc.at[:in_dim, :ENC_FEATURES].set(wenc_r)
    benc = jnp.zeros((1, ENC_FEATURES_PAD), jnp.float32).at[:, :ENC_FEATURES].set(benc_r)

    # Projector Linear(1000, 512): rows 1000..1023 zero so padded features contribute 0.
    w1_r, b1 = lin(ks[2], ks[3], ENC_FEATURES, HIDDEN)
    w1 = jnp.zeros((ENC_FEATURES_PAD, HIDDEN), jnp.float32).at[:ENC_FEATURES, :].set(w1_r)

    # Projector Linear(512, 128).
    w2, b2 = lin(ks[4], ks[5], HIDDEN, PROJECTION_DIM)

    return tuple(a.astype(jnp.bfloat16) for a in (wenc, benc, w1, b1, w2, b2))


def _reference_forward(x1, x2, params):
    """Pure-JAX reference mirroring the kernel's numerics (bf16 operands, f32 acc)."""
    wenc, benc, w1, b1, w2, b2 = params
    d_pad = wenc.shape[0]

    def proj(x):
        b = x.shape[0]
        xf = x.reshape(b, -1).astype(jnp.bfloat16)
        xf = jnp.pad(xf, ((0, 0), (0, d_pad - xf.shape[1])))
        feat = jnp.dot(xf, wenc, preferred_element_type=jnp.float32) + benc.astype(jnp.float32)
        h = jnp.maximum(
            jnp.dot(feat.astype(jnp.bfloat16), w1,
                    preferred_element_type=jnp.float32) + b1.astype(jnp.float32), 0.0)
        return jnp.dot(h.astype(jnp.bfloat16), w2,
                       preferred_element_type=jnp.float32) + b2.astype(jnp.float32)

    return proj(x1), proj(x2)


if __name__ == "__main__":
    key = jax.random.PRNGKey(0)
    kx1, kx2, kp, kx3, kx4, kp2 = jax.random.split(key, 6)

    # ---------------- Test 1: shipped problem size -> single-step resident path ------
    B, C, H, W = 2, 4, 16, 16                     # in_dim = 1024 (already lane-aligned)
    x1 = jax.random.normal(kx1, (B, C, H, W), jnp.float32)
    x2 = jax.random.normal(kx2, (B, C, H, W), jnp.float32)
    params = init_params(kp, C * H * W)

    z1, z2 = contrastive_forward(x1, x2, params)
    jax.block_until_ready((z1, z2))
    r1, r2 = _reference_forward(x1, x2, params)
    assert z1.shape == (B, PROJECTION_DIM) and z2.shape == (B, PROJECTION_DIM)
    assert jnp.allclose(z1, r1, atol=5e-3, rtol=5e-3), float(jnp.max(jnp.abs(z1 - r1)))
    assert jnp.allclose(z2, r2, atol=5e-3, rtol=5e-3), float(jnp.max(jnp.abs(z2 - r2)))

    # ---------------- Test 2: K-streamed path with ragged last tile (in-kernel mask) -
    Bc, Cc = 2, 3                                  # in_dim = 768 -> d_pad = 1024, 2 steps
    y1 = jax.random.normal(kx3, (Bc, Cc, H, W), jnp.float32)
    y2 = jax.random.normal(kx4, (Bc, Cc, H, W), jnp.float32)
    params2 = init_params(kp2, Cc * H * W)

    s1, s2 = contrastive_forward(y1, y2, params2, force_streamed=True)
    jax.block_until_ready((s1, s2))
    q1, q2 = _reference_forward(y1, y2, params2)
    assert jnp.allclose(s1, q1, atol=5e-3, rtol=5e-3), float(jnp.max(jnp.abs(s1 - q1)))
    assert jnp.allclose(s2, q2, atol=5e-3, rtol=5e-3), float(jnp.max(jnp.abs(s2 - q2)))

    print("KERNEL_OK")
</pallas_src>

<mosaic_0001>
module attributes {stable_mosaic.version = 11 : i64} {
  func.func @_fused_resident_kernel(%arg0: i32, %arg1: memref<2x1024xbf16, #tpu.memory_space<vmem>>, %arg2: memref<2x1024xbf16, #tpu.memory_space<vmem>>, %arg3: memref<1024x1024xbf16, #tpu.memory_space<vmem>>, %arg4: memref<1x1024xbf16, #tpu.memory_space<vmem>>, %arg5: memref<1024x512xbf16, #tpu.memory_space<vmem>>, %arg6: memref<1x512xbf16, #tpu.memory_space<vmem>>, %arg7: memref<512x128xbf16, #tpu.memory_space<vmem>>, %arg8: memref<1x128xbf16, #tpu.memory_space<vmem>>, %arg9: memref<2x128xf32, #tpu.memory_space<vmem>>, %arg10: memref<2x128xf32, #tpu.memory_space<vmem>>) attributes {dimension_semantics = [#tpu.dimension_semantics<arbitrary>], iteration_bounds = array<i64: 1>, scalar_prefetch = 0 : i64, scratch_operands = 0 : i64, tpu.core_type = #tpu.core_type<tc>, window_params = [{pipeline_mode = #tpu.pipeline_mode<synchronous>, transform_indices = @transform_0, window_bounds = array<i64: 2, 1024>}, {pipeline_mode = #tpu.pipeline_mode<synchronous>, transform_indices = @transform_1, window_bounds = array<i64: 2, 1024>}, {pipeline_mode = #tpu.pipeline_mode<synchronous>, transform_indices = @transform_2, window_bounds = array<i64: 1024, 1024>}, {pipeline_mode = #tpu.pipeline_mode<synchronous>, transform_indices = @transform_3, window_bounds = array<i64: 1, 1024>}, {pipeline_mode = #tpu.pipeline_mode<synchronous>, transform_indices = @transform_4, window_bounds = array<i64: 1024, 512>}, {pipeline_mode = #tpu.pipeline_mode<synchronous>, transform_indices = @transform_5, window_bounds = array<i64: 1, 512>}, {pipeline_mode = #tpu.pipeline_mode<synchronous>, transform_indices = @transform_6, window_bounds = array<i64: 512, 128>}, {pipeline_mode = #tpu.pipeline_mode<synchronous>, transform_indices = @transform_7, window_bounds = array<i64: 1, 128>}, {pipeline_mode = #tpu.pipeline_mode<synchronous>, transform_indices = @transform_8, window_bounds = array<i64: 2, 128>}, {pipeline_mode = #tpu.pipeline_mode<synchronous>, transform_indices = @transform_9, window_bounds = array<i64: 2, 128>}]} {
    %c0 = arith.constant 0 : index
    %c0_0 = arith.constant 0 : index
    %0 = vector.load %arg3[%c0, %c0_0] : memref<1024x1024xbf16, #tpu.memory_space<vmem>>, vector<1024x1024xbf16>
    %c0_1 = arith.constant 0 : index
    %c0_2 = arith.constant 0 : index
    %1 = vector.load %arg5[%c0_1, %c0_2] : memref<1024x512xbf16, #tpu.memory_space<vmem>>, vector<1024x512xbf16>
    %c0_3 = arith.constant 0 : index
    %c0_4 = arith.constant 0 : index
    %2 = vector.load %arg7[%c0_3, %c0_4] : memref<512x128xbf16, #tpu.memory_space<vmem>>, vector<512x128xbf16>
    %c0_5 = arith.constant 0 : index
    %c0_6 = arith.constant 0 : index
    %3 = vector.load %arg4[%c0_5, %c0_6] : memref<1x1024xbf16, #tpu.memory_space<vmem>>, vector<1x1024xbf16>
    %4 = arith.extf %3 : vector<1x1024xbf16> to vector<1x1024xf32>
    %c0_7 = arith.constant 0 : index
    %c0_8 = arith.constant 0 : index
    %5 = vector.load %arg6[%c0_7, %c0_8] : memref<1x512xbf16, #tpu.memory_space<vmem>>, vector<1x512xbf16>
    %6 = arith.extf %5 : vector<1x512xbf16> to vector<1x512xf32>
    %c0_9 = arith.constant 0 : index
    %c0_10 = arith.constant 0 : index
    %7 = vector.load %arg8[%c0_9, %c0_10] : memref<1x128xbf16, #tpu.memory_space<vmem>>, vector<1x128xbf16>
    %8 = arith.extf %7 : vector<1x128xbf16> to vector<1x128xf32>
    %c0_11 = arith.constant 0 : index
    %c0_12 = arith.constant 0 : index
    %9 = vector.load %arg1[%c0_11, %c0_12] : memref<2x1024xbf16, #tpu.memory_space<vmem>>, vector<2x1024xbf16>
    %cst = arith.constant dense<0.000000e+00> : vector<2x1024xf32>
    %10 = tpu.matmul %9, %0, %cst {dimension_numbers = #tpu.dot_dimension_numbers<[1], [0], [0], [1], [0, 0, 1, 1], [], []>} : vector<2x1024xbf16>, vector<1024x1024xbf16>, vector<2x1024xf32> -> vector<2x1024xf32>
    %11 = vector.broadcast %4 : vector<1x1024xf32> to vector<2x1024xf32>
    %12 = arith.addf %10, %11 : vector<2x1024xf32>
    %13 = arith.truncf %12 : vector<2x1024xf32> to vector<2x1024xbf16>
    %cst_13 = arith.constant dense<0.000000e+00> : vector<2x512xf32>
    %14 = tpu.matmul %13, %1, %cst_13 {dimension_numbers = #tpu.dot_dimension_numbers<[1], [0], [0], [1], [0, 0, 1, 1], [], []>} : vector<2x1024xbf16>, vector<1024x512xbf16>, vector<2x512xf32> -> vector<2x512xf32>
    %15 = vector.broadcast %6 : vector<1x512xf32> to vector<2x512xf32>
    %16 = arith.addf %14, %15 : vector<2x512xf32>
    %cst_14 = arith.constant 0.000000e+00 : f32
    %17 = vector.broadcast %cst_14 : f32 to vector<2x512xf32>
    %18 = arith.maximumf %16, %17 : vector<2x512xf32>
    %19 = arith.truncf %18 : vector<2x512xf32> to vector<2x512xbf16>
    %cst_15 = arith.constant dense<0.000000e+00> : vector<2x128xf32>
    %20 = tpu.matmul %19, %2, %cst_15 {dimension_numbers = #tpu.dot_dimension_numbers<[1], [0], [0], [1], [0, 0, 1, 1], [], []>} : vector<2x512xbf16>, vector<512x128xbf16>, vector<2x128xf32> -> vector<2x128xf32>
    %21 = vector.broadcast %8 : vector<1x128xf32> to vector<2x128xf32>
    %22 = arith.addf %20, %21 : vector<2x128xf32>
    %c0_16 = arith.constant 0 : index
    %c0_17 = arith.constant 0 : index
    %23 = vector.load %arg9[%c0_16, %c0_17] : memref<2x128xf32, #tpu.memory_space<vmem>>, vector<2x128xf32>
    tpu.vector_store %arg9[%c0_16, %c0_17], %22 {strides = array<i32>} : memref<2x128xf32, #tpu.memory_space<vmem>>, vector<2x128xf32>,
    %c0_18 = arith.constant 0 : index
    %c0_19 = arith.constant 0 : index
    %24 = vector.load %arg2[%c0_18, %c0_19] : memref<2x1024xbf16, #tpu.memory_space<vmem>>, vector<2x1024xbf16>
    %cst_20 = arith.constant dense<0.000000e+00> : vector<2x1024xf32>
    %25 = tpu.matmul %24, %0, %cst_20 {dimension_numbers = #tpu.dot_dimension_numbers<[1], [0], [0], [1], [0, 0, 1, 1], [], []>} : vector<2x1024xbf16>, vector<1024x1024xbf16>, vector<2x1024xf32> -> vector<2x1024xf32>
    %26 = vector.broadcast %4 : vector<1x1024xf32> to vector<2x1024xf32>
    %27 = arith.addf %25, %26 : vector<2x1024xf32>
    %28 = arith.truncf %27 : vector<2x1024xf32> to vector<2x1024xbf16>
    %cst_21 = arith.constant dense<0.000000e+00> : vector<2x512xf32>
    %29 = tpu.matmul %28, %1, %cst_21 {dimension_numbers = #tpu.dot_dimension_numbers<[1], [0], [0], [1], [0, 0, 1, 1], [], []>} : vector<2x1024xbf16>, vector<1024x512xbf16>, vector<2x512xf32> -> vector<2x512xf32>
    %30 = vector.broadcast %6 : vector<1x512xf32> to vector<2x512xf32>
    %31 = arith.addf %29, %30 : vector<2x512xf32>
    %cst_22 = arith.constant 0.000000e+00 : f32
    %32 = vector.broadcast %cst_22 : f32 to vector<2x512xf32>
    %33 = arith.maximumf %31, %32 : vector<2x512xf32>
    %34 = arith.truncf %33 : vector<2x512xf32> to vector<2x512xbf16>
    %cst_23 = arith.constant dense<0.000000e+00> : vector<2x128xf32>
    %35 = tpu.matmul %34, %2, %cst_23 {dimension_numbers = #tpu.dot_dimension_numbers<[1], [0], [0], [1], [0, 0, 1, 1], [], []>} : vector<2x512xbf16>, vector<512x128xbf16>, vector<2x128xf32> -> vector<2x128xf32>
    %36 = vector.broadcast %8 : vector<1x128xf32> to vector<2x128xf32>
    %37 = arith.addf %35, %36 : vector<2x128xf32>
    %c0_24 = arith.constant 0 : index
    %c0_25 = arith.constant 0 : index
    %38 = vector.load %arg10[%c0_24, %c0_25] : memref<2x128xf32, #tpu.memory_space<vmem>>, vector<2x128xf32>
    tpu.vector_store %arg10[%c0_24, %c0_25], %37 {strides = array<i32>} : memref<2x128xf32, #tpu.memory_space<vmem>>, vector<2x128xf32>,
    return
  }
  func.func @transform_0(%arg0: i32) -> (i32, i32) {
    %c0_i32 = arith.constant 0 : i32
    %c0_i32_0 = arith.constant 0 : i32
    %c0_i32_1 = arith.constant 0 : i32
    return %c0_i32, %c0_i32_0 : i32, i32
  }
  func.func @transform_1(%arg0: i32) -> (i32, i32) {
    %c0_i32 = arith.constant 0 : i32
    %c0_i32_0 = arith.constant 0 : i32
    %c0_i32_1 = arith.constant 0 : i32
    return %c0_i32, %c0_i32_0 : i32, i32
  }
  func.func @transform_2(%arg0: i32) -> (i32, i32) {
    %c0_i32 = arith.constant 0 : i32
    %c0_i32_0 = arith.constant 0 : i32
    %c0_i32_1 = arith.constant 0 : i32
    return %c0_i32, %c0_i32_0 : i32, i32
  }
  func.func @transform_3(%arg0: i32) -> (i32, i32) {
    %c0_i32 = arith.constant 0 : i32
    %c0_i32_0 = arith.constant 0 : i32
    %c0_i32_1 = arith.constant 0 : i32
    return %c0_i32, %c0_i32_0 : i32, i32
  }
  func.func @transform_4(%arg0: i32) -> (i32, i32) {
    %c0_i32 = arith.constant 0 : i32
    %c0_i32_0 = arith.constant 0 : i32
    %c0_i32_1 = arith.constant 0 : i32
    return %c0_i32, %c0_i32_0 : i32, i32
  }
  func.func @transform_5(%arg0: i32) -> (i32, i32) {
    %c0_i32 = arith.constant 0 : i32
    %c0_i32_0 = arith.constant 0 : i32
    %c0_i32_1 = arith.constant 0 : i32
    return %c0_i32, %c0_i32_0 : i32, i32
  }
  func.func @transform_6(%arg0: i32) -> (i32, i32) {
    %c0_i32 = arith.constant 0 : i32
    %c0_i32_0 = arith.constant 0 : i32
    %c0_i32_1 = arith.constant 0 : i32
    return %c0_i32, %c0_i32_0 : i32, i32
  }
  func.func @transform_7(%arg0: i32) -> (i32, i32) {
    %c0_i32 = arith.constant 0 : i32
    %c0_i32_0 = arith.constant 0 : i32
    %c0_i32_1 = arith.constant 0 : i32
    return %c0_i32, %c0_i32_0 : i32, i32
  }
  func.func @transform_8(%arg0: i32) -> (i32, i32) {
    %c0_i32 = arith.constant 0 : i32
    %c0_i32_0 = arith.constant 0 : i32
    %c0_i32_1 = arith.constant 0 : i32
    return %c0_i32, %c0_i32_0 : i32, i32
  }
  func.func @transform_9(%arg0: i32) -> (i32, i32) {
    %c0_i32 = arith.constant 0 : i32
    %c0_i32_0 = arith.constant 0 : i32
    %c0_i32_1 = arith.constant 0 : i32
    return %c0_i32, %c0_i32_0 : i32, i32
  }
}

</mosaic_0001>

<bundles_post_ra>
// kernel: tpu_custom_call.1
= control target key start
LH: loop header
LB: loop body
LE: loop exit
PB: predicated region body
PF: predicated region fallthrough
CT: control target
= control target key end

     0   :  { %15 = vsyncpa [#allocation3], 0  ;;  %s11971_s0 = inlined_call_operand.hbm [shape: bf16[2,1024], index: 0, kind: input, shape index: {}]   ;;  %s11972_s1 = inlined_call_operand.hbm [shape: bf16[2,1024], index: 1, kind: input, shape index: {}]   ;;  %s11973_s2 = inlined_call_operand.hbm [shape: bf16[1024,1024], index: 2, kind: input, shape index: {}]   ;;  %s11974_s3 = inlined_call_operand.hbm [shape: bf16[1,1024], index: 3, kind: input, shape index: {}]   ;;  %s11975_s4 = inlined_call_operand.hbm [shape: bf16[1024,512], index: 4, kind: input, shape index: {}]   ;;  %s11976_s5 = inlined_call_operand.hbm [shape: bf16[1,512], index: 5, kind: input, shape index: {}]   ;;  %s11977_s6 = inlined_call_operand.hbm [shape: bf16[512,128], index: 6, kind: input, shape index: {}]   ;;  %s11978_s7 = inlined_call_operand.hbm [shape: bf16[1,128], index: 7, kind: input, shape index: {}]   ;;  %s11979_s8 = inlined_call_operand.hbm [shape: f32[2,128], index: 8, kind: output, shape index: {0}]   ;;  %s11980_s9 = inlined_call_operand.hbm [shape: f32[2,128], index: 9, kind: output, shape index: {1}]  }
   0x1   :  { %16 = vsyncpa [#allocation6], 0 }
   0x2   :  { %17 = vsyncpa [#allocation9], 0 }
   0x3   :  { %18 = vsyncpa [#allocation12], 0 }
   0x4   :  { %19 = vsyncpa [#allocation15], 0 }
   0x5   :  { %20 = vsyncpa [#allocation4], 0 }
   0x6   :  { %21 = vsyncpa [#allocation18], 0  ;;  %s9445_s30 = smov [#allocation5]   ;;  %s9446_s11 = smov [#allocation8]  }
   0x7   :  { %s38_s10 = sshll.u32 %s9445_s30, 4  ;;  %s60_s12 = sshll.u32 %s9446_s11, 4  ;;  %s39_s10 = int_to_ptr.vmem [resolvable:$true] %s38_s10  ;;  %s61_s12 = int_to_ptr.vmem [resolvable:$true] %s60_s12 }
   0x8   :  { %s9211_s15 = scalar_lea.hbm %s11972_s1, 128 }
   0x9   :  { %p9212_p0 = scmp.ne.s32.totalorder %s11972_s1, %s9211_s15  ;;  %p9215_p1 = scmp.lt.u32.totalorder %s9211_s15, %s11972_s1 }
   0xb   :  { %p9217_p2 = pnand %p9215_p1, %p9212_p0 }
   0xd   :  { %9220 = shalt.err (!%p9217_p2)
}
   0xe   :  { %s9221_s20 = scalar_lea.vmem %s39_s10, 128  ;;  %p9226_p4 = scmp.lt.s32.totalorder %s39_s10, %s39_s10 }
   0xf   :  { %p9222_p3 = scmp.ne.s32.totalorder %s39_s10, %s9221_s20  ;;  %p9227_p5 = scmp.lt.s32.totalorder %s9221_s20, %s9221_s20 }
  0x11   :  { %p9228_p6 = por %p9227_p5, %p9226_p4 }
  0x13   :  { %p9229_p7 = pnand %p9228_p6, %p9222_p3 }
  0x15   :  { %9232 = shalt.err (!%p9229_p7)
}
  0x16   :  { %41 = dma.hbm_to_vmem [thread:$0]  %s11972_s1, 128, %s39_s10, [#allocation6]  }
  0x17   :  { %s9233_s25 = scalar_lea.hbm %s11974_s3, 128 }
  0x18   :  { %p9234_p8 = scmp.ne.s32.totalorder %s11974_s3, %s9233_s25  ;;  %p9237_p9 = scmp.lt.u32.totalorder %s9233_s25, %s11974_s3 }
  0x1a   :  { %p9239_p10 = pnand %p9237_p9, %p9234_p8 }
  0x1c   :  { %9242 = shalt.err (!%p9239_p10)
}
  0x1d   :  { %s9243_s30 = scalar_lea.vmem %s61_s12, 128  ;;  %p9248_p12 = scmp.lt.s32.totalorder %s61_s12, %s61_s12 }
  0x1e   :  { %p9244_p11 = scmp.ne.s32.totalorder %s61_s12, %s9243_s30  ;;  %p9249_p13 = scmp.lt.s32.totalorder %s9243_s30, %s9243_s30 }
  0x20   :  { %p9250_p0 = por %p9249_p13, %p9248_p12 }
  0x22   :  { %p9251_p1 = pnand %p9250_p0, %p9244_p11 }
  0x24   :  { %9254 = shalt.err (!%p9251_p1)
}
  0x25   :  { %63 = dma.hbm_to_vmem [thread:$0]  %s11974_s3, 128, %s61_s12, [#allocation9]  }
  0x26   :  { %s9447_s11 = smov [#allocation11]   ;;  %s9448_s14 = smov [#allocation2]  }
  0x27   :  { %s82_s13 = sshll.u32 %s9447_s11, 4  ;;  %s28_s15 = sshll.u32 %s9448_s14, 4  ;;  %s83_s13 = int_to_ptr.vmem [resolvable:$true] %s82_s13  ;;  %s29_s15 = int_to_ptr.vmem [resolvable:$true] %s28_s15 }
  0x28   :  { %s9255_s18 = scalar_lea.hbm %s11976_s5, 64 }
  0x29   :  { %p9256_p2 = scmp.ne.s32.totalorder %s11976_s5, %s9255_s18  ;;  %p9259_p3 = scmp.lt.u32.totalorder %s9255_s18, %s11976_s5 }
  0x2b   :  { %p9261_p4 = pnand %p9259_p3, %p9256_p2 }
  0x2d   :  { %9264 = shalt.err (!%p9261_p4)
}
  0x2e   :  { %s9265_s3 = scalar_lea.vmem %s83_s13, 64  ;;  %p9270_p6 = scmp.lt.s32.totalorder %s83_s13, %s83_s13 }
  0x2f   :  { %p9266_p5 = scmp.ne.s32.totalorder %s83_s13, %s9265_s3  ;;  %p9271_p7 = scmp.lt.s32.totalorder %s9265_s3, %s9265_s3 }
  0x31   :  { %p9272_p8 = por %p9271_p7, %p9270_p6 }
  0x33   :  { %p9273_p9 = pnand %p9272_p8, %p9266_p5 }
  0x35   :  { %9276 = shalt.err (!%p9273_p9)
}
  0x36   :  { %85 = dma.hbm_to_vmem [thread:$0]  %s11976_s5, 64, %s83_s13, [#allocation12]  }
  0x37   :  { %s9277_s26 = scalar_lea.hbm %s11971_s0, 128 }
  0x38   :  { %p9278_p10 = scmp.ne.s32.totalorder %s11971_s0, %s9277_s26  ;;  %p9281_p11 = scmp.lt.u32.totalorder %s9277_s26, %s11971_s0 }
  0x3a   :  { %p9283_p12 = pnand %p9281_p11, %p9278_p10 }
  0x3c   :  { %9286 = shalt.err (!%p9283_p12)
}
  0x3d   :  { %s9287_s1 = scalar_lea.vmem %s29_s15, 128  ;;  %p9292_p0 = scmp.lt.s32.totalorder %s29_s15, %s29_s15 }
  0x3e   :  { %p9288_p13 = scmp.ne.s32.totalorder %s29_s15, %s9287_s1  ;;  %p9293_p1 = scmp.lt.s32.totalorder %s9287_s1, %s9287_s1 }
  0x40   :  { %p9294_p2 = por %p9293_p1, %p9292_p0 }
  0x42   :  { %p9295_p3 = pnand %p9294_p2, %p9288_p13 }
  0x44   :  { %9298 = shalt.err (!%p9295_p3)
}
  0x45   :  { %31 = dma.hbm_to_vmem [thread:$0]  %s11971_s0, 128, %s29_s15, [#allocation3]  }
  0x46   :  { %s9449_s11 = smov [#allocation7]   ;;  %s9299_s17 = scalar_lea.hbm %s11973_s2, 65536 }
  0x47   :  { %s47_s13 = sshll.u32 %s9449_s11, 4  ;;  %p9300_p4 = scmp.ne.s32.totalorder %s11973_s2, %s9299_s17  ;;  %s48_s13 = int_to_ptr.vmem [resolvable:$true] %s47_s13 }
  0x48   :  { %p9303_p5 = scmp.lt.u32.totalorder %s9299_s17, %s11973_s2 }
  0x4a   :  { %p9305_p6 = pnand %p9303_p5, %p9300_p4 }
  0x4c   :  { %9308 = shalt.err (!%p9305_p6)
}
  0x4d   :  { %s9309_s22 = scalar_lea.vmem %s48_s13, 65536  ;;  %p9314_p8 = scmp.lt.s32.totalorder %s48_s13, %s48_s13 }
  0x4e   :  { %p9310_p7 = scmp.ne.s32.totalorder %s48_s13, %s9309_s22  ;;  %p9315_p9 = scmp.lt.s32.totalorder %s9309_s22, %s9309_s22 }
  0x50   :  { %p9316_p10 = por %p9315_p9, %p9314_p8 }
  0x52   :  { %p9317_p11 = pnand %p9316_p10, %p9310_p7 }
  0x54   :  { %9320 = shalt.err (!%p9317_p11)
}
  0x55   :  { %s9450_s0 = smov 512   ;;  %s9451_s15 = smov 32  }
  0x56   :  { %53 = dma.hbm_to_vmem [thread:$0]  %s11973_s2, 65536, %s48_s13, [#allocation6], %s9450_s0, %s9450_s0, %s9451_s15  }
  0x57   :  { %s9452_s23 = smov [#allocation10]   ;;  %s9321_s27 = scalar_lea.hbm %s11975_s4, 32768 }
  0x58   :  { %s69_s24 = sshll.u32 %s9452_s23, 4  ;;  %p9322_p12 = scmp.ne.s32.totalorder %s11975_s4, %s9321_s27  ;;  %s70_s24 = int_to_ptr.vmem [resolvable:$true] %s69_s24 }
  0x59   :  { %p9325_p13 = scmp.lt.u32.totalorder %s9321_s27, %s11975_s4 }
  0x5b   :  { %p9327_p0 = pnand %p9325_p13, %p9322_p12 }
  0x5d   :  { %9330 = shalt.err (!%p9327_p0)
}
  0x5e   :  { %s9331_s5 = scalar_lea.vmem %s70_s24, 32768  ;;  %p9336_p2 = scmp.lt.s32.totalorder %s70_s24, %s70_s24 }
  0x5f   :  { %p9332_p1 = scmp.ne.s32.totalorder %s70_s24, %s9331_s5  ;;  %p9337_p3 = scmp.lt.s32.totalorder %s9331_s5, %s9331_s5 }
  0x61   :  { %p9338_p4 = por %p9337_p3, %p9336_p2 }
  0x63   :  { %p9339_p5 = pnand %p9338_p4, %p9332_p1 }
  0x65   :  { %9342 = shalt.err (!%p9339_p5)
}
  0x66   :  { %s9453_s2 = smov 256   ;;  %s9454_s10 = smov 16  }
  0x67   :  { %75 = dma.hbm_to_vmem [thread:$0]  %s11975_s4, 32768, %s70_s24, [#allocation9], %s9453_s2, %s9453_s2, %s9454_s10  }
  0x68   :  { %s9455_s14 = smov [#allocation13]   ;;  %s9343_s19 = scalar_lea.hbm %s11977_s6, 4096 }
  0x69   :  { %s91_s16 = sshll.u32 %s9455_s14, 4  ;;  %p9344_p6 = scmp.ne.s32.totalorder %s11977_s6, %s9343_s19  ;;  %s92_s16 = int_to_ptr.vmem [resolvable:$true] %s91_s16 }
  0x6a   :  { %p9347_p7 = scmp.lt.u32.totalorder %s9343_s19, %s11977_s6 }
  0x6c   :  { %p9349_p8 = pnand %p9347_p7, %p9344_p6 }
  0x6e   :  { %9352 = shalt.err (!%p9349_p8)
}
  0x6f   :  { %s9353_s15 = scalar_lea.vmem %s92_s16, 4096  ;;  %p9358_p10 = scmp.lt.s32.totalorder %s92_s16, %s92_s16 }
  0x70   :  { %p9354_p9 = scmp.ne.s32.totalorder %s92_s16, %s9353_s15  ;;  %p9359_p11 = scmp.lt.s32.totalorder %s9353_s15, %s9353_s15 }
  0x72   :  { %p9360_p12 = por %p9359_p11, %p9358_p10 }
  0x74   :  { %p9361_p13 = pnand %p9360_p12, %p9354_p9 }
  0x76   :  { %9364 = shalt.err (!%p9361_p13)
}
  0x77   :  { %s9456_s4 = smov 64   ;;  %s9457_s3 = smov 4  }
  0x78   :  { %97 = dma.hbm_to_vmem [thread:$0]  %s11977_s6, 4096, %s92_s16, [#allocation12], %s9456_s4, %s9456_s4, %s9457_s3  }
  0x79   :  { %s9458_s24 = smov [#allocation14]   ;;  %s9365_s28 = scalar_lea.hbm %s11978_s7, 16 }
  0x7a   :  { %s104_s25 = sshll.u32 %s9458_s24, 4  ;;  %p9366_p0 = scmp.ne.s32.totalorder %s11978_s7, %s9365_s28  ;;  %s105_s25 = int_to_ptr.vmem [resolvable:$true] %s104_s25 }
  0x7b   :  { %p9369_p1 = scmp.lt.u32.totalorder %s9365_s28, %s11978_s7 }
  0x7d   :  { %p9371_p2 = pnand %p9369_p1, %p9366_p0 }
  0x7f   :  { %9374 = shalt.err (!%p9371_p2)
}
  0x80   :  { %s9375_s2 = scalar_lea.vmem %s105_s25, 16  ;;  %s9379_s6 = scalar_lea.vmem %s105_s25, 32 }
  0x81   :  { %p9376_p3 = scmp.ne.s32.totalorder %s105_s25, %s9375_s2  ;;  %p9380_p4 = scmp.lt.s32.totalorder %s105_s25, %s105_s25 }
  0x82   :  { %p9381_p5 = scmp.lt.s32.totalorder %s9379_s6, %s9375_s2 }
  0x84   :  { %p9382_p6 = por %p9381_p5, %p9380_p4 }
  0x86   :  { %p9383_p7 = pnand %p9382_p6, %p9376_p3 }
  0x88   :  { %9386 = shalt.err (!%p9383_p7)
}
  0x89   :  { %107 = dma.hbm_to_vmem [thread:$0]  %s11978_s7, 16, %s105_s25, [#allocation15]  }
  0x8a   :  { %9431 = dma.done.wait [#allocation3], 128  }
  0x8b   :  { %9432 = vsyncadd [#allocation3], 4294967168 }
  0x8c   :  { %9433 = dma.done.wait [#allocation6], 65664  }
  0x8d   :  { %9434 = vsyncadd [#allocation6], 4294901632 }
  0x8e   :  { %9435 = dma.done.wait [#allocation9], 32896  }
  0x8f   :  { %9436 = vsyncadd [#allocation9], 4294934400 }
  0x90   :  { %9437 = dma.done.wait [#allocation12], 4160  }
  0x91   :  { %9438 = vsyncadd [#allocation12], 4294963136 }
  0x92   :  { %9439 = dma.done.wait [#allocation15], 16  }
  0x93   :  { %9440 = vsyncadd [#allocation15], 4294967280  ;;  %v133_v0 = vld [vmem:[#allocation7] sm:$0xff]  ;;  %v134_v2 = vld [vmem:[#allocation7 + $0x8] sm:$0xff]  ;;  %v975_v32 = vlaneseq  ;;  %v9459_v33 = vmov 1966171168  }
  0x94   :  { %v137_v1 = vld [vmem:[#allocation7 + $0x20] sm:$0xff]  ;;  %v138_v4 = vld [vmem:[#allocation7 + $0x28] sm:$0xff]  ;;  %v1050_v34 = vunpack.c.l.s4 %v9459_v33  ;;  %v9684_v59 = vld [vmem:[#allocation2] sm:$0xff]  ;;  %s9460_s7 = smov [#allocation16]  }
  0x95   :  { %v9608_v3 = vcombine.high %v133_v0, %v137_v1  ;;  %v9610_v5 = vcombine.low %v133_v0, %v137_v1  ;;  %v141_v6 = vld [vmem:[#allocation7 + $0x40] sm:$0xff]  ;;  %v9612_v8 = vcombine.high %v134_v2, %v138_v4  ;;  %v9614_v9 = vcombine.low %v134_v2, %v138_v4  ;;  %v142_v11 = vld [vmem:[#allocation7 + $0x48] sm:$0xff]  ;;  %s7405_s13 = sshll.u32 %s9460_s7, 4  ;;  %s7406_s13 = int_to_ptr.vmem [resolvable:$true] %s7405_s13 }
  0x96   :  { %v145_v7 = vld [vmem:[#allocation7 + $0x60] sm:$0xff]  ;;  %v146_v12 = vld [vmem:[#allocation7 + $0x68] sm:$0xff]  ;;  %v9658_v43 = vshrl.u32 %v975_v32, 7  ;;  %v1051_v44 = vunpack.c.0.s8 %v1050_v34  ;;  %s9387_s14 = scalar_lea.vmem %s7406_s13, 32  ;;  %p9392_p9 = scmp.lt.s32.totalorder %s7406_s13, %s7406_s13 }
  0x97   :  { %v9616_v10 = vcombine.high %v141_v6, %v145_v7  ;;  %v149_v13 = vld [vmem:[#allocation7 + $0x80] sm:$0xff]  ;;  %3665 = vmatprep.subr.bf16.mxu0 %v9608_v3  ;;  %v9619_v14 = vcombine.high %v142_v11, %v146_v12  ;;  %v150_v16 = vld [vmem:[#allocation7 + $0x88] sm:$0xff]  ;;  %3829 = vmatprep.subr.bf16.mxu1 %v9612_v8  ;;  %v9623_v18 = vcombine.low %v141_v6, %v145_v7  ;;  %p9388_p8 = scmp.ne.s32.totalorder %s7406_s13, %s9387_s14  ;;  %p9393_p10 = scmp.lt.s32.totalorder %s9387_s14, %s9387_s14 }
  0x98   :  { %v153_v15 = vld [vmem:[#allocation7 + $0xa0] sm:$0xff]  ;;  %v154_v17 = vld [vmem:[#allocation7 + $0xa8] sm:$0xff]  ;;  %3666 = vmatpush1.bf16.msra.mxu0 %v9610_v5  ;;  %3830 = vmatpush1.bf16.msra.mxu1 %v9614_v9  ;;  %v9627_v19 = vcombine.low %v142_v11, %v146_v12  ;;  %v9673_v53 = vsub.s32 %v1051_v44, %v9658_v43 }
  0x99   :  { %3667 = vmatprep.subr.bf16.mxu0 %v9616_v10  ;;  %v9629_v20 = vcombine.high %v149_v13, %v153_v15  ;;  %3831 = vmatprep.subr.bf16.mxu1 %v9619_v14  ;;  %v9632_v21 = vcombine.high %v150_v16, %v154_v17  ;;  %v157_v22 = vld [vmem:[#allocation7 + $0xc0] sm:$0xff]  ;;  %v158_v24 = vld [vmem:[#allocation7 + $0xc8] sm:$0xff]  ;;  %v9635_v26 = vcombine.low %v149_v13, %v153_v15  ;;  %p9394_p11 = por %p9393_p10, %p9392_p9 }
  0x9a   :  { %v161_v23 = vld [vmem:[#allocation7 + $0xe0] sm:$0xff]  ;;  %v162_v25 = vld [vmem:[#allocation7 + $0xe8] sm:$0xff]  ;;  %v9639_v27 = vcombine.low %v150_v16, %v154_v17  ;;  %v9691_v63 = vrot.slane %v9684_v59, %v9673_v53 }
  0x9b   :  { %v9641_v28 = vcombine.high %v157_v22, %v161_v23  ;;  %v9644_v29 = vcombine.high %v158_v24, %v162_v25  ;;  %v165_v30 = vld [vmem:[#allocation7 + $0x100] sm:$0xff]  ;;  %v166_v35 = vld [vmem:[#allocation7 + $0x108] sm:$0xff]  ;;  %v9647_v37 = vcombine.low %v157_v22, %v161_v23  ;;  %v9651_v38 = vcombine.low %v158_v24, %v162_v25  ;;  %p9395_p12 = pnand %p9394_p11, %p9388_p8 }
  0x9c   :  { %3668 = vmatpush1.bf16.msra.mxu0 %v9623_v18  ;;  %3832 = vmatpush1.bf16.msra.mxu1 %v9627_v19  ;;  %v169_v31 = vld [vmem:[#allocation7 + $0x120] sm:$0xff]  ;;  %v170_v36 = vld [vmem:[#allocation7 + $0x128] sm:$0xff]  ;;  %v1063_v4 = vcombine.high %v9691_v63, %v9691_v63 }
  0x9d   :  { %3669 = vmatprep.subr.bf16.mxu0 %v9629_v20  ;;  %3833 = vmatprep.subr.bf16.mxu1 %v9632_v21  ;;  %v9653_v39 = vcombine.high %v165_v30, %v169_v31  ;;  %v9656_v40 = vcombine.high %v166_v35, %v170_v36  ;;  %v173_v41 = vld [vmem:[#allocation7 + $0x140] sm:$0xff]  ;;  %v174_v45 = vld [vmem:[#allocation7 + $0x148] sm:$0xff]  ;;  %v9661_v47 = vcombine.low %v165_v30, %v169_v31 }
  0x9e   :  { %v177_v42 = vld [vmem:[#allocation7 + $0x160] sm:$0xff]  ;;  %v178_v46 = vld [vmem:[#allocation7 + $0x168] sm:$0xff]  ;;  %v9665_v48 = vcombine.low %v166_v35, %v170_v36  ;;  %v9708_v15 = vrot.slane %v1063_v4, %v9673_v53 }
  0x9f   :  { %v9667_v49 = vcombine.high %v173_v41, %v177_v42  ;;  %v9670_v50 = vcombine.high %v174_v45, %v178_v46  ;;  %v181_v51 = vld [vmem:[#allocation7 + $0x180] sm:$0xff]  ;;  %v182_v54 = vld [vmem:[#allocation7 + $0x188] sm:$0xff]  ;;  %v9676_v56 = vcombine.low %v173_v41, %v177_v42  ;;  %v9680_v57 = vcombine.low %v174_v45, %v178_v46 }
  0xa0   :  { %3670 = vmatpush1.bf16.msra.mxu0 %v9635_v26  ;;  %3834 = vmatpush1.bf16.msra.mxu1 %v9639_v27  ;;  %v185_v52 = vld [vmem:[#allocation7 + $0x1a0] sm:$0xff]  ;;  %v186_v55 = vld [vmem:[#allocation7 + $0x1a8] sm:$0xff] }
  0xa1   :  { %3671 = vmatprep.subr.bf16.mxu0 %v9641_v28  ;;  %3835 = vmatprep.subr.bf16.mxu1 %v9644_v29  ;;  %v9682_v58 = vcombine.high %v181_v51, %v185_v52  ;;  %v9687_v60 = vcombine.high %v182_v54, %v186_v55  ;;  %v189_v61 = vld [vmem:[#allocation7 + $0x1c0] sm:$0xff]  ;;  %v190_v0 = vld [vmem:[#allocation7 + $0x1c8] sm:$0xff]  ;;  %v9694_v2 = vcombine.low %v181_v51, %v185_v52 }
  0xa2   :  { %v193_v62 = vld [vmem:[#allocation7 + $0x1e0] sm:$0xff]  ;;  %v194_v1 = vld [vmem:[#allocation7 + $0x1e8] sm:$0xff]  ;;  %v9700_v6 = vcombine.low %v182_v54, %v186_v55  ;;  %3697 = vmatprep.mubr.bf16.mxu0 %v9708_v15  ;;  %3861 = vmatprep.mubr.bf16.mxu1 %v9708_v15 }
  0xa3   :  { %v9702_v7 = vcombine.high %v189_v61, %v193_v62  ;;  %v9705_v11 = vcombine.high %v190_v0, %v194_v1  ;;  %v197_v12 = vld [vmem:[#allocation7 + $0x200] sm:$0xff]  ;;  %v198_v16 = vld [vmem:[#allocation7 + $0x208] sm:$0xff]  ;;  %v9711_v22 = vcombine.low %v189_v61, %v193_v62  ;;  %v9716_v23 = vcombine.low %v190_v0, %v194_v1 }
  0xa4   :  { %3672 = vmatpush1.bf16.msra.mxu0 %v9647_v37  ;;  %3836 = vmatpush1.bf16.msra.mxu1 %v9651_v38  ;;  %v201_v13 = vld [vmem:[#allocation7 + $0x220] sm:$0xff]  ;;  %v202_v17 = vld [vmem:[#allocation7 + $0x228] sm:$0xff] }
  0xa5   :  { %3673 = vmatprep.subr.bf16.mxu0 %v9653_v39  ;;  %3837 = vmatprep.subr.bf16.mxu1 %v9656_v40  ;;  %v9718_v24 = vcombine.high %v197_v12, %v201_v13  ;;  %v9721_v25 = vcombine.high %v198_v16, %v202_v17  ;;  %v205_v30 = vld [vmem:[#allocation7 + $0x240] sm:$0xff]  ;;  %v206_v32 = vld [vmem:[#allocation7 + $0x248] sm:$0xff]  ;;  %v9725_v34 = vcombine.low %v197_v12, %v201_v13 }
  0xa6   :  { %v209_v31 = vld [vmem:[#allocation7 + $0x260] sm:$0xff]  ;;  %v210_v33 = vld [vmem:[#allocation7 + $0x268] sm:$0xff]  ;;  %v9729_v35 = vcombine.low %v198_v16, %v202_v17 }
  0xa7   :  { %v9731_v36 = vcombine.high %v205_v30, %v209_v31  ;;  %v9734_v41 = vcombine.high %v206_v32, %v210_v33  ;;  %v213_v42 = vld [vmem:[#allocation7 + $0x280] sm:$0xff]  ;;  %v214_v45 = vld [vmem:[#allocation7 + $0x288] sm:$0xff]  ;;  %v9737_v51 = vcombine.low %v205_v30, %v209_v31  ;;  %v9741_v52 = vcombine.low %v206_v32, %v210_v33 }
  0xa8   :  { %3674 = vmatpush1.bf16.msra.mxu0 %v9661_v47  ;;  %3838 = vmatpush1.bf16.msra.mxu1 %v9665_v48  ;;  %12462 = vst [vmem:[#allocation26_spill] sm:$0xff] %v9729_v35  ;;  %v217_v44 = vld [vmem:[#allocation7 + $0x2a0] sm:$0xff]  ;;  %v218_v46 = vld [vmem:[#allocation7 + $0x2a8] sm:$0xff] }
  0xa9   :  { %3675 = vmatprep.subr.bf16.mxu0 %v9667_v49  ;;  %3839 = vmatprep.subr.bf16.mxu1 %v9670_v50  ;;  %12463 = vst [vmem:[#allocation27_spill] sm:$0xff] %v9731_v36  ;;  %12464 = vst [vmem:[#allocation28_spill] sm:$0xff] %v9734_v41  ;;  %v9743_v54 = vcombine.high %v213_v42, %v217_v44  ;;  %v9746_v55 = vcombine.high %v214_v45, %v218_v46  ;;  %v221_v61 = vld [vmem:[#allocation7 + $0x2c0] sm:$0xff]  ;;  %v222_v0 = vld [vmem:[#allocation7 + $0x2c8] sm:$0xff] }
  0xaa   :  { %12465 = vst [vmem:[#allocation29_spill] sm:$0xff] %v9737_v51  ;;  %12466 = vst [vmem:[#allocation30_spill] sm:$0xff] %v9741_v52  ;;  %v225_v62 = vld [vmem:[#allocation7 + $0x2e0] sm:$0xff]  ;;  %v226_v1 = vld [vmem:[#allocation7 + $0x2e8] sm:$0xff]  ;;  %v9749_v4 = vcombine.low %v213_v42, %v217_v44  ;;  %v9753_v12 = vcombine.low %v214_v45, %v218_v46 }
  0xab   :  { %12467 = vst [vmem:[#allocation31_spill] sm:$0xff] %v9743_v54  ;;  %12468 = vst [vmem:[#allocation32_spill] sm:$0xff] %v9746_v55  ;;  %v9755_v13 = vcombine.high %v221_v61, %v225_v62  ;;  %v9758_v16 = vcombine.high %v222_v0, %v226_v1  ;;  %v229_v17 = vld [vmem:[#allocation7 + $0x300] sm:$0xff]  ;;  %v230_v31 = vld [vmem:[#allocation7 + $0x308] sm:$0xff]  ;;  %v9761_v33 = vcombine.low %v221_v61, %v225_v62 }
  0xac   :  { %3676 = vmatpush1.bf16.msra.mxu0 %v9676_v56  ;;  %3840 = vmatpush1.bf16.msra.mxu1 %v9680_v57  ;;  %12469 = vst [vmem:[#allocation33_spill] sm:$0xff] %v9749_v4  ;;  %12470 = vst [vmem:[#allocation34_spill] sm:$0xff] %v9753_v12  ;;  %v233_v30 = vld [vmem:[#allocation7 + $0x320] sm:$0xff]  ;;  %v234_v32 = vld [vmem:[#allocation7 + $0x328] sm:$0xff]  ;;  %v9765_v42 = vcombine.low %v222_v0, %v226_v1 }
  0xad   :  { %3677 = vmatprep.subr.bf16.mxu0 %v9682_v58  ;;  %3841 = vmatprep.subr.bf16.mxu1 %v9687_v60  ;;  %12471 = vst [vmem:[#allocation35_spill] sm:$0xff] %v9755_v13  ;;  %12472 = vst [vmem:[#allocation36_spill] sm:$0xff] %v9758_v16  ;;  %v9767_v44 = vcombine.high %v229_v17, %v233_v30  ;;  %v9770_v45 = vcombine.high %v230_v31, %v234_v32  ;;  %v237_v46 = vld [vmem:[#allocation7 + $0x340] sm:$0xff] }
  0xae   :  { %12473 = vst [vmem:[#allocation37_spill] sm:$0xff] %v9761_v33  ;;  %12474 = vst [vmem:[#allocation38_spill] sm:$0xff] %v9765_v42  ;;  %v9773_v61 = vcombine.low %v229_v17, %v233_v30  ;;  %v9777_v62 = vcombine.low %v230_v31, %v234_v32 }
  0xaf   :  { %12475 = vst [vmem:[#allocation39_spill] sm:$0xff] %v9767_v44  ;;  %12476 = vst [vmem:[#allocation40_spill] sm:$0xff] %v9770_v45 }
  0xb0   :  { %3678 = vmatpush1.bf16.msra.mxu0 %v9694_v2  ;;  %3842 = vmatpush1.bf16.msra.mxu1 %v9700_v6  ;;  %12477 = vst [vmem:[#allocation41_spill] sm:$0xff] %v9773_v61  ;;  %12478 = vst [vmem:[#allocation42_spill] sm:$0xff] %v9777_v62 }
  0xb1   :  { %3679 = vmatprep.subr.bf16.mxu0 %v9702_v7  ;;  %3843 = vmatprep.subr.bf16.mxu1 %v9705_v11 }
  0xb4   :  { %3680 = vmatpush1.bf16.msra.mxu0 %v9711_v22  ;;  %3844 = vmatpush1.bf16.msra.mxu1 %v9716_v23 }
  0xb5   :  { %3681 = vmatprep.subr.bf16.mxu0 %v9718_v24  ;;  %3845 = vmatprep.subr.bf16.mxu1 %v9721_v25 }
  0xb8   :  { %3682 = vmatpush1.bf16.msra.mxu0 %v9725_v34  ;;  %3846 = vmatpush1.bf16.msra.mxu1 %v9729_v35  ;;  %v554_v35 = vld [vmem:[#allocation7 + $0xd28] sm:$0xff] }
  0xb9   :  { %3683 = vmatprep.subr.bf16.mxu0 %v9731_v36  ;;  %3847 = vmatprep.subr.bf16.mxu1 %v9734_v41  ;;  %v410_v36 = vld [vmem:[#allocation7 + $0x8a8] sm:$0xff] }
  0xbc   :  { %3684 = vmatpush1.bf16.msra.mxu0 %v9737_v51  ;;  %3848 = vmatpush1.bf16.msra.mxu1 %v9741_v52  ;;  %v242_v52 = vld [vmem:[#allocation7 + $0x368] sm:$0xff] }
  0xbd   :  { %3685 = vmatprep.subr.bf16.mxu0 %v9743_v54  ;;  %3849 = vmatprep.subr.bf16.mxu1 %v9746_v55  ;;  %v241_v55 = vld [vmem:[#allocation7 + $0x360] sm:$0xff]  ;;  %v238_v54 = vld [vmem:[#allocation7 + $0x348] sm:$0xff] }
  0xbe   :  { %v9779_v0 = vcombine.high %v237_v46, %v241_v55  ;;  %v9782_v1 = vcombine.high %v238_v54, %v242_v52  ;;  %v9785_v17 = vcombine.low %v237_v46, %v241_v55  ;;  %v9789_v30 = vcombine.low %v238_v54, %v242_v52  ;;  %v298_v51 = vld [vmem:[#allocation7 + $0x528] sm:$0xff] }
  0xc0   :  { %3686 = vmatpush1.bf16.msra.mxu0 %v9749_v4  ;;  %3850 = vmatpush1.bf16.msra.mxu1 %v9753_v12  ;;  %12479 = vst [vmem:[#allocation43_spill] sm:$0xff] %v9779_v0  ;;  %12480 = vst [vmem:[#allocation44_spill] sm:$0xff] %v9782_v1  ;;  %v246_v12 = vld [vmem:[#allocation7 + $0x388] sm:$0xff] }
  0xc1   :  { %3687 = vmatprep.subr.bf16.mxu0 %v9755_v13  ;;  %3851 = vmatprep.subr.bf16.mxu1 %v9758_v16  ;;  %v245_v16 = vld [vmem:[#allocation7 + $0x380] sm:$0xff]  ;;  %v250_v4 = vld [vmem:[#allocation7 + $0x3a8] sm:$0xff]  ;;  %12481 = vst [vmem:[#allocation45_spill] sm:$0xff] %v9785_v17  ;;  %12482 = vst [vmem:[#allocation46_spill] sm:$0xff] %v9789_v30 }
  0xc2   :  { %v249_v13 = vld [vmem:[#allocation7 + $0x3a0] sm:$0xff]  ;;  %v9794_v32 = vcombine.high %v246_v12, %v250_v4  ;;  %v9801_v52 = vcombine.low %v246_v12, %v250_v4 }
  0xc3   :  { %v9791_v31 = vcombine.high %v245_v16, %v249_v13  ;;  %v9797_v55 = vcombine.low %v245_v16, %v249_v13 }
  0xc4   :  { %3688 = vmatpush1.bf16.msra.mxu0 %v9761_v33  ;;  %3852 = vmatpush1.bf16.msra.mxu1 %v9765_v42  ;;  %12484 = vst [vmem:[#allocation48_spill] sm:$0xff] %v9794_v32  ;;  %v254_v42 = vld [vmem:[#allocation7 + $0x3c8] sm:$0xff]  ;;  %12486 = vst [vmem:[#allocation50_spill] sm:$0xff] %v9801_v52 }
  0xc5   :  { %3689 = vmatprep.subr.bf16.mxu0 %v9767_v44  ;;  %3853 = vmatprep.subr.bf16.mxu1 %v9770_v45  ;;  %12483 = vst [vmem:[#allocation47_spill] sm:$0xff] %v9791_v31  ;;  %v253_v45 = vld [vmem:[#allocation7 + $0x3c0] sm:$0xff]  ;;  %v258_v33 = vld [vmem:[#allocation7 + $0x3e8] sm:$0xff]  ;;  %12485 = vst [vmem:[#allocation49_spill] sm:$0xff] %v9797_v55 }
  0xc6   :  { %v257_v44 = vld [vmem:[#allocation7 + $0x3e0] sm:$0xff]  ;;  %v9806_v46 = vcombine.high %v254_v42, %v258_v33  ;;  %v9813_v4 = vcombine.low %v254_v42, %v258_v33 }
  0xc7   :  { %v9803_v54 = vcombine.high %v253_v45, %v257_v44  ;;  %v9809_v13 = vcombine.low %v253_v45, %v257_v44  ;;  %v270_v44 = vld [vmem:[#allocation7 + $0x448] sm:$0xff] }
  0xc8   :  { %3690 = vmatpush1.bf16.msra.mxu0 %v9773_v61  ;;  %3854 = vmatpush1.bf16.msra.mxu1 %v9777_v62  ;;  %12488 = vst [vmem:[#allocation52_spill] sm:$0xff] %v9806_v46  ;;  %v262_v62 = vld [vmem:[#allocation7 + $0x408] sm:$0xff]  ;;  %12490 = vst [vmem:[#allocation54_spill] sm:$0xff] %v9813_v4 }
  0xc9   :  { %3691 = vmatprep.subr.bf16.mxu0 %v9779_v0  ;;  %3855 = vmatprep.subr.bf16.mxu1 %v9782_v1  ;;  %12487 = vst [vmem:[#allocation51_spill] sm:$0xff] %v9803_v54  ;;  %v261_v1 = vld [vmem:[#allocation7 + $0x400] sm:$0xff]  ;;  %v266_v61 = vld [vmem:[#allocation7 + $0x428] sm:$0xff]  ;;  %12489 = vst [vmem:[#allocation53_spill] sm:$0xff] %v9809_v13 }
  0xca   :  { %v265_v0 = vld [vmem:[#allocation7 + $0x420] sm:$0xff]  ;;  %v9818_v16 = vcombine.high %v262_v62, %v266_v61  ;;  %v274_v45 = vld [vmem:[#allocation7 + $0x468] sm:$0xff]  ;;  %v9829_v33 = vcombine.low %v262_v62, %v266_v61 }
  0xcb   :  { %v9815_v12 = vcombine.high %v261_v1, %v265_v0  ;;  %v9847_v62 = vcombine.low %v270_v44, %v274_v45 }
  0xcc   :  { %3692 = vmatpush1.bf16.msra.mxu0 %v9785_v17  ;;  %3856 = vmatpush1.bf16.msra.mxu1 %v9789_v30  ;;  %12492 = vst [vmem:[#allocation56_spill] sm:$0xff] %v9818_v16  ;;  %v9822_v30 = vrot.slane %v9691_v63, %v9673_v53  ;;  %12494 = vst [vmem:[#allocation58_spill] sm:$0xff] %v9829_v33  ;;  %v9834_v63 = vcombine.high %v270_v44, %v274_v45  ;;  %v282_v17 = vld [vmem:[#allocation7 + $0x4a8] sm:$0xff]  ;;  %v293_v45 = vld [vmem:[#allocation7 + $0x500] sm:$0xff] }
  0xcd   :  { %3693 = vmatprep.subr.bf16.mxu0 %v9791_v31  ;;  %3857 = vmatprep.subr.bf16.mxu1 %v9794_v32  ;;  %12491 = vst [vmem:[#allocation55_spill] sm:$0xff] %v9815_v12  ;;  %v269_v32 = vld [vmem:[#allocation7 + $0x440] sm:$0xff]  ;;  %12498 = vst [vmem:[#allocation62_spill] sm:$0xff] %v9847_v62 }
  0xce   :  { %v273_v31 = vld [vmem:[#allocation7 + $0x460] sm:$0xff]  ;;  %12496 = vst [vmem:[#allocation60_spill] sm:$0xff] %v9834_v63 }
  0xcf   :  { %v9831_v42 = vcombine.high %v269_v32, %v273_v31  ;;  %v9843_v61 = vcombine.low %v269_v32, %v273_v31 }
  0xd0   :  { %3694 = vmatpush1.bf16.msra.mxu0 %v9797_v55  ;;  %3858 = vmatpush1.bf16.msra.mxu1 %v9801_v52  ;;  %v9825_v52 = vcombine.low %v261_v1, %v265_v0  ;;  %v278_v55 = vld [vmem:[#allocation7 + $0x488] sm:$0xff]  ;;  %v9838_v0 = vcombine.high %v9708_v15, %v9708_v15 }
  0xd1   :  { %3695 = vmatprep.subr.bf16.mxu0 %v9803_v54  ;;  %3859 = vmatprep.subr.bf16.mxu1 %v9806_v46  ;;  %12495 = vst [vmem:[#allocation59_spill] sm:$0xff] %v9831_v42  ;;  %v277_v46 = vld [vmem:[#allocation7 + $0x480] sm:$0xff]  ;;  %12497 = vst [vmem:[#allocation61_spill] sm:$0xff] %v9843_v61  ;;  %v9861_v32 = vcombine.low %v278_v55, %v282_v17 }
  0xd2   :  { %12493 = vst [vmem:[#allocation57_spill] sm:$0xff] %v9825_v52  ;;  %v281_v54 = vld [vmem:[#allocation7 + $0x4a0] sm:$0xff] }
  0xd3   :  { %v9849_v1 = vcombine.high %v277_v46, %v281_v54  ;;  %v9857_v31 = vcombine.low %v277_v46, %v281_v54  ;;  %12502 = vst [vmem:[#allocation66_spill] sm:$0xff] %v9861_v32  ;;  %v301_v46 = vld [vmem:[#allocation7 + $0x540] sm:$0xff] }
  0xd4   :  { %3696 = vmatpush1.bf16.msra.mxu0 %v9809_v13  ;;  %3860 = vmatpush1.bf16.msra.mxu1 %v9813_v4  ;;  %v286_v4 = vld [vmem:[#allocation7 + $0x4c8] sm:$0xff]  ;;  %v9852_v13 = vcombine.high %v278_v55, %v282_v17 }
  0xd5   :  { %3706 = vmatprep.subr.bf16.mxu0 %v9815_v12  ;;  %3870 = vmatprep.subr.bf16.mxu1 %v9818_v16  ;;  %12499 = vst [vmem:[#allocation63_spill] sm:$0xff] %v9849_v1  ;;  %v285_v16 = vld [vmem:[#allocation7 + $0x4c0] sm:$0xff]  ;;  %12501 = vst [vmem:[#allocation65_spill] sm:$0xff] %v9857_v31 }
  0xd6   :  { %v289_v12 = vld [vmem:[#allocation7 + $0x4e0] sm:$0xff]  ;;  %12500 = vst [vmem:[#allocation64_spill] sm:$0xff] %v9852_v13 }
  0xd7   :  { %3698 = vmatmul.mubr.bf16.vlgmr.msra.gmra.mrb[0].mxu0 %v9822_v30  ;;  %3862 = vmatmul.mubr.bf16.vlgmr.msra.gmra.mrb[0].mxu1 %v9822_v30  ;;  %v9863_v44 = vcombine.high %v285_v16, %v289_v12  ;;  %v9869_v54 = vcombine.low %v285_v16, %v289_v12  ;;  %v309_v16 = vld [vmem:[#allocation7 + $0x580] sm:$0xff] }
  0xd8   :  { %3707 = vmatpush1.bf16.msra.mxu0 %v9825_v52  ;;  %3871 = vmatpush1.bf16.msra.mxu1 %v9829_v33  ;;  %v290_v52 = vld [vmem:[#allocation7 + $0x4e8] sm:$0xff] }
  0xd9   :  { %3708 = vmatprep.subr.bf16.mxu0 %v9831_v42  ;;  %3872 = vmatprep.subr.bf16.mxu1 %v9834_v63  ;;  %12503 = vst [vmem:[#allocation67_spill] sm:$0xff] %v9863_v44  ;;  %v297_v63 = vld [vmem:[#allocation7 + $0x520] sm:$0xff]  ;;  %v294_v42 = vld [vmem:[#allocation7 + $0x508] sm:$0xff]  ;;  %v9866_v33 = vcombine.high %v286_v4, %v290_v52  ;;  %12505 = vst [vmem:[#allocation69_spill] sm:$0xff] %v9869_v54  ;;  %v9873_v17 = vcombine.low %v286_v4, %v290_v52 }
  0xda   :  { %3738 = vmatprep.mubr.bf16.mxu0 %v9838_v0  ;;  %3902 = vmatprep.mubr.bf16.mxu1 %v9838_v0  ;;  %v9875_v55 = vcombine.high %v293_v45, %v297_v63  ;;  %v9881_v12 = vcombine.low %v293_v45, %v297_v63  ;;  %v9885_v52 = vcombine.low %v294_v42, %v298_v51  ;;  %v317_v45 = vld [vmem:[#allocation7 + $0x5c0] sm:$0xff] }
  0xdb   :  { %12504 = vst [vmem:[#allocation68_spill] sm:$0xff] %v9866_v33  ;;  %12506 = vst [vmem:[#allocation70_spill] sm:$0xff] %v9873_v17 }
  0xdc   :  { %3709 = vmatpush1.bf16.msra.mxu0 %v9843_v61  ;;  %3873 = vmatpush1.bf16.msra.mxu1 %v9847_v62  ;;  %12507 = vst [vmem:[#allocation71_spill] sm:$0xff] %v9875_v55  ;;  %v302_v62 = vld [vmem:[#allocation7 + $0x548] sm:$0xff]  ;;  %12509 = vst [vmem:[#allocation73_spill] sm:$0xff] %v9881_v12 }
  0xdd   :  { %3710 = vmatprep.subr.bf16.mxu0 %v9849_v1  ;;  %3874 = vmatprep.subr.bf16.mxu1 %v9852_v13  ;;  %v305_v1 = vld [vmem:[#allocation7 + $0x560] sm:$0xff]  ;;  %v9878_v13 = vcombine.high %v294_v42, %v298_v51  ;;  %v306_v61 = vld [vmem:[#allocation7 + $0x568] sm:$0xff]  ;;  %12510 = vst [vmem:[#allocation74_spill] sm:$0xff] %v9885_v52 }
  0xde   :  { %v9887_v4 = vcombine.high %v301_v46, %v305_v1  ;;  %v9893_v63 = vcombine.low %v301_v46, %v305_v1  ;;  %v9897_v51 = vcombine.low %v302_v62, %v306_v61  ;;  %v325_v46 = vld [vmem:[#allocation7 + $0x600] sm:$0xff] }
  0xdf   :  { %12508 = vst [vmem:[#allocation72_spill] sm:$0xff] %v9878_v13 }
  0xe0   :  { %3711 = vmatpush1.bf16.msra.mxu0 %v9857_v31  ;;  %3875 = vmatpush1.bf16.msra.mxu1 %v9861_v32  ;;  %12511 = vst [vmem:[#allocation75_spill] sm:$0xff] %v9887_v4  ;;  %v310_v32 = vld [vmem:[#allocation7 + $0x588] sm:$0xff]  ;;  %12513 = vst [vmem:[#allocation77_spill] sm:$0xff] %v9893_v63 }
  0xe1   :  { %3712 = vmatprep.subr.bf16.mxu0 %v9863_v44  ;;  %3876 = vmatprep.subr.bf16.mxu1 %v9866_v33  ;;  %v313_v44 = vld [vmem:[#allocation7 + $0x5a0] sm:$0xff]  ;;  %v9890_v33 = vcombine.high %v302_v62, %v306_v61  ;;  %v314_v31 = vld [vmem:[#allocation7 + $0x5a8] sm:$0xff]  ;;  %12514 = vst [vmem:[#allocation78_spill] sm:$0xff] %v9897_v51 }
  0xe2   :  { %v9899_v42 = vcombine.high %v309_v16, %v313_v44  ;;  %v9905_v1 = vcombine.low %v309_v16, %v313_v44  ;;  %v9909_v61 = vcombine.low %v310_v32, %v314_v31  ;;  %v333_v16 = vld [vmem:[#allocation7 + $0x640] sm:$0xff] }
  0xe3   :  { %12512 = vst [vmem:[#allocation76_spill] sm:$0xff] %v9890_v33 }
  0xe4   :  { %3713 = vmatpush1.bf16.msra.mxu0 %v9869_v54  ;;  %3877 = vmatpush1.bf16.msra.mxu1 %v9873_v17  ;;  %12515 = vst [vmem:[#allocation79_spill] sm:$0xff] %v9899_v42  ;;  %v318_v17 = vld [vmem:[#allocation7 + $0x5c8] sm:$0xff]  ;;  %12517 = vst [vmem:[#allocation81_spill] sm:$0xff] %v9905_v1 }
  0xe5   :  { %3714 = vmatprep.subr.bf16.mxu0 %v9875_v55  ;;  %3878 = vmatprep.subr.bf16.mxu1 %v9878_v13  ;;  %v321_v55 = vld [vmem:[#allocation7 + $0x5e0] sm:$0xff]  ;;  %v9902_v13 = vcombine.high %v310_v32, %v314_v31  ;;  %v322_v54 = vld [vmem:[#allocation7 + $0x5e8] sm:$0xff]  ;;  %12518 = vst [vmem:[#allocation82_spill] sm:$0xff] %v9909_v61 }
  0xe6   :  { %v9911_v62 = vcombine.high %v317_v45, %v321_v55  ;;  %v9917_v44 = vcombine.low %v317_v45, %v321_v55  ;;  %v9921_v31 = vcombine.low %v318_v17, %v322_v54  ;;  %v341_v45 = vld [vmem:[#allocation7 + $0x680] sm:$0xff] }
  0xe7   :  { %12516 = vst [vmem:[#allocation80_spill] sm:$0xff] %v9902_v13 }
  0xe8   :  { %3715 = vmatpush1.bf16.msra.mxu0 %v9881_v12  ;;  %3879 = vmatpush1.bf16.msra.mxu1 %v9885_v52  ;;  %12519 = vst [vmem:[#allocation83_spill] sm:$0xff] %v9911_v62  ;;  %v326_v52 = vld [vmem:[#allocation7 + $0x608] sm:$0xff]  ;;  %12521 = vst [vmem:[#allocation85_spill] sm:$0xff] %v9917_v44 }
  0xe9   :  { %3716 = vmatprep.subr.bf16.mxu0 %v9887_v4  ;;  %3880 = vmatprep.subr.bf16.mxu1 %v9890_v33  ;;  %v329_v4 = vld [vmem:[#allocation7 + $0x620] sm:$0xff]  ;;  %v9914_v33 = vcombine.high %v318_v17, %v322_v54  ;;  %v330_v12 = vld [vmem:[#allocation7 + $0x628] sm:$0xff]  ;;  %12522 = vst [vmem:[#allocation86_spill] sm:$0xff] %v9921_v31 }
  0xea   :  { %v9923_v32 = vcombine.high %v325_v46, %v329_v4  ;;  %v9929_v55 = vcombine.low %v325_v46, %v329_v4  ;;  %v9933_v54 = vcombine.low %v326_v52, %v330_v12  ;;  %v349_v46 = vld [vmem:[#allocation7 + $0x6c0] sm:$0xff] }
  0xeb   :  { %12520 = vst [vmem:[#allocation84_spill] sm:$0xff] %v9914_v33 }
  0xec   :  { %3717 = vmatpush1.bf16.msra.mxu0 %v9893_v63  ;;  %3881 = vmatpush1.bf16.msra.mxu1 %v9897_v51  ;;  %12523 = vst [vmem:[#allocation87_spill] sm:$0xff] %v9923_v32  ;;  %v334_v51 = vld [vmem:[#allocation7 + $0x648] sm:$0xff]  ;;  %12525 = vst [vmem:[#allocation89_spill] sm:$0xff] %v9929_v55 }
  0xed   :  { %3718 = vmatprep.subr.bf16.mxu0 %v9899_v42  ;;  %3882 = vmatprep.subr.bf16.mxu1 %v9902_v13  ;;  %v337_v42 = vld [vmem:[#allocation7 + $0x660] sm:$0xff]  ;;  %v9926_v13 = vcombine.high %v326_v52, %v330_v12  ;;  %v338_v63 = vld [vmem:[#allocation7 + $0x668] sm:$0xff]  ;;  %12526 = vst [vmem:[#allocation90_spill] sm:$0xff] %v9933_v54 }
  0xee   :  { %v9935_v17 = vcombine.high %v333_v16, %v337_v42  ;;  %v9941_v4 = vcombine.low %v333_v16, %v337_v42  ;;  %v9945_v12 = vcombine.low %v334_v51, %v338_v63  ;;  %v357_v16 = vld [vmem:[#allocation7 + $0x700] sm:$0xff] }
  0xef   :  { %12524 = vst [vmem:[#allocation88_spill] sm:$0xff] %v9926_v13 }
  0xf0   :  { %3719 = vmatpush1.bf16.msra.mxu0 %v9905_v1  ;;  %3883 = vmatpush1.bf16.msra.mxu1 %v9909_v61  ;;  %12527 = vst [vmem:[#allocation91_spill] sm:$0xff] %v9935_v17  ;;  %v342_v61 = vld [vmem:[#allocation7 + $0x688] sm:$0xff]  ;;  %12529 = vst [vmem:[#allocation93_spill] sm:$0xff] %v9941_v4 }
  0xf1   :  { %3720 = vmatprep.subr.bf16.mxu0 %v9911_v62  ;;  %3884 = vmatprep.subr.bf16.mxu1 %v9914_v33  ;;  %v345_v62 = vld [vmem:[#allocation7 + $0x6a0] sm:$0xff]  ;;  %v9938_v33 = vcombine.high %v334_v51, %v338_v63  ;;  %v346_v1 = vld [vmem:[#allocation7 + $0x6a8] sm:$0xff]  ;;  %12530 = vst [vmem:[#allocation94_spill] sm:$0xff] %v9945_v12 }
  0xf2   :  { %v9947_v52 = vcombine.high %v341_v45, %v345_v62  ;;  %v9953_v42 = vcombine.low %v341_v45, %v345_v62  ;;  %v9957_v63 = vcombine.low %v342_v61, %v346_v1  ;;  %v365_v45 = vld [vmem:[#allocation7 + $0x740] sm:$0xff] }
  0xf3   :  { %12528 = vst [vmem:[#allocation92_spill] sm:$0xff] %v9938_v33 }
  0xf4   :  { %3721 = vmatpush1.bf16.msra.mxu0 %v9917_v44  ;;  %3885 = vmatpush1.bf16.msra.mxu1 %v9921_v31  ;;  %12531 = vst [vmem:[#allocation95_spill] sm:$0xff] %v9947_v52  ;;  %v350_v31 = vld [vmem:[#allocation7 + $0x6c8] sm:$0xff]  ;;  %12533 = vst [vmem:[#allocation97_spill] sm:$0xff] %v9953_v42 }
  0xf5   :  { %3722 = vmatprep.subr.bf16.mxu0 %v9923_v32  ;;  %3886 = vmatprep.subr.bf16.mxu1 %v9926_v13  ;;  %v353_v32 = vld [vmem:[#allocation7 + $0x6e0] sm:$0xff]  ;;  %v9950_v13 = vcombine.high %v342_v61, %v346_v1  ;;  %v354_v44 = vld [vmem:[#allocation7 + $0x6e8] sm:$0xff]  ;;  %12534 = vst [vmem:[#allocation98_spill] sm:$0xff] %v9957_v63 }
  0xf6   :  { %v9959_v51 = vcombine.high %v349_v46, %v353_v32  ;;  %v9965_v62 = vcombine.low %v349_v46, %v353_v32  ;;  %v9969_v1 = vcombine.low %v350_v31, %v354_v44  ;;  %v373_v46 = vld [vmem:[#allocation7 + $0x780] sm:$0xff] }
  0xf7   :  { %12532 = vst [vmem:[#allocation96_spill] sm:$0xff] %v9950_v13 }
  0xf8   :  { %3723 = vmatpush1.bf16.msra.mxu0 %v9929_v55  ;;  %3887 = vmatpush1.bf16.msra.mxu1 %v9933_v54  ;;  %12535 = vst [vmem:[#allocation99_spill] sm:$0xff] %v9959_v51  ;;  %v358_v54 = vld [vmem:[#allocation7 + $0x708] sm:$0xff]  ;;  %12537 = vst [vmem:[#allocation101_spill] sm:$0xff] %v9965_v62 }
  0xf9   :  { %3724 = vmatprep.subr.bf16.mxu0 %v9935_v17  ;;  %3888 = vmatprep.subr.bf16.mxu1 %v9938_v33  ;;  %v361_v17 = vld [vmem:[#allocation7 + $0x720] sm:$0xff]  ;;  %v9962_v33 = vcombine.high %v350_v31, %v354_v44  ;;  %v362_v55 = vld [vmem:[#allocation7 + $0x728] sm:$0xff]  ;;  %12538 = vst [vmem:[#allocation102_spill] sm:$0xff] %v9969_v1 }
  0xfa   :  { %v9971_v61 = vcombine.high %v357_v16, %v361_v17  ;;  %v9977_v32 = vcombine.low %v357_v16, %v361_v17  ;;  %v9981_v44 = vcombine.low %v358_v54, %v362_v55  ;;  %v381_v16 = vld [vmem:[#allocation7 + $0x7c0] sm:$0xff] }
  0xfb   :  { %12536 = vst [vmem:[#allocation100_spill] sm:$0xff] %v9962_v33 }
  0xfc   :  { %3725 = vmatpush1.bf16.msra.mxu0 %v9941_v4  ;;  %3889 = vmatpush1.bf16.msra.mxu1 %v9945_v12  ;;  %12539 = vst [vmem:[#allocation103_spill] sm:$0xff] %v9971_v61  ;;  %v366_v12 = vld [vmem:[#allocation7 + $0x748] sm:$0xff]  ;;  %12541 = vst [vmem:[#allocation105_spill] sm:$0xff] %v9977_v32 }
  0xfd   :  { %3726 = vmatprep.subr.bf16.mxu0 %v9947_v52  ;;  %3890 = vmatprep.subr.bf16.mxu1 %v9950_v13  ;;  %v369_v52 = vld [vmem:[#allocation7 + $0x760] sm:$0xff]  ;;  %v9974_v13 = vcombine.high %v358_v54, %v362_v55  ;;  %v370_v4 = vld [vmem:[#allocation7 + $0x768] sm:$0xff]  ;;  %12542 = vst [vmem:[#allocation106_spill] sm:$0xff] %v9981_v44 }
  0xfe   :  { %v9983_v31 = vcombine.high %v365_v45, %v369_v52  ;;  %v9989_v17 = vcombine.low %v365_v45, %v369_v52  ;;  %v9993_v55 = vcombine.low %v366_v12, %v370_v4  ;;  %v1048_v52 = vcombine.high %v9684_v59, %v9684_v59  ;;  %v394_v59 = vld [vmem:[#allocation7 + $0x828] sm:$0xff] }
  0xff   :  { %12540 = vst [vmem:[#allocation104_spill] sm:$0xff] %v9974_v13 }
 0x100   :  { %3727 = vmatpush1.bf16.msra.mxu0 %v9953_v42  ;;  %3891 = vmatpush1.bf16.msra.mxu1 %v9957_v63  ;;  %12543 = vst [vmem:[#allocation107_spill] sm:$0xff] %v9983_v31  ;;  %v374_v63 = vld [vmem:[#allocation7 + $0x788] sm:$0xff]  ;;  %12545 = vst [vmem:[#allocation109_spill] sm:$0xff] %v9989_v17 }
 0x101   :  { %3728 = vmatprep.subr.bf16.mxu0 %v9959_v51  ;;  %3892 = vmatprep.subr.bf16.mxu1 %v9962_v33  ;;  %v377_v51 = vld [vmem:[#allocation7 + $0x7a0] sm:$0xff]  ;;  %v9986_v33 = vcombine.high %v366_v12, %v370_v4  ;;  %v378_v42 = vld [vmem:[#allocation7 + $0x7a8] sm:$0xff]  ;;  %12546 = vst [vmem:[#allocation110_spill] sm:$0xff] %v9993_v55 }
 0x102   :  { %v9995_v54 = vcombine.high %v373_v46, %v377_v51  ;;  %v10003_v45 = vcombine.low %v373_v46, %v377_v51  ;;  %v10007_v4 = vcombine.low %v374_v63, %v378_v42  ;;  %v397_v46 = vld [vmem:[#allocation7 + $0x840] sm:$0xff] }
 0x103   :  { %12544 = vst [vmem:[#allocation108_spill] sm:$0xff] %v9986_v33 }
 0x104   :  { %3729 = vmatpush1.bf16.msra.mxu0 %v9965_v62  ;;  %3893 = vmatpush1.bf16.msra.mxu1 %v9969_v1  ;;  %12547 = vst [vmem:[#allocation111_spill] sm:$0xff] %v9995_v54  ;;  %v382_v1 = vld [vmem:[#allocation7 + $0x7c8] sm:$0xff]  ;;  %12549 = vst [vmem:[#allocation113_spill] sm:$0xff] %v10003_v45 }
 0x105   :  { %3730 = vmatprep.subr.bf16.mxu0 %v9971_v61  ;;  %3894 = vmatprep.subr.bf16.mxu1 %v9974_v13  ;;  %v385_v61 = vld [vmem:[#allocation7 + $0x7e0] sm:$0xff]  ;;  %v9998_v13 = vcombine.high %v374_v63, %v378_v42  ;;  %v386_v62 = vld [vmem:[#allocation7 + $0x7e8] sm:$0xff]  ;;  %12550 = vst [vmem:[#allocation114_spill] sm:$0xff] %v10007_v4 }
 0x106   :  { %v10009_v12 = vcombine.high %v381_v16, %v385_v61  ;;  %v10018_v51 = vcombine.low %v381_v16, %v385_v61  ;;  %v10022_v42 = vcombine.low %v382_v1, %v386_v62  ;;  %v10033_v16 = vcombine.high %v9822_v30, %v9822_v30 }
 0x107   :  { %12548 = vst [vmem:[#allocation112_spill] sm:$0xff] %v9998_v13 }
 0x108   :  { %3731 = vmatpush1.bf16.msra.mxu0 %v9977_v32  ;;  %3895 = vmatpush1.bf16.msra.mxu1 %v9981_v44  ;;  %12551 = vst [vmem:[#allocation115_spill] sm:$0xff] %v10009_v12  ;;  %v390_v44 = vld [vmem:[#allocation7 + $0x808] sm:$0xff]  ;;  %v10012_v32 = vcombine.high %v382_v1, %v386_v62  ;;  %12553 = vst [vmem:[#allocation117_spill] sm:$0xff] %v10018_v51 }
 0x109   :  { %3732 = vmatprep.subr.bf16.mxu0 %v9983_v31  ;;  %3896 = vmatprep.subr.bf16.mxu1 %v9986_v33  ;;  %v389_v31 = vld [vmem:[#allocation7 + $0x800] sm:$0xff]  ;;  %12554 = vst [vmem:[#allocation118_spill] sm:$0xff] %v10022_v42  ;;  %v10040_v1 = vcombine.low %v390_v44, %v394_v59 }
 0x10a   :  { %v393_v33 = vld [vmem:[#allocation7 + $0x820] sm:$0xff]  ;;  %12552 = vst [vmem:[#allocation116_spill] sm:$0xff] %v10012_v32 }
 0x10b   :  { %v10024_v63 = vcombine.high %v389_v31, %v393_v33  ;;  %v10036_v62 = vcombine.low %v389_v31, %v393_v33  ;;  %12558 = vst [vmem:[#allocation122_spill] sm:$0xff] %v10040_v1 }
 0x10c   :  { %3733 = vmatpush1.bf16.msra.mxu0 %v9989_v17  ;;  %3897 = vmatpush1.bf16.msra.mxu1 %v9993_v55  ;;  %v10015_v17 = vrot.slane %v1048_v52, %v9673_v53  ;;  %v10027_v55 = vcombine.high %v390_v44, %v394_v59  ;;  %v402_v52 = vld [vmem:[#allocation7 + $0x868] sm:$0xff]  ;;  %v413_v59 = vld [vmem:[#allocation7 + $0x8c0] sm:$0xff] }
 0x10d   :  { %3734 = vmatprep.subr.bf16.mxu0 %v9995_v54  ;;  %3898 = vmatprep.subr.bf16.mxu1 %v9998_v13  ;;  %12555 = vst [vmem:[#allocation119_spill] sm:$0xff] %v10024_v63  ;;  %v401_v13 = vld [vmem:[#allocation7 + $0x860] sm:$0xff]  ;;  %v398_v54 = vld [vmem:[#allocation7 + $0x848] sm:$0xff]  ;;  %12557 = vst [vmem:[#allocation121_spill] sm:$0xff] %v10036_v62 }
 0x10e   :  { %12556 = vst [vmem:[#allocation120_spill] sm:$0xff] %v10027_v55  ;;  %v1064_v61 = vcombine.high %v10015_v17, %v10015_v17  ;;  %v10045_v41 = vcombine.high %v398_v54, %v402_v52  ;;  %v10053_v33 = vcombine.low %v397_v46, %v401_v13  ;;  %v10057_v44 = vcombine.low %v398_v54, %v402_v52  ;;  %v421_v52 = vld [vmem:[#allocation7 + $0x900] sm:$0xff] }
 0x110   :  { %3735 = vmatpush1.bf16.msra.mxu0 %v10003_v45  ;;  %3899 = vmatpush1.bf16.msra.mxu1 %v10007_v4  ;;  %v409_v4 = vld [vmem:[#allocation7 + $0x8a0] sm:$0xff]  ;;  %v406_v45 = vld [vmem:[#allocation7 + $0x888] sm:$0xff]  ;;  %12560 = vst [vmem:[#allocation124_spill] sm:$0xff] %v10045_v41  ;;  %12561 = vst [vmem:[#allocation125_spill] sm:$0xff] %v10053_v33 }
 0x111   :  { %3736 = vmatprep.subr.bf16.mxu0 %v10009_v12  ;;  %3900 = vmatprep.subr.bf16.mxu1 %v10012_v32  ;;  %v10042_v32 = vcombine.high %v397_v46, %v401_v13  ;;  %v405_v12 = vld [vmem:[#allocation7 + $0x880] sm:$0xff]  ;;  %12562 = vst [vmem:[#allocation126_spill] sm:$0xff] %v10057_v44  ;;  %v10071_v54 = vcombine.low %v406_v45, %v410_v36 }
 0x112   :  { %v10059_v31 = vcombine.high %v405_v12, %v409_v4  ;;  %v10067_v13 = vcombine.low %v405_v12, %v409_v4  ;;  %v429_v12 = vld [vmem:[#allocation7 + $0x940] sm:$0xff] }
 0x113   :  { %12559 = vst [vmem:[#allocation123_spill] sm:$0xff] %v10042_v32  ;;  %12566 = vst [vmem:[#allocation130_spill] sm:$0xff] %v10071_v54 }
 0x114   :  { %3737 = vmatpush1.bf16.msra.mxu0 %v10018_v51  ;;  %3901 = vmatpush1.bf16.msra.mxu1 %v10022_v42  ;;  %v10048_v51 = vrot.slane %v1064_v61, %v9673_v53  ;;  %12563 = vst [vmem:[#allocation127_spill] sm:$0xff] %v10059_v31  ;;  %v414_v61 = vld [vmem:[#allocation7 + $0x8c8] sm:$0xff]  ;;  %12565 = vst [vmem:[#allocation129_spill] sm:$0xff] %v10067_v13 }
 0x115   :  { %3747 = vmatprep.subr.bf16.mxu0 %v10024_v63  ;;  %3911 = vmatprep.subr.bf16.mxu1 %v10027_v55  ;;  %v417_v55 = vld [vmem:[#allocation7 + $0x8e0] sm:$0xff]  ;;  %v10062_v63 = vcombine.high %v406_v45, %v410_v36  ;;  %v426_v42 = vld [vmem:[#allocation7 + $0x928] sm:$0xff] }
 0x116   :  { %v10073_v46 = vcombine.high %v413_v59, %v417_v55  ;;  %v10079_v4 = vcombine.low %v413_v59, %v417_v55 }
 0x117   :  { %3739 = vmatmul.mubr.bf16.vlgmr.msra.gmra.mrb[0].mxu0 %v10033_v16  ;;  %3903 = vmatmul.mubr.bf16.vlgmr.msra.gmra.mrb[0].mxu1 %v10033_v16  ;;  %12564 = vst [vmem:[#allocation128_spill] sm:$0xff] %v10062_v63 }
 0x118   :  { %3748 = vmatpush1.bf16.msra.mxu0 %v10036_v62  ;;  %3912 = vmatpush1.bf16.msra.mxu1 %v10040_v1  ;;  %v418_v62 = vld [vmem:[#allocation7 + $0x8e8] sm:$0xff]  ;;  %12567 = vst [vmem:[#allocation131_spill] sm:$0xff] %v10073_v46  ;;  %12569 = vst [vmem:[#allocation133_spill] sm:$0xff] %v10079_v4 }
 0x119   :  { %3749 = vmatprep.subr.bf16.mxu0 %v10042_v32  ;;  %3913 = vmatprep.subr.bf16.mxu1 %v10045_v41  ;;  %v425_v41 = vld [vmem:[#allocation7 + $0x920] sm:$0xff]  ;;  %v422_v32 = vld [vmem:[#allocation7 + $0x908] sm:$0xff]  ;;  %v10076_v1 = vcombine.high %v414_v61, %v418_v62  ;;  %v10083_v36 = vcombine.low %v414_v61, %v418_v62 }
 0x11a   :  { %3779 = vmatprep.mubr.bf16.mxu0 %v10048_v51  ;;  %3943 = vmatprep.mubr.bf16.mxu1 %v10048_v51  ;;  %v10085_v45 = vcombine.high %v421_v52, %v425_v41  ;;  %v10091_v55 = vcombine.low %v421_v52, %v425_v41  ;;  %v10095_v62 = vcombine.low %v422_v32, %v426_v42  ;;  %v437_v61 = vld [vmem:[#allocation7 + $0x980] sm:$0xff] }
 0x11b   :  { %12568 = vst [vmem:[#allocation132_spill] sm:$0xff] %v10076_v1  ;;  %12570 = vst [vmem:[#allocation134_spill] sm:$0xff] %v10083_v36  ;;  %v445_v52 = vld [vmem:[#allocation7 + $0x9c0] sm:$0xff] }
 0x11c   :  { %3750 = vmatpush1.bf16.msra.mxu0 %v10053_v33  ;;  %3914 = vmatpush1.bf16.msra.mxu1 %v10057_v44  ;;  %12571 = vst [vmem:[#allocation135_spill] sm:$0xff] %v10085_v45  ;;  %v430_v44 = vld [vmem:[#allocation7 + $0x948] sm:$0xff]  ;;  %12573 = vst [vmem:[#allocation137_spill] sm:$0xff] %v10091_v55 }
 0x11d   :  { %3751 = vmatprep.subr.bf16.mxu0 %v10059_v31  ;;  %3915 = vmatprep.subr.bf16.mxu1 %v10062_v63  ;;  %v433_v31 = vld [vmem:[#allocation7 + $0x960] sm:$0xff]  ;;  %v10088_v63 = vcombine.high %v422_v32, %v426_v42  ;;  %v434_v33 = vld [vmem:[#allocation7 + $0x968] sm:$0xff]  ;;  %12574 = vst [vmem:[#allocation138_spill] sm:$0xff] %v10095_v62 }
 0x11e   :  { %v10097_v59 = vcombine.high %v429_v12, %v433_v31  ;;  %v10103_v41 = vcombine.low %v429_v12, %v433_v31  ;;  %v10107_v32 = vcombine.low %v430_v44, %v434_v33  ;;  %v453_v12 = vld [vmem:[#allocation7 + $0xa00] sm:$0xff] }
 0x11f   :  { %12572 = vst [vmem:[#allocation136_spill] sm:$0xff] %v10088_v63 }
 0x120   :  { %3752 = vmatpush1.bf16.msra.mxu0 %v10067_v13  ;;  %3916 = vmatpush1.bf16.msra.mxu1 %v10071_v54  ;;  %12575 = vst [vmem:[#allocation139_spill] sm:$0xff] %v10097_v59  ;;  %v438_v54 = vld [vmem:[#allocation7 + $0x988] sm:$0xff]  ;;  %12577 = vst [vmem:[#allocation141_spill] sm:$0xff] %v10103_v41 }
 0x121   :  { %3753 = vmatprep.subr.bf16.mxu0 %v10073_v46  ;;  %3917 = vmatprep.subr.bf16.mxu1 %v10076_v1  ;;  %v441_v46 = vld [vmem:[#allocation7 + $0x9a0] sm:$0xff]  ;;  %v10100_v1 = vcombine.high %v430_v44, %v434_v33  ;;  %v442_v13 = vld [vmem:[#allocation7 + $0x9a8] sm:$0xff]  ;;  %12578 = vst [vmem:[#allocation142_spill] sm:$0xff] %v10107_v32 }
 0x122   :  { %v10109_v42 = vcombine.high %v437_v61, %v441_v46  ;;  %v10115_v31 = vcombine.low %v437_v61, %v441_v46  ;;  %v10119_v33 = vcombine.low %v438_v54, %v442_v13  ;;  %v461_v61 = vld [vmem:[#allocation7 + $0xa40] sm:$0xff] }
 0x123   :  { %12576 = vst [vmem:[#allocation140_spill] sm:$0xff] %v10100_v1 }
 0x124   :  { %3754 = vmatpush1.bf16.msra.mxu0 %v10079_v4  ;;  %3918 = vmatpush1.bf16.msra.mxu1 %v10083_v36  ;;  %12579 = vst [vmem:[#allocation143_spill] sm:$0xff] %v10109_v42  ;;  %v446_v36 = vld [vmem:[#allocation7 + $0x9c8] sm:$0xff]  ;;  %12581 = vst [vmem:[#allocation145_spill] sm:$0xff] %v10115_v31 }
 0x125   :  { %3755 = vmatprep.subr.bf16.mxu0 %v10085_v45  ;;  %3919 = vmatprep.subr.bf16.mxu1 %v10088_v63  ;;  %v449_v45 = vld [vmem:[#allocation7 + $0x9e0] sm:$0xff]  ;;  %v10112_v63 = vcombine.high %v438_v54, %v442_v13  ;;  %v450_v4 = vld [vmem:[#allocation7 + $0x9e8] sm:$0xff]  ;;  %12582 = vst [vmem:[#allocation146_spill] sm:$0xff] %v10119_v33 }
 0x126   :  { %v10121_v44 = vcombine.high %v445_v52, %v449_v45  ;;  %v10127_v46 = vcombine.low %v445_v52, %v449_v45  ;;  %v10131_v13 = vcombine.low %v446_v36, %v450_v4  ;;  %v469_v52 = vld [vmem:[#allocation7 + $0xa80] sm:$0xff] }
 0x127   :  { %12580 = vst [vmem:[#allocation144_spill] sm:$0xff] %v10112_v63 }
 0x128   :  { %3756 = vmatpush1.bf16.msra.mxu0 %v10091_v55  ;;  %3920 = vmatpush1.bf16.msra.mxu1 %v10095_v62  ;;  %12583 = vst [vmem:[#allocation147_spill] sm:$0xff] %v10121_v44  ;;  %v454_v62 = vld [vmem:[#allocation7 + $0xa08] sm:$0xff]  ;;  %12585 = vst [vmem:[#allocation149_spill] sm:$0xff] %v10127_v46 }
 0x129   :  { %3757 = vmatprep.subr.bf16.mxu0 %v10097_v59  ;;  %3921 = vmatprep.subr.bf16.mxu1 %v10100_v1  ;;  %v457_v59 = vld [vmem:[#allocation7 + $0xa20] sm:$0xff]  ;;  %v10124_v1 = vcombine.high %v446_v36, %v450_v4  ;;  %v458_v55 = vld [vmem:[#allocation7 + $0xa28] sm:$0xff]  ;;  %12586 = vst [vmem:[#allocation150_spill] sm:$0xff] %v10131_v13 }
 0x12a   :  { %v10133_v54 = vcombine.high %v453_v12, %v457_v59  ;;  %v10139_v45 = vcombine.low %v453_v12, %v457_v59  ;;  %v10143_v4 = vcombine.low %v454_v62, %v458_v55  ;;  %v477_v12 = vld [vmem:[#allocation7 + $0xac0] sm:$0xff] }
 0x12b   :  { %12584 = vst [vmem:[#allocation148_spill] sm:$0xff] %v10124_v1 }
 0x12c   :  { %3758 = vmatpush1.bf16.msra.mxu0 %v10103_v41  ;;  %3922 = vmatpush1.bf16.msra.mxu1 %v10107_v32  ;;  %12587 = vst [vmem:[#allocation151_spill] sm:$0xff] %v10133_v54  ;;  %v462_v32 = vld [vmem:[#allocation7 + $0xa48] sm:$0xff]  ;;  %12589 = vst [vmem:[#allocation153_spill] sm:$0xff] %v10139_v45 }
 0x12d   :  { %3759 = vmatprep.subr.bf16.mxu0 %v10109_v42  ;;  %3923 = vmatprep.subr.bf16.mxu1 %v10112_v63  ;;  %v465_v42 = vld [vmem:[#allocation7 + $0xa60] sm:$0xff]  ;;  %v10136_v63 = vcombine.high %v454_v62, %v458_v55  ;;  %v466_v41 = vld [vmem:[#allocation7 + $0xa68] sm:$0xff]  ;;  %12590 = vst [vmem:[#allocation154_spill] sm:$0xff] %v10143_v4 }
 0x12e   :  { %v10145_v36 = vcombine.high %v461_v61, %v465_v42  ;;  %v10151_v59 = vcombine.low %v461_v61, %v465_v42  ;;  %v10155_v55 = vcombine.low %v462_v32, %v466_v41  ;;  %v485_v61 = vld [vmem:[#allocation7 + $0xb00] sm:$0xff] }
 0x12f   :  { %12588 = vst [vmem:[#allocation152_spill] sm:$0xff] %v10136_v63 }
 0x130   :  { %3760 = vmatpush1.bf16.msra.mxu0 %v10115_v31  ;;  %3924 = vmatpush1.bf16.msra.mxu1 %v10119_v33  ;;  %12591 = vst [vmem:[#allocation155_spill] sm:$0xff] %v10145_v36  ;;  %v470_v33 = vld [vmem:[#allocation7 + $0xa88] sm:$0xff]  ;;  %12593 = vst [vmem:[#allocation157_spill] sm:$0xff] %v10151_v59 }
 0x131   :  { %3761 = vmatprep.subr.bf16.mxu0 %v10121_v44  ;;  %3925 = vmatprep.subr.bf16.mxu1 %v10124_v1  ;;  %v473_v44 = vld [vmem:[#allocation7 + $0xaa0] sm:$0xff]  ;;  %v10148_v1 = vcombine.high %v462_v32, %v466_v41  ;;  %v474_v31 = vld [vmem:[#allocation7 + $0xaa8] sm:$0xff]  ;;  %12594 = vst [vmem:[#allocation158_spill] sm:$0xff] %v10155_v55 }
 0x132   :  { %v10157_v62 = vcombine.high %v469_v52, %v473_v44  ;;  %v10163_v42 = vcombine.low %v469_v52, %v473_v44  ;;  %v10167_v41 = vcombine.low %v470_v33, %v474_v31  ;;  %v493_v52 = vld [vmem:[#allocation7 + $0xb40] sm:$0xff] }
 0x133   :  { %12592 = vst [vmem:[#allocation156_spill] sm:$0xff] %v10148_v1 }
 0x134   :  { %3762 = vmatpush1.bf16.msra.mxu0 %v10127_v46  ;;  %3926 = vmatpush1.bf16.msra.mxu1 %v10131_v13  ;;  %12595 = vst [vmem:[#allocation159_spill] sm:$0xff] %v10157_v62  ;;  %v478_v13 = vld [vmem:[#allocation7 + $0xac8] sm:$0xff]  ;;  %12597 = vst [vmem:[#allocation161_spill] sm:$0xff] %v10163_v42 }
 0x135   :  { %3763 = vmatprep.subr.bf16.mxu0 %v10133_v54  ;;  %3927 = vmatprep.subr.bf16.mxu1 %v10136_v63  ;;  %v481_v54 = vld [vmem:[#allocation7 + $0xae0] sm:$0xff]  ;;  %v10160_v63 = vcombine.high %v470_v33, %v474_v31  ;;  %v482_v46 = vld [vmem:[#allocation7 + $0xae8] sm:$0xff]  ;;  %12598 = vst [vmem:[#allocation162_spill] sm:$0xff] %v10167_v41 }
 0x136   :  { %v10169_v32 = vcombine.high %v477_v12, %v481_v54  ;;  %v10175_v44 = vcombine.low %v477_v12, %v481_v54  ;;  %v10179_v31 = vcombine.low %v478_v13, %v482_v46  ;;  %v501_v12 = vld [vmem:[#allocation7 + $0xb80] sm:$0xff] }
 0x137   :  { %12596 = vst [vmem:[#allocation160_spill] sm:$0xff] %v10160_v63 }
 0x138   :  { %3764 = vmatpush1.bf16.msra.mxu0 %v10139_v45  ;;  %3928 = vmatpush1.bf16.msra.mxu1 %v10143_v4  ;;  %12599 = vst [vmem:[#allocation163_spill] sm:$0xff] %v10169_v32  ;;  %v486_v4 = vld [vmem:[#allocation7 + $0xb08] sm:$0xff]  ;;  %12601 = vst [vmem:[#allocation165_spill] sm:$0xff] %v10175_v44 }
 0x139   :  { %3765 = vmatprep.subr.bf16.mxu0 %v10145_v36  ;;  %3929 = vmatprep.subr.bf16.mxu1 %v10148_v1  ;;  %v489_v36 = vld [vmem:[#allocation7 + $0xb20] sm:$0xff]  ;;  %v10172_v1 = vcombine.high %v478_v13, %v482_v46  ;;  %v490_v45 = vld [vmem:[#allocation7 + $0xb28] sm:$0xff]  ;;  %12602 = vst [vmem:[#allocation166_spill] sm:$0xff] %v10179_v31 }
 0x13a   :  { %v10181_v33 = vcombine.high %v485_v61, %v489_v36  ;;  %v10187_v54 = vcombine.low %v485_v61, %v489_v36  ;;  %v10191_v46 = vcombine.low %v486_v4, %v490_v45  ;;  %v509_v61 = vld [vmem:[#allocation7 + $0xbc0] sm:$0xff] }
 0x13b   :  { %12600 = vst [vmem:[#allocation164_spill] sm:$0xff] %v10172_v1 }
 0x13c   :  { %3766 = vmatpush1.bf16.msra.mxu0 %v10151_v59  ;;  %3930 = vmatpush1.bf16.msra.mxu1 %v10155_v55  ;;  %12603 = vst [vmem:[#allocation167_spill] sm:$0xff] %v10181_v33  ;;  %v494_v55 = vld [vmem:[#allocation7 + $0xb48] sm:$0xff]  ;;  %12605 = vst [vmem:[#allocation169_spill] sm:$0xff] %v10187_v54 }
 0x13d   :  { %3767 = vmatprep.subr.bf16.mxu0 %v10157_v62  ;;  %3931 = vmatprep.subr.bf16.mxu1 %v10160_v63  ;;  %v497_v62 = vld [vmem:[#allocation7 + $0xb60] sm:$0xff]  ;;  %v10184_v63 = vcombine.high %v486_v4, %v490_v45  ;;  %v498_v59 = vld [vmem:[#allocation7 + $0xb68] sm:$0xff]  ;;  %12606 = vst [vmem:[#allocation170_spill] sm:$0xff] %v10191_v46 }
 0x13e   :  { %v10193_v13 = vcombine.high %v493_v52, %v497_v62  ;;  %v10199_v36 = vcombine.low %v493_v52, %v497_v62  ;;  %v10203_v45 = vcombine.low %v494_v55, %v498_v59  ;;  %v517_v52 = vld [vmem:[#allocation7 + $0xc00] sm:$0xff] }
 0x13f   :  { %12604 = vst [vmem:[#allocation168_spill] sm:$0xff] %v10184_v63 }
 0x140   :  { %3768 = vmatpush1.bf16.msra.mxu0 %v10163_v42  ;;  %3932 = vmatpush1.bf16.msra.mxu1 %v10167_v41  ;;  %12607 = vst [vmem:[#allocation171_spill] sm:$0xff] %v10193_v13  ;;  %v502_v41 = vld [vmem:[#allocation7 + $0xb88] sm:$0xff]  ;;  %12609 = vst [vmem:[#allocation173_spill] sm:$0xff] %v10199_v36 }
 0x141   :  { %3769 = vmatprep.subr.bf16.mxu0 %v10169_v32  ;;  %3933 = vmatprep.subr.bf16.mxu1 %v10172_v1  ;;  %v505_v32 = vld [vmem:[#allocation7 + $0xba0] sm:$0xff]  ;;  %v10196_v1 = vcombine.high %v494_v55, %v498_v59  ;;  %v506_v42 = vld [vmem:[#allocation7 + $0xba8] sm:$0xff]  ;;  %12610 = vst [vmem:[#allocation174_spill] sm:$0xff] %v10203_v45 }
 0x142   :  { %v10205_v4 = vcombine.high %v501_v12, %v505_v32  ;;  %v10211_v62 = vcombine.low %v501_v12, %v505_v32  ;;  %v10215_v59 = vcombine.low %v502_v41, %v506_v42  ;;  %v525_v12 = vld [vmem:[#allocation7 + $0xc40] sm:$0xff] }
 0x143   :  { %12608 = vst [vmem:[#allocation172_spill] sm:$0xff] %v10196_v1 }
 0x144   :  { %3770 = vmatpush1.bf16.msra.mxu0 %v10175_v44  ;;  %3934 = vmatpush1.bf16.msra.mxu1 %v10179_v31  ;;  %12611 = vst [vmem:[#allocation175_spill] sm:$0xff] %v10205_v4  ;;  %v510_v31 = vld [vmem:[#allocation7 + $0xbc8] sm:$0xff]  ;;  %12613 = vst [vmem:[#allocation177_spill] sm:$0xff] %v10211_v62 }
 0x145   :  { %3771 = vmatprep.subr.bf16.mxu0 %v10181_v33  ;;  %3935 = vmatprep.subr.bf16.mxu1 %v10184_v63  ;;  %v513_v33 = vld [vmem:[#allocation7 + $0xbe0] sm:$0xff]  ;;  %v10208_v63 = vcombine.high %v502_v41, %v506_v42  ;;  %v514_v44 = vld [vmem:[#allocation7 + $0xbe8] sm:$0xff]  ;;  %12614 = vst [vmem:[#allocation178_spill] sm:$0xff] %v10215_v59 }
 0x146   :  { %v10217_v55 = vcombine.high %v509_v61, %v513_v33  ;;  %v10223_v32 = vcombine.low %v509_v61, %v513_v33  ;;  %v10227_v42 = vcombine.low %v510_v31, %v514_v44  ;;  %v10236_v33 = vrot.slane %v10015_v17, %v9673_v53  ;;  %v538_v17 = vld [vmem:[#allocation7 + $0xca8] sm:$0xff] }
 0x147   :  { %12612 = vst [vmem:[#allocation176_spill] sm:$0xff] %v10208_v63 }
 0x148   :  { %3772 = vmatpush1.bf16.msra.mxu0 %v10187_v54  ;;  %3936 = vmatpush1.bf16.msra.mxu1 %v10191_v46  ;;  %12615 = vst [vmem:[#allocation179_spill] sm:$0xff] %v10217_v55  ;;  %v518_v46 = vld [vmem:[#allocation7 + $0xc08] sm:$0xff]  ;;  %12617 = vst [vmem:[#allocation181_spill] sm:$0xff] %v10223_v32 }
 0x149   :  { %3773 = vmatprep.subr.bf16.mxu0 %v10193_v13  ;;  %3937 = vmatprep.subr.bf16.mxu1 %v10196_v1  ;;  %v521_v13 = vld [vmem:[#allocation7 + $0xc20] sm:$0xff]  ;;  %v10220_v1 = vcombine.high %v510_v31, %v514_v44  ;;  %v522_v54 = vld [vmem:[#allocation7 + $0xc28] sm:$0xff]  ;;  %12618 = vst [vmem:[#allocation182_spill] sm:$0xff] %v10227_v42 }
 0x14a   :  { %v10229_v41 = vcombine.high %v517_v52, %v521_v13  ;;  %v10239_v61 = vcombine.low %v517_v52, %v521_v13  ;;  %v10243_v44 = vcombine.low %v518_v46, %v522_v54  ;;  %v10252_v13 = vcombine.high %v10048_v51, %v10048_v51 }
 0x14b   :  { %12616 = vst [vmem:[#allocation180_spill] sm:$0xff] %v10220_v1 }
 0x14c   :  { %3774 = vmatpush1.bf16.msra.mxu0 %v10199_v36  ;;  %3938 = vmatpush1.bf16.msra.mxu1 %v10203_v45  ;;  %12619 = vst [vmem:[#allocation183_spill] sm:$0xff] %v10229_v41  ;;  %v526_v45 = vld [vmem:[#allocation7 + $0xc48] sm:$0xff]  ;;  %12621 = vst [vmem:[#allocation185_spill] sm:$0xff] %v10239_v61 }
 0x14d   :  { %3775 = vmatprep.subr.bf16.mxu0 %v10205_v4  ;;  %3939 = vmatprep.subr.bf16.mxu1 %v10208_v63  ;;  %v529_v4 = vld [vmem:[#allocation7 + $0xc60] sm:$0xff]  ;;  %v10232_v63 = vcombine.high %v518_v46, %v522_v54  ;;  %v530_v36 = vld [vmem:[#allocation7 + $0xc68] sm:$0xff]  ;;  %12622 = vst [vmem:[#allocation186_spill] sm:$0xff] %v10243_v44 }
 0x14e   :  { %v10245_v31 = vcombine.high %v525_v12, %v529_v4  ;;  %v10257_v54 = vcombine.low %v525_v12, %v529_v4  ;;  %v10261_v46 = vcombine.low %v526_v45, %v530_v36  ;;  %v549_v12 = vld [vmem:[#allocation7 + $0xd00] sm:$0xff] }
 0x14f   :  { %12620 = vst [vmem:[#allocation184_spill] sm:$0xff] %v10232_v63 }
 0x150   :  { %3776 = vmatpush1.bf16.msra.mxu0 %v10211_v62  ;;  %3940 = vmatpush1.bf16.msra.mxu1 %v10215_v59  ;;  %12623 = vst [vmem:[#allocation187_spill] sm:$0xff] %v10245_v31  ;;  %v534_v59 = vld [vmem:[#allocation7 + $0xc88] sm:$0xff]  ;;  %v10248_v62 = vcombine.high %v526_v45, %v530_v36  ;;  %12625 = vst [vmem:[#allocation189_spill] sm:$0xff] %v10257_v54 }
 0x151   :  { %3777 = vmatprep.subr.bf16.mxu0 %v10217_v55  ;;  %3941 = vmatprep.subr.bf16.mxu1 %v10220_v1  ;;  %v533_v1 = vld [vmem:[#allocation7 + $0xc80] sm:$0xff]  ;;  %12626 = vst [vmem:[#allocation190_spill] sm:$0xff] %v10261_v46  ;;  %v10275_v36 = vcombine.low %v534_v59, %v538_v17 }
 0x152   :  { %v537_v55 = vld [vmem:[#allocation7 + $0xca0] sm:$0xff]  ;;  %12624 = vst [vmem:[#allocation188_spill] sm:$0xff] %v10248_v62 }
 0x153   :  { %v10263_v52 = vcombine.high %v533_v1, %v537_v55  ;;  %v10271_v4 = vcombine.low %v533_v1, %v537_v55  ;;  %12630 = vst [vmem:[#allocation194_spill] sm:$0xff] %v10275_v36 }
 0x154   :  { %3778 = vmatpush1.bf16.msra.mxu0 %v10223_v32  ;;  %3942 = vmatpush1.bf16.msra.mxu1 %v10227_v42  ;;  %v542_v42 = vld [vmem:[#allocation7 + $0xcc8] sm:$0xff]  ;;  %v10266_v32 = vcombine.high %v534_v59, %v538_v17  ;;  %v557_v17 = vld [vmem:[#allocation7 + $0xd40] sm:$0xff] }
 0x155   :  { %3788 = vmatprep.subr.bf16.mxu0 %v10229_v41  ;;  %3952 = vmatprep.subr.bf16.mxu1 %v10232_v63  ;;  %12627 = vst [vmem:[#allocation191_spill] sm:$0xff] %v10263_v52  ;;  %v541_v63 = vld [vmem:[#allocation7 + $0xcc0] sm:$0xff]  ;;  %12629 = vst [vmem:[#allocation193_spill] sm:$0xff] %v10271_v4 }
 0x156   :  { %v545_v41 = vld [vmem:[#allocation7 + $0xce0] sm:$0xff]  ;;  %12628 = vst [vmem:[#allocation192_spill] sm:$0xff] %v10266_v32 }
 0x157   :  { %3780 = vmatmul.mubr.bf16.vlgmr.msra.gmra.mrb[0].mxu0 %v10236_v33  ;;  %3944 = vmatmul.mubr.bf16.vlgmr.msra.gmra.mrb[0].mxu1 %v10236_v33  ;;  %v10277_v45 = vcombine.high %v541_v63, %v545_v41  ;;  %v10283_v1 = vcombine.low %v541_v63, %v545_v41 }
 0x158   :  { %3789 = vmatpush1.bf16.msra.mxu0 %v10239_v61  ;;  %3953 = vmatpush1.bf16.msra.mxu1 %v10243_v44  ;;  %v546_v61 = vld [vmem:[#allocation7 + $0xce8] sm:$0xff] }
 0x159   :  { %3790 = vmatprep.subr.bf16.mxu0 %v10245_v31  ;;  %3954 = vmatprep.subr.bf16.mxu1 %v10248_v62  ;;  %12631 = vst [vmem:[#allocation195_spill] sm:$0xff] %v10277_v45  ;;  %v553_v62 = vld [vmem:[#allocation7 + $0xd20] sm:$0xff]  ;;  %v550_v31 = vld [vmem:[#allocation7 + $0xd08] sm:$0xff]  ;;  %v10280_v44 = vcombine.high %v542_v42, %v546_v61  ;;  %12633 = vst [vmem:[#allocation197_spill] sm:$0xff] %v10283_v1  ;;  %v10287_v59 = vcombine.low %v542_v42, %v546_v61 }
 0x15a   :  { %3820 = vmatprep.mubr.bf16.mxu0 %v10252_v13  ;;  %3984 = vmatprep.mubr.bf16.mxu1 %v10252_v13  ;;  %v10289_v55 = vcombine.high %v549_v12, %v553_v62  ;;  %v10295_v63 = vcombine.low %v549_v12, %v553_v62  ;;  %v10299_v42 = vcombine.low %v550_v31, %v554_v35  ;;  %v565_v61 = vld [vmem:[#allocation7 + $0xd80] sm:$0xff] }
 0x15b   :  { %12632 = vst [vmem:[#allocation196_spill] sm:$0xff] %v10280_v44  ;;  %12634 = vst [vmem:[#allocation198_spill] sm:$0xff] %v10287_v59  ;;  %v573_v12 = vld [vmem:[#allocation7 + $0xdc0] sm:$0xff] }
 0x15c   :  { %3791 = vmatpush1.bf16.msra.mxu0 %v10257_v54  ;;  %3955 = vmatpush1.bf16.msra.mxu1 %v10261_v46  ;;  %12635 = vst [vmem:[#allocation199_spill] sm:$0xff] %v10289_v55  ;;  %v558_v46 = vld [vmem:[#allocation7 + $0xd48] sm:$0xff]  ;;  %12637 = vst [vmem:[#allocation201_spill] sm:$0xff] %v10295_v63 }
 0x15d   :  { %3792 = vmatprep.subr.bf16.mxu0 %v10263_v52  ;;  %3956 = vmatprep.subr.bf16.mxu1 %v10266_v32  ;;  %v561_v52 = vld [vmem:[#allocation7 + $0xd60] sm:$0xff]  ;;  %v10292_v32 = vcombine.high %v550_v31, %v554_v35  ;;  %v562_v54 = vld [vmem:[#allocation7 + $0xd68] sm:$0xff]  ;;  %12638 = vst [vmem:[#allocation202_spill] sm:$0xff] %v10299_v42 }
 0x15e   :  { %v10301_v41 = vcombine.high %v557_v17, %v561_v52  ;;  %v10307_v62 = vcombine.low %v557_v17, %v561_v52  ;;  %v10311_v35 = vcombine.low %v558_v46, %v562_v54  ;;  %v581_v17 = vld [vmem:[#allocation7 + $0xe00] sm:$0xff] }
 0x15f   :  { %12636 = vst [vmem:[#allocation200_spill] sm:$0xff] %v10292_v32 }
 0x160   :  { %3793 = vmatpush1.bf16.msra.mxu0 %v10271_v4  ;;  %3957 = vmatpush1.bf16.msra.mxu1 %v10275_v36  ;;  %12639 = vst [vmem:[#allocation203_spill] sm:$0xff] %v10301_v41  ;;  %v566_v36 = vld [vmem:[#allocation7 + $0xd88] sm:$0xff]  ;;  %12641 = vst [vmem:[#allocation205_spill] sm:$0xff] %v10307_v62 }
 0x161   :  { %3794 = vmatprep.subr.bf16.mxu0 %v10277_v45  ;;  %3958 = vmatprep.subr.bf16.mxu1 %v10280_v44  ;;  %v569_v45 = vld [vmem:[#allocation7 + $0xda0] sm:$0xff]  ;;  %v10304_v44 = vcombine.high %v558_v46, %v562_v54  ;;  %v570_v4 = vld [vmem:[#allocation7 + $0xda8] sm:$0xff]  ;;  %12642 = vst [vmem:[#allocation206_spill] sm:$0xff] %v10311_v35 }
 0x162   :  { %v10313_v31 = vcombine.high %v565_v61, %v569_v45  ;;  %v10319_v52 = vcombine.low %v565_v61, %v569_v45  ;;  %v10323_v54 = vcombine.low %v566_v36, %v570_v4  ;;  %v589_v61 = vld [vmem:[#allocation7 + $0xe40] sm:$0xff] }
 0x163   :  { %12640 = vst [vmem:[#allocation204_spill] sm:$0xff] %v10304_v44 }
 0x164   :  { %3795 = vmatpush1.bf16.msra.mxu0 %v10283_v1  ;;  %3959 = vmatpush1.bf16.msra.mxu1 %v10287_v59  ;;  %12643 = vst [vmem:[#allocation207_spill] sm:$0xff] %v10313_v31  ;;  %v574_v59 = vld [vmem:[#allocation7 + $0xdc8] sm:$0xff]  ;;  %12645 = vst [vmem:[#allocation209_spill] sm:$0xff] %v10319_v52 }
 0x165   :  { %3796 = vmatprep.subr.bf16.mxu0 %v10289_v55  ;;  %3960 = vmatprep.subr.bf16.mxu1 %v10292_v32  ;;  %v577_v55 = vld [vmem:[#allocation7 + $0xde0] sm:$0xff]  ;;  %v10316_v32 = vcombine.high %v566_v36, %v570_v4  ;;  %v578_v1 = vld [vmem:[#allocation7 + $0xde8] sm:$0xff]  ;;  %12646 = vst [vmem:[#allocation210_spill] sm:$0xff] %v10323_v54 }
 0x166   :  { %v10325_v46 = vcombine.high %v573_v12, %v577_v55  ;;  %v10331_v45 = vcombine.low %v573_v12, %v577_v55  ;;  %v10335_v4 = vcombine.low %v574_v59, %v578_v1 }
 0x167   :  { %12644 = vst [vmem:[#allocation208_spill] sm:$0xff] %v10316_v32 }
 0x168   :  { %3797 = vmatpush1.bf16.msra.mxu0 %v10295_v63  ;;  %3961 = vmatpush1.bf16.msra.mxu1 %v10299_v42  ;;  %12647 = vst [vmem:[#allocation211_spill] sm:$0xff] %v10325_v46  ;;  %v582_v42 = vld [vmem:[#allocation7 + $0xe08] sm:$0xff]  ;;  %12649 = vst [vmem:[#allocation213_spill] sm:$0xff] %v10331_v45 }
 0x169   :  { %3798 = vmatprep.subr.bf16.mxu0 %v10301_v41  ;;  %3962 = vmatprep.subr.bf16.mxu1 %v10304_v44  ;;  %v585_v41 = vld [vmem:[#allocation7 + $0xe20] sm:$0xff]  ;;  %v10328_v44 = vcombine.high %v574_v59, %v578_v1  ;;  %v586_v63 = vld [vmem:[#allocation7 + $0xe28] sm:$0xff]  ;;  %12650 = vst [vmem:[#allocation214_spill] sm:$0xff] %v10335_v4 }
 0x16a   :  { %v10337_v36 = vcombine.high %v581_v17, %v585_v41  ;;  %v10343_v55 = vcombine.low %v581_v17, %v585_v41  ;;  %v10347_v1 = vcombine.low %v582_v42, %v586_v63 }
 0x16b   :  { %12648 = vst [vmem:[#allocation212_spill] sm:$0xff] %v10328_v44 }
 0x16c   :  { %3799 = vmatpush1.bf16.msra.mxu0 %v10307_v62  ;;  %3963 = vmatpush1.bf16.msra.mxu1 %v10311_v35  ;;  %12651 = vst [vmem:[#allocation215_spill] sm:$0xff] %v10337_v36  ;;  %v590_v35 = vld [vmem:[#allocation7 + $0xe48] sm:$0xff]  ;;  %12653 = vst [vmem:[#allocation217_spill] sm:$0xff] %v10343_v55 }
 0x16d   :  { %3800 = vmatprep.subr.bf16.mxu0 %v10313_v31  ;;  %3964 = vmatprep.subr.bf16.mxu1 %v10316_v32  ;;  %v593_v31 = vld [vmem:[#allocation7 + $0xe60] sm:$0xff]  ;;  %v10340_v32 = vcombine.high %v582_v42, %v586_v63  ;;  %v594_v62 = vld [vmem:[#allocation7 + $0xe68] sm:$0xff]  ;;  %12654 = vst [vmem:[#allocation218_spill] sm:$0xff] %v10347_v1 }
 0x16e   :  { %v10349_v59 = vcombine.high %v589_v61, %v593_v31  ;;  %v10352_v12 = vcombine.high %v590_v35, %v594_v62  ;;  %v10355_v41 = vcombine.low %v589_v61, %v593_v31  ;;  %v10359_v63 = vcombine.low %v590_v35, %v594_v62 }
 0x16f   :  { %12652 = vst [vmem:[#allocation216_spill] sm:$0xff] %v10340_v32 }
 0x170   :  { %3801 = vmatpush1.bf16.msra.mxu0 %v10319_v52  ;;  %3965 = vmatpush1.bf16.msra.mxu1 %v10323_v54  ;;  %12655 = vst [vmem:[#allocation219_spill] sm:$0xff] %v10349_v59  ;;  %12656 = vst [vmem:[#allocation220_spill] sm:$0xff] %v10352_v12  ;;  %v598_v54 = vld [vmem:[#allocation7 + $0xe88] sm:$0xff] }
 0x171   :  { %3802 = vmatprep.subr.bf16.mxu0 %v10325_v46  ;;  %3966 = vmatprep.subr.bf16.mxu1 %v10328_v44  ;;  %v597_v44 = vld [vmem:[#allocation7 + $0xe80] sm:$0xff]  ;;  %v602_v52 = vld [vmem:[#allocation7 + $0xea8] sm:$0xff]  ;;  %12657 = vst [vmem:[#allocation221_spill] sm:$0xff] %v10355_v41  ;;  %12658 = vst [vmem:[#allocation222_spill] sm:$0xff] %v10359_v63 }
 0x172   :  { %v601_v46 = vld [vmem:[#allocation7 + $0xea0] sm:$0xff]  ;;  %v10364_v17 = vcombine.high %v598_v54, %v602_v52  ;;  %v10371_v62 = vcombine.low %v598_v54, %v602_v52 }
 0x173   :  { %v10361_v42 = vcombine.high %v597_v44, %v601_v46  ;;  %v10367_v31 = vcombine.low %v597_v44, %v601_v46 }
 0x174   :  { %3803 = vmatpush1.bf16.msra.mxu0 %v10331_v45  ;;  %3967 = vmatpush1.bf16.msra.mxu1 %v10335_v4  ;;  %12660 = vst [vmem:[#allocation224_spill] sm:$0xff] %v10364_v17  ;;  %v606_v4 = vld [vmem:[#allocation7 + $0xec8] sm:$0xff]  ;;  %12662 = vst [vmem:[#allocation226_spill] sm:$0xff] %v10371_v62 }
 0x175   :  { %3804 = vmatprep.subr.bf16.mxu0 %v10337_v36  ;;  %3968 = vmatprep.subr.bf16.mxu1 %v10340_v32  ;;  %12659 = vst [vmem:[#allocation223_spill] sm:$0xff] %v10361_v42  ;;  %v605_v32 = vld [vmem:[#allocation7 + $0xec0] sm:$0xff]  ;;  %v610_v45 = vld [vmem:[#allocation7 + $0xee8] sm:$0xff]  ;;  %12661 = vst [vmem:[#allocation225_spill] sm:$0xff] %v10367_v31 }
 0x176   :  { %v609_v36 = vld [vmem:[#allocation7 + $0xee0] sm:$0xff]  ;;  %v10376_v61 = vcombine.high %v606_v4, %v610_v45  ;;  %v10383_v52 = vcombine.low %v606_v4, %v610_v45 }
 0x177   :  { %v10373_v35 = vcombine.high %v605_v32, %v609_v36  ;;  %v10379_v44 = vcombine.low %v605_v32, %v609_v36 }
 0x178   :  { %3805 = vmatpush1.bf16.msra.mxu0 %v10343_v55  ;;  %3969 = vmatpush1.bf16.msra.mxu1 %v10347_v1  ;;  %12664 = vst [vmem:[#allocation228_spill] sm:$0xff] %v10376_v61  ;;  %v614_v1 = vld [vmem:[#allocation7 + $0xf08] sm:$0xff]  ;;  %12666 = vst [vmem:[#allocation230_spill] sm:$0xff] %v10383_v52 }
 0x179   :  { %3806 = vmatprep.subr.bf16.mxu0 %v10349_v59  ;;  %3970 = vmatprep.subr.bf16.mxu1 %v10352_v12  ;;  %12663 = vst [vmem:[#allocation227_spill] sm:$0xff] %v10373_v35  ;;  %v613_v12 = vld [vmem:[#allocation7 + $0xf00] sm:$0xff]  ;;  %v618_v55 = vld [vmem:[#allocation7 + $0xf28] sm:$0xff]  ;;  %12665 = vst [vmem:[#allocation229_spill] sm:$0xff] %v10379_v44 }
 0x17a   :  { %v617_v59 = vld [vmem:[#allocation7 + $0xf20] sm:$0xff]  ;;  %v10388_v46 = vcombine.high %v614_v1, %v618_v55  ;;  %v10395_v45 = vcombine.low %v614_v1, %v618_v55 }
 0x17b   :  { %v10385_v54 = vcombine.high %v613_v12, %v617_v59  ;;  %v10391_v32 = vcombine.low %v613_v12, %v617_v59 }
 0x17c   :  { %3807 = vmatpush1.bf16.msra.mxu0 %v10355_v41  ;;  %3971 = vmatpush1.bf16.msra.mxu1 %v10359_v63  ;;  %12668 = vst [vmem:[#allocation232_spill] sm:$0xff] %v10388_v46  ;;  %v622_v63 = vld [vmem:[#allocation7 + $0xf48] sm:$0xff]  ;;  %12670 = vst [vmem:[#allocation234_spill] sm:$0xff] %v10395_v45 }
 0x17d   :  { %3808 = vmatprep.subr.bf16.mxu0 %v10361_v42  ;;  %3972 = vmatprep.subr.bf16.mxu1 %v10364_v17  ;;  %12667 = vst [vmem:[#allocation231_spill] sm:$0xff] %v10385_v54  ;;  %v621_v17 = vld [vmem:[#allocation7 + $0xf40] sm:$0xff]  ;;  %v626_v41 = vld [vmem:[#allocation7 + $0xf68] sm:$0xff]  ;;  %12669 = vst [vmem:[#allocation233_spill] sm:$0xff] %v10391_v32 }
 0x17e   :  { %v625_v42 = vld [vmem:[#allocation7 + $0xf60] sm:$0xff]  ;;  %v10400_v36 = vcombine.high %v622_v63, %v626_v41  ;;  %v10407_v55 = vcombine.low %v622_v63, %v626_v41 }
 0x17f   :  { %v10397_v4 = vcombine.high %v621_v17, %v625_v42  ;;  %v10403_v59 = vcombine.low %v621_v17, %v625_v42 }
 0x180   :  { %3809 = vmatpush1.bf16.msra.mxu0 %v10367_v31  ;;  %3973 = vmatpush1.bf16.msra.mxu1 %v10371_v62  ;;  %12672 = vst [vmem:[#allocation236_spill] sm:$0xff] %v10400_v36  ;;  %v630_v62 = vld [vmem:[#allocation7 + $0xf88] sm:$0xff]  ;;  %12674 = vst [vmem:[#allocation238_spill] sm:$0xff] %v10407_v55 }
 0x181   :  { %3810 = vmatprep.subr.bf16.mxu0 %v10373_v35  ;;  %3974 = vmatprep.subr.bf16.mxu1 %v10376_v61  ;;  %12671 = vst [vmem:[#allocation235_spill] sm:$0xff] %v10397_v4  ;;  %v629_v61 = vld [vmem:[#allocation7 + $0xf80] sm:$0xff]  ;;  %v634_v31 = vld [vmem:[#allocation7 + $0xfa8] sm:$0xff]  ;;  %12673 = vst [vmem:[#allocation237_spill] sm:$0xff] %v10403_v59 }
 0x182   :  { %v633_v35 = vld [vmem:[#allocation7 + $0xfa0] sm:$0xff]  ;;  %v10412_v12 = vcombine.high %v630_v62, %v634_v31  ;;  %v10419_v41 = vcombine.low %v630_v62, %v634_v31 }
 0x183   :  { %v10409_v1 = vcombine.high %v629_v61, %v633_v35  ;;  %v10415_v42 = vcombine.low %v629_v61, %v633_v35 }
 0x184   :  { %3811 = vmatpush1.bf16.msra.mxu0 %v10379_v44  ;;  %3975 = vmatpush1.bf16.msra.mxu1 %v10383_v52  ;;  %12676 = vst [vmem:[#allocation240_spill] sm:$0xff] %v10412_v12  ;;  %v638_v52 = vld [vmem:[#allocation7 + $0xfc8] sm:$0xff]  ;;  %12678 = vst [vmem:[#allocation242_spill] sm:$0xff] %v10419_v41 }
 0x185   :  { %3812 = vmatprep.subr.bf16.mxu0 %v10385_v54  ;;  %3976 = vmatprep.subr.bf16.mxu1 %v10388_v46  ;;  %12675 = vst [vmem:[#allocation239_spill] sm:$0xff] %v10409_v1  ;;  %v637_v46 = vld [vmem:[#allocation7 + $0xfc0] sm:$0xff]  ;;  %v642_v44 = vld [vmem:[#allocation7 + $0xfe8] sm:$0xff]  ;;  %12677 = vst [vmem:[#allocation241_spill] sm:$0xff] %v10415_v42 }
 0x186   :  { %v641_v54 = vld [vmem:[#allocation7 + $0xfe0] sm:$0xff]  ;;  %v10424_v17 = vcombine.high %v638_v52, %v642_v44  ;;  %v10431_v31 = vcombine.low %v638_v52, %v642_v44 }
 0x187   :  { %v10421_v63 = vcombine.high %v637_v46, %v641_v54  ;;  %v10427_v35 = vcombine.low %v637_v46, %v641_v54  ;;  %v144_v54 = vld [vmem:[#allocation7 + $0x58] sm:$0xff] }
 0x188   :  { %3813 = vmatpush1.bf16.msra.mxu0 %v10391_v32  ;;  %3977 = vmatpush1.bf16.msra.mxu1 %v10395_v45  ;;  %12680 = vst [vmem:[#allocation244_spill] sm:$0xff] %v10424_v17  ;;  %v136_v45 = vld [vmem:[#allocation7 + $0x18] sm:$0xff]  ;;  %12682 = vst [vmem:[#allocation246_spill] sm:$0xff] %v10431_v31 }
 0x189   :  { %3814 = vmatprep.subr.bf16.mxu0 %v10397_v4  ;;  %3978 = vmatprep.subr.bf16.mxu1 %v10400_v36  ;;  %12679 = vst [vmem:[#allocation243_spill] sm:$0xff] %v10421_v63  ;;  %v135_v36 = vld [vmem:[#allocation7 + $0x10] sm:$0xff]  ;;  %v140_v32 = vld [vmem:[#allocation7 + $0x38] sm:$0xff]  ;;  %12681 = vst [vmem:[#allocation245_spill] sm:$0xff] %v10427_v35 }
 0x18a   :  { %v139_v4 = vld [vmem:[#allocation7 + $0x30] sm:$0xff]  ;;  %v10436_v61 = vcombine.high %v136_v45, %v140_v32  ;;  %v148_v46 = vld [vmem:[#allocation7 + $0x78] sm:$0xff]  ;;  %v10447_v44 = vcombine.low %v136_v45, %v140_v32 }
 0x18b   :  { %v10433_v62 = vcombine.high %v135_v36, %v139_v4  ;;  %v10461_v32 = vcombine.low %v144_v54, %v148_v46 }
 0x18c   :  { %3815 = vmatpush1.bf16.msra.mxu0 %v10403_v59  ;;  %3979 = vmatpush1.bf16.msra.mxu1 %v10407_v55  ;;  %12684 = vst [vmem:[#allocation248_spill] sm:$0xff] %v10436_v61  ;;  %v10440_v55 = vcombine.high %v10236_v33, %v10236_v33  ;;  %12686 = vst [vmem:[#allocation250_spill] sm:$0xff] %v10447_v44  ;;  %v152_v59 = vld [vmem:[#allocation7 + $0x98] sm:$0xff] }
 0x18d   :  { %3816 = vmatprep.subr.bf16.mxu0 %v10409_v1  ;;  %3980 = vmatprep.subr.bf16.mxu1 %v10412_v12  ;;  %12683 = vst [vmem:[#allocation247_spill] sm:$0xff] %v10433_v62  ;;  %v143_v12 = vld [vmem:[#allocation7 + $0x50] sm:$0xff]  ;;  %12690 = vst [vmem:[#allocation254_spill] sm:$0xff] %v10461_v32 }
 0x18e   :  { %v147_v1 = vld [vmem:[#allocation7 + $0x70] sm:$0xff] }
 0x18f   :  { %v10449_v52 = vcombine.high %v143_v12, %v147_v1 }
 0x190   :  { %3817 = vmatpush1.bf16.msra.mxu0 %v10415_v42  ;;  %3981 = vmatpush1.bf16.msra.mxu1 %v10419_v41  ;;  %v10443_v41 = vcombine.low %v135_v36, %v139_v4  ;;  %v155_v42 = vld [vmem:[#allocation7 + $0xb0] sm:$0xff]  ;;  %v10457_v4 = vcombine.low %v143_v12, %v147_v1 }
 0x191   :  { %3818 = vmatprep.subr.bf16.mxu0 %v10421_v63  ;;  %3982 = vmatprep.subr.bf16.mxu1 %v10424_v17  ;;  %12687 = vst [vmem:[#allocation251_spill] sm:$0xff] %v10449_v52  ;;  %v10452_v17 = vcombine.high %v144_v54, %v148_v46  ;;  %v151_v63 = vld [vmem:[#allocation7 + $0x90] sm:$0xff] }
 0x192   :  { %12685 = vst [vmem:[#allocation249_spill] sm:$0xff] %v10443_v41  ;;  %12689 = vst [vmem:[#allocation253_spill] sm:$0xff] %v10457_v4  ;;  %v10463_v45 = vcombine.high %v151_v63, %v155_v42  ;;  %v10471_v1 = vcombine.low %v151_v63, %v155_v42 }
 0x193   :  { %12688 = vst [vmem:[#allocation252_spill] sm:$0xff] %v10452_v17 }
 0x194   :  { %3819 = vmatpush1.bf16.msra.mxu0 %v10427_v35  ;;  %3983 = vmatpush1.bf16.msra.mxu1 %v10431_v31  ;;  %v156_v35 = vld [vmem:[#allocation7 + $0xb8] sm:$0xff]  ;;  %12691 = vst [vmem:[#allocation255_spill] sm:$0xff] %v10463_v45  ;;  %12693 = vst [vmem:[#allocation257_spill] sm:$0xff] %v10471_v1 }
 0x195   :  { %3993 = vmatprep.subr.bf16.mxu0 %v10433_v62  ;;  %4157 = vmatprep.subr.bf16.mxu1 %v10436_v61  ;;  %v10466_v36 = vcombine.high %v152_v59, %v156_v35  ;;  %v159_v61 = vld [vmem:[#allocation7 + $0xd0] sm:$0xff]  ;;  %v160_v31 = vld [vmem:[#allocation7 + $0xd8] sm:$0xff]  ;;  %v10475_v12 = vcombine.low %v152_v59, %v156_v35 }
 0x196   :  { %v163_v62 = vld [vmem:[#allocation7 + $0xf0] sm:$0xff] }
 0x197   :  { %3821 = vmatmul.mubr.bf16.vlgmr.msra.gmra.mrb[0].mxu0 %v10440_v55  ;;  %3985 = vmatmul.mubr.bf16.vlgmr.msra.gmra.mrb[0].mxu1 %v10440_v55  ;;  %12692 = vst [vmem:[#allocation256_spill] sm:$0xff] %v10466_v36  ;;  %12694 = vst [vmem:[#allocation258_spill] sm:$0xff] %v10475_v12  ;;  %v10477_v54 = vcombine.high %v159_v61, %v163_v62  ;;  %v10483_v42 = vcombine.low %v159_v61, %v163_v62 }
 0x198   :  { %3994 = vmatpush1.bf16.msra.mxu0 %v10443_v41  ;;  %4158 = vmatpush1.bf16.msra.mxu1 %v10447_v44  ;;  %v164_v41 = vld [vmem:[#allocation7 + $0xf8] sm:$0xff] }
 0x199   :  { %3995 = vmatprep.subr.bf16.mxu0 %v10449_v52  ;;  %4159 = vmatprep.subr.bf16.mxu1 %v10452_v17  ;;  %12695 = vst [vmem:[#allocation259_spill] sm:$0xff] %v10477_v54  ;;  %v10480_v46 = vcombine.high %v160_v31, %v164_v41  ;;  %v167_v17 = vld [vmem:[#allocation7 + $0x110] sm:$0xff]  ;;  %v168_v44 = vld [vmem:[#allocation7 + $0x118] sm:$0xff]  ;;  %12697 = vst [vmem:[#allocation261_spill] sm:$0xff] %v10483_v42  ;;  %v10487_v59 = vcombine.low %v160_v31, %v164_v41 }
 0x19a   :  { %4025 = vmatprep.mubr.bf16.mxu0 %v9708_v15  ;;  %4189 = vmatprep.mubr.bf16.mxu1 %v9708_v15  ;;  %v171_v52 = vld [vmem:[#allocation7 + $0x130] sm:$0xff]  ;;  %v172_v15 = vld [vmem:[#allocation7 + $0x138] sm:$0xff] }
 0x19b   :  { %12696 = vst [vmem:[#allocation260_spill] sm:$0xff] %v10480_v46  ;;  %12698 = vst [vmem:[#allocation262_spill] sm:$0xff] %v10487_v59  ;;  %v10489_v63 = vcombine.high %v167_v17, %v171_v52  ;;  %v10492_v35 = vcombine.high %v168_v44, %v172_v15  ;;  %v10495_v62 = vcombine.low %v167_v17, %v171_v52 }
 0x19c   :  { %3996 = vmatpush1.bf16.msra.mxu0 %v10457_v4  ;;  %4160 = vmatpush1.bf16.msra.mxu1 %v10461_v32  ;;  %v176_v32 = vld [vmem:[#allocation7 + $0x158] sm:$0xff]  ;;  %v10499_v41 = vcombine.low %v168_v44, %v172_v15 }
 0x19d   :  { %3997 = vmatprep.subr.bf16.mxu0 %v10463_v45  ;;  %4161 = vmatprep.subr.bf16.mxu1 %v10466_v36  ;;  %12699 = vst [vmem:[#allocation263_spill] sm:$0xff] %v10489_v63  ;;  %12700 = vst [vmem:[#allocation264_spill] sm:$0xff] %v10492_v35  ;;  %v175_v36 = vld [vmem:[#allocation7 + $0x150] sm:$0xff]  ;;  %v180_v4 = vld [vmem:[#allocation7 + $0x178] sm:$0xff] }
 0x19e   :  { %v179_v45 = vld [vmem:[#allocation7 + $0x170] sm:$0xff]  ;;  %12701 = vst [vmem:[#allocation265_spill] sm:$0xff] %v10495_v62  ;;  %12702 = vst [vmem:[#allocation266_spill] sm:$0xff] %v10499_v41  ;;  %v10504_v61 = vcombine.high %v176_v32, %v180_v4  ;;  %v10511_v44 = vcombine.low %v176_v32, %v180_v4 }
 0x19f   :  { %v10501_v31 = vcombine.high %v175_v36, %v179_v45  ;;  %v10507_v17 = vcombine.low %v175_v36, %v179_v45 }
 0x1a0   :  { %3998 = vmatpush1.bf16.msra.mxu0 %v10471_v1  ;;  %4162 = vmatpush1.bf16.msra.mxu1 %v10475_v12  ;;  %12704 = vst [vmem:[#allocation268_spill] sm:$0xff] %v10504_v61  ;;  %v184_v12 = vld [vmem:[#allocation7 + $0x198] sm:$0xff]  ;;  %12706 = vst [vmem:[#allocation270_spill] sm:$0xff] %v10511_v44 }
 0x1a1   :  { %3999 = vmatprep.subr.bf16.mxu0 %v10477_v54  ;;  %4163 = vmatprep.subr.bf16.mxu1 %v10480_v46  ;;  %12703 = vst [vmem:[#allocation267_spill] sm:$0xff] %v10501_v31  ;;  %v183_v46 = vld [vmem:[#allocation7 + $0x190] sm:$0xff]  ;;  %v188_v1 = vld [vmem:[#allocation7 + $0x1b8] sm:$0xff]  ;;  %12705 = vst [vmem:[#allocation269_spill] sm:$0xff] %v10507_v17 }
 0x1a2   :  { %v187_v54 = vld [vmem:[#allocation7 + $0x1b0] sm:$0xff]  ;;  %v10516_v15 = vcombine.high %v184_v12, %v188_v1  ;;  %v10523_v4 = vcombine.low %v184_v12, %v188_v1 }
 0x1a3   :  { %v10513_v52 = vcombine.high %v183_v46, %v187_v54  ;;  %v10519_v45 = vcombine.low %v183_v46, %v187_v54 }
 0x1a4   :  { %4000 = vmatpush1.bf16.msra.mxu0 %v10483_v42  ;;  %4164 = vmatpush1.bf16.msra.mxu1 %v10487_v59  ;;  %12708 = vst [vmem:[#allocation272_spill] sm:$0xff] %v10516_v15  ;;  %v192_v59 = vld [vmem:[#allocation7 + $0x1d8] sm:$0xff]  ;;  %12710 = vst [vmem:[#allocation274_spill] sm:$0xff] %v10523_v4 }
 0x1a5   :  { %4001 = vmatprep.subr.bf16.mxu0 %v10489_v63  ;;  %4165 = vmatprep.subr.bf16.mxu1 %v10492_v35  ;;  %12707 = vst [vmem:[#allocation271_spill] sm:$0xff] %v10513_v52  ;;  %v191_v35 = vld [vmem:[#allocation7 + $0x1d0] sm:$0xff]  ;;  %v196_v42 = vld [vmem:[#allocation7 + $0x1f8] sm:$0xff]  ;;  %12709 = vst [vmem:[#allocation273_spill] sm:$0xff] %v10519_v45 }
 0x1a6   :  { %v195_v63 = vld [vmem:[#allocation7 + $0x1f0] sm:$0xff]  ;;  %v10528_v36 = vcombine.high %v192_v59, %v196_v42  ;;  %v10535_v1 = vcombine.low %v192_v59, %v196_v42 }
 0x1a7   :  { %v10525_v32 = vcombine.high %v191_v35, %v195_v63  ;;  %v10531_v54 = vcombine.low %v191_v35, %v195_v63 }
 0x1a8   :  { %4002 = vmatpush1.bf16.msra.mxu0 %v10495_v62  ;;  %4166 = vmatpush1.bf16.msra.mxu1 %v10499_v41  ;;  %12712 = vst [vmem:[#allocation276_spill] sm:$0xff] %v10528_v36  ;;  %v200_v41 = vld [vmem:[#allocation7 + $0x218] sm:$0xff]  ;;  %12714 = vst [vmem:[#allocation278_spill] sm:$0xff] %v10535_v1 }
 0x1a9   :  { %4003 = vmatprep.subr.bf16.mxu0 %v10501_v31  ;;  %4167 = vmatprep.subr.bf16.mxu1 %v10504_v61  ;;  %12711 = vst [vmem:[#allocation275_spill] sm:$0xff] %v10525_v32  ;;  %v199_v61 = vld [vmem:[#allocation7 + $0x210] sm:$0xff]  ;;  %v204_v62 = vld [vmem:[#allocation7 + $0x238] sm:$0xff]  ;;  %12713 = vst [vmem:[#allocation277_spill] sm:$0xff] %v10531_v54 }
 0x1aa   :  { %v203_v31 = vld [vmem:[#allocation7 + $0x230] sm:$0xff]  ;;  %v10540_v46 = vcombine.high %v200_v41, %v204_v62  ;;  %v10547_v42 = vcombine.low %v200_v41, %v204_v62 }
 0x1ab   :  { %v10537_v12 = vcombine.high %v199_v61, %v203_v31  ;;  %v10543_v63 = vcombine.low %v199_v61, %v203_v31 }
 0x1ac   :  { %4004 = vmatpush1.bf16.msra.mxu0 %v10507_v17  ;;  %4168 = vmatpush1.bf16.msra.mxu1 %v10511_v44  ;;  %12716 = vst [vmem:[#allocation280_spill] sm:$0xff] %v10540_v46  ;;  %v208_v44 = vld [vmem:[#allocation7 + $0x258] sm:$0xff]  ;;  %12718 = vst [vmem:[#allocation282_spill] sm:$0xff] %v10547_v42 }
 0x1ad   :  { %4005 = vmatprep.subr.bf16.mxu0 %v10513_v52  ;;  %4169 = vmatprep.subr.bf16.mxu1 %v10516_v15  ;;  %12715 = vst [vmem:[#allocation279_spill] sm:$0xff] %v10537_v12  ;;  %v207_v15 = vld [vmem:[#allocation7 + $0x250] sm:$0xff]  ;;  %v212_v17 = vld [vmem:[#allocation7 + $0x278] sm:$0xff]  ;;  %12717 = vst [vmem:[#allocation281_spill] sm:$0xff] %v10543_v63 }
 0x1ae   :  { %v211_v52 = vld [vmem:[#allocation7 + $0x270] sm:$0xff]  ;;  %v10552_v35 = vcombine.high %v208_v44, %v212_v17  ;;  %v10559_v62 = vcombine.low %v208_v44, %v212_v17 }
 0x1af   :  { %v10549_v59 = vcombine.high %v207_v15, %v211_v52  ;;  %v10555_v31 = vcombine.low %v207_v15, %v211_v52 }
 0x1b0   :  { %4006 = vmatpush1.bf16.msra.mxu0 %v10519_v45  ;;  %4170 = vmatpush1.bf16.msra.mxu1 %v10523_v4  ;;  %12720 = vst [vmem:[#allocation284_spill] sm:$0xff] %v10552_v35  ;;  %v216_v4 = vld [vmem:[#allocation7 + $0x298] sm:$0xff]  ;;  %12722 = vst [vmem:[#allocation286_spill] sm:$0xff] %v10559_v62 }
 0x1b1   :  { %4007 = vmatprep.subr.bf16.mxu0 %v10525_v32  ;;  %4171 = vmatprep.subr.bf16.mxu1 %v10528_v36  ;;  %12719 = vst [vmem:[#allocation283_spill] sm:$0xff] %v10549_v59  ;;  %v215_v36 = vld [vmem:[#allocation7 + $0x290] sm:$0xff]  ;;  %v220_v45 = vld [vmem:[#allocation7 + $0x2b8] sm:$0xff]  ;;  %12721 = vst [vmem:[#allocation285_spill] sm:$0xff] %v10555_v31 }
 0x1b2   :  { %v219_v32 = vld [vmem:[#allocation7 + $0x2b0] sm:$0xff]  ;;  %v10564_v61 = vcombine.high %v216_v4, %v220_v45  ;;  %v10571_v17 = vcombine.low %v216_v4, %v220_v45 }
 0x1b3   :  { %v10561_v41 = vcombine.high %v215_v36, %v219_v32  ;;  %v10567_v52 = vcombine.low %v215_v36, %v219_v32 }
 0x1b4   :  { %4008 = vmatpush1.bf16.msra.mxu0 %v10531_v54  ;;  %4172 = vmatpush1.bf16.msra.mxu1 %v10535_v1  ;;  %12724 = vst [vmem:[#allocation288_spill] sm:$0xff] %v10564_v61  ;;  %v224_v1 = vld [vmem:[#allocation7 + $0x2d8] sm:$0xff]  ;;  %12726 = vst [vmem:[#allocation290_spill] sm:$0xff] %v10571_v17 }
 0x1b5   :  { %4009 = vmatprep.subr.bf16.mxu0 %v10537_v12  ;;  %4173 = vmatprep.subr.bf16.mxu1 %v10540_v46  ;;  %12723 = vst [vmem:[#allocation287_spill] sm:$0xff] %v10561_v41  ;;  %v223_v46 = vld [vmem:[#allocation7 + $0x2d0] sm:$0xff]  ;;  %v228_v54 = vld [vmem:[#allocation7 + $0x2f8] sm:$0xff]  ;;  %12725 = vst [vmem:[#allocation289_spill] sm:$0xff] %v10567_v52 }
 0x1b6   :  { %v227_v12 = vld [vmem:[#allocation7 + $0x2f0] sm:$0xff]  ;;  %v10576_v15 = vcombine.high %v224_v1, %v228_v54  ;;  %v10583_v45 = vcombine.low %v224_v1, %v228_v54 }
 0x1b7   :  { %v10573_v44 = vcombine.high %v223_v46, %v227_v12  ;;  %v10579_v32 = vcombine.low %v223_v46, %v227_v12 }
 0x1b8   :  { %4010 = vmatpush1.bf16.msra.mxu0 %v10543_v63  ;;  %4174 = vmatpush1.bf16.msra.mxu1 %v10547_v42  ;;  %12728 = vst [vmem:[#allocation292_spill] sm:$0xff] %v10576_v15  ;;  %v232_v42 = vld [vmem:[#allocation7 + $0x318] sm:$0xff]  ;;  %12730 = vst [vmem:[#allocation294_spill] sm:$0xff] %v10583_v45 }
 0x1b9   :  { %4011 = vmatprep.subr.bf16.mxu0 %v10549_v59  ;;  %4175 = vmatprep.subr.bf16.mxu1 %v10552_v35  ;;  %12727 = vst [vmem:[#allocation291_spill] sm:$0xff] %v10573_v44  ;;  %v231_v35 = vld [vmem:[#allocation7 + $0x310] sm:$0xff]  ;;  %v236_v63 = vld [vmem:[#allocation7 + $0x338] sm:$0xff]  ;;  %12729 = vst [vmem:[#allocation293_spill] sm:$0xff] %v10579_v32 }
 0x1ba   :  { %v235_v59 = vld [vmem:[#allocation7 + $0x330] sm:$0xff]  ;;  %v10588_v36 = vcombine.high %v232_v42, %v236_v63  ;;  %v10595_v54 = vcombine.low %v232_v42, %v236_v63 }
 0x1bb   :  { %v10585_v4 = vcombine.high %v231_v35, %v235_v59  ;;  %v10591_v12 = vcombine.low %v231_v35, %v235_v59 }
 0x1bc   :  { %4012 = vmatpush1.bf16.msra.mxu0 %v10555_v31  ;;  %4176 = vmatpush1.bf16.msra.mxu1 %v10559_v62  ;;  %12732 = vst [vmem:[#allocation296_spill] sm:$0xff] %v10588_v36  ;;  %v240_v62 = vld [vmem:[#allocation7 + $0x358] sm:$0xff]  ;;  %12734 = vst [vmem:[#allocation298_spill] sm:$0xff] %v10595_v54 }
 0x1bd   :  { %4013 = vmatprep.subr.bf16.mxu0 %v10561_v41  ;;  %4177 = vmatprep.subr.bf16.mxu1 %v10564_v61  ;;  %12731 = vst [vmem:[#allocation295_spill] sm:$0xff] %v10585_v4  ;;  %v239_v61 = vld [vmem:[#allocation7 + $0x350] sm:$0xff]  ;;  %v244_v31 = vld [vmem:[#allocation7 + $0x378] sm:$0xff]  ;;  %12733 = vst [vmem:[#allocation297_spill] sm:$0xff] %v10591_v12 }
 0x1be   :  { %v243_v41 = vld [vmem:[#allocation7 + $0x370] sm:$0xff]  ;;  %v10600_v46 = vcombine.high %v240_v62, %v244_v31  ;;  %v10607_v63 = vcombine.low %v240_v62, %v244_v31 }
 0x1bf   :  { %v10597_v1 = vcombine.high %v239_v61, %v243_v41  ;;  %v10603_v59 = vcombine.low %v239_v61, %v243_v41 }
 0x1c0   :  { %4014 = vmatpush1.bf16.msra.mxu0 %v10567_v52  ;;  %4178 = vmatpush1.bf16.msra.mxu1 %v10571_v17  ;;  %12736 = vst [vmem:[#allocation300_spill] sm:$0xff] %v10600_v46  ;;  %v248_v17 = vld [vmem:[#allocation7 + $0x398] sm:$0xff]  ;;  %12738 = vst [vmem:[#allocation302_spill] sm:$0xff] %v10607_v63 }
 0x1c1   :  { %4015 = vmatprep.subr.bf16.mxu0 %v10573_v44  ;;  %4179 = vmatprep.subr.bf16.mxu1 %v10576_v15  ;;  %12735 = vst [vmem:[#allocation299_spill] sm:$0xff] %v10597_v1  ;;  %v247_v15 = vld [vmem:[#allocation7 + $0x390] sm:$0xff]  ;;  %v252_v52 = vld [vmem:[#allocation7 + $0x3b8] sm:$0xff]  ;;  %12737 = vst [vmem:[#allocation301_spill] sm:$0xff] %v10603_v59 }
 0x1c2   :  { %v251_v44 = vld [vmem:[#allocation7 + $0x3b0] sm:$0xff]  ;;  %v10612_v35 = vcombine.high %v248_v17, %v252_v52  ;;  %v10619_v31 = vcombine.low %v248_v17, %v252_v52 }
 0x1c3   :  { %v10609_v42 = vcombine.high %v247_v15, %v251_v44  ;;  %v10615_v41 = vcombine.low %v247_v15, %v251_v44 }
 0x1c4   :  { %4016 = vmatpush1.bf16.msra.mxu0 %v10579_v32  ;;  %4180 = vmatpush1.bf16.msra.mxu1 %v10583_v45  ;;  %12740 = vst [vmem:[#allocation304_spill] sm:$0xff] %v10612_v35  ;;  %v256_v45 = vld [vmem:[#allocation7 + $0x3d8] sm:$0xff]  ;;  %12742 = vst [vmem:[#allocation306_spill] sm:$0xff] %v10619_v31 }
 0x1c5   :  { %4017 = vmatprep.subr.bf16.mxu0 %v10585_v4  ;;  %4181 = vmatprep.subr.bf16.mxu1 %v10588_v36  ;;  %12739 = vst [vmem:[#allocation303_spill] sm:$0xff] %v10609_v42  ;;  %v255_v36 = vld [vmem:[#allocation7 + $0x3d0] sm:$0xff]  ;;  %v260_v32 = vld [vmem:[#allocation7 + $0x3f8] sm:$0xff]  ;;  %12741 = vst [vmem:[#allocation305_spill] sm:$0xff] %v10615_v41 }
 0x1c6   :  { %v259_v4 = vld [vmem:[#allocation7 + $0x3f0] sm:$0xff]  ;;  %v10624_v61 = vcombine.high %v256_v45, %v260_v32  ;;  %v10631_v52 = vcombine.low %v256_v45, %v260_v32 }
 0x1c7   :  { %v10621_v62 = vcombine.high %v255_v36, %v259_v4  ;;  %v10627_v44 = vcombine.low %v255_v36, %v259_v4 }
 0x1c8   :  { %4018 = vmatpush1.bf16.msra.mxu0 %v10591_v12  ;;  %4182 = vmatpush1.bf16.msra.mxu1 %v10595_v54  ;;  %12744 = vst [vmem:[#allocation308_spill] sm:$0xff] %v10624_v61  ;;  %v264_v54 = vld [vmem:[#allocation7 + $0x418] sm:$0xff]  ;;  %12746 = vst [vmem:[#allocation310_spill] sm:$0xff] %v10631_v52 }
 0x1c9   :  { %4019 = vmatprep.subr.bf16.mxu0 %v10597_v1  ;;  %4183 = vmatprep.subr.bf16.mxu1 %v10600_v46  ;;  %12743 = vst [vmem:[#allocation307_spill] sm:$0xff] %v10621_v62  ;;  %v263_v46 = vld [vmem:[#allocation7 + $0x410] sm:$0xff]  ;;  %v268_v12 = vld [vmem:[#allocation7 + $0x438] sm:$0xff]  ;;  %12745 = vst [vmem:[#allocation309_spill] sm:$0xff] %v10627_v44 }
 0x1ca   :  { %v267_v1 = vld [vmem:[#allocation7 + $0x430] sm:$0xff]  ;;  %v10636_v15 = vcombine.high %v264_v54, %v268_v12  ;;  %v10643_v32 = vcombine.low %v264_v54, %v268_v12 }
 0x1cb   :  { %v10633_v17 = vcombine.high %v263_v46, %v267_v1  ;;  %v10639_v4 = vcombine.low %v263_v46, %v267_v1 }
 0x1cc   :  { %4020 = vmatpush1.bf16.msra.mxu0 %v10603_v59  ;;  %4184 = vmatpush1.bf16.msra.mxu1 %v10607_v63  ;;  %12748 = vst [vmem:[#allocation312_spill] sm:$0xff] %v10636_v15  ;;  %v272_v63 = vld [vmem:[#allocation7 + $0x458] sm:$0xff]  ;;  %12750 = vst [vmem:[#allocation314_spill] sm:$0xff] %v10643_v32 }
 0x1cd   :  { %4021 = vmatprep.subr.bf16.mxu0 %v10609_v42  ;;  %4185 = vmatprep.subr.bf16.mxu1 %v10612_v35  ;;  %12747 = vst [vmem:[#allocation311_spill] sm:$0xff] %v10633_v17  ;;  %v271_v35 = vld [vmem:[#allocation7 + $0x450] sm:$0xff]  ;;  %v276_v59 = vld [vmem:[#allocation7 + $0x478] sm:$0xff]  ;;  %12749 = vst [vmem:[#allocation313_spill] sm:$0xff] %v10639_v4 }
 0x1ce   :  { %v275_v42 = vld [vmem:[#allocation7 + $0x470] sm:$0xff]  ;;  %v10648_v36 = vcombine.high %v272_v63, %v276_v59  ;;  %v10657_v12 = vcombine.low %v272_v63, %v276_v59 }
 0x1cf   :  { %v10645_v45 = vcombine.high %v271_v35, %v275_v42  ;;  %v10653_v1 = vcombine.low %v271_v35, %v275_v42 }
 0x1d0   :  { %4022 = vmatpush1.bf16.msra.mxu0 %v10615_v41  ;;  %4186 = vmatpush1.bf16.msra.mxu1 %v10619_v31  ;;  %12752 = vst [vmem:[#allocation316_spill] sm:$0xff] %v10648_v36  ;;  %v280_v31 = vld [vmem:[#allocation7 + $0x498] sm:$0xff]  ;;  %12754 = vst [vmem:[#allocation318_spill] sm:$0xff] %v10657_v12 }
 0x1d1   :  { %4023 = vmatprep.subr.bf16.mxu0 %v10621_v62  ;;  %4187 = vmatprep.subr.bf16.mxu1 %v10624_v61  ;;  %12751 = vst [vmem:[#allocation315_spill] sm:$0xff] %v10645_v45  ;;  %v279_v61 = vld [vmem:[#allocation7 + $0x490] sm:$0xff]  ;;  %12753 = vst [vmem:[#allocation317_spill] sm:$0xff] %v10653_v1 }
 0x1d2   :  { %v283_v62 = vld [vmem:[#allocation7 + $0x4b0] sm:$0xff] }
 0x1d3   :  { %v10659_v54 = vcombine.high %v279_v61, %v283_v62  ;;  %v10667_v42 = vcombine.low %v279_v61, %v283_v62 }
 0x1d4   :  { %4024 = vmatpush1.bf16.msra.mxu0 %v10627_v44  ;;  %4188 = vmatpush1.bf16.msra.mxu1 %v10631_v52  ;;  %v284_v44 = vld [vmem:[#allocation7 + $0x4b8] sm:$0xff]  ;;  %v587_v52 = vld [vmem:[#allocation7 + $0xe30] sm:$0xff] }
 0x1d5   :  { %4034 = vmatprep.subr.bf16.mxu0 %v10633_v17  ;;  %4198 = vmatprep.subr.bf16.mxu1 %v10636_v15  ;;  %12755 = vst [vmem:[#allocation319_spill] sm:$0xff] %v10659_v54  ;;  %v10662_v46 = vcombine.high %v280_v31, %v284_v44  ;;  %v287_v15 = vld [vmem:[#allocation7 + $0x4d0] sm:$0xff]  ;;  %12757 = vst [vmem:[#allocation321_spill] sm:$0xff] %v10667_v42  ;;  %v10671_v59 = vcombine.low %v280_v31, %v284_v44 }
 0x1d6   :  { %v291_v17 = vld [vmem:[#allocation7 + $0x4f0] sm:$0xff] }
 0x1d7   :  { %4026 = vmatmul.mubr.bf16.vlgmr.msra.gmra.mrb[4].mxu0 %v9822_v30  ;;  %4190 = vmatmul.mubr.bf16.vlgmr.msra.gmra.mrb[4].mxu1 %v9822_v30  ;;  %12756 = vst [vmem:[#allocation320_spill] sm:$0xff] %v10662_v46  ;;  %v292_v30 = vld [vmem:[#allocation7 + $0x4f8] sm:$0xff]  ;;  %12758 = vst [vmem:[#allocation322_spill] sm:$0xff] %v10671_v59  ;;  %v10673_v63 = vcombine.high %v287_v15, %v291_v17  ;;  %v10679_v62 = vcombine.low %v287_v15, %v291_v17 }
 0x1d8   :  { %4035 = vmatpush1.bf16.msra.mxu0 %v10639_v4  ;;  %4199 = vmatpush1.bf16.msra.mxu1 %v10643_v32  ;;  %v288_v4 = vld [vmem:[#allocation7 + $0x4d8] sm:$0xff] }
 0x1d9   :  { %4036 = vmatprep.subr.bf16.mxu0 %v10645_v45  ;;  %4200 = vmatprep.subr.bf16.mxu1 %v10648_v36  ;;  %12759 = vst [vmem:[#allocation323_spill] sm:$0xff] %v10673_v63  ;;  %v10676_v35 = vcombine.high %v288_v4, %v292_v30  ;;  %v295_v36 = vld [vmem:[#allocation7 + $0x510] sm:$0xff]  ;;  %v296_v32 = vld [vmem:[#allocation7 + $0x518] sm:$0xff]  ;;  %12761 = vst [vmem:[#allocation325_spill] sm:$0xff] %v10679_v62  ;;  %v10683_v31 = vcombine.low %v288_v4, %v292_v30 }
 0x1da   :  { %4066 = vmatprep.mubr.bf16.mxu0 %v9838_v0  ;;  %4230 = vmatprep.mubr.bf16.mxu1 %v9838_v0  ;;  %v299_v45 = vld [vmem:[#allocation7 + $0x530] sm:$0xff]  ;;  %v300_v0 = vld [vmem:[#allocation7 + $0x538] sm:$0xff] }
 0x1db   :  { %12760 = vst [vmem:[#allocation324_spill] sm:$0xff] %v10676_v35  ;;  %12762 = vst [vmem:[#allocation326_spill] sm:$0xff] %v10683_v31  ;;  %v10685_v61 = vcombine.high %v295_v36, %v299_v45  ;;  %v10688_v44 = vcombine.high %v296_v32, %v300_v0  ;;  %v10691_v17 = vcombine.low %v295_v36, %v299_v45 }
 0x1dc   :  { %4037 = vmatpush1.bf16.msra.mxu0 %v10653_v1  ;;  %4201 = vmatpush1.bf16.msra.mxu1 %v10657_v12  ;;  %v304_v12 = vld [vmem:[#allocation7 + $0x558] sm:$0xff]  ;;  %v10695_v15 = vcombine.low %v296_v32, %v300_v0 }
 0x1dd   :  { %4038 = vmatprep.subr.bf16.mxu0 %v10659_v54  ;;  %4202 = vmatprep.subr.bf16.mxu1 %v10662_v46  ;;  %12763 = vst [vmem:[#allocation327_spill] sm:$0xff] %v10685_v61  ;;  %12764 = vst [vmem:[#allocation328_spill] sm:$0xff] %v10688_v44  ;;  %v303_v46 = vld [vmem:[#allocation7 + $0x550] sm:$0xff]  ;;  %v308_v1 = vld [vmem:[#allocation7 + $0x578] sm:$0xff] }
 0x1de   :  { %v307_v54 = vld [vmem:[#allocation7 + $0x570] sm:$0xff]  ;;  %12765 = vst [vmem:[#allocation329_spill] sm:$0xff] %v10691_v17  ;;  %12766 = vst [vmem:[#allocation330_spill] sm:$0xff] %v10695_v15  ;;  %v10700_v30 = vcombine.high %v304_v12, %v308_v1  ;;  %v10707_v32 = vcombine.low %v304_v12, %v308_v1 }
 0x1df   :  { %v10697_v4 = vcombine.high %v303_v46, %v307_v54  ;;  %v10703_v45 = vcombine.low %v303_v46, %v307_v54 }
 0x1e0   :  { %4039 = vmatpush1.bf16.msra.mxu0 %v10667_v42  ;;  %4203 = vmatpush1.bf16.msra.mxu1 %v10671_v59  ;;  %12768 = vst [vmem:[#allocation332_spill] sm:$0xff] %v10700_v30  ;;  %v312_v59 = vld [vmem:[#allocation7 + $0x598] sm:$0xff]  ;;  %12770 = vst [vmem:[#allocation334_spill] sm:$0xff] %v10707_v32 }
 0x1e1   :  { %4040 = vmatprep.subr.bf16.mxu0 %v10673_v63  ;;  %4204 = vmatprep.subr.bf16.mxu1 %v10676_v35  ;;  %12767 = vst [vmem:[#allocation331_spill] sm:$0xff] %v10697_v4  ;;  %v311_v35 = vld [vmem:[#allocation7 + $0x590] sm:$0xff]  ;;  %v316_v42 = vld [vmem:[#allocation7 + $0x5b8] sm:$0xff]  ;;  %12769 = vst [vmem:[#allocation333_spill] sm:$0xff] %v10703_v45 }
 0x1e2   :  { %v315_v63 = vld [vmem:[#allocation7 + $0x5b0] sm:$0xff]  ;;  %v10712_v0 = vcombine.high %v312_v59, %v316_v42  ;;  %v10719_v1 = vcombine.low %v312_v59, %v316_v42 }
 0x1e3   :  { %v10709_v36 = vcombine.high %v311_v35, %v315_v63  ;;  %v10715_v54 = vcombine.low %v311_v35, %v315_v63 }
 0x1e4   :  { %4041 = vmatpush1.bf16.msra.mxu0 %v10679_v62  ;;  %4205 = vmatpush1.bf16.msra.mxu1 %v10683_v31  ;;  %12772 = vst [vmem:[#allocation336_spill] sm:$0xff] %v10712_v0  ;;  %v320_v31 = vld [vmem:[#allocation7 + $0x5d8] sm:$0xff]  ;;  %12774 = vst [vmem:[#allocation338_spill] sm:$0xff] %v10719_v1 }
 0x1e5   :  { %4042 = vmatprep.subr.bf16.mxu0 %v10685_v61  ;;  %4206 = vmatprep.subr.bf16.mxu1 %v10688_v44  ;;  %12771 = vst [vmem:[#allocation335_spill] sm:$0xff] %v10709_v36  ;;  %v319_v44 = vld [vmem:[#allocation7 + $0x5d0] sm:$0xff]  ;;  %v324_v62 = vld [vmem:[#allocation7 + $0x5f8] sm:$0xff]  ;;  %12773 = vst [vmem:[#allocation337_spill] sm:$0xff] %v10715_v54 }
 0x1e6   :  { %v323_v61 = vld [vmem:[#allocation7 + $0x5f0] sm:$0xff]  ;;  %v10724_v46 = vcombine.high %v320_v31, %v324_v62  ;;  %v10731_v42 = vcombine.low %v320_v31, %v324_v62 }
 0x1e7   :  { %v10721_v12 = vcombine.high %v319_v44, %v323_v61  ;;  %v10727_v63 = vcombine.low %v319_v44, %v323_v61 }
 0x1e8   :  { %4043 = vmatpush1.bf16.msra.mxu0 %v10691_v17  ;;  %4207 = vmatpush1.bf16.msra.mxu1 %v10695_v15  ;;  %12776 = vst [vmem:[#allocation340_spill] sm:$0xff] %v10724_v46  ;;  %v328_v15 = vld [vmem:[#allocation7 + $0x618] sm:$0xff]  ;;  %12778 = vst [vmem:[#allocation342_spill] sm:$0xff] %v10731_v42 }
 0x1e9   :  { %4044 = vmatprep.subr.bf16.mxu0 %v10697_v4  ;;  %4208 = vmatprep.subr.bf16.mxu1 %v10700_v30  ;;  %12775 = vst [vmem:[#allocation339_spill] sm:$0xff] %v10721_v12  ;;  %v327_v30 = vld [vmem:[#allocation7 + $0x610] sm:$0xff]  ;;  %v332_v17 = vld [vmem:[#allocation7 + $0x638] sm:$0xff]  ;;  %12777 = vst [vmem:[#allocation341_spill] sm:$0xff] %v10727_v63 }
 0x1ea   :  { %v331_v4 = vld [vmem:[#allocation7 + $0x630] sm:$0xff]  ;;  %v10736_v35 = vcombine.high %v328_v15, %v332_v17  ;;  %v10743_v62 = vcombine.low %v328_v15, %v332_v17 }
 0x1eb   :  { %v10733_v59 = vcombine.high %v327_v30, %v331_v4  ;;  %v10739_v61 = vcombine.low %v327_v30, %v331_v4 }
 0x1ec   :  { %4045 = vmatpush1.bf16.msra.mxu0 %v10703_v45  ;;  %4209 = vmatpush1.bf16.msra.mxu1 %v10707_v32  ;;  %12780 = vst [vmem:[#allocation344_spill] sm:$0xff] %v10736_v35  ;;  %v336_v32 = vld [vmem:[#allocation7 + $0x658] sm:$0xff]  ;;  %12782 = vst [vmem:[#allocation346_spill] sm:$0xff] %v10743_v62 }
 0x1ed   :  { %4046 = vmatprep.subr.bf16.mxu0 %v10709_v36  ;;  %4210 = vmatprep.subr.bf16.mxu1 %v10712_v0  ;;  %12779 = vst [vmem:[#allocation343_spill] sm:$0xff] %v10733_v59  ;;  %v335_v0 = vld [vmem:[#allocation7 + $0x650] sm:$0xff]  ;;  %v340_v45 = vld [vmem:[#allocation7 + $0x678] sm:$0xff]  ;;  %12781 = vst [vmem:[#allocation345_spill] sm:$0xff] %v10739_v61 }
 0x1ee   :  { %v339_v36 = vld [vmem:[#allocation7 + $0x670] sm:$0xff]  ;;  %v10748_v44 = vcombine.high %v336_v32, %v340_v45  ;;  %v10755_v17 = vcombine.low %v336_v32, %v340_v45 }
 0x1ef   :  { %v10745_v31 = vcombine.high %v335_v0, %v339_v36  ;;  %v10751_v4 = vcombine.low %v335_v0, %v339_v36 }
 0x1f0   :  { %4047 = vmatpush1.bf16.msra.mxu0 %v10715_v54  ;;  %4211 = vmatpush1.bf16.msra.mxu1 %v10719_v1  ;;  %12784 = vst [vmem:[#allocation348_spill] sm:$0xff] %v10748_v44  ;;  %v344_v1 = vld [vmem:[#allocation7 + $0x698] sm:$0xff]  ;;  %12786 = vst [vmem:[#allocation350_spill] sm:$0xff] %v10755_v17 }
 0x1f1   :  { %4048 = vmatprep.subr.bf16.mxu0 %v10721_v12  ;;  %4212 = vmatprep.subr.bf16.mxu1 %v10724_v46  ;;  %12783 = vst [vmem:[#allocation347_spill] sm:$0xff] %v10745_v31  ;;  %v343_v46 = vld [vmem:[#allocation7 + $0x690] sm:$0xff]  ;;  %v348_v54 = vld [vmem:[#allocation7 + $0x6b8] sm:$0xff]  ;;  %12785 = vst [vmem:[#allocation349_spill] sm:$0xff] %v10751_v4 }
 0x1f2   :  { %v347_v12 = vld [vmem:[#allocation7 + $0x6b0] sm:$0xff]  ;;  %v10760_v30 = vcombine.high %v344_v1, %v348_v54  ;;  %v10767_v45 = vcombine.low %v344_v1, %v348_v54 }
 0x1f3   :  { %v10757_v15 = vcombine.high %v343_v46, %v347_v12  ;;  %v10763_v36 = vcombine.low %v343_v46, %v347_v12 }
 0x1f4   :  { %4049 = vmatpush1.bf16.msra.mxu0 %v10727_v63  ;;  %4213 = vmatpush1.bf16.msra.mxu1 %v10731_v42  ;;  %12788 = vst [vmem:[#allocation352_spill] sm:$0xff] %v10760_v30  ;;  %v352_v42 = vld [vmem:[#allocation7 + $0x6d8] sm:$0xff]  ;;  %12790 = vst [vmem:[#allocation354_spill] sm:$0xff] %v10767_v45 }
 0x1f5   :  { %4050 = vmatprep.subr.bf16.mxu0 %v10733_v59  ;;  %4214 = vmatprep.subr.bf16.mxu1 %v10736_v35  ;;  %12787 = vst [vmem:[#allocation351_spill] sm:$0xff] %v10757_v15  ;;  %v351_v35 = vld [vmem:[#allocation7 + $0x6d0] sm:$0xff]  ;;  %v356_v63 = vld [vmem:[#allocation7 + $0x6f8] sm:$0xff]  ;;  %12789 = vst [vmem:[#allocation353_spill] sm:$0xff] %v10763_v36 }
 0x1f6   :  { %v355_v59 = vld [vmem:[#allocation7 + $0x6f0] sm:$0xff]  ;;  %v10772_v0 = vcombine.high %v352_v42, %v356_v63  ;;  %v10779_v54 = vcombine.low %v352_v42, %v356_v63 }
 0x1f7   :  { %v10769_v32 = vcombine.high %v351_v35, %v355_v59  ;;  %v10775_v12 = vcombine.low %v351_v35, %v355_v59 }
 0x1f8   :  { %4051 = vmatpush1.bf16.msra.mxu0 %v10739_v61  ;;  %4215 = vmatpush1.bf16.msra.mxu1 %v10743_v62  ;;  %12792 = vst [vmem:[#allocation356_spill] sm:$0xff] %v10772_v0  ;;  %v360_v62 = vld [vmem:[#allocation7 + $0x718] sm:$0xff]  ;;  %12794 = vst [vmem:[#allocation358_spill] sm:$0xff] %v10779_v54 }
 0x1f9   :  { %4052 = vmatprep.subr.bf16.mxu0 %v10745_v31  ;;  %4216 = vmatprep.subr.bf16.mxu1 %v10748_v44  ;;  %12791 = vst [vmem:[#allocation355_spill] sm:$0xff] %v10769_v32  ;;  %v359_v44 = vld [vmem:[#allocation7 + $0x710] sm:$0xff]  ;;  %v364_v61 = vld [vmem:[#allocation7 + $0x738] sm:$0xff]  ;;  %12793 = vst [vmem:[#allocation357_spill] sm:$0xff] %v10775_v12 }
 0x1fa   :  { %v363_v31 = vld [vmem:[#allocation7 + $0x730] sm:$0xff]  ;;  %v10784_v46 = vcombine.high %v360_v62, %v364_v61  ;;  %v10791_v63 = vcombine.low %v360_v62, %v364_v61 }
 0x1fb   :  { %v10781_v1 = vcombine.high %v359_v44, %v363_v31  ;;  %v10787_v59 = vcombine.low %v359_v44, %v363_v31 }
 0x1fc   :  { %4053 = vmatpush1.bf16.msra.mxu0 %v10751_v4  ;;  %4217 = vmatpush1.bf16.msra.mxu1 %v10755_v17  ;;  %12796 = vst [vmem:[#allocation360_spill] sm:$0xff] %v10784_v46  ;;  %v368_v17 = vld [vmem:[#allocation7 + $0x758] sm:$0xff]  ;;  %12798 = vst [vmem:[#allocation362_spill] sm:$0xff] %v10791_v63 }
 0x1fd   :  { %4054 = vmatprep.subr.bf16.mxu0 %v10757_v15  ;;  %4218 = vmatprep.subr.bf16.mxu1 %v10760_v30  ;;  %12795 = vst [vmem:[#allocation359_spill] sm:$0xff] %v10781_v1  ;;  %v367_v30 = vld [vmem:[#allocation7 + $0x750] sm:$0xff]  ;;  %v372_v4 = vld [vmem:[#allocation7 + $0x778] sm:$0xff]  ;;  %12797 = vst [vmem:[#allocation361_spill] sm:$0xff] %v10787_v59 }
 0x1fe   :  { %v371_v15 = vld [vmem:[#allocation7 + $0x770] sm:$0xff]  ;;  %v10796_v35 = vcombine.high %v368_v17, %v372_v4  ;;  %v10803_v61 = vcombine.low %v368_v17, %v372_v4 }
 0x1ff   :  { %v10793_v42 = vcombine.high %v367_v30, %v371_v15  ;;  %v10799_v31 = vcombine.low %v367_v30, %v371_v15 }
 0x200   :  { %4055 = vmatpush1.bf16.msra.mxu0 %v10763_v36  ;;  %4219 = vmatpush1.bf16.msra.mxu1 %v10767_v45  ;;  %12800 = vst [vmem:[#allocation364_spill] sm:$0xff] %v10796_v35  ;;  %v376_v45 = vld [vmem:[#allocation7 + $0x798] sm:$0xff]  ;;  %12802 = vst [vmem:[#allocation366_spill] sm:$0xff] %v10803_v61 }
 0x201   :  { %4056 = vmatprep.subr.bf16.mxu0 %v10769_v32  ;;  %4220 = vmatprep.subr.bf16.mxu1 %v10772_v0  ;;  %12799 = vst [vmem:[#allocation363_spill] sm:$0xff] %v10793_v42  ;;  %v375_v0 = vld [vmem:[#allocation7 + $0x790] sm:$0xff]  ;;  %v380_v36 = vld [vmem:[#allocation7 + $0x7b8] sm:$0xff]  ;;  %12801 = vst [vmem:[#allocation365_spill] sm:$0xff] %v10799_v31 }
 0x202   :  { %v379_v32 = vld [vmem:[#allocation7 + $0x7b0] sm:$0xff]  ;;  %v10808_v44 = vcombine.high %v376_v45, %v380_v36  ;;  %v10815_v4 = vcombine.low %v376_v45, %v380_v36 }
 0x203   :  { %v10805_v62 = vcombine.high %v375_v0, %v379_v32  ;;  %v10811_v15 = vcombine.low %v375_v0, %v379_v32 }
 0x204   :  { %4057 = vmatpush1.bf16.msra.mxu0 %v10775_v12  ;;  %4221 = vmatpush1.bf16.msra.mxu1 %v10779_v54  ;;  %12804 = vst [vmem:[#allocation368_spill] sm:$0xff] %v10808_v44  ;;  %v384_v54 = vld [vmem:[#allocation7 + $0x7d8] sm:$0xff]  ;;  %12806 = vst [vmem:[#allocation370_spill] sm:$0xff] %v10815_v4 }
 0x205   :  { %4058 = vmatprep.subr.bf16.mxu0 %v10781_v1  ;;  %4222 = vmatprep.subr.bf16.mxu1 %v10784_v46  ;;  %12803 = vst [vmem:[#allocation367_spill] sm:$0xff] %v10805_v62  ;;  %v383_v46 = vld [vmem:[#allocation7 + $0x7d0] sm:$0xff]  ;;  %v388_v12 = vld [vmem:[#allocation7 + $0x7f8] sm:$0xff]  ;;  %12805 = vst [vmem:[#allocation369_spill] sm:$0xff] %v10811_v15 }
 0x206   :  { %v387_v1 = vld [vmem:[#allocation7 + $0x7f0] sm:$0xff]  ;;  %v10820_v30 = vcombine.high %v384_v54, %v388_v12  ;;  %v10827_v36 = vcombine.low %v384_v54, %v388_v12 }
 0x207   :  { %v10817_v17 = vcombine.high %v383_v46, %v387_v1  ;;  %v10823_v32 = vcombine.low %v383_v46, %v387_v1 }
 0x208   :  { %4059 = vmatpush1.bf16.msra.mxu0 %v10787_v59  ;;  %4223 = vmatpush1.bf16.msra.mxu1 %v10791_v63  ;;  %12808 = vst [vmem:[#allocation372_spill] sm:$0xff] %v10820_v30  ;;  %v392_v63 = vld [vmem:[#allocation7 + $0x818] sm:$0xff]  ;;  %12810 = vst [vmem:[#allocation374_spill] sm:$0xff] %v10827_v36 }
 0x209   :  { %4060 = vmatprep.subr.bf16.mxu0 %v10793_v42  ;;  %4224 = vmatprep.subr.bf16.mxu1 %v10796_v35  ;;  %12807 = vst [vmem:[#allocation371_spill] sm:$0xff] %v10817_v17  ;;  %v391_v35 = vld [vmem:[#allocation7 + $0x810] sm:$0xff]  ;;  %v396_v59 = vld [vmem:[#allocation7 + $0x838] sm:$0xff]  ;;  %12809 = vst [vmem:[#allocation373_spill] sm:$0xff] %v10823_v32 }
 0x20a   :  { %v395_v42 = vld [vmem:[#allocation7 + $0x830] sm:$0xff]  ;;  %v10832_v0 = vcombine.high %v392_v63, %v396_v59  ;;  %v10839_v12 = vcombine.low %v392_v63, %v396_v59 }
 0x20b   :  { %v10829_v45 = vcombine.high %v391_v35, %v395_v42  ;;  %v10835_v1 = vcombine.low %v391_v35, %v395_v42 }
 0x20c   :  { %4061 = vmatpush1.bf16.msra.mxu0 %v10799_v31  ;;  %4225 = vmatpush1.bf16.msra.mxu1 %v10803_v61  ;;  %12812 = vst [vmem:[#allocation376_spill] sm:$0xff] %v10832_v0  ;;  %v400_v61 = vld [vmem:[#allocation7 + $0x858] sm:$0xff]  ;;  %12814 = vst [vmem:[#allocation378_spill] sm:$0xff] %v10839_v12 }
 0x20d   :  { %4062 = vmatprep.subr.bf16.mxu0 %v10805_v62  ;;  %4226 = vmatprep.subr.bf16.mxu1 %v10808_v44  ;;  %12811 = vst [vmem:[#allocation375_spill] sm:$0xff] %v10829_v45  ;;  %v399_v44 = vld [vmem:[#allocation7 + $0x850] sm:$0xff]  ;;  %v404_v31 = vld [vmem:[#allocation7 + $0x878] sm:$0xff]  ;;  %12813 = vst [vmem:[#allocation377_spill] sm:$0xff] %v10835_v1 }
 0x20e   :  { %v403_v62 = vld [vmem:[#allocation7 + $0x870] sm:$0xff]  ;;  %v10844_v46 = vcombine.high %v400_v61, %v404_v31  ;;  %v10853_v59 = vcombine.low %v400_v61, %v404_v31 }
 0x20f   :  { %v10841_v54 = vcombine.high %v399_v44, %v403_v62  ;;  %v10849_v42 = vcombine.low %v399_v44, %v403_v62 }
 0x210   :  { %4063 = vmatpush1.bf16.msra.mxu0 %v10811_v15  ;;  %4227 = vmatpush1.bf16.msra.mxu1 %v10815_v4  ;;  %12816 = vst [vmem:[#allocation380_spill] sm:$0xff] %v10844_v46  ;;  %v408_v4 = vld [vmem:[#allocation7 + $0x898] sm:$0xff]  ;;  %12818 = vst [vmem:[#allocation382_spill] sm:$0xff] %v10853_v59 }
 0x211   :  { %4064 = vmatprep.subr.bf16.mxu0 %v10817_v17  ;;  %4228 = vmatprep.subr.bf16.mxu1 %v10820_v30  ;;  %12815 = vst [vmem:[#allocation379_spill] sm:$0xff] %v10841_v54  ;;  %v407_v30 = vld [vmem:[#allocation7 + $0x890] sm:$0xff]  ;;  %12817 = vst [vmem:[#allocation381_spill] sm:$0xff] %v10849_v42 }
 0x212   :  { %v411_v17 = vld [vmem:[#allocation7 + $0x8b0] sm:$0xff] }
 0x213   :  { %v10855_v63 = vcombine.high %v407_v30, %v411_v17  ;;  %v10863_v62 = vcombine.low %v407_v30, %v411_v17 }
 0x214   :  { %4065 = vmatpush1.bf16.msra.mxu0 %v10823_v32  ;;  %4229 = vmatpush1.bf16.msra.mxu1 %v10827_v36  ;;  %v412_v32 = vld [vmem:[#allocation7 + $0x8b8] sm:$0xff] }
 0x215   :  { %4075 = vmatprep.subr.bf16.mxu0 %v10829_v45  ;;  %4239 = vmatprep.subr.bf16.mxu1 %v10832_v0  ;;  %12819 = vst [vmem:[#allocation383_spill] sm:$0xff] %v10855_v63  ;;  %v10858_v35 = vcombine.high %v408_v4, %v412_v32  ;;  %v415_v0 = vld [vmem:[#allocation7 + $0x8d0] sm:$0xff]  ;;  %12821 = vst [vmem:[#allocation385_spill] sm:$0xff] %v10863_v62  ;;  %v10867_v31 = vcombine.low %v408_v4, %v412_v32 }
 0x216   :  { %v419_v45 = vld [vmem:[#allocation7 + $0x8f0] sm:$0xff] }
 0x217   :  { %4067 = vmatmul.mubr.bf16.vlgmr.msra.gmra.mrb[4].mxu0 %v10033_v16  ;;  %4231 = vmatmul.mubr.bf16.vlgmr.msra.gmra.mrb[4].mxu1 %v10033_v16  ;;  %12820 = vst [vmem:[#allocation384_spill] sm:$0xff] %v10858_v35  ;;  %v420_v16 = vld [vmem:[#allocation7 + $0x8f8] sm:$0xff]  ;;  %12822 = vst [vmem:[#allocation386_spill] sm:$0xff] %v10867_v31  ;;  %v10869_v61 = vcombine.high %v415_v0, %v419_v45  ;;  %v10875_v17 = vcombine.low %v415_v0, %v419_v45 }
 0x218   :  { %4076 = vmatpush1.bf16.msra.mxu0 %v10835_v1  ;;  %4240 = vmatpush1.bf16.msra.mxu1 %v10839_v12  ;;  %v416_v1 = vld [vmem:[#allocation7 + $0x8d8] sm:$0xff] }
 0x219   :  { %4077 = vmatprep.subr.bf16.mxu0 %v10841_v54  ;;  %4241 = vmatprep.subr.bf16.mxu1 %v10844_v46  ;;  %12823 = vst [vmem:[#allocation387_spill] sm:$0xff] %v10869_v61  ;;  %v10872_v44 = vcombine.high %v416_v1, %v420_v16  ;;  %v423_v46 = vld [vmem:[#allocation7 + $0x910] sm:$0xff]  ;;  %v424_v12 = vld [vmem:[#allocation7 + $0x918] sm:$0xff]  ;;  %12825 = vst [vmem:[#allocation389_spill] sm:$0xff] %v10875_v17  ;;  %v10879_v4 = vcombine.low %v416_v1, %v420_v16 }
 0x21a   :  { %4107 = vmatprep.mubr.bf16.mxu0 %v10048_v51  ;;  %4271 = vmatprep.mubr.bf16.mxu1 %v10048_v51  ;;  %v427_v54 = vld [vmem:[#allocation7 + $0x930] sm:$0xff]  ;;  %v428_v51 = vld [vmem:[#allocation7 + $0x938] sm:$0xff] }
 0x21b   :  { %12824 = vst [vmem:[#allocation388_spill] sm:$0xff] %v10872_v44  ;;  %12826 = vst [vmem:[#allocation390_spill] sm:$0xff] %v10879_v4  ;;  %v10881_v30 = vcombine.high %v423_v46, %v427_v54  ;;  %v10884_v32 = vcombine.high %v424_v12, %v428_v51  ;;  %v10887_v45 = vcombine.low %v423_v46, %v427_v54 }
 0x21c   :  { %4078 = vmatpush1.bf16.msra.mxu0 %v10849_v42  ;;  %4242 = vmatpush1.bf16.msra.mxu1 %v10853_v59  ;;  %v432_v59 = vld [vmem:[#allocation7 + $0x958] sm:$0xff]  ;;  %v10891_v0 = vcombine.low %v424_v12, %v428_v51 }
 0x21d   :  { %4079 = vmatprep.subr.bf16.mxu0 %v10855_v63  ;;  %4243 = vmatprep.subr.bf16.mxu1 %v10858_v35  ;;  %12827 = vst [vmem:[#allocation391_spill] sm:$0xff] %v10881_v30  ;;  %12828 = vst [vmem:[#allocation392_spill] sm:$0xff] %v10884_v32  ;;  %v431_v35 = vld [vmem:[#allocation7 + $0x950] sm:$0xff]  ;;  %v436_v42 = vld [vmem:[#allocation7 + $0x978] sm:$0xff] }
 0x21e   :  { %v435_v63 = vld [vmem:[#allocation7 + $0x970] sm:$0xff]  ;;  %12829 = vst [vmem:[#allocation393_spill] sm:$0xff] %v10887_v45  ;;  %12830 = vst [vmem:[#allocation394_spill] sm:$0xff] %v10891_v0  ;;  %v10896_v16 = vcombine.high %v432_v59, %v436_v42  ;;  %v10903_v12 = vcombine.low %v432_v59, %v436_v42 }
 0x21f   :  { %v10893_v1 = vcombine.high %v431_v35, %v435_v63  ;;  %v10899_v54 = vcombine.low %v431_v35, %v435_v63 }
 0x220   :  { %4080 = vmatpush1.bf16.msra.mxu0 %v10863_v62  ;;  %4244 = vmatpush1.bf16.msra.mxu1 %v10867_v31  ;;  %12832 = vst [vmem:[#allocation396_spill] sm:$0xff] %v10896_v16  ;;  %v440_v31 = vld [vmem:[#allocation7 + $0x998] sm:$0xff]  ;;  %12834 = vst [vmem:[#allocation398_spill] sm:$0xff] %v10903_v12 }
 0x221   :  { %4081 = vmatprep.subr.bf16.mxu0 %v10869_v61  ;;  %4245 = vmatprep.subr.bf16.mxu1 %v10872_v44  ;;  %12831 = vst [vmem:[#allocation395_spill] sm:$0xff] %v10893_v1  ;;  %v439_v44 = vld [vmem:[#allocation7 + $0x990] sm:$0xff]  ;;  %v444_v62 = vld [vmem:[#allocation7 + $0x9b8] sm:$0xff]  ;;  %12833 = vst [vmem:[#allocation397_spill] sm:$0xff] %v10899_v54 }
 0x222   :  { %v443_v61 = vld [vmem:[#allocation7 + $0x9b0] sm:$0xff]  ;;  %v10908_v51 = vcombine.high %v440_v31, %v444_v62  ;;  %v10915_v42 = vcombine.low %v440_v31, %v444_v62 }
 0x223   :  { %v10905_v46 = vcombine.high %v439_v44, %v443_v61  ;;  %v10911_v63 = vcombine.low %v439_v44, %v443_v61 }
 0x224   :  { %4082 = vmatpush1.bf16.msra.mxu0 %v10875_v17  ;;  %4246 = vmatpush1.bf16.msra.mxu1 %v10879_v4  ;;  %12836 = vst [vmem:[#allocation400_spill] sm:$0xff] %v10908_v51  ;;  %v448_v4 = vld [vmem:[#allocation7 + $0x9d8] sm:$0xff]  ;;  %12838 = vst [vmem:[#allocation402_spill] sm:$0xff] %v10915_v42 }
 0x225   :  { %4083 = vmatprep.subr.bf16.mxu0 %v10881_v30  ;;  %4247 = vmatprep.subr.bf16.mxu1 %v10884_v32  ;;  %12835 = vst [vmem:[#allocation399_spill] sm:$0xff] %v10905_v46  ;;  %v447_v32 = vld [vmem:[#allocation7 + $0x9d0] sm:$0xff]  ;;  %v452_v17 = vld [vmem:[#allocation7 + $0x9f8] sm:$0xff]  ;;  %12837 = vst [vmem:[#allocation401_spill] sm:$0xff] %v10911_v63 }
 0x226   :  { %v451_v30 = vld [vmem:[#allocation7 + $0x9f0] sm:$0xff]  ;;  %v10920_v35 = vcombine.high %v448_v4, %v452_v17  ;;  %v10927_v62 = vcombine.low %v448_v4, %v452_v17 }
 0x227   :  { %v10917_v59 = vcombine.high %v447_v32, %v451_v30  ;;  %v10923_v61 = vcombine.low %v447_v32, %v451_v30 }
 0x228   :  { %4084 = vmatpush1.bf16.msra.mxu0 %v10887_v45  ;;  %4248 = vmatpush1.bf16.msra.mxu1 %v10891_v0  ;;  %12840 = vst [vmem:[#allocation404_spill] sm:$0xff] %v10920_v35  ;;  %v456_v0 = vld [vmem:[#allocation7 + $0xa18] sm:$0xff]  ;;  %12842 = vst [vmem:[#allocation406_spill] sm:$0xff] %v10927_v62 }
 0x229   :  { %4085 = vmatprep.subr.bf16.mxu0 %v10893_v1  ;;  %4249 = vmatprep.subr.bf16.mxu1 %v10896_v16  ;;  %12839 = vst [vmem:[#allocation403_spill] sm:$0xff] %v10917_v59  ;;  %v455_v16 = vld [vmem:[#allocation7 + $0xa10] sm:$0xff]  ;;  %v460_v45 = vld [vmem:[#allocation7 + $0xa38] sm:$0xff]  ;;  %12841 = vst [vmem:[#allocation405_spill] sm:$0xff] %v10923_v61 }
 0x22a   :  { %v459_v1 = vld [vmem:[#allocation7 + $0xa30] sm:$0xff]  ;;  %v10932_v44 = vcombine.high %v456_v0, %v460_v45  ;;  %v10939_v17 = vcombine.low %v456_v0, %v460_v45 }
 0x22b   :  { %v10929_v31 = vcombine.high %v455_v16, %v459_v1  ;;  %v10935_v30 = vcombine.low %v455_v16, %v459_v1 }
 0x22c   :  { %4086 = vmatpush1.bf16.msra.mxu0 %v10899_v54  ;;  %4250 = vmatpush1.bf16.msra.mxu1 %v10903_v12  ;;  %12844 = vst [vmem:[#allocation408_spill] sm:$0xff] %v10932_v44  ;;  %v464_v12 = vld [vmem:[#allocation7 + $0xa58] sm:$0xff]  ;;  %12846 = vst [vmem:[#allocation410_spill] sm:$0xff] %v10939_v17 }
 0x22d   :  { %4087 = vmatprep.subr.bf16.mxu0 %v10905_v46  ;;  %4251 = vmatprep.subr.bf16.mxu1 %v10908_v51  ;;  %12843 = vst [vmem:[#allocation407_spill] sm:$0xff] %v10929_v31  ;;  %v463_v51 = vld [vmem:[#allocation7 + $0xa50] sm:$0xff]  ;;  %v468_v54 = vld [vmem:[#allocation7 + $0xa78] sm:$0xff]  ;;  %12845 = vst [vmem:[#allocation409_spill] sm:$0xff] %v10935_v30 }
 0x22e   :  { %v467_v46 = vld [vmem:[#allocation7 + $0xa70] sm:$0xff]  ;;  %v10944_v32 = vcombine.high %v464_v12, %v468_v54  ;;  %v10951_v45 = vcombine.low %v464_v12, %v468_v54 }
 0x22f   :  { %v10941_v4 = vcombine.high %v463_v51, %v467_v46  ;;  %v10947_v1 = vcombine.low %v463_v51, %v467_v46 }
 0x230   :  { %4088 = vmatpush1.bf16.msra.mxu0 %v10911_v63  ;;  %4252 = vmatpush1.bf16.msra.mxu1 %v10915_v42  ;;  %12848 = vst [vmem:[#allocation412_spill] sm:$0xff] %v10944_v32  ;;  %v472_v42 = vld [vmem:[#allocation7 + $0xa98] sm:$0xff]  ;;  %12850 = vst [vmem:[#allocation414_spill] sm:$0xff] %v10951_v45 }
 0x231   :  { %4089 = vmatprep.subr.bf16.mxu0 %v10917_v59  ;;  %4253 = vmatprep.subr.bf16.mxu1 %v10920_v35  ;;  %12847 = vst [vmem:[#allocation411_spill] sm:$0xff] %v10941_v4  ;;  %v471_v35 = vld [vmem:[#allocation7 + $0xa90] sm:$0xff]  ;;  %v476_v63 = vld [vmem:[#allocation7 + $0xab8] sm:$0xff]  ;;  %12849 = vst [vmem:[#allocation413_spill] sm:$0xff] %v10947_v1 }
 0x232   :  { %v475_v59 = vld [vmem:[#allocation7 + $0xab0] sm:$0xff]  ;;  %v10956_v16 = vcombine.high %v472_v42, %v476_v63  ;;  %v10963_v54 = vcombine.low %v472_v42, %v476_v63 }
 0x233   :  { %v10953_v0 = vcombine.high %v471_v35, %v475_v59  ;;  %v10959_v46 = vcombine.low %v471_v35, %v475_v59 }
 0x234   :  { %4090 = vmatpush1.bf16.msra.mxu0 %v10923_v61  ;;  %4254 = vmatpush1.bf16.msra.mxu1 %v10927_v62  ;;  %12852 = vst [vmem:[#allocation416_spill] sm:$0xff] %v10956_v16  ;;  %v480_v62 = vld [vmem:[#allocation7 + $0xad8] sm:$0xff]  ;;  %12854 = vst [vmem:[#allocation418_spill] sm:$0xff] %v10963_v54 }
 0x235   :  { %4091 = vmatprep.subr.bf16.mxu0 %v10929_v31  ;;  %4255 = vmatprep.subr.bf16.mxu1 %v10932_v44  ;;  %12851 = vst [vmem:[#allocation415_spill] sm:$0xff] %v10953_v0  ;;  %v479_v44 = vld [vmem:[#allocation7 + $0xad0] sm:$0xff]  ;;  %v484_v61 = vld [vmem:[#allocation7 + $0xaf8] sm:$0xff]  ;;  %12853 = vst [vmem:[#allocation417_spill] sm:$0xff] %v10959_v46 }
 0x236   :  { %v483_v31 = vld [vmem:[#allocation7 + $0xaf0] sm:$0xff]  ;;  %v10968_v51 = vcombine.high %v480_v62, %v484_v61  ;;  %v10975_v63 = vcombine.low %v480_v62, %v484_v61 }
 0x237   :  { %v10965_v12 = vcombine.high %v479_v44, %v483_v31  ;;  %v10971_v59 = vcombine.low %v479_v44, %v483_v31 }
 0x238   :  { %4092 = vmatpush1.bf16.msra.mxu0 %v10935_v30  ;;  %4256 = vmatpush1.bf16.msra.mxu1 %v10939_v17  ;;  %12856 = vst [vmem:[#allocation420_spill] sm:$0xff] %v10968_v51  ;;  %v488_v17 = vld [vmem:[#allocation7 + $0xb18] sm:$0xff]  ;;  %12858 = vst [vmem:[#allocation422_spill] sm:$0xff] %v10975_v63 }
 0x239   :  { %4093 = vmatprep.subr.bf16.mxu0 %v10941_v4  ;;  %4257 = vmatprep.subr.bf16.mxu1 %v10944_v32  ;;  %12855 = vst [vmem:[#allocation419_spill] sm:$0xff] %v10965_v12  ;;  %v487_v32 = vld [vmem:[#allocation7 + $0xb10] sm:$0xff]  ;;  %v492_v30 = vld [vmem:[#allocation7 + $0xb38] sm:$0xff]  ;;  %12857 = vst [vmem:[#allocation421_spill] sm:$0xff] %v10971_v59 }
 0x23a   :  { %v491_v4 = vld [vmem:[#allocation7 + $0xb30] sm:$0xff]  ;;  %v10980_v35 = vcombine.high %v488_v17, %v492_v30  ;;  %v10987_v61 = vcombine.low %v488_v17, %v492_v30 }
 0x23b   :  { %v10977_v42 = vcombine.high %v487_v32, %v491_v4  ;;  %v10983_v31 = vcombine.low %v487_v32, %v491_v4 }
 0x23c   :  { %4094 = vmatpush1.bf16.msra.mxu0 %v10947_v1  ;;  %4258 = vmatpush1.bf16.msra.mxu1 %v10951_v45  ;;  %12860 = vst [vmem:[#allocation424_spill] sm:$0xff] %v10980_v35  ;;  %v496_v45 = vld [vmem:[#allocation7 + $0xb58] sm:$0xff]  ;;  %12862 = vst [vmem:[#allocation426_spill] sm:$0xff] %v10987_v61 }
 0x23d   :  { %4095 = vmatprep.subr.bf16.mxu0 %v10953_v0  ;;  %4259 = vmatprep.subr.bf16.mxu1 %v10956_v16  ;;  %12859 = vst [vmem:[#allocation423_spill] sm:$0xff] %v10977_v42  ;;  %v495_v16 = vld [vmem:[#allocation7 + $0xb50] sm:$0xff]  ;;  %v500_v1 = vld [vmem:[#allocation7 + $0xb78] sm:$0xff]  ;;  %12861 = vst [vmem:[#allocation425_spill] sm:$0xff] %v10983_v31 }
 0x23e   :  { %v499_v0 = vld [vmem:[#allocation7 + $0xb70] sm:$0xff]  ;;  %v10992_v44 = vcombine.high %v496_v45, %v500_v1  ;;  %v10999_v30 = vcombine.low %v496_v45, %v500_v1 }
 0x23f   :  { %v10989_v62 = vcombine.high %v495_v16, %v499_v0  ;;  %v10995_v4 = vcombine.low %v495_v16, %v499_v0 }
 0x240   :  { %4096 = vmatpush1.bf16.msra.mxu0 %v10959_v46  ;;  %4260 = vmatpush1.bf16.msra.mxu1 %v10963_v54  ;;  %12864 = vst [vmem:[#allocation428_spill] sm:$0xff] %v10992_v44  ;;  %v504_v54 = vld [vmem:[#allocation7 + $0xb98] sm:$0xff]  ;;  %12866 = vst [vmem:[#allocation430_spill] sm:$0xff] %v10999_v30 }
 0x241   :  { %4097 = vmatprep.subr.bf16.mxu0 %v10965_v12  ;;  %4261 = vmatprep.subr.bf16.mxu1 %v10968_v51  ;;  %12863 = vst [vmem:[#allocation427_spill] sm:$0xff] %v10989_v62  ;;  %v503_v51 = vld [vmem:[#allocation7 + $0xb90] sm:$0xff]  ;;  %v508_v46 = vld [vmem:[#allocation7 + $0xbb8] sm:$0xff]  ;;  %12865 = vst [vmem:[#allocation429_spill] sm:$0xff] %v10995_v4 }
 0x242   :  { %v507_v12 = vld [vmem:[#allocation7 + $0xbb0] sm:$0xff]  ;;  %v11004_v32 = vcombine.high %v504_v54, %v508_v46  ;;  %v11011_v1 = vcombine.low %v504_v54, %v508_v46 }
 0x243   :  { %v11001_v17 = vcombine.high %v503_v51, %v507_v12  ;;  %v11007_v0 = vcombine.low %v503_v51, %v507_v12 }
 0x244   :  { %4098 = vmatpush1.bf16.msra.mxu0 %v10971_v59  ;;  %4262 = vmatpush1.bf16.msra.mxu1 %v10975_v63  ;;  %12868 = vst [vmem:[#allocation432_spill] sm:$0xff] %v11004_v32  ;;  %v512_v63 = vld [vmem:[#allocation7 + $0xbd8] sm:$0xff]  ;;  %12870 = vst [vmem:[#allocation434_spill] sm:$0xff] %v11011_v1 }
 0x245   :  { %4099 = vmatprep.subr.bf16.mxu0 %v10977_v42  ;;  %4263 = vmatprep.subr.bf16.mxu1 %v10980_v35  ;;  %12867 = vst [vmem:[#allocation431_spill] sm:$0xff] %v11001_v17  ;;  %v511_v35 = vld [vmem:[#allocation7 + $0xbd0] sm:$0xff]  ;;  %v516_v59 = vld [vmem:[#allocation7 + $0xbf8] sm:$0xff]  ;;  %12869 = vst [vmem:[#allocation433_spill] sm:$0xff] %v11007_v0 }
 0x246   :  { %v515_v42 = vld [vmem:[#allocation7 + $0xbf0] sm:$0xff]  ;;  %v11016_v16 = vcombine.high %v512_v63, %v516_v59  ;;  %v11023_v46 = vcombine.low %v512_v63, %v516_v59 }
 0x247   :  { %v11013_v45 = vcombine.high %v511_v35, %v515_v42  ;;  %v11019_v12 = vcombine.low %v511_v35, %v515_v42 }
 0x248   :  { %4100 = vmatpush1.bf16.msra.mxu0 %v10983_v31  ;;  %4264 = vmatpush1.bf16.msra.mxu1 %v10987_v61  ;;  %12872 = vst [vmem:[#allocation436_spill] sm:$0xff] %v11016_v16  ;;  %v520_v61 = vld [vmem:[#allocation7 + $0xc18] sm:$0xff]  ;;  %12874 = vst [vmem:[#allocation438_spill] sm:$0xff] %v11023_v46 }
 0x249   :  { %4101 = vmatprep.subr.bf16.mxu0 %v10989_v62  ;;  %4265 = vmatprep.subr.bf16.mxu1 %v10992_v44  ;;  %12871 = vst [vmem:[#allocation435_spill] sm:$0xff] %v11013_v45  ;;  %v519_v44 = vld [vmem:[#allocation7 + $0xc10] sm:$0xff]  ;;  %v524_v31 = vld [vmem:[#allocation7 + $0xc38] sm:$0xff]  ;;  %12873 = vst [vmem:[#allocation437_spill] sm:$0xff] %v11019_v12 }
 0x24a   :  { %v523_v62 = vld [vmem:[#allocation7 + $0xc30] sm:$0xff]  ;;  %v11028_v51 = vcombine.high %v520_v61, %v524_v31  ;;  %v11035_v59 = vcombine.low %v520_v61, %v524_v31 }
 0x24b   :  { %v11025_v54 = vcombine.high %v519_v44, %v523_v62  ;;  %v11031_v42 = vcombine.low %v519_v44, %v523_v62 }
 0x24c   :  { %4102 = vmatpush1.bf16.msra.mxu0 %v10995_v4  ;;  %4266 = vmatpush1.bf16.msra.mxu1 %v10999_v30  ;;  %12876 = vst [vmem:[#allocation440_spill] sm:$0xff] %v11028_v51  ;;  %v528_v30 = vld [vmem:[#allocation7 + $0xc58] sm:$0xff]  ;;  %12878 = vst [vmem:[#allocation442_spill] sm:$0xff] %v11035_v59 }
 0x24d   :  { %4103 = vmatprep.subr.bf16.mxu0 %v11001_v17  ;;  %4267 = vmatprep.subr.bf16.mxu1 %v11004_v32  ;;  %12875 = vst [vmem:[#allocation439_spill] sm:$0xff] %v11025_v54  ;;  %v527_v32 = vld [vmem:[#allocation7 + $0xc50] sm:$0xff]  ;;  %v532_v4 = vld [vmem:[#allocation7 + $0xc78] sm:$0xff]  ;;  %12877 = vst [vmem:[#allocation441_spill] sm:$0xff] %v11031_v42 }
 0x24e   :  { %v531_v17 = vld [vmem:[#allocation7 + $0xc70] sm:$0xff]  ;;  %v11040_v35 = vcombine.high %v528_v30, %v532_v4  ;;  %v11049_v31 = vcombine.low %v528_v30, %v532_v4 }
 0x24f   :  { %v11037_v63 = vcombine.high %v527_v32, %v531_v17  ;;  %v11045_v62 = vcombine.low %v527_v32, %v531_v17 }
 0x250   :  { %4104 = vmatpush1.bf16.msra.mxu0 %v11007_v0  ;;  %4268 = vmatpush1.bf16.msra.mxu1 %v11011_v1  ;;  %12880 = vst [vmem:[#allocation444_spill] sm:$0xff] %v11040_v35  ;;  %v536_v1 = vld [vmem:[#allocation7 + $0xc98] sm:$0xff]  ;;  %12882 = vst [vmem:[#allocation446_spill] sm:$0xff] %v11049_v31 }
 0x251   :  { %4105 = vmatprep.subr.bf16.mxu0 %v11013_v45  ;;  %4269 = vmatprep.subr.bf16.mxu1 %v11016_v16  ;;  %12879 = vst [vmem:[#allocation443_spill] sm:$0xff] %v11037_v63  ;;  %v535_v16 = vld [vmem:[#allocation7 + $0xc90] sm:$0xff]  ;;  %12881 = vst [vmem:[#allocation445_spill] sm:$0xff] %v11045_v62 }
 0x252   :  { %v539_v45 = vld [vmem:[#allocation7 + $0xcb0] sm:$0xff] }
 0x253   :  { %v11051_v61 = vcombine.high %v535_v16, %v539_v45  ;;  %v11059_v17 = vcombine.low %v535_v16, %v539_v45 }
 0x254   :  { %4106 = vmatpush1.bf16.msra.mxu0 %v11019_v12  ;;  %4270 = vmatpush1.bf16.msra.mxu1 %v11023_v46  ;;  %v540_v12 = vld [vmem:[#allocation7 + $0xcb8] sm:$0xff] }
 0x255   :  { %4116 = vmatprep.subr.bf16.mxu0 %v11025_v54  ;;  %4280 = vmatprep.subr.bf16.mxu1 %v11028_v51  ;;  %12883 = vst [vmem:[#allocation447_spill] sm:$0xff] %v11051_v61  ;;  %v11054_v44 = vcombine.high %v536_v1, %v540_v12  ;;  %v543_v51 = vld [vmem:[#allocation7 + $0xcd0] sm:$0xff]  ;;  %12885 = vst [vmem:[#allocation449_spill] sm:$0xff] %v11059_v17  ;;  %v11063_v4 = vcombine.low %v536_v1, %v540_v12 }
 0x256   :  { %v547_v54 = vld [vmem:[#allocation7 + $0xcf0] sm:$0xff] }
 0x257   :  { %4108 = vmatmul.mubr.bf16.vlgmr.msra.gmra.mrb[4].mxu0 %v10236_v33  ;;  %4272 = vmatmul.mubr.bf16.vlgmr.msra.gmra.mrb[4].mxu1 %v10236_v33  ;;  %12884 = vst [vmem:[#allocation448_spill] sm:$0xff] %v11054_v44  ;;  %v548_v33 = vld [vmem:[#allocation7 + $0xcf8] sm:$0xff]  ;;  %12886 = vst [vmem:[#allocation450_spill] sm:$0xff] %v11063_v4  ;;  %v11065_v30 = vcombine.high %v543_v51, %v547_v54  ;;  %v11071_v45 = vcombine.low %v543_v51, %v547_v54 }
 0x258   :  { %4117 = vmatpush1.bf16.msra.mxu0 %v11031_v42  ;;  %4281 = vmatpush1.bf16.msra.mxu1 %v11035_v59  ;;  %v544_v42 = vld [vmem:[#allocation7 + $0xcd8] sm:$0xff] }
 0x259   :  { %4118 = vmatprep.subr.bf16.mxu0 %v11037_v63  ;;  %4282 = vmatprep.subr.bf16.mxu1 %v11040_v35  ;;  %12887 = vst [vmem:[#allocation451_spill] sm:$0xff] %v11065_v30  ;;  %v11068_v32 = vcombine.high %v544_v42, %v548_v33  ;;  %v551_v35 = vld [vmem:[#allocation7 + $0xd10] sm:$0xff]  ;;  %v552_v59 = vld [vmem:[#allocation7 + $0xd18] sm:$0xff]  ;;  %12889 = vst [vmem:[#allocation453_spill] sm:$0xff] %v11071_v45  ;;  %v11075_v1 = vcombine.low %v544_v42, %v548_v33 }
 0x25a   :  { %4148 = vmatprep.mubr.bf16.mxu0 %v10252_v13  ;;  %4312 = vmatprep.mubr.bf16.mxu1 %v10252_v13  ;;  %v555_v63 = vld [vmem:[#allocation7 + $0xd30] sm:$0xff]  ;;  %v556_v13 = vld [vmem:[#allocation7 + $0xd38] sm:$0xff] }
 0x25b   :  { %12888 = vst [vmem:[#allocation452_spill] sm:$0xff] %v11068_v32  ;;  %12890 = vst [vmem:[#allocation454_spill] sm:$0xff] %v11075_v1  ;;  %v11077_v16 = vcombine.high %v551_v35, %v555_v63  ;;  %v11080_v12 = vcombine.high %v552_v59, %v556_v13  ;;  %v11083_v54 = vcombine.low %v551_v35, %v555_v63 }
 0x25c   :  { %4119 = vmatpush1.bf16.msra.mxu0 %v11045_v62  ;;  %4283 = vmatpush1.bf16.msra.mxu1 %v11049_v31  ;;  %v560_v31 = vld [vmem:[#allocation7 + $0xd58] sm:$0xff]  ;;  %v11087_v51 = vcombine.low %v552_v59, %v556_v13 }
 0x25d   :  { %4120 = vmatprep.subr.bf16.mxu0 %v11051_v61  ;;  %4284 = vmatprep.subr.bf16.mxu1 %v11054_v44  ;;  %12891 = vst [vmem:[#allocation455_spill] sm:$0xff] %v11077_v16  ;;  %12892 = vst [vmem:[#allocation456_spill] sm:$0xff] %v11080_v12  ;;  %v559_v44 = vld [vmem:[#allocation7 + $0xd50] sm:$0xff]  ;;  %v564_v62 = vld [vmem:[#allocation7 + $0xd78] sm:$0xff] }
 0x25e   :  { %v563_v61 = vld [vmem:[#allocation7 + $0xd70] sm:$0xff]  ;;  %12893 = vst [vmem:[#allocation457_spill] sm:$0xff] %v11083_v54  ;;  %12894 = vst [vmem:[#allocation458_spill] sm:$0xff] %v11087_v51  ;;  %v11092_v33 = vcombine.high %v560_v31, %v564_v62  ;;  %v11099_v59 = vcombine.low %v560_v31, %v564_v62 }
 0x25f   :  { %v11089_v42 = vcombine.high %v559_v44, %v563_v61  ;;  %v11095_v63 = vcombine.low %v559_v44, %v563_v61  ;;  %v576_v44 = vld [vmem:[#allocation7 + $0xdd8] sm:$0xff] }
 0x260   :  { %4121 = vmatpush1.bf16.msra.mxu0 %v11059_v17  ;;  %4285 = vmatpush1.bf16.msra.mxu1 %v11063_v4  ;;  %12896 = vst [vmem:[#allocation460_spill] sm:$0xff] %v11092_v33  ;;  %v568_v4 = vld [vmem:[#allocation7 + $0xd98] sm:$0xff]  ;;  %12898 = vst [vmem:[#allocation462_spill] sm:$0xff] %v11099_v59 }
 0x261   :  { %4122 = vmatprep.subr.bf16.mxu0 %v11065_v30  ;;  %4286 = vmatprep.subr.bf16.mxu1 %v11068_v32  ;;  %12895 = vst [vmem:[#allocation459_spill] sm:$0xff] %v11089_v42  ;;  %v567_v32 = vld [vmem:[#allocation7 + $0xd90] sm:$0xff]  ;;  %v572_v17 = vld [vmem:[#allocation7 + $0xdb8] sm:$0xff]  ;;  %12897 = vst [vmem:[#allocation461_spill] sm:$0xff] %v11095_v63 }
 0x262   :  { %v571_v30 = vld [vmem:[#allocation7 + $0xdb0] sm:$0xff]  ;;  %v11119_v46 = vcombine.low %v568_v4, %v572_v17 }
 0x263   :  { %v11101_v35 = vcombine.high %v567_v32, %v571_v30  ;;  %v11115_v31 = vcombine.low %v567_v32, %v571_v30  ;;  %v588_v30 = vld [vmem:[#allocation7 + $0xe38] sm:$0xff] }
 0x264   :  { %4123 = vmatpush1.bf16.msra.mxu0 %v11071_v45  ;;  %4287 = vmatpush1.bf16.msra.mxu1 %v11075_v1  ;;  %v579_v1 = vld [vmem:[#allocation7 + $0xdf0] sm:$0xff]  ;;  %12902 = vst [vmem:[#allocation466_spill] sm:$0xff] %v11119_v46 }
 0x265   :  { %4124 = vmatprep.subr.bf16.mxu0 %v11077_v16  ;;  %4288 = vmatprep.subr.bf16.mxu1 %v11080_v12  ;;  %12899 = vst [vmem:[#allocation463_spill] sm:$0xff] %v11101_v35  ;;  %v11106_v12 = vcombine.high %v568_v4, %v572_v17  ;;  %v575_v16 = vld [vmem:[#allocation7 + $0xdd0] sm:$0xff]  ;;  %12901 = vst [vmem:[#allocation465_spill] sm:$0xff] %v11115_v31 }
 0x266   :  { %v11121_v0 = vcombine.high %v575_v16, %v579_v1  ;;  %v11127_v32 = vcombine.low %v575_v16, %v579_v1 }
 0x267   :  { %12900 = vst [vmem:[#allocation464_spill] sm:$0xff] %v11106_v12 }
 0x268   :  { %4125 = vmatpush1.bf16.msra.mxu0 %v11083_v54  ;;  %4289 = vmatpush1.bf16.msra.mxu1 %v11087_v51  ;;  %v580_v51 = vld [vmem:[#allocation7 + $0xdf8] sm:$0xff]  ;;  %12903 = vst [vmem:[#allocation467_spill] sm:$0xff] %v11121_v0  ;;  %12905 = vst [vmem:[#allocation469_spill] sm:$0xff] %v11127_v32 }
 0x269   :  { %4126 = vmatprep.subr.bf16.mxu0 %v11089_v42  ;;  %4290 = vmatprep.subr.bf16.mxu1 %v11092_v33  ;;  %v11124_v15 = vcombine.high %v576_v44, %v580_v51  ;;  %v11131_v17 = vcombine.low %v576_v44, %v580_v51 }
 0x26a   :  { %v11103_v13 = vpop.f32.mrb[0].mxu0  ;;  %v11108_v45 = vpop.f32.mrb[0].mxu1 }
 0x26b   :  { %v11110_v61 = vpop.f32.mrb[1].mxu0  ;;  %v11112_v54 = vpop.f32.mrb[1].mxu1  ;;  %12904 = vst [vmem:[#allocation468_spill] sm:$0xff] %v11124_v15  ;;  %12906 = vst [vmem:[#allocation470_spill] sm:$0xff] %v11131_v17 }
 0x26c   :  { %v3826_v62 = vpop.f32.mrb[2].mxu0  ;;  %4127 = vmatpush1.bf16.msra.mxu0 %v11095_v63  ;;  %v3990_v42 = vpop.f32.mrb[2].mxu1  ;;  %4291 = vmatpush1.bf16.msra.mxu1 %v11099_v59  ;;  %v584_v63 = vld [vmem:[#allocation7 + $0xe18] sm:$0xff]  ;;  %v11186_v59 = vld [vmem:[#allocation8] sm:$0xff] }
 0x26d   :  { %v3827_v33 = vpop.f32.mrb[3].mxu0  ;;  %4128 = vmatprep.subr.bf16.mxu0 %v11101_v35  ;;  %v3991_v36 = vpop.f32.mrb[3].mxu1  ;;  %4292 = vmatprep.subr.bf16.mxu1 %v11106_v12  ;;  %v583_v62 = vld [vmem:[#allocation7 + $0xe10] sm:$0xff]  ;;  %v592_v12 = vld [vmem:[#allocation7 + $0xe58] sm:$0xff]  ;;  %v11143_v16 = vcombine.low %v584_v63, %v588_v30 }
 0x26e   :  { %v11133_v4 = vcombine.high %v583_v62, %v587_v52  ;;  %v11136_v36 = vcombine.high %v584_v63, %v588_v30  ;;  %v591_v42 = vld [vmem:[#allocation7 + $0xe50] sm:$0xff]  ;;  %v596_v35 = vld [vmem:[#allocation7 + $0xe78] sm:$0xff]  ;;  %v11139_v1 = vcombine.low %v583_v62, %v587_v52 }
 0x26f   :  { %v595_v33 = vld [vmem:[#allocation7 + $0xe70] sm:$0xff]  ;;  %12910 = vst [vmem:[#allocation474_spill] sm:$0xff] %v11143_v16  ;;  %v11148_v44 = vcombine.high %v592_v12, %v596_v35  ;;  %v11155_v63 = vcombine.low %v592_v12, %v596_v35 }
 0x270   :  { %4129 = vmatpush1.bf16.msra.mxu0 %v11115_v31  ;;  %4293 = vmatpush1.bf16.msra.mxu1 %v11119_v46  ;;  %12907 = vst [vmem:[#allocation471_spill] sm:$0xff] %v11133_v4  ;;  %12908 = vst [vmem:[#allocation472_spill] sm:$0xff] %v11136_v36  ;;  %v11145_v51 = vcombine.high %v591_v42, %v595_v33  ;;  %v600_v46 = vld [vmem:[#allocation7 + $0xe98] sm:$0xff]  ;;  %v11151_v52 = vcombine.low %v591_v42, %v595_v33 }
 0x271   :  { %4130 = vmatprep.subr.bf16.mxu0 %v11121_v0  ;;  %4294 = vmatprep.subr.bf16.mxu1 %v11124_v15  ;;  %12909 = vst [vmem:[#allocation473_spill] sm:$0xff] %v11139_v1  ;;  %12912 = vst [vmem:[#allocation476_spill] sm:$0xff] %v11148_v44  ;;  %v599_v15 = vld [vmem:[#allocation7 + $0xe90] sm:$0xff]  ;;  %v604_v31 = vld [vmem:[#allocation7 + $0xeb8] sm:$0xff] }
 0x272   :  { %12911 = vst [vmem:[#allocation475_spill] sm:$0xff] %v11145_v51  ;;  %v603_v0 = vld [vmem:[#allocation7 + $0xeb0] sm:$0xff]  ;;  %12913 = vst [vmem:[#allocation477_spill] sm:$0xff] %v11151_v52  ;;  %v11160_v30 = vcombine.high %v600_v46, %v604_v31  ;;  %v11167_v12 = vcombine.low %v600_v46, %v604_v31 }
 0x273   :  { %12914 = vst [vmem:[#allocation478_spill] sm:$0xff] %v11155_v63  ;;  %v11157_v62 = vcombine.high %v599_v15, %v603_v0  ;;  %v11163_v42 = vcombine.low %v599_v15, %v603_v0 }
 0x274   :  { %4131 = vmatpush1.bf16.msra.mxu0 %v11127_v32  ;;  %4295 = vmatpush1.bf16.msra.mxu1 %v11131_v17  ;;  %12916 = vst [vmem:[#allocation480_spill] sm:$0xff] %v11160_v30  ;;  %v608_v17 = vld [vmem:[#allocation7 + $0xed8] sm:$0xff]  ;;  %12918 = vst [vmem:[#allocation482_spill] sm:$0xff] %v11167_v12 }
 0x275   :  { %4132 = vmatprep.subr.bf16.mxu0 %v11133_v4  ;;  %4296 = vmatprep.subr.bf16.mxu1 %v11136_v36  ;;  %12915 = vst [vmem:[#allocation479_spill] sm:$0xff] %v11157_v62  ;;  %v607_v36 = vld [vmem:[#allocation7 + $0xed0] sm:$0xff]  ;;  %v612_v32 = vld [vmem:[#allocation7 + $0xef8] sm:$0xff]  ;;  %12917 = vst [vmem:[#allocation481_spill] sm:$0xff] %v11163_v42 }
 0x276   :  { %v611_v4 = vld [vmem:[#allocation7 + $0xef0] sm:$0xff]  ;;  %v11172_v33 = vcombine.high %v608_v17, %v612_v32  ;;  %v11179_v0 = vcombine.low %v608_v17, %v612_v32 }
 0x277   :  { %v11169_v35 = vcombine.high %v607_v36, %v611_v4  ;;  %v11175_v15 = vcombine.low %v607_v36, %v611_v4 }
 0x278   :  { %4133 = vmatpush1.bf16.msra.mxu0 %v11139_v1  ;;  %4297 = vmatpush1.bf16.msra.mxu1 %v11143_v16  ;;  %12920 = vst [vmem:[#allocation484_spill] sm:$0xff] %v11172_v33  ;;  %v616_v16 = vld [vmem:[#allocation7 + $0xf18] sm:$0xff]  ;;  %12922 = vst [vmem:[#allocation486_spill] sm:$0xff] %v11179_v0 }
 0x279   :  { %4134 = vmatprep.subr.bf16.mxu0 %v11145_v51  ;;  %4298 = vmatprep.subr.bf16.mxu1 %v11148_v44  ;;  %12919 = vst [vmem:[#allocation483_spill] sm:$0xff] %v11169_v35  ;;  %v615_v44 = vld [vmem:[#allocation7 + $0xf10] sm:$0xff]  ;;  %v620_v1 = vld [vmem:[#allocation7 + $0xf38] sm:$0xff]  ;;  %12921 = vst [vmem:[#allocation485_spill] sm:$0xff] %v11175_v15 }
 0x27a   :  { %v619_v51 = vld [vmem:[#allocation7 + $0xf30] sm:$0xff]  ;;  %v11184_v31 = vcombine.high %v616_v16, %v620_v1  ;;  %v11193_v32 = vcombine.low %v616_v16, %v620_v1 }
 0x27b   :  { %v11181_v46 = vcombine.high %v615_v44, %v619_v51  ;;  %v11189_v4 = vcombine.low %v615_v44, %v619_v51  ;;  %v11204_v51 = vsub.s32 2, %v9658_v43  ;;  %v632_v44 = vld [vmem:[#allocation7 + $0xf98] sm:$0xff] }
 0x27c   :  { %4135 = vmatpush1.bf16.msra.mxu0 %v11151_v52  ;;  %4299 = vmatpush1.bf16.msra.mxu1 %v11155_v63  ;;  %12924 = vst [vmem:[#allocation488_spill] sm:$0xff] %v11184_v31  ;;  %v624_v63 = vld [vmem:[#allocation7 + $0xf58] sm:$0xff]  ;;  %12926 = vst [vmem:[#allocation490_spill] sm:$0xff] %v11193_v32 }
 0x27d   :  { %4136 = vmatprep.subr.bf16.mxu0 %v11157_v62  ;;  %4300 = vmatprep.subr.bf16.mxu1 %v11160_v30  ;;  %12923 = vst [vmem:[#allocation487_spill] sm:$0xff] %v11181_v46  ;;  %v623_v30 = vld [vmem:[#allocation7 + $0xf50] sm:$0xff]  ;;  %v628_v52 = vld [vmem:[#allocation7 + $0xf78] sm:$0xff]  ;;  %12925 = vst [vmem:[#allocation489_spill] sm:$0xff] %v11189_v4 }
 0x27e   :  { %v627_v62 = vld [vmem:[#allocation7 + $0xf70] sm:$0xff]  ;;  %v11198_v36 = vcombine.high %v624_v63, %v628_v52  ;;  %v11211_v16 = vcombine.low %v624_v63, %v628_v52  ;;  %v11224_v52 = vsub.s32 0, %v9658_v43 }
 0x27f   :  { %v11195_v17 = vcombine.high %v623_v30, %v627_v62  ;;  %v11207_v1 = vcombine.low %v623_v30, %v627_v62  ;;  %v644_v62 = vld [vmem:[#allocation7 + $0xff8] sm:$0xff] }
 0x280   :  { %4137 = vmatpush1.bf16.msra.mxu0 %v11163_v42  ;;  %4301 = vmatpush1.bf16.msra.mxu1 %v11167_v12  ;;  %12928 = vst [vmem:[#allocation492_spill] sm:$0xff] %v11198_v36  ;;  %v11201_v12 = vunpack.c.l.bf16 %v11186_v59  ;;  %v643_v42 = vld [vmem:[#allocation7 + $0xff0] sm:$0xff] }
 0x281   :  { %4138 = vmatprep.subr.bf16.mxu0 %v11169_v35  ;;  %4302 = vmatprep.subr.bf16.mxu1 %v11172_v33  ;;  %12927 = vst [vmem:[#allocation491_spill] sm:$0xff] %v11195_v17  ;;  %v631_v33 = vld [vmem:[#allocation7 + $0xf90] sm:$0xff] }
 0x282   :  { %v635_v35 = vld [vmem:[#allocation7 + $0xfb0] sm:$0xff]  ;;  %v982_v41 = vrot.slane %v11201_v12, %v11204_v51 }
 0x283   :  { %v11221_v30 = vcombine.low %v631_v33, %v635_v35 }
 0x284   :  { %4139 = vmatpush1.bf16.msra.mxu0 %v11175_v15  ;;  %4303 = vmatpush1.bf16.msra.mxu1 %v11179_v0  ;;  %v636_v0 = vld [vmem:[#allocation7 + $0xfb8] sm:$0xff]  ;;  %v639_v15 = vld [vmem:[#allocation7 + $0xfd0] sm:$0xff] }
 0x285   :  { %4140 = vmatprep.subr.bf16.mxu0 %v11181_v46  ;;  %4304 = vmatprep.subr.bf16.mxu1 %v11184_v31  ;;  %v11213_v31 = vcombine.high %v631_v33, %v635_v35  ;;  %v11216_v46 = vcombine.high %v632_v44, %v636_v0  ;;  %12930 = vst [vmem:[#allocation494_spill] sm:$0xff] %v11221_v30 }
 0x286   :  { %v11228_v63 = vcombine.low %v632_v44, %v636_v0  ;;  %v11239_v35 = vcombine.low %v639_v15, %v643_v42  ;;  %v8508_v0 = vld [vmem:[#allocation10 + $0x4] ss:$16 sps:$4 sm:$0xff]   ;;  %v8511_v44 = vld [vmem:[#allocation10 + $0xc] ss:$16 sps:$4 sm:$0xff]  }
 0x287   :  { %12929 = vst [vmem:[#allocation493_spill] sm:$0xff] %v11216_v46 }
 0x288   :  { %4141 = vmatpush1.bf16.msra.mxu0 %v11189_v4  ;;  %4305 = vmatpush1.bf16.msra.mxu1 %v11193_v32  ;;  %v640_v4 = vld [vmem:[#allocation7 + $0xfd8] sm:$0xff]  ;;  %12931 = vst [vmem:[#allocation495_spill] sm:$0xff] %v11228_v63  ;;  %v11236_v32 = vrot.slane %v982_v41, %v11224_v52  ;;  %12935 = vst [vmem:[#allocation499_spill] sm:$0xff] %v11239_v35 }
 0x289   :  { %4142 = vmatprep.subr.bf16.mxu0 %v11195_v17  ;;  %4306 = vmatprep.subr.bf16.mxu1 %v11198_v36  ;;  %v11230_v36 = vcombine.high %v639_v15, %v643_v42  ;;  %v11233_v17 = vcombine.high %v640_v4, %v644_v62  ;;  %v11243_v33 = vcombine.low %v640_v4, %v644_v62  ;;  %v8506_v41 = vld [vmem:[#allocation10] ss:$16 sps:$4 sm:$0xff]   ;;  %v8509_v42 = vld [vmem:[#allocation10 + $0x8] ss:$16 sps:$4 sm:$0xff]   ;;  %v8514_v15 = vld [vmem:[#allocation10 + $0x24] ss:$16 sps:$4 sm:$0xff]  }
 0x28a   :  { %12934 = vst [vmem:[#allocation498_spill] sm:$0xff] %v11236_v32  ;;  %v8517_v4 = vld [vmem:[#allocation10 + $0x2c] ss:$16 sps:$4 sm:$0xff]   ;;  %v8512_v62 = vld [vmem:[#allocation10 + $0x20] ss:$16 sps:$4 sm:$0xff]  }
 0x28b   :  { %12932 = vst [vmem:[#allocation496_spill] sm:$0xff] %v11230_v36  ;;  %12933 = vst [vmem:[#allocation497_spill] sm:$0xff] %v11233_v17 }
 0x28c   :  { %4143 = vmatpush1.bf16.msra.mxu0 %v11207_v1  ;;  %4307 = vmatpush1.bf16.msra.mxu1 %v11211_v16  ;;  %12936 = vst [vmem:[#allocation500_spill] sm:$0xff] %v11243_v33 }
 0x28d   :  { %4144 = vmatprep.subr.bf16.mxu0 %v11213_v31  ;;  %4308 = vmatprep.subr.bf16.mxu1 %v11216_v46  ;;  %v8321_v46 = vadd.f32 %v11110_v61, %v11236_v32  ;;  %v8515_v61 = vld [vmem:[#allocation10 + $0x28] ss:$16 sps:$4 sm:$0xff]   ;;  %v8520_v32 = vld [vmem:[#allocation10 + $0x44] ss:$16 sps:$4 sm:$0xff]  }
 0x290   :  { %4145 = vmatpush1.bf16.msra.mxu0 %v11221_v30  ;;  %4309 = vmatpush1.bf16.msra.mxu1 %v11228_v63  ;;  %v4322_v63 = vpack.c.bf16 %v8321_v46, %v8321_v46  ;;  %v8521_v46 = vld [vmem:[#allocation10 + $0x48] ss:$16 sps:$4 sm:$0xff]  }
 0x291   :  { %4146 = vmatprep.subr.bf16.mxu0 %v11230_v36  ;;  %4310 = vmatprep.subr.bf16.mxu1 %v11233_v17  ;;  %v8535_v17 = vld [vmem:[#allocation10 + $0x8c] ss:$16 sps:$4 sm:$0xff]   ;;  %v8604_v36 = vld [vmem:[#allocation10 + $0x204] ss:$16 sps:$4 sm:$0xff]  }
 0x294   :  { %4147 = vmatpush1.bf16.msra.mxu0 %v11239_v35  ;;  %4311 = vmatpush1.bf16.msra.mxu1 %v11243_v33  ;;  %v8523_v35 = vld [vmem:[#allocation10 + $0x4c] ss:$16 sps:$4 sm:$0xff]  }
 0x295   :  { %5646 = vmatprep.subr.bf16.mxu0 %v8508_v0  ;;  %5810 = vmatprep.subr.bf16.mxu1 %v8511_v44  ;;  %v8518_v0 = vld [vmem:[#allocation10 + $0x40] ss:$16 sps:$4 sm:$0xff]   ;;  %v8526_v44 = vld [vmem:[#allocation10 + $0x64] ss:$16 sps:$4 sm:$0xff]   ;;  %v8529_v33 = vld [vmem:[#allocation10 + $0x6c] ss:$16 sps:$4 sm:$0xff]  }
 0x297   :  { %4149 = vmatmul.mubr.bf16.vlgmr.msra.gmra.mrb[4].mxu0 %v10440_v55  ;;  %4313 = vmatmul.mubr.bf16.vlgmr.msra.gmra.mrb[4].mxu1 %v10440_v55  ;;  %v8524_v55 = vld [vmem:[#allocation10 + $0x60] ss:$16 sps:$4 sm:$0xff]  }
 0x298   :  { %5647 = vmatpush1.bf16.msra.mxu0 %v8506_v41  ;;  %5678 = vmatprep.mubr.bf16.mxu0 %v4322_v63  ;;  %v8527_v41 = vld [vmem:[#allocation10 + $0x68] ss:$16 sps:$4 sm:$0xff]  }
 0x299   :  { %5811 = vmatpush1.bf16.msra.mxu1 %v8509_v42  ;;  %5842 = vmatprep.mubr.bf16.mxu1 %v4322_v63  ;;  %v8532_v42 = vld [vmem:[#allocation10 + $0x84] ss:$16 sps:$4 sm:$0xff]   ;;  %v8530_v63 = vld [vmem:[#allocation10 + $0x80] ss:$16 sps:$4 sm:$0xff]  }
 0x29a   :  { %5648 = vmatprep.subr.bf16.mxu0 %v8514_v15  ;;  %5812 = vmatprep.subr.bf16.mxu1 %v8517_v4  ;;  %v8533_v15 = vld [vmem:[#allocation10 + $0x88] ss:$16 sps:$4 sm:$0xff]   ;;  %v8538_v4 = vld [vmem:[#allocation10 + $0xa4] ss:$16 sps:$4 sm:$0xff]  }
 0x29c   :  { %5649 = vmatpush1.bf16.msra.mxu0 %v8512_v62  ;;  %v8536_v62 = vld [vmem:[#allocation10 + $0xa0] ss:$16 sps:$4 sm:$0xff]  }
 0x29d   :  { %5813 = vmatpush1.bf16.msra.mxu1 %v8515_v61  ;;  %5650 = vmatprep.subr.bf16.mxu0 %v8520_v32  ;;  %v8541_v32 = vld [vmem:[#allocation10 + $0xac] ss:$16 sps:$4 sm:$0xff]   ;;  %v8544_v61 = vld [vmem:[#allocation10 + $0xc4] ss:$16 sps:$4 sm:$0xff]  }
 0x29e   :  { %5814 = vmatprep.subr.bf16.mxu1 %v8523_v35  ;;  %v8539_v35 = vld [vmem:[#allocation10 + $0xa8] ss:$16 sps:$4 sm:$0xff]  }
 0x2a0   :  { %5651 = vmatpush1.bf16.msra.mxu0 %v8518_v0  ;;  %v8547_v0 = vld [vmem:[#allocation10 + $0xcc] ss:$16 sps:$4 sm:$0xff]  }
 0x2a1   :  { %5815 = vmatpush1.bf16.msra.mxu1 %v8521_v46  ;;  %5652 = vmatprep.subr.bf16.mxu0 %v8526_v44  ;;  %v8542_v46 = vld [vmem:[#allocation10 + $0xc0] ss:$16 sps:$4 sm:$0xff]   ;;  %v8550_v44 = vld [vmem:[#allocation10 + $0xe4] ss:$16 sps:$4 sm:$0xff]  }
 0x2a2   :  { %5816 = vmatprep.subr.bf16.mxu1 %v8529_v33  ;;  %v8545_v33 = vld [vmem:[#allocation10 + $0xc8] ss:$16 sps:$4 sm:$0xff]  }
 0x2a4   :  { %5653 = vmatpush1.bf16.msra.mxu0 %v8524_v55  ;;  %v8553_v55 = vld [vmem:[#allocation10 + $0xec] ss:$16 sps:$4 sm:$0xff]  }
 0x2a5   :  { %5817 = vmatpush1.bf16.msra.mxu1 %v8527_v41  ;;  %5654 = vmatprep.subr.bf16.mxu0 %v8532_v42  ;;  %v8548_v41 = vld [vmem:[#allocation10 + $0xe0] ss:$16 sps:$4 sm:$0xff]   ;;  %v8556_v42 = vld [vmem:[#allocation10 + $0x104] ss:$16 sps:$4 sm:$0xff]  }
 0x2a6   :  { %5818 = vmatprep.subr.bf16.mxu1 %v8535_v17  ;;  %v8551_v17 = vld [vmem:[#allocation10 + $0xe8] ss:$16 sps:$4 sm:$0xff]  }
 0x2a8   :  { %5655 = vmatpush1.bf16.msra.mxu0 %v8530_v63  ;;  %v8559_v63 = vld [vmem:[#allocation10 + $0x10c] ss:$16 sps:$4 sm:$0xff]  }
 0x2a9   :  { %5819 = vmatpush1.bf16.msra.mxu1 %v8533_v15  ;;  %5656 = vmatprep.subr.bf16.mxu0 %v8538_v4  ;;  %v8554_v15 = vld [vmem:[#allocation10 + $0x100] ss:$16 sps:$4 sm:$0xff]   ;;  %v8557_v4 = vld [vmem:[#allocation10 + $0x108] ss:$16 sps:$4 sm:$0xff]  }
 0x2aa   :  { %5820 = vmatprep.subr.bf16.mxu1 %v8541_v32  ;;  %v8562_v32 = vld [vmem:[#allocation10 + $0x124] ss:$16 sps:$4 sm:$0xff]  }
 0x2ac   :  { %5657 = vmatpush1.bf16.msra.mxu0 %v8536_v62  ;;  %v8565_v62 = vld [vmem:[#allocation10 + $0x12c] ss:$16 sps:$4 sm:$0xff]  }
 0x2ad   :  { %5821 = vmatpush1.bf16.msra.mxu1 %v8539_v35  ;;  %5658 = vmatprep.subr.bf16.mxu0 %v8544_v61  ;;  %v8560_v35 = vld [vmem:[#allocation10 + $0x120] ss:$16 sps:$4 sm:$0xff]   ;;  %v8563_v61 = vld [vmem:[#allocation10 + $0x128] ss:$16 sps:$4 sm:$0xff]  }
 0x2ae   :  { %5822 = vmatprep.subr.bf16.mxu1 %v8547_v0  ;;  %v8568_v0 = vld [vmem:[#allocation10 + $0x144] ss:$16 sps:$4 sm:$0xff]  }
 0x2b0   :  { %5659 = vmatpush1.bf16.msra.mxu0 %v8542_v46  ;;  %v8571_v46 = vld [vmem:[#allocation10 + $0x14c] ss:$16 sps:$4 sm:$0xff]  }
 0x2b1   :  { %5823 = vmatpush1.bf16.msra.mxu1 %v8545_v33  ;;  %5660 = vmatprep.subr.bf16.mxu0 %v8550_v44  ;;  %v8566_v33 = vld [vmem:[#allocation10 + $0x140] ss:$16 sps:$4 sm:$0xff]   ;;  %v8569_v44 = vld [vmem:[#allocation10 + $0x148] ss:$16 sps:$4 sm:$0xff]  }
 0x2b2   :  { %5824 = vmatprep.subr.bf16.mxu1 %v8553_v55  ;;  %v8574_v55 = vld [vmem:[#allocation10 + $0x164] ss:$16 sps:$4 sm:$0xff]  }
 0x2b4   :  { %5661 = vmatpush1.bf16.msra.mxu0 %v8548_v41  ;;  %v8577_v41 = vld [vmem:[#allocation10 + $0x16c] ss:$16 sps:$4 sm:$0xff]  }
 0x2b5   :  { %5825 = vmatpush1.bf16.msra.mxu1 %v8551_v17  ;;  %5662 = vmatprep.subr.bf16.mxu0 %v8556_v42  ;;  %v8572_v17 = vld [vmem:[#allocation10 + $0x160] ss:$16 sps:$4 sm:$0xff]   ;;  %v8575_v42 = vld [vmem:[#allocation10 + $0x168] ss:$16 sps:$4 sm:$0xff]  }
 0x2b6   :  { %5826 = vmatprep.subr.bf16.mxu1 %v8559_v63  ;;  %v8580_v63 = vld [vmem:[#allocation10 + $0x184] ss:$16 sps:$4 sm:$0xff]  }
 0x2b8   :  { %5663 = vmatpush1.bf16.msra.mxu0 %v8554_v15  ;;  %v8583_v15 = vld [vmem:[#allocation10 + $0x18c] ss:$16 sps:$4 sm:$0xff]  }
 0x2b9   :  { %5827 = vmatpush1.bf16.msra.mxu1 %v8557_v4  ;;  %5664 = vmatprep.subr.bf16.mxu0 %v8562_v32  ;;  %v8578_v4 = vld [vmem:[#allocation10 + $0x180] ss:$16 sps:$4 sm:$0xff]   ;;  %v8581_v32 = vld [vmem:[#allocation10 + $0x188] ss:$16 sps:$4 sm:$0xff]  }
 0x2ba   :  { %5828 = vmatprep.subr.bf16.mxu1 %v8565_v62  ;;  %v8586_v62 = vld [vmem:[#allocation10 + $0x1a4] ss:$16 sps:$4 sm:$0xff]  }
 0x2bc   :  { %5665 = vmatpush1.bf16.msra.mxu0 %v8560_v35  ;;  %v8589_v35 = vld [vmem:[#allocation10 + $0x1ac] ss:$16 sps:$4 sm:$0xff]  }
 0x2bd   :  { %5829 = vmatpush1.bf16.msra.mxu1 %v8563_v61  ;;  %5666 = vmatprep.subr.bf16.mxu0 %v8568_v0  ;;  %v11253_v61 = vsub.s32 6, %v9658_v43  ;;  %v8584_v0 = vld [vmem:[#allocation10 + $0x1a0] ss:$16 sps:$4 sm:$0xff]  }
 0x2be   :  { %5830 = vmatprep.subr.bf16.mxu1 %v8571_v46  ;;  %v978_v46 = vrot.slane %v11201_v12, %v11224_v52 }
 0x2c0   :  { %5667 = vmatpush1.bf16.msra.mxu0 %v8566_v33  ;;  %v8587_v33 = vld [vmem:[#allocation10 + $0x1a8] ss:$16 sps:$4 sm:$0xff]  }
 0x2c1   :  { %5831 = vmatpush1.bf16.msra.mxu1 %v8569_v44  ;;  %5668 = vmatprep.subr.bf16.mxu0 %v8574_v55  ;;  %v8592_v44 = vld [vmem:[#allocation10 + $0x1c4] ss:$16 sps:$4 sm:$0xff]   ;;  %v8595_v55 = vld [vmem:[#allocation10 + $0x1cc] ss:$16 sps:$4 sm:$0xff]  }
 0x2c2   :  { %5832 = vmatprep.subr.bf16.mxu1 %v8577_v41  ;;  %v990_v41 = vrot.slane %v11201_v12, %v11253_v61 }
 0x2c4   :  { %5669 = vmatpush1.bf16.msra.mxu0 %v8572_v17  ;;  %v8590_v17 = vld [vmem:[#allocation10 + $0x1c0] ss:$16 sps:$4 sm:$0xff]  }
 0x2c5   :  { %5833 = vmatpush1.bf16.msra.mxu1 %v8575_v42  ;;  %5670 = vmatprep.subr.bf16.mxu0 %v8580_v63  ;;  %v11260_v42 = vrot.slane %v978_v46, %v11224_v52  ;;  %v8593_v63 = vld [vmem:[#allocation10 + $0x1c8] ss:$16 sps:$4 sm:$0xff]   ;;  %v8607_v46 = vld [vmem:[#allocation10 + $0x20c] ss:$16 sps:$4 sm:$0xff]  }
 0x2c6   :  { %5834 = vmatprep.subr.bf16.mxu1 %v8583_v15  ;;  %v8598_v15 = vld [vmem:[#allocation10 + $0x1e4] ss:$16 sps:$4 sm:$0xff]  }
 0x2c8   :  { %5671 = vmatpush1.bf16.msra.mxu0 %v8578_v4  ;;  %v8601_v4 = vld [vmem:[#allocation10 + $0x1ec] ss:$16 sps:$4 sm:$0xff]  }
 0x2c9   :  { %5835 = vmatpush1.bf16.msra.mxu1 %v8581_v32  ;;  %5672 = vmatprep.subr.bf16.mxu0 %v8586_v62  ;;  %v11263_v32 = vrot.slane %v990_v41, %v11224_v52  ;;  %v8596_v62 = vld [vmem:[#allocation10 + $0x1e0] ss:$16 sps:$4 sm:$0xff]   ;;  %v8605_v41 = vld [vmem:[#allocation10 + $0x208] ss:$16 sps:$4 sm:$0xff]  }
 0x2ca   :  { %5836 = vmatprep.subr.bf16.mxu1 %v8589_v35  ;;  %v8320_v35 = vadd.f32 %v11103_v13, %v11260_v42  ;;  %v8613_v13 = vld [vmem:[#allocation10 + $0x22c] ss:$16 sps:$4 sm:$0xff]  }
 0x2cb   :  { %12937 = vst [vmem:[#allocation501_spill] sm:$0xff] %v11263_v32 }
 0x2cc   :  { %5673 = vmatpush1.bf16.msra.mxu0 %v8584_v0  ;;  %v8599_v0 = vld [vmem:[#allocation10 + $0x1e8] ss:$16 sps:$4 sm:$0xff]  }
 0x2cd   :  { %5837 = vmatpush1.bf16.msra.mxu1 %v8587_v33  ;;  %5674 = vmatprep.subr.bf16.mxu0 %v8592_v44  ;;  %v8323_v33 = vadd.f32 %v11112_v54, %v11263_v32  ;;  %v8602_v44 = vld [vmem:[#allocation10 + $0x200] ss:$16 sps:$4 sm:$0xff]   ;;  %v8619_v54 = vld [vmem:[#allocation10 + $0x24c] ss:$16 sps:$4 sm:$0xff]   ;;  %v8802_v32 = vld [vmem:[#allocation10 + $0x624] ss:$16 sps:$4 sm:$0xff]  }
 0x2ce   :  { %5838 = vmatprep.subr.bf16.mxu1 %v8595_v55  ;;  %v4321_v55 = vpack.c.bf16 %v8320_v35, %v8320_v35  ;;  %v8622_v35 = vld [vmem:[#allocation10 + $0x264] ss:$16 sps:$4 sm:$0xff]  }
 0x2cf   :  { %v4324_v30 = vpack.c.bf16 %v8323_v33, %v8323_v33  ;;  %v8623_v33 = vld [vmem:[#allocation10 + $0x268] ss:$16 sps:$4 sm:$0xff]  }
 0x2d0   :  { %5675 = vmatpush1.bf16.msra.mxu0 %v8590_v17  ;;  %v8610_v17 = vld [vmem:[#allocation10 + $0x224] ss:$16 sps:$4 sm:$0xff]  }
 0x2d1   :  { %5839 = vmatpush1.bf16.msra.mxu1 %v8593_v63  ;;  %5676 = vmatprep.subr.bf16.mxu0 %v8598_v15  ;;  %v8608_v63 = vld [vmem:[#allocation10 + $0x220] ss:$16 sps:$4 sm:$0xff]   ;;  %v8611_v15 = vld [vmem:[#allocation10 + $0x228] ss:$16 sps:$4 sm:$0xff]  }
 0x2d2   :  { %5840 = vmatprep.subr.bf16.mxu1 %v8601_v4  ;;  %v8616_v4 = vld [vmem:[#allocation10 + $0x244] ss:$16 sps:$4 sm:$0xff]  }
 0x2d4   :  { %5677 = vmatpush1.bf16.msra.mxu0 %v8596_v62  ;;  %v8614_v62 = vld [vmem:[#allocation10 + $0x240] ss:$16 sps:$4 sm:$0xff]  }
 0x2d5   :  { %5841 = vmatpush1.bf16.msra.mxu1 %v8599_v0  ;;  %5687 = vmatprep.subr.bf16.mxu0 %v8604_v36  ;;  %v8617_v36 = vld [vmem:[#allocation10 + $0x248] ss:$16 sps:$4 sm:$0xff]   ;;  %v8625_v0 = vld [vmem:[#allocation10 + $0x26c] ss:$16 sps:$4 sm:$0xff]  }
 0x2d6   :  { %5851 = vmatprep.subr.bf16.mxu1 %v8607_v46  ;;  %v8620_v46 = vld [vmem:[#allocation10 + $0x260] ss:$16 sps:$4 sm:$0xff]  }
 0x2d7   :  { %5679 = vmatmul.mubr.bf16.vlgmr.msra.gmra.mrb[8].mxu0 %v4321_v55 }
 0x2d8   :  { %5843 = vmatmul.mubr.bf16.vlgmr.msra.gmra.mrb[8].mxu1 %v4321_v55  ;;  %5688 = vmatpush1.bf16.msra.mxu0 %v8602_v44  ;;  %v8628_v44 = vld [vmem:[#allocation10 + $0x284] ss:$16 sps:$4 sm:$0xff]   ;;  %v8631_v55 = vld [vmem:[#allocation10 + $0x28c] ss:$16 sps:$4 sm:$0xff]  }
 0x2d9   :  { %5719 = vmatprep.mubr.bf16.mxu0 %v4324_v30  ;;  %5852 = vmatpush1.bf16.msra.mxu1 %v8605_v41  ;;  %v8629_v41 = vld [vmem:[#allocation10 + $0x288] ss:$16 sps:$4 sm:$0xff]  }
 0x2da   :  { %5883 = vmatprep.mubr.bf16.mxu1 %v4324_v30  ;;  %5689 = vmatprep.subr.bf16.mxu0 %v8610_v17  ;;  %v8626_v30 = vld [vmem:[#allocation10 + $0x280] ss:$16 sps:$4 sm:$0xff]   ;;  %v8634_v17 = vld [vmem:[#allocation10 + $0x2a4] ss:$16 sps:$4 sm:$0xff]  }
 0x2db   :  { %5853 = vmatprep.subr.bf16.mxu1 %v8613_v13  ;;  %v8637_v13 = vld [vmem:[#allocation10 + $0x2ac] ss:$16 sps:$4 sm:$0xff]  }
 0x2dc   :  { %5690 = vmatpush1.bf16.msra.mxu0 %v8608_v63  ;;  %v8632_v63 = vld [vmem:[#allocation10 + $0x2a0] ss:$16 sps:$4 sm:$0xff]  }
 0x2dd   :  { %5854 = vmatpush1.bf16.msra.mxu1 %v8611_v15  ;;  %5691 = vmatprep.subr.bf16.mxu0 %v8616_v4  ;;  %v8635_v15 = vld [vmem:[#allocation10 + $0x2a8] ss:$16 sps:$4 sm:$0xff]   ;;  %v8640_v4 = vld [vmem:[#allocation10 + $0x2c4] ss:$16 sps:$4 sm:$0xff]  }
 0x2de   :  { %5855 = vmatprep.subr.bf16.mxu1 %v8619_v54  ;;  %v8643_v54 = vld [vmem:[#allocation10 + $0x2cc] ss:$16 sps:$4 sm:$0xff]  }
 0x2e0   :  { %5692 = vmatpush1.bf16.msra.mxu0 %v8614_v62  ;;  %v8638_v62 = vld [vmem:[#allocation10 + $0x2c0] ss:$16 sps:$4 sm:$0xff]  }
 0x2e1   :  { %5856 = vmatpush1.bf16.msra.mxu1 %v8617_v36  ;;  %5693 = vmatprep.subr.bf16.mxu0 %v8622_v35  ;;  %v8641_v36 = vld [vmem:[#allocation10 + $0x2c8] ss:$16 sps:$4 sm:$0xff]   ;;  %v8646_v35 = vld [vmem:[#allocation10 + $0x2e4] ss:$16 sps:$4 sm:$0xff]  }
 0x2e2   :  { %5857 = vmatprep.subr.bf16.mxu1 %v8625_v0  ;;  %v8649_v0 = vld [vmem:[#allocation10 + $0x2ec] ss:$16 sps:$4 sm:$0xff]  }
 0x2e4   :  { %5694 = vmatpush1.bf16.msra.mxu0 %v8620_v46  ;;  %v8644_v46 = vld [vmem:[#allocation10 + $0x2e0] ss:$16 sps:$4 sm:$0xff]  }
 0x2e5   :  { %5858 = vmatpush1.bf16.msra.mxu1 %v8623_v33  ;;  %5695 = vmatprep.subr.bf16.mxu0 %v8628_v44  ;;  %v8647_v33 = vld [vmem:[#allocation10 + $0x2e8] ss:$16 sps:$4 sm:$0xff]   ;;  %v8652_v44 = vld [vmem:[#allocation10 + $0x304] ss:$16 sps:$4 sm:$0xff]  }
 0x2e6   :  { %5859 = vmatprep.subr.bf16.mxu1 %v8631_v55  ;;  %v8655_v55 = vld [vmem:[#allocation10 + $0x30c] ss:$16 sps:$4 sm:$0xff]  }
 0x2e8   :  { %5696 = vmatpush1.bf16.msra.mxu0 %v8626_v30  ;;  %v8650_v30 = vld [vmem:[#allocation10 + $0x300] ss:$16 sps:$4 sm:$0xff]  }
 0x2e9   :  { %5860 = vmatpush1.bf16.msra.mxu1 %v8629_v41  ;;  %5697 = vmatprep.subr.bf16.mxu0 %v8634_v17  ;;  %v8653_v41 = vld [vmem:[#allocation10 + $0x308] ss:$16 sps:$4 sm:$0xff]   ;;  %v8658_v17 = vld [vmem:[#allocation10 + $0x324] ss:$16 sps:$4 sm:$0xff]  }
 0x2ea   :  { %5861 = vmatprep.subr.bf16.mxu1 %v8637_v13  ;;  %v8661_v13 = vld [vmem:[#allocation10 + $0x32c] ss:$16 sps:$4 sm:$0xff]  }
 0x2ec   :  { %5698 = vmatpush1.bf16.msra.mxu0 %v8632_v63  ;;  %v8656_v63 = vld [vmem:[#allocation10 + $0x320] ss:$16 sps:$4 sm:$0xff]  }
 0x2ed   :  { %5862 = vmatpush1.bf16.msra.mxu1 %v8635_v15  ;;  %5699 = vmatprep.subr.bf16.mxu0 %v8640_v4  ;;  %v8659_v15 = vld [vmem:[#allocation10 + $0x328] ss:$16 sps:$4 sm:$0xff]   ;;  %v8664_v4 = vld [vmem:[#allocation10 + $0x344] ss:$16 sps:$4 sm:$0xff]  }
 0x2ee   :  { %5863 = vmatprep.subr.bf16.mxu1 %v8643_v54  ;;  %v8667_v54 = vld [vmem:[#allocation10 + $0x34c] ss:$16 sps:$4 sm:$0xff]  }
 0x2f0   :  { %5700 = vmatpush1.bf16.msra.mxu0 %v8638_v62  ;;  %v8662_v62 = vld [vmem:[#allocation10 + $0x340] ss:$16 sps:$4 sm:$0xff]  }
 0x2f1   :  { %5864 = vmatpush1.bf16.msra.mxu1 %v8641_v36  ;;  %5701 = vmatprep.subr.bf16.mxu0 %v8646_v35  ;;  %v8665_v36 = vld [vmem:[#allocation10 + $0x348] ss:$16 sps:$4 sm:$0xff]   ;;  %v8670_v35 = vld [vmem:[#allocation10 + $0x364] ss:$16 sps:$4 sm:$0xff]  }
 0x2f2   :  { %5865 = vmatprep.subr.bf16.mxu1 %v8649_v0  ;;  %v8673_v0 = vld [vmem:[#allocation10 + $0x36c] ss:$16 sps:$4 sm:$0xff]  }
 0x2f4   :  { %5702 = vmatpush1.bf16.msra.mxu0 %v8644_v46  ;;  %v8668_v46 = vld [vmem:[#allocation10 + $0x360] ss:$16 sps:$4 sm:$0xff]  }
 0x2f5   :  { %5866 = vmatpush1.bf16.msra.mxu1 %v8647_v33  ;;  %5703 = vmatprep.subr.bf16.mxu0 %v8652_v44  ;;  %v8671_v33 = vld [vmem:[#allocation10 + $0x368] ss:$16 sps:$4 sm:$0xff]   ;;  %v8676_v44 = vld [vmem:[#allocation10 + $0x384] ss:$16 sps:$4 sm:$0xff]  }
 0x2f6   :  { %5867 = vmatprep.subr.bf16.mxu1 %v8655_v55  ;;  %v8679_v55 = vld [vmem:[#allocation10 + $0x38c] ss:$16 sps:$4 sm:$0xff]  }
 0x2f8   :  { %5704 = vmatpush1.bf16.msra.mxu0 %v8650_v30  ;;  %v8674_v30 = vld [vmem:[#allocation10 + $0x380] ss:$16 sps:$4 sm:$0xff]  }
 0x2f9   :  { %5868 = vmatpush1.bf16.msra.mxu1 %v8653_v41  ;;  %5705 = vmatprep.subr.bf16.mxu0 %v8658_v17  ;;  %v11270_v41 = vsub.s32 4, %v9658_v43  ;;  %v8677_v17 = vld [vmem:[#allocation10 + $0x388] ss:$16 sps:$4 sm:$0xff]   ;;  %v8686_v43 = vld [vmem:[#allocation10 + $0x3c0] ss:$16 sps:$4 sm:$0xff]  }
 0x2fa   :  { %5869 = vmatprep.subr.bf16.mxu1 %v8661_v13  ;;  %v8682_v13 = vld [vmem:[#allocation10 + $0x3a4] ss:$16 sps:$4 sm:$0xff]  }
 0x2fc   :  { %5706 = vmatpush1.bf16.msra.mxu0 %v8656_v63  ;;  %v8685_v63 = vld [vmem:[#allocation10 + $0x3ac] ss:$16 sps:$4 sm:$0xff]  }
 0x2fd   :  { %5870 = vmatpush1.bf16.msra.mxu1 %v8659_v15  ;;  %5707 = vmatprep.subr.bf16.mxu0 %v8664_v4  ;;  %v8680_v15 = vld [vmem:[#allocation10 + $0x3a0] ss:$16 sps:$4 sm:$0xff]   ;;  %v986_v4 = vrot.slane %v11201_v12, %v11270_v41 }
 0x2fe   :  { %5871 = vmatprep.subr.bf16.mxu1 %v8667_v54  ;;  %v8683_v54 = vld [vmem:[#allocation10 + $0x3a8] ss:$16 sps:$4 sm:$0xff]  }
 0x300   :  { %5708 = vmatpush1.bf16.msra.mxu0 %v8662_v62  ;;  %v8688_v62 = vld [vmem:[#allocation10 + $0x3c4] ss:$16 sps:$4 sm:$0xff]  }
 0x301   :  { %5872 = vmatpush1.bf16.msra.mxu1 %v8665_v36  ;;  %5709 = vmatprep.subr.bf16.mxu0 %v8670_v35  ;;  %v8691_v36 = vld [vmem:[#allocation10 + $0x3cc] ss:$16 sps:$4 sm:$0xff]   ;;  %v11275_v35 = vrot.slane %v986_v4, %v11224_v52  ;;  %v8706_v4 = vld [vmem:[#allocation10 + $0x424] ss:$16 sps:$4 sm:$0xff]  }
 0x302   :  { %5873 = vmatprep.subr.bf16.mxu1 %v8673_v0  ;;  %v8689_v0 = vld [vmem:[#allocation10 + $0x3c8] ss:$16 sps:$4 sm:$0xff]  }
 0x303   :  { %12938 = vst [vmem:[#allocation502_spill] sm:$0xff] %v11275_v35  ;;  %v8322_v12 = vadd.f32 %v11108_v45, %v11275_v35  ;;  %v8707_v45 = vld [vmem:[#allocation10 + $0x428] ss:$16 sps:$4 sm:$0xff]  }
 0x304   :  { %5710 = vmatpush1.bf16.msra.mxu0 %v8668_v46  ;;  %v8694_v46 = vld [vmem:[#allocation10 + $0x3e4] ss:$16 sps:$4 sm:$0xff]   ;;  %v8797_v35 = vld [vmem:[#allocation10 + $0x608] ss:$16 sps:$4 sm:$0xff]  }
 0x305   :  { %5874 = vmatpush1.bf16.msra.mxu1 %v8671_v33  ;;  %5711 = vmatprep.subr.bf16.mxu0 %v8676_v44  ;;  %v8697_v33 = vld [vmem:[#allocation10 + $0x3ec] ss:$16 sps:$4 sm:$0xff]   ;;  %v8692_v44 = vld [vmem:[#allocation10 + $0x3e0] ss:$16 sps:$4 sm:$0xff]  }
 0x306   :  { %5875 = vmatprep.subr.bf16.mxu1 %v8679_v55  ;;  %v8695_v55 = vld [vmem:[#allocation10 + $0x3e8] ss:$16 sps:$4 sm:$0xff]  }
 0x308   :  { %5712 = vmatpush1.bf16.msra.mxu0 %v8674_v30  ;;  %v8700_v30 = vld [vmem:[#allocation10 + $0x404] ss:$16 sps:$4 sm:$0xff]  }
 0x309   :  { %5876 = vmatpush1.bf16.msra.mxu1 %v8677_v17  ;;  %5713 = vmatprep.subr.bf16.mxu0 %v8682_v13  ;;  %v8703_v17 = vld [vmem:[#allocation10 + $0x40c] ss:$16 sps:$4 sm:$0xff]   ;;  %v8698_v13 = vld [vmem:[#allocation10 + $0x400] ss:$16 sps:$4 sm:$0xff]  }
 0x30a   :  { %5877 = vmatprep.subr.bf16.mxu1 %v8685_v63  ;;  %v4323_v63 = vpack.c.bf16 %v8322_v12, %v8322_v12  ;;  %v8716_v12 = vld [vmem:[#allocation10 + $0x460] ss:$16 sps:$4 sm:$0xff]  }
 0x30c   :  { %5714 = vmatpush1.bf16.msra.mxu0 %v8680_v15  ;;  %v8701_v15 = vld [vmem:[#allocation10 + $0x408] ss:$16 sps:$4 sm:$0xff]  }
 0x30d   :  { %5878 = vmatpush1.bf16.msra.mxu1 %v8683_v54  ;;  %5715 = vmatprep.subr.bf16.mxu0 %v8688_v62  ;;  %v8709_v54 = vld [vmem:[#allocation10 + $0x42c] ss:$16 sps:$4 sm:$0xff]   ;;  %v8704_v62 = vld [vmem:[#allocation10 + $0x420] ss:$16 sps:$4 sm:$0xff]  }
 0x30e   :  { %5879 = vmatprep.subr.bf16.mxu1 %v8691_v36  ;;  %v8712_v36 = vld [vmem:[#allocation10 + $0x444] ss:$16 sps:$4 sm:$0xff]  }
 0x310   :  { %5716 = vmatpush1.bf16.msra.mxu0 %v8686_v43  ;;  %v8715_v43 = vld [vmem:[#allocation10 + $0x44c] ss:$16 sps:$4 sm:$0xff]  }
 0x311   :  { %5880 = vmatpush1.bf16.msra.mxu1 %v8689_v0  ;;  %5717 = vmatprep.subr.bf16.mxu0 %v8694_v46  ;;  %v8710_v0 = vld [vmem:[#allocation10 + $0x440] ss:$16 sps:$4 sm:$0xff]   ;;  %v8713_v46 = vld [vmem:[#allocation10 + $0x448] ss:$16 sps:$4 sm:$0xff]  }
 0x312   :  { %5881 = vmatprep.subr.bf16.mxu1 %v8697_v33  ;;  %v8718_v33 = vld [vmem:[#allocation10 + $0x464] ss:$16 sps:$4 sm:$0xff]  }
 0x314   :  { %5718 = vmatpush1.bf16.msra.mxu0 %v8692_v44  ;;  %v8721_v44 = vld [vmem:[#allocation10 + $0x46c] ss:$16 sps:$4 sm:$0xff]  }
 0x315   :  { %5882 = vmatpush1.bf16.msra.mxu1 %v8695_v55  ;;  %5728 = vmatprep.subr.bf16.mxu0 %v8700_v30  ;;  %v8719_v55 = vld [vmem:[#allocation10 + $0x468] ss:$16 sps:$4 sm:$0xff]   ;;  %v8724_v30 = vld [vmem:[#allocation10 + $0x484] ss:$16 sps:$4 sm:$0xff]  }
 0x316   :  { %5892 = vmatprep.subr.bf16.mxu1 %v8703_v17  ;;  %v8727_v17 = vld [vmem:[#allocation10 + $0x48c] ss:$16 sps:$4 sm:$0xff]  }
 0x317   :  { %5720 = vmatmul.mubr.bf16.vlgmr.msra.gmra.mrb[8].mxu0 %v4323_v63 }
 0x318   :  { %5884 = vmatmul.mubr.bf16.vlgmr.msra.gmra.mrb[8].mxu1 %v4323_v63  ;;  %5729 = vmatpush1.bf16.msra.mxu0 %v8698_v13  ;;  %v8722_v13 = vld [vmem:[#allocation10 + $0x480] ss:$16 sps:$4 sm:$0xff]   ;;  %v8725_v63 = vld [vmem:[#allocation10 + $0x488] ss:$16 sps:$4 sm:$0xff]  }
 0x319   :  { %5893 = vmatpush1.bf16.msra.mxu1 %v8701_v15  ;;  %5730 = vmatprep.subr.bf16.mxu0 %v8706_v4  ;;  %v8730_v15 = vld [vmem:[#allocation10 + $0x4a4] ss:$16 sps:$4 sm:$0xff]   ;;  %v8733_v4 = vld [vmem:[#allocation10 + $0x4ac] ss:$16 sps:$4 sm:$0xff]  }
 0x31a   :  { %5894 = vmatprep.subr.bf16.mxu1 %v8709_v54  ;;  %v8728_v54 = vld [vmem:[#allocation10 + $0x4a0] ss:$16 sps:$4 sm:$0xff]  }
 0x31c   :  { %5731 = vmatpush1.bf16.msra.mxu0 %v8704_v62  ;;  %v8731_v62 = vld [vmem:[#allocation10 + $0x4a8] ss:$16 sps:$4 sm:$0xff]  }
 0x31d   :  { %5895 = vmatpush1.bf16.msra.mxu1 %v8707_v45  ;;  %5732 = vmatprep.subr.bf16.mxu0 %v8712_v36  ;;  %v8736_v45 = vld [vmem:[#allocation10 + $0x4c4] ss:$16 sps:$4 sm:$0xff]   ;;  %v8739_v36 = vld [vmem:[#allocation10 + $0x4cc] ss:$16 sps:$4 sm:$0xff]  }
 0x31e   :  { %5896 = vmatprep.subr.bf16.mxu1 %v8715_v43  ;;  %v8734_v43 = vld [vmem:[#allocation10 + $0x4c0] ss:$16 sps:$4 sm:$0xff]  }
 0x320   :  { %5733 = vmatpush1.bf16.msra.mxu0 %v8710_v0  ;;  %v8737_v0 = vld [vmem:[#allocation10 + $0x4c8] ss:$16 sps:$4 sm:$0xff]  }
 0x321   :  { %5897 = vmatpush1.bf16.msra.mxu1 %v8713_v46  ;;  %5734 = vmatprep.subr.bf16.mxu0 %v8718_v33  ;;  %v8742_v46 = vld [vmem:[#allocation10 + $0x4e4] ss:$16 sps:$4 sm:$0xff]   ;;  %v8745_v33 = vld [vmem:[#allocation10 + $0x4ec] ss:$16 sps:$4 sm:$0xff]  }
 0x322   :  { %5898 = vmatprep.subr.bf16.mxu1 %v8721_v44  ;;  %v8740_v44 = vld [vmem:[#allocation10 + $0x4e0] ss:$16 sps:$4 sm:$0xff]  }
 0x324   :  { %5735 = vmatpush1.bf16.msra.mxu0 %v8716_v12  ;;  %v8743_v12 = vld [vmem:[#allocation10 + $0x4e8] ss:$16 sps:$4 sm:$0xff]  }
 0x325   :  { %5899 = vmatpush1.bf16.msra.mxu1 %v8719_v55  ;;  %5736 = vmatprep.subr.bf16.mxu0 %v8724_v30  ;;  %v8748_v55 = vld [vmem:[#allocation10 + $0x504] ss:$16 sps:$4 sm:$0xff]   ;;  %v8751_v30 = vld [vmem:[#allocation10 + $0x50c] ss:$16 sps:$4 sm:$0xff]  }
 0x326   :  { %5900 = vmatprep.subr.bf16.mxu1 %v8727_v17  ;;  %v8746_v17 = vld [vmem:[#allocation10 + $0x500] ss:$16 sps:$4 sm:$0xff]  }
 0x328   :  { %5737 = vmatpush1.bf16.msra.mxu0 %v8722_v13  ;;  %v8749_v13 = vld [vmem:[#allocation10 + $0x508] ss:$16 sps:$4 sm:$0xff]  }
 0x329   :  { %5901 = vmatpush1.bf16.msra.mxu1 %v8725_v63  ;;  %5738 = vmatprep.subr.bf16.mxu0 %v8730_v15  ;;  %v8754_v63 = vld [vmem:[#allocation10 + $0x524] ss:$16 sps:$4 sm:$0xff]   ;;  %v8757_v15 = vld [vmem:[#allocation10 + $0x52c] ss:$16 sps:$4 sm:$0xff]  }
 0x32a   :  { %5902 = vmatprep.subr.bf16.mxu1 %v8733_v4  ;;  %v8752_v4 = vld [vmem:[#allocation10 + $0x520] ss:$16 sps:$4 sm:$0xff]  }
 0x32c   :  { %5739 = vmatpush1.bf16.msra.mxu0 %v8728_v54  ;;  %v8755_v54 = vld [vmem:[#allocation10 + $0x528] ss:$16 sps:$4 sm:$0xff]  }
 0x32d   :  { %5903 = vmatpush1.bf16.msra.mxu1 %v8731_v62  ;;  %5740 = vmatprep.subr.bf16.mxu0 %v8736_v45  ;;  %v8760_v62 = vld [vmem:[#allocation10 + $0x544] ss:$16 sps:$4 sm:$0xff]   ;;  %v8763_v45 = vld [vmem:[#allocation10 + $0x54c] ss:$16 sps:$4 sm:$0xff]  }
 0x32e   :  { %5904 = vmatprep.subr.bf16.mxu1 %v8739_v36  ;;  %v8758_v36 = vld [vmem:[#allocation10 + $0x540] ss:$16 sps:$4 sm:$0xff]  }
 0x330   :  { %5741 = vmatpush1.bf16.msra.mxu0 %v8734_v43  ;;  %v8761_v43 = vld [vmem:[#allocation10 + $0x548] ss:$16 sps:$4 sm:$0xff]  }
 0x331   :  { %5905 = vmatpush1.bf16.msra.mxu1 %v8737_v0  ;;  %5742 = vmatprep.subr.bf16.mxu0 %v8742_v46  ;;  %v8766_v0 = vld [vmem:[#allocation10 + $0x564] ss:$16 sps:$4 sm:$0xff]   ;;  %v8769_v46 = vld [vmem:[#allocation10 + $0x56c] ss:$16 sps:$4 sm:$0xff]  }
 0x332   :  { %5906 = vmatprep.subr.bf16.mxu1 %v8745_v33  ;;  %v8764_v33 = vld [vmem:[#allocation10 + $0x560] ss:$16 sps:$4 sm:$0xff]  }
 0x334   :  { %5743 = vmatpush1.bf16.msra.mxu0 %v8740_v44  ;;  %v8767_v44 = vld [vmem:[#allocation10 + $0x568] ss:$16 sps:$4 sm:$0xff]  }
 0x335   :  { %5907 = vmatpush1.bf16.msra.mxu1 %v8743_v12  ;;  %5744 = vmatprep.subr.bf16.mxu0 %v8748_v55  ;;  %v8772_v12 = vld [vmem:[#allocation10 + $0x584] ss:$16 sps:$4 sm:$0xff]   ;;  %v8775_v55 = vld [vmem:[#allocation10 + $0x58c] ss:$16 sps:$4 sm:$0xff]  }
 0x336   :  { %5908 = vmatprep.subr.bf16.mxu1 %v8751_v30  ;;  %v8770_v30 = vld [vmem:[#allocation10 + $0x580] ss:$16 sps:$4 sm:$0xff]  }
 0x338   :  { %5745 = vmatpush1.bf16.msra.mxu0 %v8746_v17  ;;  %v8773_v17 = vld [vmem:[#allocation10 + $0x588] ss:$16 sps:$4 sm:$0xff]  }
 0x339   :  { %5909 = vmatpush1.bf16.msra.mxu1 %v8749_v13  ;;  %5746 = vmatprep.subr.bf16.mxu0 %v8754_v63  ;;  %v8778_v13 = vld [vmem:[#allocation10 + $0x5a4] ss:$16 sps:$4 sm:$0xff]   ;;  %v8781_v63 = vld [vmem:[#allocation10 + $0x5ac] ss:$16 sps:$4 sm:$0xff]  }
 0x33a   :  { %5910 = vmatprep.subr.bf16.mxu1 %v8757_v15  ;;  %v8776_v15 = vld [vmem:[#allocation10 + $0x5a0] ss:$16 sps:$4 sm:$0xff]  }
 0x33c   :  { %5747 = vmatpush1.bf16.msra.mxu0 %v8752_v4  ;;  %v8779_v4 = vld [vmem:[#allocation10 + $0x5a8] ss:$16 sps:$4 sm:$0xff]  }
 0x33d   :  { %5911 = vmatpush1.bf16.msra.mxu1 %v8755_v54  ;;  %5748 = vmatprep.subr.bf16.mxu0 %v8760_v62  ;;  %v8784_v54 = vld [vmem:[#allocation10 + $0x5c4] ss:$16 sps:$4 sm:$0xff]   ;;  %v8787_v62 = vld [vmem:[#allocation10 + $0x5cc] ss:$16 sps:$4 sm:$0xff]  }
 0x33e   :  { %5912 = vmatprep.subr.bf16.mxu1 %v8763_v45  ;;  %v8782_v45 = vld [vmem:[#allocation10 + $0x5c0] ss:$16 sps:$4 sm:$0xff]  }
 0x340   :  { %5749 = vmatpush1.bf16.msra.mxu0 %v8758_v36  ;;  %v8785_v36 = vld [vmem:[#allocation10 + $0x5c8] ss:$16 sps:$4 sm:$0xff]  }
 0x341   :  { %5913 = vmatpush1.bf16.msra.mxu1 %v8761_v43  ;;  %5750 = vmatprep.subr.bf16.mxu0 %v8766_v0  ;;  %v8790_v43 = vld [vmem:[#allocation10 + $0x5e4] ss:$16 sps:$4 sm:$0xff]   ;;  %v8793_v0 = vld [vmem:[#allocation10 + $0x5ec] ss:$16 sps:$4 sm:$0xff]  }
 0x342   :  { %5914 = vmatprep.subr.bf16.mxu1 %v8769_v46  ;;  %v8788_v46 = vld [vmem:[#allocation10 + $0x5e0] ss:$16 sps:$4 sm:$0xff]  }
 0x344   :  { %5751 = vmatpush1.bf16.msra.mxu0 %v8764_v33  ;;  %v8791_v33 = vld [vmem:[#allocation10 + $0x5e8] ss:$16 sps:$4 sm:$0xff]  }
 0x345   :  { %5915 = vmatpush1.bf16.msra.mxu1 %v8767_v44  ;;  %5752 = vmatprep.subr.bf16.mxu0 %v8772_v12  ;;  %v8796_v44 = vld [vmem:[#allocation10 + $0x604] ss:$16 sps:$4 sm:$0xff]   ;;  %v8799_v12 = vld [vmem:[#allocation10 + $0x60c] ss:$16 sps:$4 sm:$0xff]  }
 0x346   :  { %5916 = vmatprep.subr.bf16.mxu1 %v8775_v55  ;;  %v11280_v55 = vunpack.c.h.bf16 %v11186_v59 }
 0x348   :  { %5753 = vmatpush1.bf16.msra.mxu0 %v8770_v30  ;;  %v994_v30 = vrot.slane %v11280_v55, %v11224_v52 }
 0x349   :  { %5917 = vmatpush1.bf16.msra.mxu1 %v8773_v17  ;;  %5754 = vmatprep.subr.bf16.mxu0 %v8778_v13  ;;  %v998_v17 = vrot.slane %v11280_v55, %v11204_v51  ;;  %v1006_v13 = vrot.slane %v11280_v55, %v11253_v61 }
 0x34a   :  { %5918 = vmatprep.subr.bf16.mxu1 %v8781_v63  ;;  %v11289_v63 = vrot.slane %v994_v30, %v11224_v52 }
 0x34c   :  { %5755 = vmatpush1.bf16.msra.mxu0 %v8776_v15  ;;  %12939 = vst [vmem:[#allocation503_spill] sm:$0xff] %v11289_v63  ;;  %v11292_v15 = vrot.slane %v998_v17, %v11224_v52  ;;  %v8794_v17 = vld [vmem:[#allocation10 + $0x600] ss:$16 sps:$4 sm:$0xff]  }
 0x34d   :  { %5919 = vmatpush1.bf16.msra.mxu1 %v8779_v4  ;;  %5756 = vmatprep.subr.bf16.mxu0 %v8784_v54  ;;  %v11295_v4 = vrot.slane %v1006_v13, %v11224_v52 }
 0x34e   :  { %5920 = vmatprep.subr.bf16.mxu1 %v8787_v62 }
 0x350   :  { %5757 = vmatpush1.bf16.msra.mxu0 %v8782_v45 }
 0x351   :  { %5921 = vmatpush1.bf16.msra.mxu1 %v8785_v36  ;;  %5758 = vmatprep.subr.bf16.mxu0 %v8790_v43 }
 0x352   :  { %5922 = vmatprep.subr.bf16.mxu1 %v8793_v0 }
 0x354   :  { %5759 = vmatpush1.bf16.msra.mxu0 %v8788_v46 }
 0x355   :  { %5923 = vmatpush1.bf16.msra.mxu1 %v8791_v33  ;;  %5769 = vmatprep.subr.bf16.mxu0 %v8796_v44 }
 0x356   :  { %5933 = vmatprep.subr.bf16.mxu1 %v8799_v12 }
 0x36a   :  { %v4150_v59 = vpop.f32.mrb[4].mxu0  ;;  %v11298_v62 = vpop.f32.mrb[4].mxu1 }
 0x36b   :  { %v8324_v54 = vadd.f32 %v4150_v59, %v11289_v63  ;;  %v4152_v45 = vpop.f32.mrb[5].mxu0  ;;  %v4316_v43 = vpop.f32.mrb[5].mxu1  ;;  %v8805_v59 = vld [vmem:[#allocation10 + $0x62c] ss:$16 sps:$4 sm:$0xff]  }
 0x36c   :  { %v8325_v36 = vadd.f32 %v4152_v45, %v11292_v15  ;;  %v4154_v0 = vpop.f32.mrb[6].mxu0  ;;  %v8327_v46 = vadd.f32 %v4316_v43, %v11295_v4  ;;  %v4318_v33 = vpop.f32.mrb[6].mxu1  ;;  %v8800_v45 = vld [vmem:[#allocation10 + $0x620] ss:$16 sps:$4 sm:$0xff]   ;;  %v8808_v43 = vld [vmem:[#allocation10 + $0x644] ss:$16 sps:$4 sm:$0xff]  }
 0x36d   :  { %v4155_v44 = vpop.f32.mrb[7].mxu0  ;;  %v4319_v30 = vpop.f32.mrb[7].mxu1  ;;  %v4325_v13 = vpack.c.bf16 %v8324_v54, %v8324_v54  ;;  %v8803_v0 = vld [vmem:[#allocation10 + $0x628] ss:$16 sps:$4 sm:$0xff]   ;;  %v8811_v33 = vld [vmem:[#allocation10 + $0x64c] ss:$16 sps:$4 sm:$0xff]  }
 0x36e   :  { %v4326_v12 = vpack.c.bf16 %v8325_v36, %v8325_v36  ;;  %v4328_v63 = vpack.c.bf16 %v8327_v46, %v8327_v46  ;;  %v8806_v54 = vld [vmem:[#allocation10 + $0x640] ss:$16 sps:$4 sm:$0xff]   ;;  %v8809_v36 = vld [vmem:[#allocation10 + $0x648] ss:$16 sps:$4 sm:$0xff]   ;;  %v8814_v44 = vld [vmem:[#allocation10 + $0x664] ss:$16 sps:$4 sm:$0xff]  }
 0x36f   :  { %v8817_v46 = vld [vmem:[#allocation10 + $0x66c] ss:$16 sps:$4 sm:$0xff]   ;;  %v8820_v30 = vld [vmem:[#allocation10 + $0x684] ss:$16 sps:$4 sm:$0xff]  }
 0x370   :  { %5760 = vmatprep.mubr.bf16.mxu0 %v4326_v12  ;;  %5924 = vmatprep.mubr.bf16.mxu1 %v4326_v12  ;;  %v8812_v12 = vld [vmem:[#allocation10 + $0x660] ss:$16 sps:$4 sm:$0xff]  }
 0x371   :  { %5761 = vmatmul.mubr.bf16.vlgmr.msra.gmra.mrb[8].mxu0 %v4325_v13  ;;  %5925 = vmatmul.mubr.bf16.vlgmr.msra.gmra.mrb[8].mxu1 %v4325_v13  ;;  %v8826_v13 = vld [vmem:[#allocation10 + $0x6a4] ss:$16 sps:$4 sm:$0xff]  }
 0x372   :  { %5770 = vmatpush1.bf16.msra.mxu0 %v8794_v17  ;;  %5934 = vmatpush1.bf16.msra.mxu1 %v8797_v35  ;;  %v8815_v35 = vld [vmem:[#allocation10 + $0x668] ss:$16 sps:$4 sm:$0xff]  }
 0x373   :  { %5801 = vmatprep.mubr.bf16.mxu0 %v4328_v63  ;;  %5965 = vmatprep.mubr.bf16.mxu1 %v4328_v63  ;;  %v8823_v63 = vld [vmem:[#allocation10 + $0x68c] ss:$16 sps:$4 sm:$0xff]   ;;  %v8821_v17 = vld [vmem:[#allocation10 + $0x688] ss:$16 sps:$4 sm:$0xff]  }
 0x374   :  { %5771 = vmatprep.subr.bf16.mxu0 %v8802_v32  ;;  %5935 = vmatprep.subr.bf16.mxu1 %v8805_v59  ;;  %v8818_v32 = vld [vmem:[#allocation10 + $0x680] ss:$16 sps:$4 sm:$0xff]   ;;  %v8829_v59 = vld [vmem:[#allocation10 + $0x6ac] ss:$16 sps:$4 sm:$0xff]  }
 0x376   :  { %5772 = vmatpush1.bf16.msra.mxu0 %v8800_v45  ;;  %5936 = vmatpush1.bf16.msra.mxu1 %v8803_v0  ;;  %v8824_v45 = vld [vmem:[#allocation10 + $0x6a0] ss:$16 sps:$4 sm:$0xff]   ;;  %v8827_v0 = vld [vmem:[#allocation10 + $0x6a8] ss:$16 sps:$4 sm:$0xff]  }
 0x377   :  { %5773 = vmatprep.subr.bf16.mxu0 %v8808_v43  ;;  %5937 = vmatprep.subr.bf16.mxu1 %v8811_v33  ;;  %v8832_v43 = vld [vmem:[#allocation10 + $0x6c4] ss:$16 sps:$4 sm:$0xff]   ;;  %v8835_v33 = vld [vmem:[#allocation10 + $0x6cc] ss:$16 sps:$4 sm:$0xff]  }
 0x37a   :  { %5774 = vmatpush1.bf16.msra.mxu0 %v8806_v54  ;;  %5938 = vmatpush1.bf16.msra.mxu1 %v8809_v36  ;;  %v8830_v54 = vld [vmem:[#allocation10 + $0x6c0] ss:$16 sps:$4 sm:$0xff]   ;;  %v8833_v36 = vld [vmem:[#allocation10 + $0x6c8] ss:$16 sps:$4 sm:$0xff]  }
 0x37b   :  { %5775 = vmatprep.subr.bf16.mxu0 %v8814_v44  ;;  %5939 = vmatprep.subr.bf16.mxu1 %v8817_v46  ;;  %v8838_v44 = vld [vmem:[#allocation10 + $0x6e4] ss:$16 sps:$4 sm:$0xff]   ;;  %v8841_v46 = vld [vmem:[#allocation10 + $0x6ec] ss:$16 sps:$4 sm:$0xff]  }
 0x37e   :  { %5776 = vmatpush1.bf16.msra.mxu0 %v8812_v12  ;;  %5940 = vmatpush1.bf16.msra.mxu1 %v8815_v35  ;;  %v8836_v12 = vld [vmem:[#allocation10 + $0x6e0] ss:$16 sps:$4 sm:$0xff]   ;;  %v8839_v35 = vld [vmem:[#allocation10 + $0x6e8] ss:$16 sps:$4 sm:$0xff]  }
 0x37f   :  { %5777 = vmatprep.subr.bf16.mxu0 %v8820_v30  ;;  %5941 = vmatprep.subr.bf16.mxu1 %v8823_v63  ;;  %v8844_v30 = vld [vmem:[#allocation10 + $0x704] ss:$16 sps:$4 sm:$0xff]   ;;  %v8847_v63 = vld [vmem:[#allocation10 + $0x70c] ss:$16 sps:$4 sm:$0xff]  }
 0x382   :  { %5778 = vmatpush1.bf16.msra.mxu0 %v8818_v32  ;;  %5942 = vmatpush1.bf16.msra.mxu1 %v8821_v17  ;;  %v8842_v32 = vld [vmem:[#allocation10 + $0x700] ss:$16 sps:$4 sm:$0xff]   ;;  %v8845_v17 = vld [vmem:[#allocation10 + $0x708] ss:$16 sps:$4 sm:$0xff]  }
 0x383   :  { %5779 = vmatprep.subr.bf16.mxu0 %v8826_v13  ;;  %5943 = vmatprep.subr.bf16.mxu1 %v8829_v59  ;;  %v8850_v13 = vld [vmem:[#allocation10 + $0x724] ss:$16 sps:$4 sm:$0xff]   ;;  %v8853_v59 = vld [vmem:[#allocation10 + $0x72c] ss:$16 sps:$4 sm:$0xff]  }
 0x386   :  { %5780 = vmatpush1.bf16.msra.mxu0 %v8824_v45  ;;  %5944 = vmatpush1.bf16.msra.mxu1 %v8827_v0  ;;  %v8848_v45 = vld [vmem:[#allocation10 + $0x720] ss:$16 sps:$4 sm:$0xff]   ;;  %v8851_v0 = vld [vmem:[#allocation10 + $0x728] ss:$16 sps:$4 sm:$0xff]  }
 0x387   :  { %5781 = vmatprep.subr.bf16.mxu0 %v8832_v43  ;;  %5945 = vmatprep.subr.bf16.mxu1 %v8835_v33  ;;  %v8856_v43 = vld [vmem:[#allocation10 + $0x744] ss:$16 sps:$4 sm:$0xff]   ;;  %v8859_v33 = vld [vmem:[#allocation10 + $0x74c] ss:$16 sps:$4 sm:$0xff]  }
 0x38a   :  { %5782 = vmatpush1.bf16.msra.mxu0 %v8830_v54  ;;  %5946 = vmatpush1.bf16.msra.mxu1 %v8833_v36  ;;  %v8854_v54 = vld [vmem:[#allocation10 + $0x740] ss:$16 sps:$4 sm:$0xff]   ;;  %v8857_v36 = vld [vmem:[#allocation10 + $0x748] ss:$16 sps:$4 sm:$0xff]  }
 0x38b   :  { %5783 = vmatprep.subr.bf16.mxu0 %v8838_v44  ;;  %5947 = vmatprep.subr.bf16.mxu1 %v8841_v46  ;;  %v8862_v44 = vld [vmem:[#allocation10 + $0x764] ss:$16 sps:$4 sm:$0xff]   ;;  %v8865_v46 = vld [vmem:[#allocation10 + $0x76c] ss:$16 sps:$4 sm:$0xff]  }
 0x38e   :  { %5784 = vmatpush1.bf16.msra.mxu0 %v8836_v12  ;;  %5948 = vmatpush1.bf16.msra.mxu1 %v8839_v35  ;;  %v8860_v12 = vld [vmem:[#allocation10 + $0x760] ss:$16 sps:$4 sm:$0xff]   ;;  %v8863_v35 = vld [vmem:[#allocation10 + $0x768] ss:$16 sps:$4 sm:$0xff]  }
 0x38f   :  { %5785 = vmatprep.subr.bf16.mxu0 %v8844_v30  ;;  %5949 = vmatprep.subr.bf16.mxu1 %v8847_v63  ;;  %v8868_v30 = vld [vmem:[#allocation10 + $0x784] ss:$16 sps:$4 sm:$0xff]   ;;  %v8871_v63 = vld [vmem:[#allocation10 + $0x78c] ss:$16 sps:$4 sm:$0xff]  }
 0x392   :  { %5786 = vmatpush1.bf16.msra.mxu0 %v8842_v32  ;;  %5950 = vmatpush1.bf16.msra.mxu1 %v8845_v17  ;;  %v8866_v32 = vld [vmem:[#allocation10 + $0x780] ss:$16 sps:$4 sm:$0xff]   ;;  %v8869_v17 = vld [vmem:[#allocation10 + $0x788] ss:$16 sps:$4 sm:$0xff]  }
 0x393   :  { %5787 = vmatprep.subr.bf16.mxu0 %v8850_v13  ;;  %5951 = vmatprep.subr.bf16.mxu1 %v8853_v59  ;;  %v8874_v13 = vld [vmem:[#allocation10 + $0x7a4] ss:$16 sps:$4 sm:$0xff]   ;;  %v8877_v59 = vld [vmem:[#allocation10 + $0x7ac] ss:$16 sps:$4 sm:$0xff]  }
 0x396   :  { %5788 = vmatpush1.bf16.msra.mxu0 %v8848_v45  ;;  %5952 = vmatpush1.bf16.msra.mxu1 %v8851_v0  ;;  %v8872_v45 = vld [vmem:[#allocation10 + $0x7a0] ss:$16 sps:$4 sm:$0xff]   ;;  %v8875_v0 = vld [vmem:[#allocation10 + $0x7a8] ss:$16 sps:$4 sm:$0xff]  }
 0x397   :  { %5789 = vmatprep.subr.bf16.mxu0 %v8856_v43  ;;  %5953 = vmatprep.subr.bf16.mxu1 %v8859_v33  ;;  %v1002_v43 = vrot.slane %v11280_v55, %v11270_v41  ;;  %v8880_v33 = vld [vmem:[#allocation10 + $0x7c4] ss:$16 sps:$4 sm:$0xff]  }
 0x39a   :  { %5790 = vmatpush1.bf16.msra.mxu0 %v8854_v54  ;;  %5954 = vmatpush1.bf16.msra.mxu1 %v8857_v36  ;;  %v8883_v54 = vld [vmem:[#allocation10 + $0x7cc] ss:$16 sps:$4 sm:$0xff]   ;;  %v8878_v36 = vld [vmem:[#allocation10 + $0x7c0] ss:$16 sps:$4 sm:$0xff]  }
 0x39b   :  { %5791 = vmatprep.subr.bf16.mxu0 %v8862_v44  ;;  %5955 = vmatprep.subr.bf16.mxu1 %v8865_v46  ;;  %v8881_v44 = vld [vmem:[#allocation10 + $0x7c8] ss:$16 sps:$4 sm:$0xff]   ;;  %v11305_v46 = vrot.slane %v1002_v43, %v11224_v52  ;;  %v8895_v43 = vld [vmem:[#allocation13 + $0xc8] sm:$0xff]  }
 0x39d   :  { %12940 = vst [vmem:[#allocation504_spill] sm:$0xff] %v11305_v46  ;;  %v8326_v55 = vadd.f32 %v11298_v62, %v11305_v46  ;;  %v8898_v62 = vld [vmem:[#allocation13 + $0x50] sm:$0xff]  }
 0x39e   :  { %5792 = vmatpush1.bf16.msra.mxu0 %v8860_v12  ;;  %5956 = vmatpush1.bf16.msra.mxu1 %v8863_v35  ;;  %v8886_v12 = vld [vmem:[#allocation10 + $0x7e4] ss:$16 sps:$4 sm:$0xff]   ;;  %v8889_v35 = vld [vmem:[#allocation10 + $0x7ec] ss:$16 sps:$4 sm:$0xff]  }
 0x39f   :  { %5793 = vmatprep.subr.bf16.mxu0 %v8868_v30  ;;  %5957 = vmatprep.subr.bf16.mxu1 %v8871_v63  ;;  %v8884_v30 = vld [vmem:[#allocation10 + $0x7e0] ss:$16 sps:$4 sm:$0xff]   ;;  %v8887_v63 = vld [vmem:[#allocation10 + $0x7e8] ss:$16 sps:$4 sm:$0xff]  }
 0x3a2   :  { %5794 = vmatpush1.bf16.msra.mxu0 %v8866_v32  ;;  %5958 = vmatpush1.bf16.msra.mxu1 %v8869_v17  ;;  %v8890_v32 = vld [vmem:[#allocation13 + $0x40] sm:$0xff]  }
 0x3a3   :  { %5795 = vmatprep.subr.bf16.mxu0 %v8874_v13  ;;  %5959 = vmatprep.subr.bf16.mxu1 %v8877_v59  ;;  %v8891_v17 = vld [vmem:[#allocation13 + $0xc0] sm:$0xff]  }
 0x3a4   :  { %v8892_v13 = vld [vmem:[#allocation13] sm:$0xff]  }
 0x3a5   :  { %v8893_v59 = vld [vmem:[#allocation13 + $0x80] sm:$0xff]  }
 0x3a6   :  { %5796 = vmatpush1.bf16.msra.mxu0 %v8872_v45  ;;  %5960 = vmatpush1.bf16.msra.mxu1 %v8875_v0  ;;  %v4327_v45 = vpack.c.bf16 %v8326_v55, %v8326_v55  ;;  %v8894_v0 = vld [vmem:[#allocation13 + $0x48] sm:$0xff]   ;;  %v8905_v55 = vld [vmem:[#allocation13 + $0x98] sm:$0xff]  }
 0x3a7   :  { %5797 = vmatprep.subr.bf16.mxu0 %v8880_v33  ;;  %5961 = vmatprep.subr.bf16.mxu1 %v8883_v54  ;;  %v8896_v33 = vld [vmem:[#allocation13 + $0x8] sm:$0xff]  }
 0x3a8   :  { %v8897_v54 = vld [vmem:[#allocation13 + $0x88] sm:$0xff]  }
 0x3aa   :  { %5798 = vmatpush1.bf16.msra.mxu0 %v8878_v36  ;;  %5962 = vmatpush1.bf16.msra.mxu1 %v8881_v44  ;;  %v8899_v36 = vld [vmem:[#allocation13 + $0xd0] sm:$0xff]  }
 0x3ab   :  { %5799 = vmatprep.subr.bf16.mxu0 %v8886_v12  ;;  %5963 = vmatprep.subr.bf16.mxu1 %v8889_v35  ;;  %v8900_v44 = vld [vmem:[#allocation13 + $0x10] sm:$0xff]   ;;  %v8902_v35 = vld [vmem:[#allocation13 + $0x58] sm:$0xff]  }
 0x3ac   :  { %v8901_v12 = vld [vmem:[#allocation13 + $0x90] sm:$0xff]  }
 0x3ae   :  { %5800 = vmatpush1.bf16.msra.mxu0 %v8884_v30  ;;  %5964 = vmatpush1.bf16.msra.mxu1 %v8887_v63  ;;  %v8903_v30 = vld [vmem:[#allocation13 + $0xd8] sm:$0xff]  }
 0x3af   :  { %8232 = vmatprep.subr.bf16.mxu0 %v8890_v32  ;;  %8254 = vmatprep.subr.bf16.mxu1 %v8891_v17  ;;  %v8904_v63 = vld [vmem:[#allocation13 + $0x18] sm:$0xff]   ;;  %v8906_v32 = vld [vmem:[#allocation13 + $0x60] sm:$0xff]  }
 0x3b0   :  { %v8907_v17 = vld [vmem:[#allocation13 + $0xe0] sm:$0xff]  }
 0x3b1   :  { %5802 = vmatmul.mubr.bf16.vlgmr.msra.gmra.mrb[8].mxu0 %v4327_v45  ;;  %5966 = vmatmul.mubr.bf16.vlgmr.msra.gmra.mrb[8].mxu1 %v4327_v45  ;;  %v8910_v45 = vld [vmem:[#allocation13 + $0x68] sm:$0xff]  }
 0x3b2   :  { %8233 = vmatpush3.bf16.msra.mxu0 %v8892_v13  ;;  %8255 = vmatpush3.bf16.msra.mxu1 %v8893_v59  ;;  %v8908_v13 = vld [vmem:[#allocation13 + $0x20] sm:$0xff]  }
 0x3b3   :  { %8234 = vmatprep.subr.bf16.mxu0 %v8894_v0  ;;  %8256 = vmatprep.subr.bf16.mxu1 %v8895_v43  ;;  %v8909_v59 = vld [vmem:[#allocation13 + $0xa0] sm:$0xff]   ;;  %v8911_v0 = vld [vmem:[#allocation13 + $0xe8] sm:$0xff]  }
 0x3b4   :  { %v8912_v43 = vld [vmem:[#allocation13 + $0x28] sm:$0xff]  }
 0x3b6   :  { %8235 = vmatpush3.bf16.msra.mxu0 %v8896_v33  ;;  %8257 = vmatpush3.bf16.msra.mxu1 %v8897_v54  ;;  %v8913_v33 = vld [vmem:[#allocation13 + $0xa8] sm:$0xff]   ;;  %v8914_v54 = vld [vmem:[#allocation13 + $0x70] sm:$0xff]  }
 0x3b7   :  { %8236 = vmatprep.subr.bf16.mxu0 %v8898_v62  ;;  %8258 = vmatprep.subr.bf16.mxu1 %v8899_v36  ;;  %v8915_v62 = vld [vmem:[#allocation13 + $0xf0] sm:$0xff]  }
 0x3b8   :  { %v8916_v36 = vld [vmem:[#allocation13 + $0x30] sm:$0xff]  }
 0x3ba   :  { %8237 = vmatpush3.bf16.msra.mxu0 %v8900_v44  ;;  %8259 = vmatpush3.bf16.msra.mxu1 %v8901_v12  ;;  %v8917_v44 = vld [vmem:[#allocation13 + $0xb0] sm:$0xff]   ;;  %v8918_v12 = vld [vmem:[#allocation13 + $0x78] sm:$0xff]  }
 0x3bb   :  { %8238 = vmatprep.subr.bf16.mxu0 %v8902_v35  ;;  %8260 = vmatprep.subr.bf16.mxu1 %v8903_v30  ;;  %v8919_v35 = vld [vmem:[#allocation13 + $0xf8] sm:$0xff]  }
 0x3bc   :  { %v8920_v30 = vld [vmem:[#allocation13 + $0x38] sm:$0xff]  }
 0x3be   :  { %8239 = vmatpush3.bf16.msra.mxu0 %v8904_v63  ;;  %8261 = vmatpush3.bf16.msra.mxu1 %v8905_v55  ;;  %v8921_v63 = vld [vmem:[#allocation13 + $0xb8] sm:$0xff]  }
 0x3bf   :  { %8240 = vmatprep.subr.bf16.mxu0 %v8906_v32  ;;  %8262 = vmatprep.subr.bf16.mxu1 %v8907_v17  ;;  %v968_v55 = vld [vmem:[#allocation11] sm:$0xf] }
 0x3c0   :  { %v969_v32 = vunpack.c.l.bf16 %v968_v55 }
 0x3c2   :  { %8241 = vmatpush3.bf16.msra.mxu0 %v8908_v13  ;;  %8263 = vmatpush3.bf16.msra.mxu1 %v8909_v59  ;;  %v4333_v17 = vrot.slane %v969_v32, %v11224_v52  ;;  %v4341_v13 = vrot.slane %v969_v32, %v11270_v41  ;;  %v4337_v59 = vrot.slane %v969_v32, %v11204_v51 }
 0x3c3   :  { %8242 = vmatprep.subr.bf16.mxu0 %v8910_v45  ;;  %8264 = vmatprep.subr.bf16.mxu1 %v8911_v0  ;;  %v4345_v45 = vrot.slane %v969_v32, %v11253_v61 }
 0x3c4   :  { %v11316_v0 = vrot.slane %v4333_v17, %v11224_v52 }
 0x3c6   :  { %8243 = vmatpush3.bf16.msra.mxu0 %v8912_v43  ;;  %8265 = vmatpush3.bf16.msra.mxu1 %v8913_v33  ;;  %12941 = vst [vmem:[#allocation505_spill] sm:$0xff] %v11316_v0  ;;  %v11319_v43 = vrot.slane %v4341_v13, %v11224_v52  ;;  %v11321_v33 = vld [vmem:[#allocation5] sm:$0xff] }
 0x3c7   :  { %8244 = vmatprep.subr.bf16.mxu0 %v8914_v54  ;;  %8266 = vmatprep.subr.bf16.mxu1 %v8915_v62  ;;  %v11331_v51 = vrot.slane %v11321_v33, %v9673_v53 }
 0x3c8   :  { %12942 = vst [vmem:[#allocation506_spill] sm:$0xff] %v11319_v43 }
 0x3c9   :  { %v6276_v46 = vcombine.high %v11331_v51, %v11331_v51 }
 0x3ca   :  { %8245 = vmatpush3.bf16.msra.mxu0 %v8916_v36  ;;  %8267 = vmatpush3.bf16.msra.mxu1 %v8917_v44 }
 0x3cb   :  { %8246 = vmatprep.subr.bf16.mxu0 %v8918_v12  ;;  %8268 = vmatprep.subr.bf16.mxu1 %v8919_v35 }
 0x3ce   :  { %8247 = vmatpush3.bf16.msra.mxu0 %v8920_v30  ;;  %8269 = vmatpush3.bf16.msra.mxu1 %v8921_v63 }
 0x3cf   :  { %6318 = vmatprep.subr.bf16.mxu0 %v9608_v3  ;;  %6482 = vmatprep.subr.bf16.mxu1 %v9612_v8  ;;  %v11324_v3 = vrot.slane %v4337_v59, %v11224_v52  ;;  %v11327_v8 = vrot.slane %v4345_v45, %v11224_v52 }
 0x484   :  { %v5803_v54 = vpop.f32.mrb[8].mxu0  ;;  %v5967_v41 = vpop.f32.mrb[8].mxu1 }
 0x485   :  { %v8328_v61 = vadd.f32 %v5803_v54, %v11316_v0  ;;  %v8330_v62 = vadd.f32 %v5967_v41, %v11319_v43  ;;  %v5805_v36 = vpop.f32.mrb[9].mxu0  ;;  %v5969_v44 = vpop.f32.mrb[9].mxu1 }
 0x486   :  { %v8329_v12 = vadd.f32 %v5805_v36, %v11324_v3  ;;  %v8331_v35 = vadd.f32 %v5969_v44, %v11327_v8  ;;  %v5807_v30 = vpop.f32.mrb[10].mxu0  ;;  %v5971_v63 = vpop.f32.mrb[10].mxu1  ;;  %v11340_v36 = vrot.slane %v6276_v46, %v9673_v53  ;;  %v12974_v46 = vld [vmem:[#allocation57_spill] sm:$0xff]  ;;  %v12980_v44 = vld [vmem:[#allocation63_spill] sm:$0xff] }
 0x487   :  { %v5974_v55 = vmax.f32 %v8328_v61, 0.0  ;;  %v5976_v32 = vmax.f32 %v8330_v62, 0.0  ;;  %v5808_v17 = vpop.f32.mrb[11].mxu0  ;;  %v5972_v13 = vpop.f32.mrb[11].mxu1  ;;  %v12978_v61 = vld [vmem:[#allocation61_spill] sm:$0xff]  ;;  %v12979_v62 = vld [vmem:[#allocation62_spill] sm:$0xff] }
 0x488   :  { %v5975_v59 = vmax.f32 %v8329_v12, 0.0  ;;  %v5977_v45 = vmax.f32 %v8331_v35, 0.0  ;;  %v12981_v12 = vld [vmem:[#allocation64_spill] sm:$0xff]  ;;  %v12982_v35 = vld [vmem:[#allocation65_spill] sm:$0xff]  ;;  %v12983_v30 = vld [vmem:[#allocation66_spill] sm:$0xff] }
 0x489   :  { %v5978_v41 = vpack.c.bf16 %v5974_v55, %v5974_v55  ;;  %v5980_v43 = vpack.c.bf16 %v5976_v32, %v5976_v32  ;;  %v12984_v63 = vld [vmem:[#allocation67_spill] sm:$0xff]  ;;  %v12985_v55 = vld [vmem:[#allocation68_spill] sm:$0xff]  ;;  %v12986_v32 = vld [vmem:[#allocation69_spill] sm:$0xff] }
 0x48a   :  { %v5979_v54 = vpack.c.bf16 %v5975_v59, %v5975_v59  ;;  %v5981_v0 = vpack.c.bf16 %v5977_v45, %v5977_v45  ;;  %v12987_v17 = vld [vmem:[#allocation70_spill] sm:$0xff]  ;;  %v12988_v13 = vld [vmem:[#allocation71_spill] sm:$0xff]  ;;  %v12989_v59 = vld [vmem:[#allocation72_spill] sm:$0xff] }
 0x48b   :  { %v12990_v45 = vld [vmem:[#allocation73_spill] sm:$0xff] }
 0x48c   :  { %6210 = vmatprep.mubr.bf16.mxu0 %v5979_v54  ;;  %6250 = vmatprep.mubr.bf16.mxu1 %v5981_v0  ;;  %v12975_v0 = vld [vmem:[#allocation58_spill] sm:$0xff] }
 0x48d   :  { %6211 = vmatmul.mubr.bf16.vlgmr.msra.gmra.mrb[12].mxu0 %v5978_v41  ;;  %6251 = vmatmul.mubr.bf16.vlgmr.msra.gmra.mrb[12].mxu1 %v5980_v43  ;;  %v12976_v43 = vld [vmem:[#allocation59_spill] sm:$0xff]  ;;  %v12991_v54 = vld [vmem:[#allocation74_spill] sm:$0xff] }
 0x48e   :  { %6319 = vmatpush1.bf16.msra.mxu0 %v9610_v5  ;;  %6483 = vmatpush1.bf16.msra.mxu1 %v9614_v9  ;;  %v12943_v5 = vld [vmem:[#allocation26_spill] sm:$0xff]  ;;  %v12944_v9 = vld [vmem:[#allocation27_spill] sm:$0xff] }
 0x48f   :  { %6320 = vmatprep.subr.bf16.mxu0 %v9616_v10  ;;  %6484 = vmatprep.subr.bf16.mxu1 %v9619_v14  ;;  %v12945_v10 = vld [vmem:[#allocation28_spill] sm:$0xff]  ;;  %v12946_v14 = vld [vmem:[#allocation29_spill] sm:$0xff]  ;;  %v12992_v41 = vld [vmem:[#allocation75_spill] sm:$0xff] }
 0x490   :  { %6350 = vmatprep.mubr.bf16.mxu0 %v11340_v36  ;;  %6514 = vmatprep.mubr.bf16.mxu1 %v11340_v36 }
 0x492   :  { %6321 = vmatpush1.bf16.msra.mxu0 %v9623_v18  ;;  %6485 = vmatpush1.bf16.msra.mxu1 %v9627_v19  ;;  %v12947_v18 = vld [vmem:[#allocation30_spill] sm:$0xff]  ;;  %v12948_v19 = vld [vmem:[#allocation31_spill] sm:$0xff] }
 0x493   :  { %6322 = vmatprep.subr.bf16.mxu0 %v9629_v20  ;;  %6486 = vmatprep.subr.bf16.mxu1 %v9632_v21  ;;  %v12949_v20 = vld [vmem:[#allocation32_spill] sm:$0xff]  ;;  %v12950_v21 = vld [vmem:[#allocation33_spill] sm:$0xff] }
 0x496   :  { %6323 = vmatpush1.bf16.msra.mxu0 %v9635_v26  ;;  %6487 = vmatpush1.bf16.msra.mxu1 %v9639_v27  ;;  %v12951_v26 = vld [vmem:[#allocation34_spill] sm:$0xff]  ;;  %v12952_v27 = vld [vmem:[#allocation35_spill] sm:$0xff] }
 0x497   :  { %6324 = vmatprep.subr.bf16.mxu0 %v9641_v28  ;;  %6488 = vmatprep.subr.bf16.mxu1 %v9644_v29  ;;  %v12953_v28 = vld [vmem:[#allocation36_spill] sm:$0xff]  ;;  %v12954_v29 = vld [vmem:[#allocation37_spill] sm:$0xff] }
 0x49a   :  { %6325 = vmatpush1.bf16.msra.mxu0 %v9647_v37  ;;  %6489 = vmatpush1.bf16.msra.mxu1 %v9651_v38  ;;  %v12955_v37 = vld [vmem:[#allocation38_spill] sm:$0xff]  ;;  %v12956_v38 = vld [vmem:[#allocation39_spill] sm:$0xff] }
 0x49b   :  { %6326 = vmatprep.subr.bf16.mxu0 %v9653_v39  ;;  %6490 = vmatprep.subr.bf16.mxu1 %v9656_v40  ;;  %v12957_v39 = vld [vmem:[#allocation40_spill] sm:$0xff]  ;;  %v12958_v40 = vld [vmem:[#allocation41_spill] sm:$0xff] }
 0x49e   :  { %6327 = vmatpush1.bf16.msra.mxu0 %v9661_v47  ;;  %6491 = vmatpush1.bf16.msra.mxu1 %v9665_v48  ;;  %v12959_v47 = vld [vmem:[#allocation42_spill] sm:$0xff]  ;;  %v12960_v48 = vld [vmem:[#allocation43_spill] sm:$0xff] }
 0x49f   :  { %6328 = vmatprep.subr.bf16.mxu0 %v9667_v49  ;;  %6492 = vmatprep.subr.bf16.mxu1 %v9670_v50  ;;  %v12961_v49 = vld [vmem:[#allocation44_spill] sm:$0xff]  ;;  %v12962_v50 = vld [vmem:[#allocation45_spill] sm:$0xff] }
 0x4a2   :  { %6329 = vmatpush1.bf16.msra.mxu0 %v9676_v56  ;;  %6493 = vmatpush1.bf16.msra.mxu1 %v9680_v57  ;;  %v12963_v56 = vld [vmem:[#allocation46_spill] sm:$0xff]  ;;  %v12964_v57 = vld [vmem:[#allocation47_spill] sm:$0xff] }
 0x4a3   :  { %6330 = vmatprep.subr.bf16.mxu0 %v9682_v58  ;;  %6494 = vmatprep.subr.bf16.mxu1 %v9687_v60  ;;  %v12965_v58 = vld [vmem:[#allocation48_spill] sm:$0xff]  ;;  %v12966_v60 = vld [vmem:[#allocation49_spill] sm:$0xff] }
 0x4a6   :  { %6331 = vmatpush1.bf16.msra.mxu0 %v9694_v2  ;;  %6495 = vmatpush1.bf16.msra.mxu1 %v9700_v6  ;;  %v12967_v2 = vld [vmem:[#allocation50_spill] sm:$0xff]  ;;  %v12968_v6 = vld [vmem:[#allocation51_spill] sm:$0xff] }
 0x4a7   :  { %6332 = vmatprep.subr.bf16.mxu0 %v9702_v7  ;;  %6496 = vmatprep.subr.bf16.mxu1 %v9705_v11  ;;  %v12969_v7 = vld [vmem:[#allocation52_spill] sm:$0xff]  ;;  %v11406_v11 = vrot.slane %v11331_v51, %v9673_v53 }
 0x4a8   :  { %v12977_v51 = vld [vmem:[#allocation60_spill] sm:$0xff] }
 0x4aa   :  { %6333 = vmatpush1.bf16.msra.mxu0 %v9711_v22  ;;  %6497 = vmatpush1.bf16.msra.mxu1 %v9716_v23  ;;  %v12970_v22 = vld [vmem:[#allocation53_spill] sm:$0xff]  ;;  %v12971_v23 = vld [vmem:[#allocation54_spill] sm:$0xff] }
 0x4ab   :  { %6334 = vmatprep.subr.bf16.mxu0 %v9718_v24  ;;  %6498 = vmatprep.subr.bf16.mxu1 %v9721_v25  ;;  %v12972_v24 = vld [vmem:[#allocation55_spill] sm:$0xff]  ;;  %v12973_v25 = vld [vmem:[#allocation56_spill] sm:$0xff] }
 0x4ae   :  { %6335 = vmatpush1.bf16.msra.mxu0 %v9725_v34  ;;  %6499 = vmatpush1.bf16.msra.mxu1 %v12943_v5  ;;  %v11414_v34 = vcombine.high %v11340_v36, %v11340_v36  ;;  %v12993_v5 = vld [vmem:[#allocation76_spill] sm:$0xff] }
 0x4af   :  { %6336 = vmatprep.subr.bf16.mxu0 %v12944_v9  ;;  %6500 = vmatprep.subr.bf16.mxu1 %v12945_v10  ;;  %v12994_v9 = vld [vmem:[#allocation77_spill] sm:$0xff]  ;;  %v12995_v10 = vld [vmem:[#allocation78_spill] sm:$0xff] }
 0x4b2   :  { %6337 = vmatpush1.bf16.msra.mxu0 %v12946_v14  ;;  %6501 = vmatpush1.bf16.msra.mxu1 %v12947_v18  ;;  %v12996_v14 = vld [vmem:[#allocation79_spill] sm:$0xff]  ;;  %v12997_v18 = vld [vmem:[#allocation80_spill] sm:$0xff] }
 0x4b3   :  { %6338 = vmatprep.subr.bf16.mxu0 %v12948_v19  ;;  %6502 = vmatprep.subr.bf16.mxu1 %v12949_v20  ;;  %v12998_v19 = vld [vmem:[#allocation81_spill] sm:$0xff]  ;;  %v12999_v20 = vld [vmem:[#allocation82_spill] sm:$0xff] }
 0x4b6   :  { %6339 = vmatpush1.bf16.msra.mxu0 %v12950_v21  ;;  %6503 = vmatpush1.bf16.msra.mxu1 %v12951_v26  ;;  %v13000_v21 = vld [vmem:[#allocation83_spill] sm:$0xff]  ;;  %v13001_v26 = vld [vmem:[#allocation84_spill] sm:$0xff] }
 0x4b7   :  { %6340 = vmatprep.subr.bf16.mxu0 %v12952_v27  ;;  %6504 = vmatprep.subr.bf16.mxu1 %v12953_v28  ;;  %v13002_v27 = vld [vmem:[#allocation85_spill] sm:$0xff]  ;;  %v13003_v28 = vld [vmem:[#allocation86_spill] sm:$0xff] }
 0x4ba   :  { %6341 = vmatpush1.bf16.msra.mxu0 %v12954_v29  ;;  %6505 = vmatpush1.bf16.msra.mxu1 %v12955_v37  ;;  %v13004_v29 = vld [vmem:[#allocation87_spill] sm:$0xff]  ;;  %v13005_v37 = vld [vmem:[#allocation88_spill] sm:$0xff] }
 0x4bb   :  { %6342 = vmatprep.subr.bf16.mxu0 %v12956_v38  ;;  %6506 = vmatprep.subr.bf16.mxu1 %v12957_v39  ;;  %v13006_v38 = vld [vmem:[#allocation89_spill] sm:$0xff]  ;;  %v13007_v39 = vld [vmem:[#allocation90_spill] sm:$0xff] }
 0x4be   :  { %6343 = vmatpush1.bf16.msra.mxu0 %v12958_v40  ;;  %6507 = vmatpush1.bf16.msra.mxu1 %v12959_v47  ;;  %v13008_v40 = vld [vmem:[#allocation91_spill] sm:$0xff]  ;;  %v13009_v47 = vld [vmem:[#allocation92_spill] sm:$0xff] }
 0x4bf   :  { %6344 = vmatprep.subr.bf16.mxu0 %v12960_v48  ;;  %6508 = vmatprep.subr.bf16.mxu1 %v12961_v49  ;;  %v13010_v48 = vld [vmem:[#allocation93_spill] sm:$0xff]  ;;  %v13011_v49 = vld [vmem:[#allocation94_spill] sm:$0xff] }
 0x4c2   :  { %6345 = vmatpush1.bf16.msra.mxu0 %v12962_v50  ;;  %6509 = vmatpush1.bf16.msra.mxu1 %v12963_v56  ;;  %v13012_v50 = vld [vmem:[#allocation95_spill] sm:$0xff]  ;;  %v13013_v56 = vld [vmem:[#allocation96_spill] sm:$0xff] }
 0x4c3   :  { %6346 = vmatprep.subr.bf16.mxu0 %v12964_v57  ;;  %6510 = vmatprep.subr.bf16.mxu1 %v12965_v58  ;;  %v13014_v57 = vld [vmem:[#allocation97_spill] sm:$0xff]  ;;  %v13015_v58 = vld [vmem:[#allocation98_spill] sm:$0xff] }
 0x4c6   :  { %6347 = vmatpush1.bf16.msra.mxu0 %v12966_v60  ;;  %6511 = vmatpush1.bf16.msra.mxu1 %v12967_v2  ;;  %v13016_v60 = vld [vmem:[#allocation99_spill] sm:$0xff]  ;;  %v13017_v2 = vld [vmem:[#allocation100_spill] sm:$0xff] }
 0x4c7   :  { %6348 = vmatprep.subr.bf16.mxu0 %v12968_v6  ;;  %6512 = vmatprep.subr.bf16.mxu1 %v12969_v7  ;;  %v13018_v6 = vld [vmem:[#allocation101_spill] sm:$0xff]  ;;  %v13019_v7 = vld [vmem:[#allocation102_spill] sm:$0xff] }
 0x4ca   :  { %6349 = vmatpush1.bf16.msra.mxu0 %v12970_v22  ;;  %6513 = vmatpush1.bf16.msra.mxu1 %v12971_v23  ;;  %v13020_v22 = vld [vmem:[#allocation103_spill] sm:$0xff]  ;;  %v13021_v23 = vld [vmem:[#allocation104_spill] sm:$0xff] }
 0x4cb   :  { %6359 = vmatprep.subr.bf16.mxu0 %v12972_v24  ;;  %6523 = vmatprep.subr.bf16.mxu1 %v12973_v25  ;;  %v13022_v24 = vld [vmem:[#allocation105_spill] sm:$0xff]  ;;  %v13023_v25 = vld [vmem:[#allocation106_spill] sm:$0xff] }
 0x4cd   :  { %6351 = vmatmul.mubr.bf16.vlgmr.msra.gmra.mrb[16].mxu0 %v11406_v11  ;;  %6515 = vmatmul.mubr.bf16.vlgmr.msra.gmra.mrb[16].mxu1 %v11406_v11 }
 0x4ce   :  { %6360 = vmatpush1.bf16.msra.mxu0 %v12974_v46  ;;  %6524 = vmatpush1.bf16.msra.mxu1 %v12975_v0  ;;  %v13024_v46 = vld [vmem:[#allocation107_spill] sm:$0xff]  ;;  %v13025_v0 = vld [vmem:[#allocation108_spill] sm:$0xff] }
 0x4cf   :  { %6361 = vmatprep.subr.bf16.mxu0 %v12976_v43  ;;  %6525 = vmatprep.subr.bf16.mxu1 %v12977_v51  ;;  %v6261_v43 = vcombine.high %v11321_v33, %v11321_v33  ;;  %v13026_v51 = vld [vmem:[#allocation109_spill] sm:$0xff] }
 0x4d0   :  { %6391 = vmatprep.mubr.bf16.mxu0 %v11414_v34  ;;  %6555 = vmatprep.mubr.bf16.mxu1 %v11414_v34 }
 0x4d2   :  { %6362 = vmatpush1.bf16.msra.mxu0 %v12978_v61  ;;  %6526 = vmatpush1.bf16.msra.mxu1 %v12979_v62  ;;  %v13027_v61 = vld [vmem:[#allocation110_spill] sm:$0xff]  ;;  %v13028_v62 = vld [vmem:[#allocation111_spill] sm:$0xff] }
 0x4d3   :  { %6363 = vmatprep.subr.bf16.mxu0 %v12980_v44  ;;  %6527 = vmatprep.subr.bf16.mxu1 %v12981_v12  ;;  %v13029_v44 = vld [vmem:[#allocation112_spill] sm:$0xff]  ;;  %v11479_v12 = vrot.slane %v6261_v43, %v9673_v53  ;;  %v13072_v43 = vld [vmem:[#allocation155_spill] sm:$0xff] }
 0x4d5   :  { %v6277_v33 = vcombine.high %v11479_v12, %v11479_v12 }
 0x4d6   :  { %6364 = vmatpush1.bf16.msra.mxu0 %v12982_v35  ;;  %6528 = vmatpush1.bf16.msra.mxu1 %v12983_v30  ;;  %v13030_v35 = vld [vmem:[#allocation113_spill] sm:$0xff]  ;;  %v13031_v30 = vld [vmem:[#allocation114_spill] sm:$0xff] }
 0x4d7   :  { %6365 = vmatprep.subr.bf16.mxu0 %v12984_v63  ;;  %6529 = vmatprep.subr.bf16.mxu1 %v12985_v55  ;;  %v13032_v63 = vld [vmem:[#allocation115_spill] sm:$0xff]  ;;  %v13033_v55 = vld [vmem:[#allocation116_spill] sm:$0xff] }
 0x4da   :  { %6366 = vmatpush1.bf16.msra.mxu0 %v12986_v32  ;;  %6530 = vmatpush1.bf16.msra.mxu1 %v12987_v17  ;;  %v11489_v32 = vcombine.high %v11406_v11, %v11406_v11  ;;  %v13034_v17 = vld [vmem:[#allocation117_spill] sm:$0xff] }
 0x4db   :  { %6367 = vmatprep.subr.bf16.mxu0 %v12988_v13  ;;  %6531 = vmatprep.subr.bf16.mxu1 %v12989_v59  ;;  %v13035_v13 = vld [vmem:[#allocation118_spill] sm:$0xff]  ;;  %v13036_v59 = vld [vmem:[#allocation119_spill] sm:$0xff] }
 0x4de   :  { %6368 = vmatpush1.bf16.msra.mxu0 %v12990_v45  ;;  %6532 = vmatpush1.bf16.msra.mxu1 %v12991_v54  ;;  %v13037_v45 = vld [vmem:[#allocation120_spill] sm:$0xff]  ;;  %v11496_v54 = vrot.slane %v6277_v33, %v9673_v53 }
 0x4df   :  { %6369 = vmatprep.subr.bf16.mxu0 %v12992_v41  ;;  %6533 = vmatprep.subr.bf16.mxu1 %v12993_v5  ;;  %v13038_v41 = vld [vmem:[#allocation121_spill] sm:$0xff]  ;;  %v13039_v5 = vld [vmem:[#allocation122_spill] sm:$0xff]  ;;  %v13081_v33 = vld [vmem:[#allocation164_spill] sm:$0xff] }
 0x4e2   :  { %6370 = vmatpush1.bf16.msra.mxu0 %v12994_v9  ;;  %6534 = vmatpush1.bf16.msra.mxu1 %v12995_v10  ;;  %v13040_v9 = vld [vmem:[#allocation123_spill] sm:$0xff]  ;;  %v13041_v10 = vld [vmem:[#allocation124_spill] sm:$0xff] }
 0x4e3   :  { %6371 = vmatprep.subr.bf16.mxu0 %v12996_v14  ;;  %6535 = vmatprep.subr.bf16.mxu1 %v12997_v18  ;;  %v13042_v14 = vld [vmem:[#allocation125_spill] sm:$0xff]  ;;  %v13043_v18 = vld [vmem:[#allocation126_spill] sm:$0xff] }
 0x4e6   :  { %6372 = vmatpush1.bf16.msra.mxu0 %v12998_v19  ;;  %6536 = vmatpush1.bf16.msra.mxu1 %v12999_v20  ;;  %v13044_v19 = vld [vmem:[#allocation127_spill] sm:$0xff]  ;;  %v13045_v20 = vld [vmem:[#allocation128_spill] sm:$0xff] }
 0x4e7   :  { %6373 = vmatprep.subr.bf16.mxu0 %v13000_v21  ;;  %6537 = vmatprep.subr.bf16.mxu1 %v13001_v26  ;;  %v13046_v21 = vld [vmem:[#allocation129_spill] sm:$0xff]  ;;  %v13047_v26 = vld [vmem:[#allocation130_spill] sm:$0xff] }
 0x4ea   :  { %6374 = vmatpush1.bf16.msra.mxu0 %v13002_v27  ;;  %6538 = vmatpush1.bf16.msra.mxu1 %v13003_v28  ;;  %v13048_v27 = vld [vmem:[#allocation131_spill] sm:$0xff]  ;;  %v13049_v28 = vld [vmem:[#allocation132_spill] sm:$0xff] }
 0x4eb   :  { %6375 = vmatprep.subr.bf16.mxu0 %v13004_v29  ;;  %6539 = vmatprep.subr.bf16.mxu1 %v13005_v37  ;;  %v13050_v29 = vld [vmem:[#allocation133_spill] sm:$0xff]  ;;  %v13051_v37 = vld [vmem:[#allocation134_spill] sm:$0xff] }
 0x4ee   :  { %6376 = vmatpush1.bf16.msra.mxu0 %v13006_v38  ;;  %6540 = vmatpush1.bf16.msra.mxu1 %v13007_v39  ;;  %v13052_v38 = vld [vmem:[#allocation135_spill] sm:$0xff]  ;;  %v13053_v39 = vld [vmem:[#allocation136_spill] sm:$0xff] }
 0x4ef   :  { %6377 = vmatprep.subr.bf16.mxu0 %v13008_v40  ;;  %6541 = vmatprep.subr.bf16.mxu1 %v13009_v47  ;;  %v13054_v40 = vld [vmem:[#allocation137_spill] sm:$0xff]  ;;  %v13055_v47 = vld [vmem:[#allocation138_spill] sm:$0xff] }
 0x4f2   :  { %6378 = vmatpush1.bf16.msra.mxu0 %v13010_v48  ;;  %6542 = vmatpush1.bf16.msra.mxu1 %v13011_v49  ;;  %v13056_v48 = vld [vmem:[#allocation139_spill] sm:$0xff]  ;;  %v13057_v49 = vld [vmem:[#allocation140_spill] sm:$0xff] }
 0x4f3   :  { %6379 = vmatprep.subr.bf16.mxu0 %v13012_v50  ;;  %6543 = vmatprep.subr.bf16.mxu1 %v13013_v56  ;;  %v13058_v50 = vld [vmem:[#allocation141_spill] sm:$0xff]  ;;  %v13059_v56 = vld [vmem:[#allocation142_spill] sm:$0xff] }
 0x4f6   :  { %6380 = vmatpush1.bf16.msra.mxu0 %v13014_v57  ;;  %6544 = vmatpush1.bf16.msra.mxu1 %v13015_v58  ;;  %v13060_v57 = vld [vmem:[#allocation143_spill] sm:$0xff]  ;;  %v13061_v58 = vld [vmem:[#allocation144_spill] sm:$0xff] }
 0x4f7   :  { %6381 = vmatprep.subr.bf16.mxu0 %v13016_v60  ;;  %6545 = vmatprep.subr.bf16.mxu1 %v13017_v2  ;;  %v13062_v60 = vld [vmem:[#allocation145_spill] sm:$0xff]  ;;  %v13063_v2 = vld [vmem:[#allocation146_spill] sm:$0xff] }
 0x4fa   :  { %6382 = vmatpush1.bf16.msra.mxu0 %v13018_v6  ;;  %6546 = vmatpush1.bf16.msra.mxu1 %v13019_v7  ;;  %v13064_v6 = vld [vmem:[#allocation147_spill] sm:$0xff]  ;;  %v13065_v7 = vld [vmem:[#allocation148_spill] sm:$0xff] }
 0x4fb   :  { %6383 = vmatprep.subr.bf16.mxu0 %v13020_v22  ;;  %6547 = vmatprep.subr.bf16.mxu1 %v13021_v23  ;;  %v13066_v22 = vld [vmem:[#allocation149_spill] sm:$0xff]  ;;  %v13067_v23 = vld [vmem:[#allocation150_spill] sm:$0xff] }
 0x4fe   :  { %6384 = vmatpush1.bf16.msra.mxu0 %v13022_v24  ;;  %6548 = vmatpush1.bf16.msra.mxu1 %v13023_v25  ;;  %v13068_v24 = vld [vmem:[#allocation151_spill] sm:$0xff]  ;;  %v13069_v25 = vld [vmem:[#allocation152_spill] sm:$0xff] }
 0x4ff   :  { %6385 = vmatprep.subr.bf16.mxu0 %v13024_v46  ;;  %6549 = vmatprep.subr.bf16.mxu1 %v13025_v0  ;;  %v13070_v46 = vld [vmem:[#allocation153_spill] sm:$0xff]  ;;  %v13071_v0 = vld [vmem:[#allocation154_spill] sm:$0xff] }
 0x502   :  { %6386 = vmatpush1.bf16.msra.mxu0 %v13026_v51  ;;  %6550 = vmatpush1.bf16.msra.mxu1 %v13027_v61  ;;  %v13073_v51 = vld [vmem:[#allocation156_spill] sm:$0xff]  ;;  %v13074_v61 = vld [vmem:[#allocation157_spill] sm:$0xff] }
 0x503   :  { %6387 = vmatprep.subr.bf16.mxu0 %v13028_v62  ;;  %6551 = vmatprep.subr.bf16.mxu1 %v13029_v44  ;;  %v13075_v62 = vld [vmem:[#allocation158_spill] sm:$0xff]  ;;  %v13076_v44 = vld [vmem:[#allocation159_spill] sm:$0xff] }
 0x506   :  { %6388 = vmatpush1.bf16.msra.mxu0 %v13030_v35  ;;  %6552 = vmatpush1.bf16.msra.mxu1 %v13031_v30  ;;  %v13077_v35 = vld [vmem:[#allocation160_spill] sm:$0xff]  ;;  %v13078_v30 = vld [vmem:[#allocation161_spill] sm:$0xff] }
 0x507   :  { %6389 = vmatprep.subr.bf16.mxu0 %v13032_v63  ;;  %6553 = vmatprep.subr.bf16.mxu1 %v13033_v55  ;;  %v13079_v63 = vld [vmem:[#allocation162_spill] sm:$0xff]  ;;  %v13080_v55 = vld [vmem:[#allocation163_spill] sm:$0xff] }
 0x50a   :  { %6390 = vmatpush1.bf16.msra.mxu0 %v13034_v17  ;;  %6554 = vmatpush1.bf16.msra.mxu1 %v13035_v13  ;;  %v13082_v17 = vld [vmem:[#allocation165_spill] sm:$0xff]  ;;  %v13083_v13 = vld [vmem:[#allocation166_spill] sm:$0xff] }
 0x50b   :  { %6400 = vmatprep.subr.bf16.mxu0 %v13036_v59  ;;  %6564 = vmatprep.subr.bf16.mxu1 %v13037_v45  ;;  %v13084_v59 = vld [vmem:[#allocation167_spill] sm:$0xff]  ;;  %v13085_v45 = vld [vmem:[#allocation168_spill] sm:$0xff] }
 0x50d   :  { %6392 = vmatmul.mubr.bf16.vlgmr.msra.gmra.mrb[16].mxu0 %v11489_v32  ;;  %6556 = vmatmul.mubr.bf16.vlgmr.msra.gmra.mrb[16].mxu1 %v11489_v32 }
 0x50e   :  { %6401 = vmatpush1.bf16.msra.mxu0 %v13038_v41  ;;  %6565 = vmatpush1.bf16.msra.mxu1 %v13039_v5  ;;  %v13086_v41 = vld [vmem:[#allocation169_spill] sm:$0xff]  ;;  %v13087_v5 = vld [vmem:[#allocation170_spill] sm:$0xff] }
 0x50f   :  { %6402 = vmatprep.subr.bf16.mxu0 %v13040_v9  ;;  %6566 = vmatprep.subr.bf16.mxu1 %v13041_v10  ;;  %v13088_v9 = vld [vmem:[#allocation171_spill] sm:$0xff]  ;;  %v13089_v10 = vld [vmem:[#allocation172_spill] sm:$0xff] }
 0x510   :  { %6432 = vmatprep.mubr.bf16.mxu0 %v11496_v54  ;;  %6596 = vmatprep.mubr.bf16.mxu1 %v11496_v54 }
 0x512   :  { %6403 = vmatpush1.bf16.msra.mxu0 %v13042_v14  ;;  %6567 = vmatpush1.bf16.msra.mxu1 %v13043_v18  ;;  %v13090_v14 = vld [vmem:[#allocation173_spill] sm:$0xff]  ;;  %v13091_v18 = vld [vmem:[#allocation174_spill] sm:$0xff] }
 0x513   :  { %6404 = vmatprep.subr.bf16.mxu0 %v13044_v19  ;;  %6568 = vmatprep.subr.bf16.mxu1 %v13045_v20  ;;  %v13092_v19 = vld [vmem:[#allocation175_spill] sm:$0xff]  ;;  %v13093_v20 = vld [vmem:[#allocation176_spill] sm:$0xff] }
 0x516   :  { %6405 = vmatpush1.bf16.msra.mxu0 %v13046_v21  ;;  %6569 = vmatpush1.bf16.msra.mxu1 %v13047_v26  ;;  %v13094_v21 = vld [vmem:[#allocation177_spill] sm:$0xff]  ;;  %v13095_v26 = vld [vmem:[#allocation178_spill] sm:$0xff] }
 0x517   :  { %6406 = vmatprep.subr.bf16.mxu0 %v13048_v27  ;;  %6570 = vmatprep.subr.bf16.mxu1 %v13049_v28  ;;  %v13096_v27 = vld [vmem:[#allocation179_spill] sm:$0xff]  ;;  %v13097_v28 = vld [vmem:[#allocation180_spill] sm:$0xff] }
 0x51a   :  { %6407 = vmatpush1.bf16.msra.mxu0 %v13050_v29  ;;  %6571 = vmatpush1.bf16.msra.mxu1 %v13051_v37  ;;  %v11564_v29 = vrot.slane %v11479_v12, %v9673_v53  ;;  %v13098_v37 = vld [vmem:[#allocation181_spill] sm:$0xff]  ;;  %v13103_v53 = vld [vmem:[#allocation186_spill] sm:$0xff]  ;;  %v13104_v12 = vld [vmem:[#allocation187_spill] sm:$0xff] }
 0x51b   :  { %6408 = vmatprep.subr.bf16.mxu0 %v13052_v38  ;;  %6572 = vmatprep.subr.bf16.mxu1 %v13053_v39  ;;  %v13099_v38 = vld [vmem:[#allocation182_spill] sm:$0xff]  ;;  %v13100_v39 = vld [vmem:[#allocation183_spill] sm:$0xff] }
 0x51e   :  { %6409 = vmatpush1.bf16.msra.mxu0 %v13054_v40  ;;  %6573 = vmatpush1.bf16.msra.mxu1 %v13055_v47  ;;  %v13101_v40 = vld [vmem:[#allocation184_spill] sm:$0xff]  ;;  %v11572_v47 = vcombine.high %v11496_v54, %v11496_v54 }
 0x51f   :  { %6410 = vmatprep.subr.bf16.mxu0 %v13056_v48  ;;  %6574 = vmatprep.subr.bf16.mxu1 %v13057_v49  ;;  %v13102_v48 = vld [vmem:[#allocation185_spill] sm:$0xff]  ;;  %v13105_v49 = vld [vmem:[#allocation188_spill] sm:$0xff] }
 0x522   :  { %6411 = vmatpush1.bf16.msra.mxu0 %v13058_v50  ;;  %6575 = vmatpush1.bf16.msra.mxu1 %v13059_v56  ;;  %v13106_v50 = vld [vmem:[#allocation189_spill] sm:$0xff]  ;;  %v13107_v56 = vld [vmem:[#allocation190_spill] sm:$0xff] }
 0x523   :  { %6412 = vmatprep.subr.bf16.mxu0 %v13060_v57  ;;  %6576 = vmatprep.subr.bf16.mxu1 %v13061_v58  ;;  %v13108_v57 = vld [vmem:[#allocation191_spill] sm:$0xff]  ;;  %v13109_v58 = vld [vmem:[#allocation192_spill] sm:$0xff] }
 0x526   :  { %6413 = vmatpush1.bf16.msra.mxu0 %v13062_v60  ;;  %6577 = vmatpush1.bf16.msra.mxu1 %v13063_v2  ;;  %v13110_v60 = vld [vmem:[#allocation193_spill] sm:$0xff]  ;;  %v13111_v2 = vld [vmem:[#allocation194_spill] sm:$0xff] }
 0x527   :  { %6414 = vmatprep.subr.bf16.mxu0 %v13064_v6  ;;  %6578 = vmatprep.subr.bf16.mxu1 %v13065_v7  ;;  %v13112_v6 = vld [vmem:[#allocation195_spill] sm:$0xff]  ;;  %v13113_v7 = vld [vmem:[#allocation196_spill] sm:$0xff] }
 0x52a   :  { %6415 = vmatpush1.bf16.msra.mxu0 %v13066_v22  ;;  %6579 = vmatpush1.bf16.msra.mxu1 %v13067_v23  ;;  %v970_v22 = vld [vmem:[#allocation14] sm:$0x1] }
 0x52b   :  { %6416 = vmatprep.subr.bf16.mxu0 %v13068_v24  ;;  %6580 = vmatprep.subr.bf16.mxu1 %v13069_v25  ;;  %v13114_v23 = vld [vmem:[#allocation197_spill] sm:$0xff]  ;;  %v13115_v24 = vld [vmem:[#allocation198_spill] sm:$0xff]  ;;  %v13116_v25 = vld [vmem:[#allocation199_spill] sm:$0xff] }
 0x52e   :  { %6417 = vmatpush1.bf16.msra.mxu0 %v13070_v46  ;;  %6581 = vmatpush1.bf16.msra.mxu1 %v13071_v0  ;;  %v13117_v46 = vld [vmem:[#allocation200_spill] sm:$0xff]  ;;  %v971_v0 = vunpack.c.l.bf16 %v970_v22  ;;  %v13148_v22 = vld [vmem:[#allocation231_spill] sm:$0xff] }
 0x52f   :  { %6418 = vmatprep.subr.bf16.mxu0 %v13072_v43  ;;  %6582 = vmatprep.subr.bf16.mxu1 %v13073_v51  ;;  %v13118_v43 = vld [vmem:[#allocation201_spill] sm:$0xff]  ;;  %v13119_v51 = vld [vmem:[#allocation202_spill] sm:$0xff] }
 0x532   :  { %6419 = vmatpush1.bf16.msra.mxu0 %v13074_v61  ;;  %6583 = vmatpush1.bf16.msra.mxu1 %v13075_v62  ;;  %v13120_v61 = vld [vmem:[#allocation203_spill] sm:$0xff]  ;;  %v13121_v62 = vld [vmem:[#allocation204_spill] sm:$0xff] }
 0x533   :  { %6420 = vmatprep.subr.bf16.mxu0 %v13076_v44  ;;  %6584 = vmatprep.subr.bf16.mxu1 %v13077_v35 }
 0x536   :  { %6421 = vmatpush1.bf16.msra.mxu0 %v13078_v30  ;;  %6585 = vmatpush1.bf16.msra.mxu1 %v13079_v63  ;;  %v11599_v30 = vrot.slane %v971_v0, %v11224_v52  ;;  %v13153_v0 = vld [vmem:[#allocation236_spill] sm:$0xff] }
 0x537   :  { %6422 = vmatprep.subr.bf16.mxu0 %v13080_v55  ;;  %6586 = vmatprep.subr.bf16.mxu1 %v13081_v33 }
 0x53a   :  { %6423 = vmatpush1.bf16.msra.mxu0 %v13082_v17  ;;  %6587 = vmatpush1.bf16.msra.mxu1 %v13083_v13  ;;  %v13122_v13 = vld [vmem:[#allocation205_spill] sm:$0xff] }
 0x53b   :  { %6424 = vmatprep.subr.bf16.mxu0 %v13084_v59  ;;  %6588 = vmatprep.subr.bf16.mxu1 %v13085_v45  ;;  %v13123_v59 = vld [vmem:[#allocation206_spill] sm:$0xff] }
 0x53e   :  { %6425 = vmatpush1.bf16.msra.mxu0 %v13086_v41  ;;  %6589 = vmatpush1.bf16.msra.mxu1 %v13087_v5 }
 0x53f   :  { %6426 = vmatprep.subr.bf16.mxu0 %v13088_v9  ;;  %6590 = vmatprep.subr.bf16.mxu1 %v13089_v10  ;;  %v13124_v10 = vld [vmem:[#allocation207_spill] sm:$0xff] }
 0x542   :  { %6427 = vmatpush1.bf16.msra.mxu0 %v13090_v14  ;;  %6591 = vmatpush1.bf16.msra.mxu1 %v13091_v18  ;;  %v13125_v14 = vld [vmem:[#allocation208_spill] sm:$0xff] }
 0x543   :  { %6428 = vmatprep.subr.bf16.mxu0 %v13092_v19  ;;  %6592 = vmatprep.subr.bf16.mxu1 %v13093_v20  ;;  %v13126_v19 = vld [vmem:[#allocation209_spill] sm:$0xff]  ;;  %v13127_v20 = vld [vmem:[#allocation210_spill] sm:$0xff] }
 0x546   :  { %6429 = vmatpush1.bf16.msra.mxu0 %v13094_v21  ;;  %6593 = vmatpush1.bf16.msra.mxu1 %v13095_v26  ;;  %v13128_v21 = vld [vmem:[#allocation211_spill] sm:$0xff]  ;;  %v13129_v26 = vld [vmem:[#allocation212_spill] sm:$0xff] }
 0x547   :  { %6430 = vmatprep.subr.bf16.mxu0 %v13096_v27  ;;  %6594 = vmatprep.subr.bf16.mxu1 %v13097_v28  ;;  %v13130_v27 = vld [vmem:[#allocation213_spill] sm:$0xff]  ;;  %v13131_v28 = vld [vmem:[#allocation214_spill] sm:$0xff] }
 0x54a   :  { %6431 = vmatpush1.bf16.msra.mxu0 %v13098_v37  ;;  %6595 = vmatpush1.bf16.msra.mxu1 %v13099_v38  ;;  %v13132_v37 = vld [vmem:[#allocation215_spill] sm:$0xff]  ;;  %v13133_v38 = vld [vmem:[#allocation216_spill] sm:$0xff] }
 0x54b   :  { %6441 = vmatprep.subr.bf16.mxu0 %v13100_v39  ;;  %6605 = vmatprep.subr.bf16.mxu1 %v13101_v40  ;;  %v13134_v39 = vld [vmem:[#allocation217_spill] sm:$0xff]  ;;  %v13135_v40 = vld [vmem:[#allocation218_spill] sm:$0xff] }
 0x54d   :  { %6433 = vmatmul.mubr.bf16.vlgmr.msra.gmra.mrb[16].mxu0 %v11564_v29  ;;  %6597 = vmatmul.mubr.bf16.vlgmr.msra.gmra.mrb[16].mxu1 %v11564_v29 }
 0x54e   :  { %6442 = vmatpush1.bf16.msra.mxu0 %v13102_v48  ;;  %6606 = vmatpush1.bf16.msra.mxu1 %v13103_v53  ;;  %v13136_v48 = vld [vmem:[#allocation219_spill] sm:$0xff]  ;;  %v13137_v53 = vld [vmem:[#allocation220_spill] sm:$0xff] }
 0x54f   :  { %6443 = vmatprep.subr.bf16.mxu0 %v13104_v12  ;;  %6607 = vmatprep.subr.bf16.mxu1 %v13105_v49  ;;  %v13138_v12 = vld [vmem:[#allocation221_spill] sm:$0xff]  ;;  %v13139_v49 = vld [vmem:[#allocation222_spill] sm:$0xff] }
 0x550   :  { %6473 = vmatprep.mubr.bf16.mxu0 %v11572_v47  ;;  %6637 = vmatprep.mubr.bf16.mxu1 %v11572_v47 }
 0x552   :  { %6444 = vmatpush1.bf16.msra.mxu0 %v13106_v50  ;;  %6608 = vmatpush1.bf16.msra.mxu1 %v13107_v56  ;;  %v13140_v50 = vld [vmem:[#allocation223_spill] sm:$0xff]  ;;  %v13141_v56 = vld [vmem:[#allocation224_spill] sm:$0xff] }
 0x553   :  { %6445 = vmatprep.subr.bf16.mxu0 %v13108_v57  ;;  %6609 = vmatprep.subr.bf16.mxu1 %v13109_v58  ;;  %v13142_v57 = vld [vmem:[#allocation225_spill] sm:$0xff]  ;;  %v13143_v58 = vld [vmem:[#allocation226_spill] sm:$0xff] }
 0x556   :  { %6446 = vmatpush1.bf16.msra.mxu0 %v13110_v60  ;;  %6610 = vmatpush1.bf16.msra.mxu1 %v13111_v2  ;;  %v13144_v60 = vld [vmem:[#allocation227_spill] sm:$0xff]  ;;  %v13145_v2 = vld [vmem:[#allocation228_spill] sm:$0xff] }
 0x557   :  { %6447 = vmatprep.subr.bf16.mxu0 %v13112_v6  ;;  %6611 = vmatprep.subr.bf16.mxu1 %v13113_v7  ;;  %v13146_v6 = vld [vmem:[#allocation229_spill] sm:$0xff]  ;;  %v13147_v7 = vld [vmem:[#allocation230_spill] sm:$0xff] }
 0x55a   :  { %6448 = vmatpush1.bf16.msra.mxu0 %v13114_v23  ;;  %6612 = vmatpush1.bf16.msra.mxu1 %v13115_v24  ;;  %v13149_v23 = vld [vmem:[#allocation232_spill] sm:$0xff]  ;;  %v13150_v24 = vld [vmem:[#allocation233_spill] sm:$0xff] }
 0x55b   :  { %6449 = vmatprep.subr.bf16.mxu0 %v13116_v25  ;;  %6613 = vmatprep.subr.bf16.mxu1 %v13117_v46  ;;  %v13151_v25 = vld [vmem:[#allocation234_spill] sm:$0xff]  ;;  %v13152_v46 = vld [vmem:[#allocation235_spill] sm:$0xff] }
 0x55e   :  { %6450 = vmatpush1.bf16.msra.mxu0 %v13118_v43  ;;  %6614 = vmatpush1.bf16.msra.mxu1 %v13119_v51  ;;  %v13154_v43 = vld [vmem:[#allocation237_spill] sm:$0xff]  ;;  %v13155_v51 = vld [vmem:[#allocation238_spill] sm:$0xff] }
 0x55f   :  { %6451 = vmatprep.subr.bf16.mxu0 %v13120_v61  ;;  %6615 = vmatprep.subr.bf16.mxu1 %v13121_v62  ;;  %v13156_v61 = vld [vmem:[#allocation239_spill] sm:$0xff]  ;;  %v13157_v62 = vld [vmem:[#allocation240_spill] sm:$0xff] }
 0x560   :  { %v8248_v44 = vpop.f32.mrb[12].mxu0  ;;  %v8270_v35 = vpop.f32.mrb[12].mxu1 }
 0x561   :  { %v8249_v63 = vpop.f32.mrb[13].mxu0  ;;  %v8271_v55 = vpop.f32.mrb[13].mxu1 }
 0x562   :  { %v8250_v33 = vadd.f32 %v8249_v63, %v8248_v44  ;;  %v8272_v17 = vadd.f32 %v8271_v55, %v8270_v35  ;;  %6452 = vmatpush1.bf16.msra.mxu0 %v13122_v13  ;;  %6616 = vmatpush1.bf16.msra.mxu1 %v13123_v59  ;;  %v8251_v45 = vpop.f32.mrb[14].mxu0  ;;  %v8273_v41 = vpop.f32.mrb[14].mxu1  ;;  %v13158_v44 = vld [vmem:[#allocation241_spill] sm:$0xff]  ;;  %v13159_v35 = vld [vmem:[#allocation242_spill] sm:$0xff]  ;;  %v13160_v63 = vld [vmem:[#allocation243_spill] sm:$0xff] }
 0x563   :  { %v8252_v5 = vpop.f32.mrb[15].mxu0  ;;  %v8274_v9 = vpop.f32.mrb[15].mxu1  ;;  %6453 = vmatprep.subr.bf16.mxu0 %v13124_v10  ;;  %6617 = vmatprep.subr.bf16.mxu1 %v13125_v14  ;;  %v13161_v55 = vld [vmem:[#allocation244_spill] sm:$0xff]  ;;  %v13163_v13 = vld [vmem:[#allocation246_spill] sm:$0xff]  ;;  %v13164_v59 = vld [vmem:[#allocation247_spill] sm:$0xff] }
 0x564   :  { %v6213_v18 = vadd.f32 %v8250_v33, %v11599_v30  ;;  %v11644_v33 = vcombine.high %v11564_v29, %v11564_v29  ;;  %v13165_v45 = vld [vmem:[#allocation248_spill] sm:$0xff]  ;;  %v13166_v41 = vld [vmem:[#allocation249_spill] sm:$0xff]  ;;  %v13167_v5 = vld [vmem:[#allocation250_spill] sm:$0xff] }
 0x565   :  { %v13168_v9 = vld [vmem:[#allocation251_spill] sm:$0xff]  ;;  %v13169_v10 = vld [vmem:[#allocation252_spill] sm:$0xff]  ;;  %v13170_v14 = vld [vmem:[#allocation253_spill] sm:$0xff] }
 0x566   :  { %v6253_v52 = vadd.f32 %v8272_v17, %v6213_v18  ;;  %6454 = vmatpush1.bf16.msra.mxu0 %v13126_v19  ;;  %6618 = vmatpush1.bf16.msra.mxu1 %v13127_v20  ;;  %v13162_v17 = vld [vmem:[#allocation245_spill] sm:$0xff]  ;;  %v13171_v18 = vld [vmem:[#allocation254_spill] sm:$0xff]  ;;  %v13173_v19 = vld [vmem:[#allocation256_spill] sm:$0xff] }
 0x567   :  { %6455 = vmatprep.subr.bf16.mxu0 %v13128_v21  ;;  %6619 = vmatprep.subr.bf16.mxu1 %v13129_v26  ;;  %v13174_v20 = vld [vmem:[#allocation257_spill] sm:$0xff]  ;;  %v13175_v21 = vld [vmem:[#allocation258_spill] sm:$0xff]  ;;  %v13176_v26 = vld [vmem:[#allocation259_spill] sm:$0xff] }
 0x568   :  { %6258 = vst [vmem:[#allocation16] sm:$0x3] %v6253_v52  ;;  %v13172_v52 = vld [vmem:[#allocation255_spill] sm:$0xff] }
 0x56a   :  { %6456 = vmatpush1.bf16.msra.mxu0 %v13130_v27  ;;  %6620 = vmatpush1.bf16.msra.mxu1 %v13131_v28  ;;  %v13177_v27 = vld [vmem:[#allocation260_spill] sm:$0xff]  ;;  %v13178_v28 = vld [vmem:[#allocation261_spill] sm:$0xff] }
 0x56b   :  { %6457 = vmatprep.subr.bf16.mxu0 %v13132_v37  ;;  %6621 = vmatprep.subr.bf16.mxu1 %v13133_v38  ;;  %v13179_v37 = vld [vmem:[#allocation262_spill] sm:$0xff]  ;;  %v13181_v38 = vld [vmem:[#allocation264_spill] sm:$0xff] }
 0x56e   :  { %6458 = vmatpush1.bf16.msra.mxu0 %v13134_v39  ;;  %6622 = vmatpush1.bf16.msra.mxu1 %v13135_v40  ;;  %v13182_v39 = vld [vmem:[#allocation265_spill] sm:$0xff]  ;;  %v13183_v40 = vld [vmem:[#allocation266_spill] sm:$0xff] }
 0x56f   :  { %6459 = vmatprep.subr.bf16.mxu0 %v13136_v48  ;;  %6623 = vmatprep.subr.bf16.mxu1 %v13137_v53  ;;  %v13184_v48 = vld [vmem:[#allocation267_spill] sm:$0xff]  ;;  %v13185_v53 = vld [vmem:[#allocation268_spill] sm:$0xff] }
 0x572   :  { %6460 = vmatpush1.bf16.msra.mxu0 %v13138_v12  ;;  %6624 = vmatpush1.bf16.msra.mxu1 %v13139_v49  ;;  %v13186_v12 = vld [vmem:[#allocation269_spill] sm:$0xff]  ;;  %v13187_v49 = vld [vmem:[#allocation270_spill] sm:$0xff] }
 0x573   :  { %6461 = vmatprep.subr.bf16.mxu0 %v13140_v50  ;;  %6625 = vmatprep.subr.bf16.mxu1 %v13141_v56  ;;  %v13188_v50 = vld [vmem:[#allocation271_spill] sm:$0xff]  ;;  %v13189_v56 = vld [vmem:[#allocation272_spill] sm:$0xff] }
 0x576   :  { %6462 = vmatpush1.bf16.msra.mxu0 %v13142_v57  ;;  %6626 = vmatpush1.bf16.msra.mxu1 %v13143_v58  ;;  %v13190_v57 = vld [vmem:[#allocation273_spill] sm:$0xff]  ;;  %v13191_v58 = vld [vmem:[#allocation274_spill] sm:$0xff] }
 0x577   :  { %6463 = vmatprep.subr.bf16.mxu0 %v13144_v60  ;;  %6627 = vmatprep.subr.bf16.mxu1 %v13145_v2  ;;  %v13192_v60 = vld [vmem:[#allocation275_spill] sm:$0xff]  ;;  %v13193_v2 = vld [vmem:[#allocation276_spill] sm:$0xff] }
 0x57a   :  { %6464 = vmatpush1.bf16.msra.mxu0 %v13146_v6  ;;  %6628 = vmatpush1.bf16.msra.mxu1 %v13147_v7  ;;  %v13194_v6 = vld [vmem:[#allocation277_spill] sm:$0xff]  ;;  %v13195_v7 = vld [vmem:[#allocation278_spill] sm:$0xff] }
 0x57b   :  { %6465 = vmatprep.subr.bf16.mxu0 %v13148_v22  ;;  %6629 = vmatprep.subr.bf16.mxu1 %v13149_v23  ;;  %v13196_v22 = vld [vmem:[#allocation279_spill] sm:$0xff]  ;;  %v13197_v23 = vld [vmem:[#allocation280_spill] sm:$0xff] }
 0x57e   :  { %6466 = vmatpush1.bf16.msra.mxu0 %v13150_v24  ;;  %6630 = vmatpush1.bf16.msra.mxu1 %v13151_v25  ;;  %v13198_v24 = vld [vmem:[#allocation281_spill] sm:$0xff]  ;;  %v13199_v25 = vld [vmem:[#allocation282_spill] sm:$0xff] }
 0x57f   :  { %6467 = vmatprep.subr.bf16.mxu0 %v13152_v46  ;;  %6631 = vmatprep.subr.bf16.mxu1 %v13153_v0  ;;  %v13200_v46 = vld [vmem:[#allocation283_spill] sm:$0xff]  ;;  %v13201_v0 = vld [vmem:[#allocation284_spill] sm:$0xff] }
 0x582   :  { %6468 = vmatpush1.bf16.msra.mxu0 %v13154_v43  ;;  %6632 = vmatpush1.bf16.msra.mxu1 %v13155_v51  ;;  %v13202_v43 = vld [vmem:[#allocation285_spill] sm:$0xff]  ;;  %v13203_v51 = vld [vmem:[#allocation286_spill] sm:$0xff] }
 0x583   :  { %6469 = vmatprep.subr.bf16.mxu0 %v13156_v61  ;;  %6633 = vmatprep.subr.bf16.mxu1 %v13157_v62  ;;  %v13204_v61 = vld [vmem:[#allocation287_spill] sm:$0xff]  ;;  %v13205_v62 = vld [vmem:[#allocation288_spill] sm:$0xff] }
 0x586   :  { %6470 = vmatpush1.bf16.msra.mxu0 %v13158_v44  ;;  %6634 = vmatpush1.bf16.msra.mxu1 %v13159_v35  ;;  %v13206_v44 = vld [vmem:[#allocation289_spill] sm:$0xff]  ;;  %v13207_v35 = vld [vmem:[#allocation290_spill] sm:$0xff] }
 0x587   :  { %6471 = vmatprep.subr.bf16.mxu0 %v13160_v63  ;;  %6635 = vmatprep.subr.bf16.mxu1 %v13161_v55  ;;  %v13208_v63 = vld [vmem:[#allocation291_spill] sm:$0xff]  ;;  %v13209_v55 = vld [vmem:[#allocation292_spill] sm:$0xff] }
 0x58a   :  { %6472 = vmatpush1.bf16.msra.mxu0 %v13162_v17  ;;  %6636 = vmatpush1.bf16.msra.mxu1 %v13163_v13  ;;  %v13210_v17 = vld [vmem:[#allocation293_spill] sm:$0xff]  ;;  %v13211_v13 = vld [vmem:[#allocation294_spill] sm:$0xff] }
 0x58b   :  { %6646 = vmatprep.subr.bf16.mxu0 %v13164_v59  ;;  %6810 = vmatprep.subr.bf16.mxu1 %v13165_v45  ;;  %v13212_v59 = vld [vmem:[#allocation295_spill] sm:$0xff]  ;;  %v13213_v45 = vld [vmem:[#allocation296_spill] sm:$0xff] }
 0x58d   :  { %6474 = vmatmul.mubr.bf16.vlgmr.msra.gmra.mrb[16].mxu0 %v11644_v33  ;;  %6638 = vmatmul.mubr.bf16.vlgmr.msra.gmra.mrb[16].mxu1 %v11644_v33 }
 0x58e   :  { %6647 = vmatpush1.bf16.msra.mxu0 %v13166_v41  ;;  %6811 = vmatpush1.bf16.msra.mxu1 %v13167_v5  ;;  %v13214_v41 = vld [vmem:[#allocation297_spill] sm:$0xff]  ;;  %v13215_v5 = vld [vmem:[#allocation298_spill] sm:$0xff] }
 0x58f   :  { %6648 = vmatprep.subr.bf16.mxu0 %v13168_v9  ;;  %6812 = vmatprep.subr.bf16.mxu1 %v13169_v10  ;;  %v13216_v9 = vld [vmem:[#allocation299_spill] sm:$0xff]  ;;  %v13217_v10 = vld [vmem:[#allocation300_spill] sm:$0xff] }
 0x590   :  { %6678 = vmatprep.mubr.bf16.mxu0 %v11340_v36  ;;  %6842 = vmatprep.mubr.bf16.mxu1 %v11340_v36  ;;  %v13180_v36 = vld [vmem:[#allocation263_spill] sm:$0xff] }
 0x592   :  { %6649 = vmatpush1.bf16.msra.mxu0 %v13170_v14  ;;  %6813 = vmatpush1.bf16.msra.mxu1 %v13171_v18  ;;  %v13218_v14 = vld [vmem:[#allocation301_spill] sm:$0xff]  ;;  %v13219_v18 = vld [vmem:[#allocation302_spill] sm:$0xff] }
 0x593   :  { %6650 = vmatprep.subr.bf16.mxu0 %v13172_v52  ;;  %6814 = vmatprep.subr.bf16.mxu1 %v13173_v19  ;;  %v13220_v52 = vld [vmem:[#allocation303_spill] sm:$0xff]  ;;  %v13221_v19 = vld [vmem:[#allocation304_spill] sm:$0xff] }
 0x596   :  { %6651 = vmatpush1.bf16.msra.mxu0 %v13174_v20  ;;  %6815 = vmatpush1.bf16.msra.mxu1 %v13175_v21  ;;  %v13222_v20 = vld [vmem:[#allocation305_spill] sm:$0xff]  ;;  %v13223_v21 = vld [vmem:[#allocation306_spill] sm:$0xff] }
 0x597   :  { %6652 = vmatprep.subr.bf16.mxu0 %v13176_v26  ;;  %6816 = vmatprep.subr.bf16.mxu1 %v13177_v27  ;;  %v13224_v26 = vld [vmem:[#allocation307_spill] sm:$0xff]  ;;  %v13225_v27 = vld [vmem:[#allocation308_spill] sm:$0xff] }
 0x59a   :  { %6653 = vmatpush1.bf16.msra.mxu0 %v13178_v28  ;;  %6817 = vmatpush1.bf16.msra.mxu1 %v13179_v37  ;;  %v13226_v28 = vld [vmem:[#allocation309_spill] sm:$0xff]  ;;  %v13227_v37 = vld [vmem:[#allocation310_spill] sm:$0xff] }
 0x59b   :  { %6654 = vmatprep.subr.bf16.mxu0 %v13180_v36  ;;  %6818 = vmatprep.subr.bf16.mxu1 %v13181_v38  ;;  %v13228_v36 = vld [vmem:[#allocation311_spill] sm:$0xff]  ;;  %v13229_v38 = vld [vmem:[#allocation312_spill] sm:$0xff] }
 0x59e   :  { %6655 = vmatpush1.bf16.msra.mxu0 %v13182_v39  ;;  %6819 = vmatpush1.bf16.msra.mxu1 %v13183_v40  ;;  %v13230_v39 = vld [vmem:[#allocation313_spill] sm:$0xff]  ;;  %v13231_v40 = vld [vmem:[#allocation314_spill] sm:$0xff] }
 0x59f   :  { %6656 = vmatprep.subr.bf16.mxu0 %v13184_v48  ;;  %6820 = vmatprep.subr.bf16.mxu1 %v13185_v53  ;;  %v13232_v48 = vld [vmem:[#allocation315_spill] sm:$0xff]  ;;  %v13233_v53 = vld [vmem:[#allocation316_spill] sm:$0xff] }
 0x5a2   :  { %6657 = vmatpush1.bf16.msra.mxu0 %v13186_v12  ;;  %6821 = vmatpush1.bf16.msra.mxu1 %v13187_v49  ;;  %v13234_v12 = vld [vmem:[#allocation317_spill] sm:$0xff]  ;;  %v13235_v49 = vld [vmem:[#allocation318_spill] sm:$0xff] }
 0x5a3   :  { %6658 = vmatprep.subr.bf16.mxu0 %v13188_v50  ;;  %6822 = vmatprep.subr.bf16.mxu1 %v13189_v56  ;;  %v13236_v50 = vld [vmem:[#allocation319_spill] sm:$0xff]  ;;  %v13237_v56 = vld [vmem:[#allocation320_spill] sm:$0xff] }
 0x5a6   :  { %6659 = vmatpush1.bf16.msra.mxu0 %v13190_v57  ;;  %6823 = vmatpush1.bf16.msra.mxu1 %v13191_v58  ;;  %v13239_v57 = vld [vmem:[#allocation322_spill] sm:$0xff]  ;;  %v13240_v58 = vld [vmem:[#allocation323_spill] sm:$0xff] }
 0x5a7   :  { %6660 = vmatprep.subr.bf16.mxu0 %v13192_v60  ;;  %6824 = vmatprep.subr.bf16.mxu1 %v13193_v2  ;;  %v13241_v60 = vld [vmem:[#allocation324_spill] sm:$0xff]  ;;  %v13242_v2 = vld [vmem:[#allocation325_spill] sm:$0xff] }
 0x5aa   :  { %6661 = vmatpush1.bf16.msra.mxu0 %v13194_v6  ;;  %6825 = vmatpush1.bf16.msra.mxu1 %v13195_v7  ;;  %v13243_v6 = vld [vmem:[#allocation326_spill] sm:$0xff]  ;;  %v13245_v7 = vld [vmem:[#allocation328_spill] sm:$0xff] }
 0x5ab   :  { %6662 = vmatprep.subr.bf16.mxu0 %v13196_v22  ;;  %6826 = vmatprep.subr.bf16.mxu1 %v13197_v23  ;;  %v13246_v22 = vld [vmem:[#allocation329_spill] sm:$0xff]  ;;  %v13247_v23 = vld [vmem:[#allocation330_spill] sm:$0xff] }
 0x5ae   :  { %6663 = vmatpush1.bf16.msra.mxu0 %v13198_v24  ;;  %6827 = vmatpush1.bf16.msra.mxu1 %v13199_v25  ;;  %v13248_v24 = vld [vmem:[#allocation331_spill] sm:$0xff]  ;;  %v13249_v25 = vld [vmem:[#allocation332_spill] sm:$0xff] }
 0x5af   :  { %6664 = vmatprep.subr.bf16.mxu0 %v13200_v46  ;;  %6828 = vmatprep.subr.bf16.mxu1 %v13201_v0  ;;  %v13250_v46 = vld [vmem:[#allocation333_spill] sm:$0xff]  ;;  %v13251_v0 = vld [vmem:[#allocation334_spill] sm:$0xff] }
 0x5b2   :  { %6665 = vmatpush1.bf16.msra.mxu0 %v13202_v43  ;;  %6829 = vmatpush1.bf16.msra.mxu1 %v13203_v51  ;;  %v13252_v43 = vld [vmem:[#allocation335_spill] sm:$0xff]  ;;  %v13253_v51 = vld [vmem:[#allocation336_spill] sm:$0xff] }
 0x5b3   :  { %6666 = vmatprep.subr.bf16.mxu0 %v13204_v61  ;;  %6830 = vmatprep.subr.bf16.mxu1 %v13205_v62  ;;  %v13254_v61 = vld [vmem:[#allocation337_spill] sm:$0xff]  ;;  %v13255_v62 = vld [vmem:[#allocation338_spill] sm:$0xff] }
 0x5b6   :  { %6667 = vmatpush1.bf16.msra.mxu0 %v13206_v44  ;;  %6831 = vmatpush1.bf16.msra.mxu1 %v13207_v35  ;;  %v13256_v44 = vld [vmem:[#allocation339_spill] sm:$0xff]  ;;  %v13257_v35 = vld [vmem:[#allocation340_spill] sm:$0xff] }
 0x5b7   :  { %6668 = vmatprep.subr.bf16.mxu0 %v13208_v63  ;;  %6832 = vmatprep.subr.bf16.mxu1 %v13209_v55  ;;  %v13258_v63 = vld [vmem:[#allocation341_spill] sm:$0xff]  ;;  %v13259_v55 = vld [vmem:[#allocation342_spill] sm:$0xff] }
 0x5ba   :  { %6669 = vmatpush1.bf16.msra.mxu0 %v13210_v17  ;;  %6833 = vmatpush1.bf16.msra.mxu1 %v13211_v13  ;;  %v13260_v17 = vld [vmem:[#allocation343_spill] sm:$0xff]  ;;  %v13261_v13 = vld [vmem:[#allocation344_spill] sm:$0xff] }
 0x5bb   :  { %6670 = vmatprep.subr.bf16.mxu0 %v13212_v59  ;;  %6834 = vmatprep.subr.bf16.mxu1 %v13213_v45  ;;  %v13262_v59 = vld [vmem:[#allocation345_spill] sm:$0xff]  ;;  %v13263_v45 = vld [vmem:[#allocation346_spill] sm:$0xff] }
 0x5be   :  { %6671 = vmatpush1.bf16.msra.mxu0 %v13214_v41  ;;  %6835 = vmatpush1.bf16.msra.mxu1 %v13215_v5  ;;  %v13264_v41 = vld [vmem:[#allocation347_spill] sm:$0xff]  ;;  %v13265_v5 = vld [vmem:[#allocation348_spill] sm:$0xff] }
 0x5bf   :  { %6672 = vmatprep.subr.bf16.mxu0 %v13216_v9  ;;  %6836 = vmatprep.subr.bf16.mxu1 %v13217_v10  ;;  %v13266_v9 = vld [vmem:[#allocation349_spill] sm:$0xff]  ;;  %v13267_v10 = vld [vmem:[#allocation350_spill] sm:$0xff] }
 0x5c2   :  { %6673 = vmatpush1.bf16.msra.mxu0 %v13218_v14  ;;  %6837 = vmatpush1.bf16.msra.mxu1 %v13219_v18  ;;  %v13268_v14 = vld [vmem:[#allocation351_spill] sm:$0xff]  ;;  %v13269_v18 = vld [vmem:[#allocation352_spill] sm:$0xff] }
 0x5c3   :  { %6674 = vmatprep.subr.bf16.mxu0 %v13220_v52  ;;  %6838 = vmatprep.subr.bf16.mxu1 %v13221_v19  ;;  %v13270_v52 = vld [vmem:[#allocation353_spill] sm:$0xff]  ;;  %v13271_v19 = vld [vmem:[#allocation354_spill] sm:$0xff] }
 0x5c6   :  { %6675 = vmatpush1.bf16.msra.mxu0 %v13222_v20  ;;  %6839 = vmatpush1.bf16.msra.mxu1 %v13223_v21  ;;  %v13272_v20 = vld [vmem:[#allocation355_spill] sm:$0xff]  ;;  %v13273_v21 = vld [vmem:[#allocation356_spill] sm:$0xff] }
 0x5c7   :  { %6676 = vmatprep.subr.bf16.mxu0 %v13224_v26  ;;  %6840 = vmatprep.subr.bf16.mxu1 %v13225_v27  ;;  %v13274_v26 = vld [vmem:[#allocation357_spill] sm:$0xff]  ;;  %v13275_v27 = vld [vmem:[#allocation358_spill] sm:$0xff] }
 0x5ca   :  { %6677 = vmatpush1.bf16.msra.mxu0 %v13226_v28  ;;  %6841 = vmatpush1.bf16.msra.mxu1 %v13227_v37  ;;  %v13276_v28 = vld [vmem:[#allocation359_spill] sm:$0xff]  ;;  %v13277_v37 = vld [vmem:[#allocation360_spill] sm:$0xff] }
 0x5cb   :  { %6687 = vmatprep.subr.bf16.mxu0 %v13228_v36  ;;  %6851 = vmatprep.subr.bf16.mxu1 %v13229_v38  ;;  %v13278_v36 = vld [vmem:[#allocation361_spill] sm:$0xff]  ;;  %v13279_v38 = vld [vmem:[#allocation362_spill] sm:$0xff] }
 0x5cd   :  { %6679 = vmatmul.mubr.bf16.vlgmr.msra.gmra.mrb[20].mxu0 %v11406_v11  ;;  %6843 = vmatmul.mubr.bf16.vlgmr.msra.gmra.mrb[20].mxu1 %v11406_v11  ;;  %v13238_v11 = vld [vmem:[#allocation321_spill] sm:$0xff] }
 0x5ce   :  { %6688 = vmatpush1.bf16.msra.mxu0 %v13230_v39  ;;  %6852 = vmatpush1.bf16.msra.mxu1 %v13231_v40  ;;  %v13280_v39 = vld [vmem:[#allocation363_spill] sm:$0xff]  ;;  %v13281_v40 = vld [vmem:[#allocation364_spill] sm:$0xff] }
 0x5cf   :  { %6689 = vmatprep.subr.bf16.mxu0 %v13232_v48  ;;  %6853 = vmatprep.subr.bf16.mxu1 %v13233_v53  ;;  %v13282_v48 = vld [vmem:[#allocation365_spill] sm:$0xff]  ;;  %v13283_v53 = vld [vmem:[#allocation366_spill] sm:$0xff] }
 0x5d0   :  { %6719 = vmatprep.mubr.bf16.mxu0 %v11414_v34  ;;  %6883 = vmatprep.mubr.bf16.mxu1 %v11414_v34  ;;  %v13244_v34 = vld [vmem:[#allocation327_spill] sm:$0xff] }
 0x5d2   :  { %6690 = vmatpush1.bf16.msra.mxu0 %v13234_v12  ;;  %6854 = vmatpush1.bf16.msra.mxu1 %v13235_v49  ;;  %v13284_v12 = vld [vmem:[#allocation367_spill] sm:$0xff]  ;;  %v13285_v49 = vld [vmem:[#allocation368_spill] sm:$0xff] }
 0x5d3   :  { %6691 = vmatprep.subr.bf16.mxu0 %v13236_v50  ;;  %6855 = vmatprep.subr.bf16.mxu1 %v13237_v56  ;;  %v13286_v50 = vld [vmem:[#allocation369_spill] sm:$0xff]  ;;  %v13287_v56 = vld [vmem:[#allocation370_spill] sm:$0xff] }
 0x5d6   :  { %6692 = vmatpush1.bf16.msra.mxu0 %v13238_v11  ;;  %6856 = vmatpush1.bf16.msra.mxu1 %v13239_v57  ;;  %v13288_v11 = vld [vmem:[#allocation371_spill] sm:$0xff]  ;;  %v13289_v57 = vld [vmem:[#allocation372_spill] sm:$0xff] }
 0x5d7   :  { %6693 = vmatprep.subr.bf16.mxu0 %v13240_v58  ;;  %6857 = vmatprep.subr.bf16.mxu1 %v13241_v60  ;;  %v13290_v58 = vld [vmem:[#allocation373_spill] sm:$0xff]  ;;  %v13291_v60 = vld [vmem:[#allocation374_spill] sm:$0xff] }
 0x5da   :  { %6694 = vmatpush1.bf16.msra.mxu0 %v13242_v2  ;;  %6858 = vmatpush1.bf16.msra.mxu1 %v13243_v6  ;;  %v13292_v2 = vld [vmem:[#allocation375_spill] sm:$0xff]  ;;  %v13293_v6 = vld [vmem:[#allocation376_spill] sm:$0xff] }
 0x5db   :  { %6695 = vmatprep.subr.bf16.mxu0 %v13244_v34  ;;  %6859 = vmatprep.subr.bf16.mxu1 %v13245_v7  ;;  %v13294_v34 = vld [vmem:[#allocation377_spill] sm:$0xff]  ;;  %v13295_v7 = vld [vmem:[#allocation378_spill] sm:$0xff] }
 0x5de   :  { %6696 = vmatpush1.bf16.msra.mxu0 %v13246_v22  ;;  %6860 = vmatpush1.bf16.msra.mxu1 %v13247_v23  ;;  %v13296_v22 = vld [vmem:[#allocation379_spill] sm:$0xff]  ;;  %v13297_v23 = vld [vmem:[#allocation380_spill] sm:$0xff] }
 0x5df   :  { %6697 = vmatprep.subr.bf16.mxu0 %v13248_v24  ;;  %6861 = vmatprep.subr.bf16.mxu1 %v13249_v25  ;;  %v13298_v24 = vld [vmem:[#allocation381_spill] sm:$0xff]  ;;  %v13299_v25 = vld [vmem:[#allocation382_spill] sm:$0xff] }
 0x5e2   :  { %6698 = vmatpush1.bf16.msra.mxu0 %v13250_v46  ;;  %6862 = vmatpush1.bf16.msra.mxu1 %v13251_v0  ;;  %v13300_v46 = vld [vmem:[#allocation383_spill] sm:$0xff]  ;;  %v13301_v0 = vld [vmem:[#allocation384_spill] sm:$0xff] }
 0x5e3   :  { %6699 = vmatprep.subr.bf16.mxu0 %v13252_v43  ;;  %6863 = vmatprep.subr.bf16.mxu1 %v13253_v51  ;;  %v13303_v43 = vld [vmem:[#allocation386_spill] sm:$0xff]  ;;  %v13304_v51 = vld [vmem:[#allocation387_spill] sm:$0xff] }
 0x5e6   :  { %6700 = vmatpush1.bf16.msra.mxu0 %v13254_v61  ;;  %6864 = vmatpush1.bf16.msra.mxu1 %v13255_v62  ;;  %v13305_v61 = vld [vmem:[#allocation388_spill] sm:$0xff]  ;;  %v13306_v62 = vld [vmem:[#allocation389_spill] sm:$0xff] }
 0x5e7   :  { %6701 = vmatprep.subr.bf16.mxu0 %v13256_v44  ;;  %6865 = vmatprep.subr.bf16.mxu1 %v13257_v35  ;;  %v13307_v44 = vld [vmem:[#allocation390_spill] sm:$0xff]  ;;  %v13309_v35 = vld [vmem:[#allocation392_spill] sm:$0xff] }
 0x5ea   :  { %6702 = vmatpush1.bf16.msra.mxu0 %v13258_v63  ;;  %6866 = vmatpush1.bf16.msra.mxu1 %v13259_v55  ;;  %v13310_v63 = vld [vmem:[#allocation393_spill] sm:$0xff]  ;;  %v13311_v55 = vld [vmem:[#allocation394_spill] sm:$0xff] }
 0x5eb   :  { %6703 = vmatprep.subr.bf16.mxu0 %v13260_v17  ;;  %6867 = vmatprep.subr.bf16.mxu1 %v13261_v13  ;;  %v13312_v17 = vld [vmem:[#allocation395_spill] sm:$0xff]  ;;  %v13313_v13 = vld [vmem:[#allocation396_spill] sm:$0xff] }
 0x5ee   :  { %6704 = vmatpush1.bf16.msra.mxu0 %v13262_v59  ;;  %6868 = vmatpush1.bf16.msra.mxu1 %v13263_v45  ;;  %v13314_v59 = vld [vmem:[#allocation397_spill] sm:$0xff]  ;;  %v13315_v45 = vld [vmem:[#allocation398_spill] sm:$0xff] }
 0x5ef   :  { %6705 = vmatprep.subr.bf16.mxu0 %v13264_v41  ;;  %6869 = vmatprep.subr.bf16.mxu1 %v13265_v5  ;;  %v13316_v41 = vld [vmem:[#allocation399_spill] sm:$0xff]  ;;  %v13317_v5 = vld [vmem:[#allocation400_spill] sm:$0xff] }
 0x5f2   :  { %6706 = vmatpush1.bf16.msra.mxu0 %v13266_v9  ;;  %6870 = vmatpush1.bf16.msra.mxu1 %v13267_v10  ;;  %v13318_v9 = vld [vmem:[#allocation401_spill] sm:$0xff]  ;;  %v13319_v10 = vld [vmem:[#allocation402_spill] sm:$0xff] }
 0x5f3   :  { %6707 = vmatprep.subr.bf16.mxu0 %v13268_v14  ;;  %6871 = vmatprep.subr.bf16.mxu1 %v13269_v18  ;;  %v13320_v14 = vld [vmem:[#allocation403_spill] sm:$0xff]  ;;  %v13321_v18 = vld [vmem:[#allocation404_spill] sm:$0xff] }
 0x5f6   :  { %6708 = vmatpush1.bf16.msra.mxu0 %v13270_v52  ;;  %6872 = vmatpush1.bf16.msra.mxu1 %v13271_v19  ;;  %v13322_v52 = vld [vmem:[#allocation405_spill] sm:$0xff]  ;;  %v13323_v19 = vld [vmem:[#allocation406_spill] sm:$0xff] }
 0x5f7   :  { %6709 = vmatprep.subr.bf16.mxu0 %v13272_v20  ;;  %6873 = vmatprep.subr.bf16.mxu1 %v13273_v21  ;;  %v13324_v20 = vld [vmem:[#allocation407_spill] sm:$0xff]  ;;  %v13325_v21 = vld [vmem:[#allocation408_spill] sm:$0xff] }
 0x5fa   :  { %6710 = vmatpush1.bf16.msra.mxu0 %v13274_v26  ;;  %6874 = vmatpush1.bf16.msra.mxu1 %v13275_v27  ;;  %v13326_v26 = vld [vmem:[#allocation409_spill] sm:$0xff]  ;;  %v13327_v27 = vld [vmem:[#allocation410_spill] sm:$0xff] }
 0x5fb   :  { %6711 = vmatprep.subr.bf16.mxu0 %v13276_v28  ;;  %6875 = vmatprep.subr.bf16.mxu1 %v13277_v37  ;;  %v13328_v28 = vld [vmem:[#allocation411_spill] sm:$0xff]  ;;  %v13329_v37 = vld [vmem:[#allocation412_spill] sm:$0xff] }
 0x5fe   :  { %6712 = vmatpush1.bf16.msra.mxu0 %v13278_v36  ;;  %6876 = vmatpush1.bf16.msra.mxu1 %v13279_v38  ;;  %v13330_v36 = vld [vmem:[#allocation413_spill] sm:$0xff]  ;;  %v13331_v38 = vld [vmem:[#allocation414_spill] sm:$0xff] }
 0x5ff   :  { %6713 = vmatprep.subr.bf16.mxu0 %v13280_v39  ;;  %6877 = vmatprep.subr.bf16.mxu1 %v13281_v40  ;;  %v13332_v39 = vld [vmem:[#allocation415_spill] sm:$0xff]  ;;  %v13333_v40 = vld [vmem:[#allocation416_spill] sm:$0xff] }
 0x602   :  { %6714 = vmatpush1.bf16.msra.mxu0 %v13282_v48  ;;  %6878 = vmatpush1.bf16.msra.mxu1 %v13283_v53  ;;  %v13334_v48 = vld [vmem:[#allocation417_spill] sm:$0xff]  ;;  %v13335_v53 = vld [vmem:[#allocation418_spill] sm:$0xff] }
 0x603   :  { %6715 = vmatprep.subr.bf16.mxu0 %v13284_v12  ;;  %6879 = vmatprep.subr.bf16.mxu1 %v13285_v49  ;;  %v13336_v12 = vld [vmem:[#allocation419_spill] sm:$0xff]  ;;  %v13337_v49 = vld [vmem:[#allocation420_spill] sm:$0xff] }
 0x606   :  { %6716 = vmatpush1.bf16.msra.mxu0 %v13286_v50  ;;  %6880 = vmatpush1.bf16.msra.mxu1 %v13287_v56  ;;  %v13338_v50 = vld [vmem:[#allocation421_spill] sm:$0xff]  ;;  %v13339_v56 = vld [vmem:[#allocation422_spill] sm:$0xff] }
 0x607   :  { %6717 = vmatprep.subr.bf16.mxu0 %v13288_v11  ;;  %6881 = vmatprep.subr.bf16.mxu1 %v13289_v57  ;;  %v13340_v11 = vld [vmem:[#allocation423_spill] sm:$0xff]  ;;  %v13341_v57 = vld [vmem:[#allocation424_spill] sm:$0xff] }
 0x60a   :  { %6718 = vmatpush1.bf16.msra.mxu0 %v13290_v58  ;;  %6882 = vmatpush1.bf16.msra.mxu1 %v13291_v60  ;;  %v13342_v58 = vld [vmem:[#allocation425_spill] sm:$0xff]  ;;  %v13343_v60 = vld [vmem:[#allocation426_spill] sm:$0xff] }
 0x60b   :  { %6728 = vmatprep.subr.bf16.mxu0 %v13292_v2  ;;  %6892 = vmatprep.subr.bf16.mxu1 %v13293_v6  ;;  %v13344_v2 = vld [vmem:[#allocation427_spill] sm:$0xff]  ;;  %v13345_v6 = vld [vmem:[#allocation428_spill] sm:$0xff] }
 0x60d   :  { %6720 = vmatmul.mubr.bf16.vlgmr.msra.gmra.mrb[20].mxu0 %v11489_v32  ;;  %6884 = vmatmul.mubr.bf16.vlgmr.msra.gmra.mrb[20].mxu1 %v11489_v32  ;;  %v13302_v32 = vld [vmem:[#allocation385_spill] sm:$0xff] }
 0x60e   :  { %6729 = vmatpush1.bf16.msra.mxu0 %v13294_v34  ;;  %6893 = vmatpush1.bf16.msra.mxu1 %v13295_v7  ;;  %v13346_v34 = vld [vmem:[#allocation429_spill] sm:$0xff]  ;;  %v13347_v7 = vld [vmem:[#allocation430_spill] sm:$0xff] }
 0x60f   :  { %6730 = vmatprep.subr.bf16.mxu0 %v13296_v22  ;;  %6894 = vmatprep.subr.bf16.mxu1 %v13297_v23  ;;  %v13348_v22 = vld [vmem:[#allocation431_spill] sm:$0xff]  ;;  %v13349_v23 = vld [vmem:[#allocation432_spill] sm:$0xff] }
 0x610   :  { %6760 = vmatprep.mubr.bf16.mxu0 %v11496_v54  ;;  %6924 = vmatprep.mubr.bf16.mxu1 %v11496_v54  ;;  %v13308_v54 = vld [vmem:[#allocation391_spill] sm:$0xff] }
 0x612   :  { %6731 = vmatpush1.bf16.msra.mxu0 %v13298_v24  ;;  %6895 = vmatpush1.bf16.msra.mxu1 %v13299_v25  ;;  %v13350_v24 = vld [vmem:[#allocation433_spill] sm:$0xff]  ;;  %v13351_v25 = vld [vmem:[#allocation434_spill] sm:$0xff] }
 0x613   :  { %6732 = vmatprep.subr.bf16.mxu0 %v13300_v46  ;;  %6896 = vmatprep.subr.bf16.mxu1 %v13301_v0  ;;  %v13352_v46 = vld [vmem:[#allocation435_spill] sm:$0xff]  ;;  %v13353_v0 = vld [vmem:[#allocation436_spill] sm:$0xff] }
 0x616   :  { %6733 = vmatpush1.bf16.msra.mxu0 %v13302_v32  ;;  %6897 = vmatpush1.bf16.msra.mxu1 %v13303_v43  ;;  %v13354_v32 = vld [vmem:[#allocation437_spill] sm:$0xff]  ;;  %v13355_v43 = vld [vmem:[#allocation438_spill] sm:$0xff] }
 0x617   :  { %6734 = vmatprep.subr.bf16.mxu0 %v13304_v51  ;;  %6898 = vmatprep.subr.bf16.mxu1 %v13305_v61  ;;  %v13356_v51 = vld [vmem:[#allocation439_spill] sm:$0xff]  ;;  %v13357_v61 = vld [vmem:[#allocation440_spill] sm:$0xff] }
 0x61a   :  { %6735 = vmatpush1.bf16.msra.mxu0 %v13306_v62  ;;  %6899 = vmatpush1.bf16.msra.mxu1 %v13307_v44  ;;  %v13358_v62 = vld [vmem:[#allocation441_spill] sm:$0xff]  ;;  %v13359_v44 = vld [vmem:[#allocation442_spill] sm:$0xff] }
 0x61b   :  { %6736 = vmatprep.subr.bf16.mxu0 %v13308_v54  ;;  %6900 = vmatprep.subr.bf16.mxu1 %v13309_v35  ;;  %v13360_v54 = vld [vmem:[#allocation443_spill] sm:$0xff]  ;;  %v13361_v35 = vld [vmem:[#allocation444_spill] sm:$0xff] }
 0x61e   :  { %6737 = vmatpush1.bf16.msra.mxu0 %v13310_v63  ;;  %6901 = vmatpush1.bf16.msra.mxu1 %v13311_v55  ;;  %v13362_v63 = vld [vmem:[#allocation445_spill] sm:$0xff]  ;;  %v13363_v55 = vld [vmem:[#allocation446_spill] sm:$0xff] }
 0x61f   :  { %6738 = vmatprep.subr.bf16.mxu0 %v13312_v17  ;;  %6902 = vmatprep.subr.bf16.mxu1 %v13313_v13  ;;  %v13364_v17 = vld [vmem:[#allocation447_spill] sm:$0xff]  ;;  %v13365_v13 = vld [vmem:[#allocation448_spill] sm:$0xff] }
 0x622   :  { %6739 = vmatpush1.bf16.msra.mxu0 %v13314_v59  ;;  %6903 = vmatpush1.bf16.msra.mxu1 %v13315_v45  ;;  %v13367_v59 = vld [vmem:[#allocation450_spill] sm:$0xff]  ;;  %v13368_v45 = vld [vmem:[#allocation451_spill] sm:$0xff] }
 0x623   :  { %6740 = vmatprep.subr.bf16.mxu0 %v13316_v41  ;;  %6904 = vmatprep.subr.bf16.mxu1 %v13317_v5  ;;  %v13369_v41 = vld [vmem:[#allocation452_spill] sm:$0xff]  ;;  %v13370_v5 = vld [vmem:[#allocation453_spill] sm:$0xff] }
 0x626   :  { %6741 = vmatpush1.bf16.msra.mxu0 %v13318_v9  ;;  %6905 = vmatpush1.bf16.msra.mxu1 %v13319_v10  ;;  %v13371_v9 = vld [vmem:[#allocation454_spill] sm:$0xff]  ;;  %v13373_v10 = vld [vmem:[#allocation456_spill] sm:$0xff] }
 0x627   :  { %6742 = vmatprep.subr.bf16.mxu0 %v13320_v14  ;;  %6906 = vmatprep.subr.bf16.mxu1 %v13321_v18  ;;  %v13374_v14 = vld [vmem:[#allocation457_spill] sm:$0xff]  ;;  %v13375_v18 = vld [vmem:[#allocation458_spill] sm:$0xff] }
 0x62a   :  { %6743 = vmatpush1.bf16.msra.mxu0 %v13322_v52  ;;  %6907 = vmatpush1.bf16.msra.mxu1 %v13323_v19  ;;  %v13376_v52 = vld [vmem:[#allocation459_spill] sm:$0xff]  ;;  %v13377_v19 = vld [vmem:[#allocation460_spill] sm:$0xff] }
 0x62b   :  { %6744 = vmatprep.subr.bf16.mxu0 %v13324_v20  ;;  %6908 = vmatprep.subr.bf16.mxu1 %v13325_v21 }
 0x62e   :  { %6745 = vmatpush1.bf16.msra.mxu0 %v13326_v26  ;;  %6909 = vmatpush1.bf16.msra.mxu1 %v13327_v27 }
 0x62f   :  { %6746 = vmatprep.subr.bf16.mxu0 %v13328_v28  ;;  %6910 = vmatprep.subr.bf16.mxu1 %v13329_v37 }
 0x632   :  { %6747 = vmatpush1.bf16.msra.mxu0 %v13330_v36  ;;  %6911 = vmatpush1.bf16.msra.mxu1 %v13331_v38  ;;  %v13378_v36 = vld [vmem:[#allocation461_spill] sm:$0xff]  ;;  %v13379_v38 = vld [vmem:[#allocation462_spill] sm:$0xff] }
 0x633   :  { %6748 = vmatprep.subr.bf16.mxu0 %v13332_v39  ;;  %6912 = vmatprep.subr.bf16.mxu1 %v13333_v40 }
 0x636   :  { %6749 = vmatpush1.bf16.msra.mxu0 %v13334_v48  ;;  %6913 = vmatpush1.bf16.msra.mxu1 %v13335_v53  ;;  %v13380_v48 = vld [vmem:[#allocation463_spill] sm:$0xff]  ;;  %v13381_v53 = vld [vmem:[#allocation464_spill] sm:$0xff] }
 0x637   :  { %6750 = vmatprep.subr.bf16.mxu0 %v13336_v12  ;;  %6914 = vmatprep.subr.bf16.mxu1 %v13337_v49  ;;  %v13382_v12 = vld [vmem:[#allocation465_spill] sm:$0xff]  ;;  %v13383_v49 = vld [vmem:[#allocation466_spill] sm:$0xff] }
 0x63a   :  { %6751 = vmatpush1.bf16.msra.mxu0 %v13338_v50  ;;  %6915 = vmatpush1.bf16.msra.mxu1 %v13339_v56  ;;  %v13384_v50 = vld [vmem:[#allocation467_spill] sm:$0xff]  ;;  %v13385_v56 = vld [vmem:[#allocation468_spill] sm:$0xff] }
 0x63b   :  { %6752 = vmatprep.subr.bf16.mxu0 %v13340_v11  ;;  %6916 = vmatprep.subr.bf16.mxu1 %v13341_v57  ;;  %v13386_v11 = vld [vmem:[#allocation469_spill] sm:$0xff]  ;;  %v13387_v57 = vld [vmem:[#allocation470_spill] sm:$0xff] }
 0x63e   :  { %6753 = vmatpush1.bf16.msra.mxu0 %v13342_v58  ;;  %6917 = vmatpush1.bf16.msra.mxu1 %v13343_v60  ;;  %v13388_v58 = vld [vmem:[#allocation471_spill] sm:$0xff]  ;;  %v13389_v60 = vld [vmem:[#allocation472_spill] sm:$0xff] }
 0x63f   :  { %6754 = vmatprep.subr.bf16.mxu0 %v13344_v2  ;;  %6918 = vmatprep.subr.bf16.mxu1 %v13345_v6  ;;  %v13390_v2 = vld [vmem:[#allocation473_spill] sm:$0xff]  ;;  %v13391_v6 = vld [vmem:[#allocation474_spill] sm:$0xff] }
 0x642   :  { %6755 = vmatpush1.bf16.msra.mxu0 %v13346_v34  ;;  %6919 = vmatpush1.bf16.msra.mxu1 %v13347_v7  ;;  %v13392_v34 = vld [vmem:[#allocation475_spill] sm:$0xff]  ;;  %v13393_v7 = vld [vmem:[#allocation476_spill] sm:$0xff] }
 0x643   :  { %6756 = vmatprep.subr.bf16.mxu0 %v13348_v22  ;;  %6920 = vmatprep.subr.bf16.mxu1 %v13349_v23  ;;  %v13394_v22 = vld [vmem:[#allocation477_spill] sm:$0xff]  ;;  %v13395_v23 = vld [vmem:[#allocation478_spill] sm:$0xff] }
 0x646   :  { %6757 = vmatpush1.bf16.msra.mxu0 %v13350_v24  ;;  %6921 = vmatpush1.bf16.msra.mxu1 %v13351_v25  ;;  %v13396_v24 = vld [vmem:[#allocation479_spill] sm:$0xff]  ;;  %v13397_v25 = vld [vmem:[#allocation480_spill] sm:$0xff] }
 0x647   :  { %6758 = vmatprep.subr.bf16.mxu0 %v13352_v46  ;;  %6922 = vmatprep.subr.bf16.mxu1 %v13353_v0  ;;  %v13398_v46 = vld [vmem:[#allocation481_spill] sm:$0xff]  ;;  %v13399_v0 = vld [vmem:[#allocation482_spill] sm:$0xff] }
 0x64a   :  { %6759 = vmatpush1.bf16.msra.mxu0 %v13354_v32  ;;  %6923 = vmatpush1.bf16.msra.mxu1 %v13355_v43  ;;  %v13400_v32 = vld [vmem:[#allocation483_spill] sm:$0xff]  ;;  %v13401_v43 = vld [vmem:[#allocation484_spill] sm:$0xff] }
 0x64b   :  { %6769 = vmatprep.subr.bf16.mxu0 %v13356_v51  ;;  %6933 = vmatprep.subr.bf16.mxu1 %v13357_v61  ;;  %v13402_v51 = vld [vmem:[#allocation485_spill] sm:$0xff]  ;;  %v13403_v61 = vld [vmem:[#allocation486_spill] sm:$0xff] }
 0x64d   :  { %6761 = vmatmul.mubr.bf16.vlgmr.msra.gmra.mrb[20].mxu0 %v11564_v29  ;;  %6925 = vmatmul.mubr.bf16.vlgmr.msra.gmra.mrb[20].mxu1 %v11564_v29  ;;  %v13366_v29 = vld [vmem:[#allocation449_spill] sm:$0xff] }
 0x64e   :  { %6770 = vmatpush1.bf16.msra.mxu0 %v13358_v62  ;;  %6934 = vmatpush1.bf16.msra.mxu1 %v13359_v44  ;;  %v13404_v62 = vld [vmem:[#allocation487_spill] sm:$0xff]  ;;  %v13405_v44 = vld [vmem:[#allocation488_spill] sm:$0xff] }
 0x64f   :  { %6771 = vmatprep.subr.bf16.mxu0 %v13360_v54  ;;  %6935 = vmatprep.subr.bf16.mxu1 %v13361_v35  ;;  %v13406_v54 = vld [vmem:[#allocation489_spill] sm:$0xff]  ;;  %v13407_v35 = vld [vmem:[#allocation490_spill] sm:$0xff] }
 0x650   :  { %6801 = vmatprep.mubr.bf16.mxu0 %v11572_v47  ;;  %6965 = vmatprep.mubr.bf16.mxu1 %v11572_v47  ;;  %v13372_v47 = vld [vmem:[#allocation455_spill] sm:$0xff] }
 0x652   :  { %6772 = vmatpush1.bf16.msra.mxu0 %v13362_v63  ;;  %6936 = vmatpush1.bf16.msra.mxu1 %v13363_v55  ;;  %v13408_v63 = vld [vmem:[#allocation491_spill] sm:$0xff]  ;;  %v13409_v55 = vld [vmem:[#allocation492_spill] sm:$0xff] }
 0x653   :  { %6773 = vmatprep.subr.bf16.mxu0 %v13364_v17  ;;  %6937 = vmatprep.subr.bf16.mxu1 %v13365_v13  ;;  %v13410_v17 = vld [vmem:[#allocation493_spill] sm:$0xff]  ;;  %v13411_v13 = vld [vmem:[#allocation494_spill] sm:$0xff] }
 0x656   :  { %6774 = vmatpush1.bf16.msra.mxu0 %v13366_v29  ;;  %6938 = vmatpush1.bf16.msra.mxu1 %v13367_v59  ;;  %v13412_v29 = vld [vmem:[#allocation495_spill] sm:$0xff]  ;;  %v13413_v59 = vld [vmem:[#allocation496_spill] sm:$0xff] }
 0x657   :  { %6775 = vmatprep.subr.bf16.mxu0 %v13368_v45  ;;  %6939 = vmatprep.subr.bf16.mxu1 %v13369_v41  ;;  %v13414_v45 = vld [vmem:[#allocation497_spill] sm:$0xff]  ;;  %v13415_v41 = vld [vmem:[#allocation498_spill] sm:$0xff] }
 0x65a   :  { %6776 = vmatpush1.bf16.msra.mxu0 %v13370_v5  ;;  %6940 = vmatpush1.bf16.msra.mxu1 %v13371_v9  ;;  %v13416_v9 = vld [vmem:[#allocation499_spill] sm:$0xff] }
 0x65b   :  { %6777 = vmatprep.subr.bf16.mxu0 %v13372_v47  ;;  %6941 = vmatprep.subr.bf16.mxu1 %v13373_v10  ;;  %v13417_v47 = vld [vmem:[#allocation500_spill] sm:$0xff] }
 0x65c   :  { %v8925_v10 = vld [vmem:[#allocation10] ss:$16 sps:$4 sm:$0xff]  }
 0x65e   :  { %6778 = vmatpush1.bf16.msra.mxu0 %v13374_v14  ;;  %6942 = vmatpush1.bf16.msra.mxu1 %v13375_v18  ;;  %v8926_v14 = vld [vmem:[#allocation10 + $0x8] ss:$16 sps:$4 sm:$0xff]   ;;  %v8927_v18 = vld [vmem:[#allocation10 + $0x24] ss:$16 sps:$4 sm:$0xff]  }
 0x65f   :  { %6779 = vmatprep.subr.bf16.mxu0 %v13376_v52  ;;  %6943 = vmatprep.subr.bf16.mxu1 %v13377_v19  ;;  %v8928_v52 = vld [vmem:[#allocation10 + $0x2c] ss:$16 sps:$4 sm:$0xff]   ;;  %v8929_v19 = vld [vmem:[#allocation10 + $0x20] ss:$16 sps:$4 sm:$0xff]  }
 0x660   :  { %v11878_v20 = vpop.f32.mrb[16].mxu0  ;;  %v11880_v21 = vpop.f32.mrb[16].mxu1 }
 0x661   :  { %v6477_v26 = vpop.f32.mrb[17].mxu0  ;;  %v11882_v27 = vpop.f32.mrb[17].mxu1 }
 0x662   :  { %v6479_v28 = vpop.f32.mrb[18].mxu0  ;;  %v6643_v37 = vpop.f32.mrb[18].mxu1  ;;  %6780 = vmatpush1.bf16.msra.mxu0 %v13378_v36  ;;  %6944 = vmatpush1.bf16.msra.mxu1 %v13379_v38  ;;  %v8333_v5 = vadd.f32 %v6477_v26, %v13415_v41  ;;  %v8930_v26 = vld [vmem:[#allocation10 + $0x28] ss:$16 sps:$4 sm:$0xff]   ;;  %v8933_v36 = vld [vmem:[#allocation10 + $0x40] ss:$16 sps:$4 sm:$0xff]  }
 0x663   :  { %v6480_v39 = vpop.f32.mrb[19].mxu0  ;;  %v6644_v40 = vpop.f32.mrb[19].mxu1  ;;  %6781 = vmatprep.subr.bf16.mxu0 %v13380_v48  ;;  %6945 = vmatprep.subr.bf16.mxu1 %v13381_v53  ;;  %v8931_v28 = vld [vmem:[#allocation10 + $0x44] ss:$16 sps:$4 sm:$0xff]   ;;  %v8932_v37 = vld [vmem:[#allocation10 + $0x4c] ss:$16 sps:$4 sm:$0xff]  }
 0x664   :  { %v8935_v38 = vld [vmem:[#allocation10 + $0x64] ss:$16 sps:$4 sm:$0xff]   ;;  %v8936_v39 = vld [vmem:[#allocation10 + $0x6c] ss:$16 sps:$4 sm:$0xff]   ;;  %v8937_v40 = vld [vmem:[#allocation10 + $0x60] ss:$16 sps:$4 sm:$0xff]  }
 0x665   :  { %v8938_v48 = vld [vmem:[#allocation10 + $0x68] ss:$16 sps:$4 sm:$0xff]   ;;  %v8939_v53 = vld [vmem:[#allocation10 + $0x84] ss:$16 sps:$4 sm:$0xff]   ;;  %v8973_v41 = vld [vmem:[#allocation10 + $0x180] ss:$16 sps:$4 sm:$0xff]  }
 0x666   :  { %6782 = vmatpush1.bf16.msra.mxu0 %v13382_v12  ;;  %6946 = vmatpush1.bf16.msra.mxu1 %v13383_v49  ;;  %v8940_v12 = vld [vmem:[#allocation10 + $0x8c] ss:$16 sps:$4 sm:$0xff]   ;;  %v8941_v49 = vld [vmem:[#allocation10 + $0x80] ss:$16 sps:$4 sm:$0xff]  }
 0x667   :  { %6783 = vmatprep.subr.bf16.mxu0 %v13384_v50  ;;  %6947 = vmatprep.subr.bf16.mxu1 %v13385_v56  ;;  %v8942_v50 = vld [vmem:[#allocation10 + $0x88] ss:$16 sps:$4 sm:$0xff]   ;;  %v8943_v56 = vld [vmem:[#allocation10 + $0xa4] ss:$16 sps:$4 sm:$0xff]  }
 0x66a   :  { %6784 = vmatpush1.bf16.msra.mxu0 %v13386_v11  ;;  %6948 = vmatpush1.bf16.msra.mxu1 %v13387_v57  ;;  %v8944_v11 = vld [vmem:[#allocation10 + $0xac] ss:$16 sps:$4 sm:$0xff]   ;;  %v8945_v57 = vld [vmem:[#allocation10 + $0xa0] ss:$16 sps:$4 sm:$0xff]  }
 0x66b   :  { %6785 = vmatprep.subr.bf16.mxu0 %v13388_v58  ;;  %6949 = vmatprep.subr.bf16.mxu1 %v13389_v60  ;;  %v8946_v58 = vld [vmem:[#allocation10 + $0xa8] ss:$16 sps:$4 sm:$0xff]   ;;  %v8947_v60 = vld [vmem:[#allocation10 + $0xc4] ss:$16 sps:$4 sm:$0xff]  }
 0x66e   :  { %6786 = vmatpush1.bf16.msra.mxu0 %v13390_v2  ;;  %6950 = vmatpush1.bf16.msra.mxu1 %v13391_v6  ;;  %v8948_v2 = vld [vmem:[#allocation10 + $0xcc] ss:$16 sps:$4 sm:$0xff]   ;;  %v8949_v6 = vld [vmem:[#allocation10 + $0xc0] ss:$16 sps:$4 sm:$0xff]  }
 0x66f   :  { %6787 = vmatprep.subr.bf16.mxu0 %v13392_v34  ;;  %6951 = vmatprep.subr.bf16.mxu1 %v13393_v7  ;;  %v8950_v34 = vld [vmem:[#allocation10 + $0xc8] ss:$16 sps:$4 sm:$0xff]   ;;  %v8951_v7 = vld [vmem:[#allocation10 + $0xe4] ss:$16 sps:$4 sm:$0xff]  }
 0x672   :  { %6788 = vmatpush1.bf16.msra.mxu0 %v13394_v22  ;;  %6952 = vmatpush1.bf16.msra.mxu1 %v13395_v23  ;;  %v8952_v22 = vld [vmem:[#allocation10 + $0xec] ss:$16 sps:$4 sm:$0xff]   ;;  %v8953_v23 = vld [vmem:[#allocation10 + $0xe0] ss:$16 sps:$4 sm:$0xff]  }
 0x673   :  { %6789 = vmatprep.subr.bf16.mxu0 %v13396_v24  ;;  %6953 = vmatprep.subr.bf16.mxu1 %v13397_v25  ;;  %v8954_v24 = vld [vmem:[#allocation10 + $0xe8] ss:$16 sps:$4 sm:$0xff]   ;;  %v8955_v25 = vld [vmem:[#allocation10 + $0x104] ss:$16 sps:$4 sm:$0xff]  }
 0x676   :  { %6790 = vmatpush1.bf16.msra.mxu0 %v13398_v46  ;;  %6954 = vmatpush1.bf16.msra.mxu1 %v13399_v0  ;;  %v8956_v46 = vld [vmem:[#allocation10 + $0x10c] ss:$16 sps:$4 sm:$0xff]   ;;  %v8957_v0 = vld [vmem:[#allocation10 + $0x100] ss:$16 sps:$4 sm:$0xff]  }
 0x677   :  { %6791 = vmatprep.subr.bf16.mxu0 %v13400_v32  ;;  %6955 = vmatprep.subr.bf16.mxu1 %v13401_v43  ;;  %v8958_v32 = vld [vmem:[#allocation10 + $0x108] ss:$16 sps:$4 sm:$0xff]   ;;  %v8959_v43 = vld [vmem:[#allocation10 + $0x124] ss:$16 sps:$4 sm:$0xff]  }
 0x67a   :  { %6792 = vmatpush1.bf16.msra.mxu0 %v13402_v51  ;;  %6956 = vmatpush1.bf16.msra.mxu1 %v13403_v61  ;;  %v8960_v51 = vld [vmem:[#allocation10 + $0x12c] ss:$16 sps:$4 sm:$0xff]   ;;  %v8961_v61 = vld [vmem:[#allocation10 + $0x120] ss:$16 sps:$4 sm:$0xff]  }
 0x67b   :  { %6793 = vmatprep.subr.bf16.mxu0 %v13404_v62  ;;  %6957 = vmatprep.subr.bf16.mxu1 %v13405_v44  ;;  %v8962_v62 = vld [vmem:[#allocation10 + $0x128] ss:$16 sps:$4 sm:$0xff]   ;;  %v8963_v44 = vld [vmem:[#allocation10 + $0x144] ss:$16 sps:$4 sm:$0xff]  }
 0x67e   :  { %6794 = vmatpush1.bf16.msra.mxu0 %v13406_v54  ;;  %6958 = vmatpush1.bf16.msra.mxu1 %v13407_v35  ;;  %v8964_v54 = vld [vmem:[#allocation10 + $0x14c] ss:$16 sps:$4 sm:$0xff]   ;;  %v8965_v35 = vld [vmem:[#allocation10 + $0x140] ss:$16 sps:$4 sm:$0xff]  }
 0x67f   :  { %6795 = vmatprep.subr.bf16.mxu0 %v13408_v63  ;;  %6959 = vmatprep.subr.bf16.mxu1 %v13409_v55  ;;  %v8966_v63 = vld [vmem:[#allocation10 + $0x148] ss:$16 sps:$4 sm:$0xff]   ;;  %v8967_v55 = vld [vmem:[#allocation10 + $0x164] ss:$16 sps:$4 sm:$0xff]  }
 0x682   :  { %6796 = vmatpush1.bf16.msra.mxu0 %v11207_v1  ;;  %6960 = vmatpush1.bf16.msra.mxu1 %v11211_v16  ;;  %v8923_v1 = vld [vmem:[#allocation10 + $0x4] ss:$16 sps:$4 sm:$0xff]   ;;  %v8924_v16 = vld [vmem:[#allocation10 + $0xc] ss:$16 sps:$4 sm:$0xff]  }
 0x683   :  { %6797 = vmatprep.subr.bf16.mxu0 %v11213_v31  ;;  %6961 = vmatprep.subr.bf16.mxu1 %v13410_v17  ;;  %v6975_v31 = vpack.c.bf16 %v8333_v5, %v8333_v5  ;;  %v8968_v17 = vld [vmem:[#allocation10 + $0x16c] ss:$16 sps:$4 sm:$0xff]   ;;  %v8974_v5 = vld [vmem:[#allocation10 + $0x188] ss:$16 sps:$4 sm:$0xff]  }
 0x686   :  { %6798 = vmatpush1.bf16.msra.mxu0 %v13411_v13  ;;  %6962 = vmatpush1.bf16.msra.mxu1 %v13412_v29  ;;  %v8969_v13 = vld [vmem:[#allocation10 + $0x160] ss:$16 sps:$4 sm:$0xff]   ;;  %v8970_v29 = vld [vmem:[#allocation10 + $0x168] ss:$16 sps:$4 sm:$0xff]  }
 0x687   :  { %6799 = vmatprep.subr.bf16.mxu0 %v13413_v59  ;;  %6963 = vmatprep.subr.bf16.mxu1 %v13414_v45  ;;  %v8971_v59 = vld [vmem:[#allocation10 + $0x184] ss:$16 sps:$4 sm:$0xff]   ;;  %v8972_v45 = vld [vmem:[#allocation10 + $0x18c] ss:$16 sps:$4 sm:$0xff]  }
 0x68a   :  { %6800 = vmatpush1.bf16.msra.mxu0 %v13416_v9  ;;  %6964 = vmatpush1.bf16.msra.mxu1 %v13417_v47  ;;  %v8975_v9 = vld [vmem:[#allocation10 + $0x1a4] ss:$16 sps:$4 sm:$0xff]   ;;  %v8976_v47 = vld [vmem:[#allocation10 + $0x1ac] ss:$16 sps:$4 sm:$0xff]  }
 0x68b   :  { %6982 = vmatprep.subr.bf16.mxu0 %v8923_v1  ;;  %7146 = vmatprep.subr.bf16.mxu1 %v8924_v16  ;;  %v8977_v1 = vld [vmem:[#allocation10 + $0x1a0] ss:$16 sps:$4 sm:$0xff]   ;;  %v8978_v16 = vld [vmem:[#allocation10 + $0x1a8] ss:$16 sps:$4 sm:$0xff]  }
 0x68d   :  { %6802 = vmatmul.mubr.bf16.vlgmr.msra.gmra.mrb[20].mxu0 %v11644_v33  ;;  %6966 = vmatmul.mubr.bf16.vlgmr.msra.gmra.mrb[20].mxu1 %v11644_v33  ;;  %v8934_v33 = vld [vmem:[#allocation10 + $0x48] ss:$16 sps:$4 sm:$0xff]  }
 0x68e   :  { %6983 = vmatpush1.bf16.msra.mxu0 %v8925_v10  ;;  %7014 = vmatprep.mubr.bf16.mxu0 %v6975_v31  ;;  %v8980_v10 = vld [vmem:[#allocation10 + $0x1cc] ss:$16 sps:$4 sm:$0xff]  }
 0x68f   :  { %7147 = vmatpush1.bf16.msra.mxu1 %v8926_v14  ;;  %7178 = vmatprep.mubr.bf16.mxu1 %v6975_v31  ;;  %v8979_v31 = vld [vmem:[#allocation10 + $0x1c4] ss:$16 sps:$4 sm:$0xff]   ;;  %v8981_v14 = vld [vmem:[#allocation10 + $0x1c0] ss:$16 sps:$4 sm:$0xff]  }
 0x690   :  { %6984 = vmatprep.subr.bf16.mxu0 %v8927_v18  ;;  %7148 = vmatprep.subr.bf16.mxu1 %v8928_v52  ;;  %v8332_v18 = vadd.f32 %v11878_v20, %v11260_v42  ;;  %v8982_v52 = vld [vmem:[#allocation10 + $0x1c8] ss:$16 sps:$4 sm:$0xff]   ;;  %v8989_v42 = vld [vmem:[#allocation10 + $0x200] ss:$16 sps:$4 sm:$0xff]  }
 0x691   :  { %v8990_v20 = vld [vmem:[#allocation10 + $0x208] ss:$16 sps:$4 sm:$0xff]  }
 0x692   :  { %6985 = vmatpush1.bf16.msra.mxu0 %v8929_v19  ;;  %v8983_v19 = vld [vmem:[#allocation10 + $0x1e4] ss:$16 sps:$4 sm:$0xff]  }
 0x693   :  { %7149 = vmatpush1.bf16.msra.mxu1 %v8930_v26  ;;  %6986 = vmatprep.subr.bf16.mxu0 %v8931_v28  ;;  %v8984_v26 = vld [vmem:[#allocation10 + $0x1ec] ss:$16 sps:$4 sm:$0xff]   ;;  %v13418_v28 = vld [vmem:[#allocation501_spill] sm:$0xff] }
 0x694   :  { %7150 = vmatprep.subr.bf16.mxu1 %v8932_v37  ;;  %v8335_v37 = vadd.f32 %v11882_v27, %v13418_v28  ;;  %v8992_v27 = vld [vmem:[#allocation10 + $0x22c] ss:$16 sps:$4 sm:$0xff]   ;;  %v9039_v28 = vld [vmem:[#allocation10 + $0x3a4] ss:$16 sps:$4 sm:$0xff]  }
 0x696   :  { %6987 = vmatpush1.bf16.msra.mxu0 %v8933_v36  ;;  %v8985_v36 = vld [vmem:[#allocation10 + $0x1e0] ss:$16 sps:$4 sm:$0xff]  }
 0x697   :  { %7151 = vmatpush1.bf16.msra.mxu1 %v8934_v33  ;;  %6988 = vmatprep.subr.bf16.mxu0 %v8935_v38  ;;  %v6974_v33 = vpack.c.bf16 %v8332_v18, %v8332_v18  ;;  %v8986_v38 = vld [vmem:[#allocation10 + $0x1e8] ss:$16 sps:$4 sm:$0xff]   ;;  %v9035_v18 = vld [vmem:[#allocation10 + $0x384] ss:$16 sps:$4 sm:$0xff]  }
 0x698   :  { %7152 = vmatprep.subr.bf16.mxu1 %v8936_v39  ;;  %v8987_v39 = vld [vmem:[#allocation10 + $0x204] ss:$16 sps:$4 sm:$0xff]  }
 0x69a   :  { %6989 = vmatpush1.bf16.msra.mxu0 %v8937_v40  ;;  %v8988_v40 = vld [vmem:[#allocation10 + $0x20c] ss:$16 sps:$4 sm:$0xff]  }
 0x69b   :  { %7153 = vmatpush1.bf16.msra.mxu1 %v8938_v48  ;;  %6990 = vmatprep.subr.bf16.mxu0 %v8939_v53  ;;  %v6977_v48 = vpack.c.bf16 %v8335_v37, %v8335_v37  ;;  %v8991_v53 = vld [vmem:[#allocation10 + $0x224] ss:$16 sps:$4 sm:$0xff]   ;;  %v9040_v37 = vld [vmem:[#allocation10 + $0x3ac] ss:$16 sps:$4 sm:$0xff]  }
 0x69c   :  { %7154 = vmatprep.subr.bf16.mxu1 %v8940_v12  ;;  %v8993_v12 = vld [vmem:[#allocation10 + $0x220] ss:$16 sps:$4 sm:$0xff]  }
 0x69e   :  { %6991 = vmatpush1.bf16.msra.mxu0 %v8941_v49  ;;  %v8994_v49 = vld [vmem:[#allocation10 + $0x228] ss:$16 sps:$4 sm:$0xff]  }
 0x69f   :  { %7155 = vmatpush1.bf16.msra.mxu1 %v8942_v50  ;;  %6992 = vmatprep.subr.bf16.mxu0 %v8943_v56  ;;  %v8995_v50 = vld [vmem:[#allocation10 + $0x244] ss:$16 sps:$4 sm:$0xff]   ;;  %v8996_v56 = vld [vmem:[#allocation10 + $0x24c] ss:$16 sps:$4 sm:$0xff]  }
 0x6a0   :  { %7156 = vmatprep.subr.bf16.mxu1 %v8944_v11  ;;  %v8997_v11 = vld [vmem:[#allocation10 + $0x240] ss:$16 sps:$4 sm:$0xff]  }
 0x6a2   :  { %6993 = vmatpush1.bf16.msra.mxu0 %v8945_v57  ;;  %v8998_v57 = vld [vmem:[#allocation10 + $0x248] ss:$16 sps:$4 sm:$0xff]  }
 0x6a3   :  { %7157 = vmatpush1.bf16.msra.mxu1 %v8946_v58  ;;  %6994 = vmatprep.subr.bf16.mxu0 %v8947_v60  ;;  %v8999_v58 = vld [vmem:[#allocation10 + $0x264] ss:$16 sps:$4 sm:$0xff]   ;;  %v9000_v60 = vld [vmem:[#allocation10 + $0x26c] ss:$16 sps:$4 sm:$0xff]  }
 0x6a4   :  { %7158 = vmatprep.subr.bf16.mxu1 %v8948_v2  ;;  %v9001_v2 = vld [vmem:[#allocation10 + $0x260] ss:$16 sps:$4 sm:$0xff]  }
 0x6a6   :  { %6995 = vmatpush1.bf16.msra.mxu0 %v8949_v6  ;;  %v9002_v6 = vld [vmem:[#allocation10 + $0x268] ss:$16 sps:$4 sm:$0xff]  }
 0x6a7   :  { %7159 = vmatpush1.bf16.msra.mxu1 %v8950_v34  ;;  %6996 = vmatprep.subr.bf16.mxu0 %v8951_v7  ;;  %v9003_v34 = vld [vmem:[#allocation10 + $0x284] ss:$16 sps:$4 sm:$0xff]   ;;  %v9004_v7 = vld [vmem:[#allocation10 + $0x28c] ss:$16 sps:$4 sm:$0xff]  }
 0x6a8   :  { %7160 = vmatprep.subr.bf16.mxu1 %v8952_v22  ;;  %v9005_v22 = vld [vmem:[#allocation10 + $0x280] ss:$16 sps:$4 sm:$0xff]  }
 0x6aa   :  { %6997 = vmatpush1.bf16.msra.mxu0 %v8953_v23  ;;  %v9006_v23 = vld [vmem:[#allocation10 + $0x288] ss:$16 sps:$4 sm:$0xff]  }
 0x6ab   :  { %7161 = vmatpush1.bf16.msra.mxu1 %v8954_v24  ;;  %6998 = vmatprep.subr.bf16.mxu0 %v8955_v25  ;;  %v9007_v24 = vld [vmem:[#allocation10 + $0x2a4] ss:$16 sps:$4 sm:$0xff]   ;;  %v9008_v25 = vld [vmem:[#allocation10 + $0x2ac] ss:$16 sps:$4 sm:$0xff]  }
 0x6ac   :  { %7162 = vmatprep.subr.bf16.mxu1 %v8956_v46  ;;  %v9009_v46 = vld [vmem:[#allocation10 + $0x2a0] ss:$16 sps:$4 sm:$0xff]  }
 0x6ae   :  { %6999 = vmatpush1.bf16.msra.mxu0 %v8957_v0  ;;  %v9010_v0 = vld [vmem:[#allocation10 + $0x2a8] ss:$16 sps:$4 sm:$0xff]  }
 0x6af   :  { %7163 = vmatpush1.bf16.msra.mxu1 %v8958_v32  ;;  %7000 = vmatprep.subr.bf16.mxu0 %v8959_v43  ;;  %v9011_v32 = vld [vmem:[#allocation10 + $0x2c4] ss:$16 sps:$4 sm:$0xff]   ;;  %v9012_v43 = vld [vmem:[#allocation10 + $0x2cc] ss:$16 sps:$4 sm:$0xff]  }
 0x6b0   :  { %7164 = vmatprep.subr.bf16.mxu1 %v8960_v51  ;;  %v9013_v51 = vld [vmem:[#allocation10 + $0x2c0] ss:$16 sps:$4 sm:$0xff]  }
 0x6b2   :  { %7001 = vmatpush1.bf16.msra.mxu0 %v8961_v61  ;;  %v9014_v61 = vld [vmem:[#allocation10 + $0x2c8] ss:$16 sps:$4 sm:$0xff]  }
 0x6b3   :  { %7165 = vmatpush1.bf16.msra.mxu1 %v8962_v62  ;;  %7002 = vmatprep.subr.bf16.mxu0 %v8963_v44  ;;  %v9015_v62 = vld [vmem:[#allocation10 + $0x2e4] ss:$16 sps:$4 sm:$0xff]   ;;  %v9016_v44 = vld [vmem:[#allocation10 + $0x2ec] ss:$16 sps:$4 sm:$0xff]  }
 0x6b4   :  { %7166 = vmatprep.subr.bf16.mxu1 %v8964_v54  ;;  %v9017_v54 = vld [vmem:[#allocation10 + $0x2e0] ss:$16 sps:$4 sm:$0xff]  }
 0x6b6   :  { %7003 = vmatpush1.bf16.msra.mxu0 %v8965_v35  ;;  %v9018_v35 = vld [vmem:[#allocation10 + $0x2e8] ss:$16 sps:$4 sm:$0xff]  }
 0x6b7   :  { %7167 = vmatpush1.bf16.msra.mxu1 %v8966_v63  ;;  %7004 = vmatprep.subr.bf16.mxu0 %v8967_v55  ;;  %v9019_v63 = vld [vmem:[#allocation10 + $0x304] ss:$16 sps:$4 sm:$0xff]   ;;  %v9020_v55 = vld [vmem:[#allocation10 + $0x30c] ss:$16 sps:$4 sm:$0xff]  }
 0x6b8   :  { %7168 = vmatprep.subr.bf16.mxu1 %v8968_v17  ;;  %v9021_v17 = vld [vmem:[#allocation10 + $0x300] ss:$16 sps:$4 sm:$0xff]  }
 0x6ba   :  { %7005 = vmatpush1.bf16.msra.mxu0 %v8969_v13  ;;  %v9022_v13 = vld [vmem:[#allocation10 + $0x308] ss:$16 sps:$4 sm:$0xff]  }
 0x6bb   :  { %7169 = vmatpush1.bf16.msra.mxu1 %v8970_v29  ;;  %7006 = vmatprep.subr.bf16.mxu0 %v8971_v59  ;;  %v9023_v29 = vld [vmem:[#allocation10 + $0x324] ss:$16 sps:$4 sm:$0xff]   ;;  %v9024_v59 = vld [vmem:[#allocation10 + $0x32c] ss:$16 sps:$4 sm:$0xff]  }
 0x6bc   :  { %7170 = vmatprep.subr.bf16.mxu1 %v8972_v45  ;;  %v9025_v45 = vld [vmem:[#allocation10 + $0x320] ss:$16 sps:$4 sm:$0xff]  }
 0x6be   :  { %7007 = vmatpush1.bf16.msra.mxu0 %v8973_v41  ;;  %v9026_v41 = vld [vmem:[#allocation10 + $0x328] ss:$16 sps:$4 sm:$0xff]  }
 0x6bf   :  { %7171 = vmatpush1.bf16.msra.mxu1 %v8974_v5  ;;  %7008 = vmatprep.subr.bf16.mxu0 %v8975_v9  ;;  %v9027_v5 = vld [vmem:[#allocation10 + $0x344] ss:$16 sps:$4 sm:$0xff]   ;;  %v9028_v9 = vld [vmem:[#allocation10 + $0x34c] ss:$16 sps:$4 sm:$0xff]  }
 0x6c0   :  { %7172 = vmatprep.subr.bf16.mxu1 %v8976_v47  ;;  %v9029_v47 = vld [vmem:[#allocation10 + $0x340] ss:$16 sps:$4 sm:$0xff]  }
 0x6c2   :  { %7009 = vmatpush1.bf16.msra.mxu0 %v8977_v1  ;;  %v9030_v1 = vld [vmem:[#allocation10 + $0x348] ss:$16 sps:$4 sm:$0xff]  }
 0x6c3   :  { %7173 = vmatpush1.bf16.msra.mxu1 %v8978_v16  ;;  %7010 = vmatprep.subr.bf16.mxu0 %v8979_v31  ;;  %v9031_v16 = vld [vmem:[#allocation10 + $0x364] ss:$16 sps:$4 sm:$0xff]   ;;  %v9032_v31 = vld [vmem:[#allocation10 + $0x36c] ss:$16 sps:$4 sm:$0xff]  }
 0x6c4   :  { %7174 = vmatprep.subr.bf16.mxu1 %v8980_v10  ;;  %v9033_v10 = vld [vmem:[#allocation10 + $0x360] ss:$16 sps:$4 sm:$0xff]  }
 0x6c6   :  { %7011 = vmatpush1.bf16.msra.mxu0 %v8981_v14  ;;  %v9034_v14 = vld [vmem:[#allocation10 + $0x368] ss:$16 sps:$4 sm:$0xff]  }
 0x6c7   :  { %7175 = vmatpush1.bf16.msra.mxu1 %v8982_v52  ;;  %7012 = vmatprep.subr.bf16.mxu0 %v8983_v19  ;;  %v9036_v52 = vld [vmem:[#allocation10 + $0x38c] ss:$16 sps:$4 sm:$0xff]   ;;  %v9037_v19 = vld [vmem:[#allocation10 + $0x380] ss:$16 sps:$4 sm:$0xff]  }
 0x6c8   :  { %7176 = vmatprep.subr.bf16.mxu1 %v8984_v26  ;;  %v9038_v26 = vld [vmem:[#allocation10 + $0x388] ss:$16 sps:$4 sm:$0xff]  }
 0x6ca   :  { %7013 = vmatpush1.bf16.msra.mxu0 %v8985_v36  ;;  %v9041_v36 = vld [vmem:[#allocation10 + $0x3a0] ss:$16 sps:$4 sm:$0xff]  }
 0x6cb   :  { %7177 = vmatpush1.bf16.msra.mxu1 %v8986_v38  ;;  %7023 = vmatprep.subr.bf16.mxu0 %v8987_v39  ;;  %v9043_v38 = vld [vmem:[#allocation10 + $0x3c4] ss:$16 sps:$4 sm:$0xff]   ;;  %v9044_v39 = vld [vmem:[#allocation10 + $0x3cc] ss:$16 sps:$4 sm:$0xff]  }
 0x6cc   :  { %7187 = vmatprep.subr.bf16.mxu1 %v8988_v40  ;;  %v9045_v40 = vld [vmem:[#allocation10 + $0x3c0] ss:$16 sps:$4 sm:$0xff]  }
 0x6cd   :  { %7015 = vmatmul.mubr.bf16.vlgmr.msra.gmra.mrb[24].mxu0 %v6974_v33 }
 0x6ce   :  { %7179 = vmatmul.mubr.bf16.vlgmr.msra.gmra.mrb[24].mxu1 %v6974_v33  ;;  %7024 = vmatpush1.bf16.msra.mxu0 %v8989_v42  ;;  %v9042_v33 = vld [vmem:[#allocation10 + $0x3a8] ss:$16 sps:$4 sm:$0xff]  }
 0x6cf   :  { %7055 = vmatprep.mubr.bf16.mxu0 %v6977_v48  ;;  %7188 = vmatpush1.bf16.msra.mxu1 %v8990_v20  ;;  %v9046_v20 = vld [vmem:[#allocation10 + $0x3c8] ss:$16 sps:$4 sm:$0xff]  }
 0x6d0   :  { %7219 = vmatprep.mubr.bf16.mxu1 %v6977_v48  ;;  %7025 = vmatprep.subr.bf16.mxu0 %v8991_v53  ;;  %v13419_v48 = vld [vmem:[#allocation502_spill] sm:$0xff]  ;;  %v9047_v53 = vld [vmem:[#allocation10 + $0x3e4] ss:$16 sps:$4 sm:$0xff]  }
 0x6d1   :  { %7189 = vmatprep.subr.bf16.mxu1 %v8992_v27  ;;  %v8334_v42 = vadd.f32 %v11880_v21, %v13419_v48  ;;  %v9048_v27 = vld [vmem:[#allocation10 + $0x3ec] ss:$16 sps:$4 sm:$0xff]   ;;  %v9054_v21 = vld [vmem:[#allocation10 + $0x408] ss:$16 sps:$4 sm:$0xff]  }
 0x6d2   :  { %7026 = vmatpush1.bf16.msra.mxu0 %v8993_v12  ;;  %v9049_v12 = vld [vmem:[#allocation10 + $0x3e0] ss:$16 sps:$4 sm:$0xff]   ;;  %v9102_v48 = vld [vmem:[#allocation10 + $0x588] ss:$16 sps:$4 sm:$0xff]  }
 0x6d3   :  { %7190 = vmatpush1.bf16.msra.mxu1 %v8994_v49  ;;  %7027 = vmatprep.subr.bf16.mxu0 %v8995_v50  ;;  %v6976_v49 = vpack.c.bf16 %v8334_v42, %v8334_v42  ;;  %v9050_v50 = vld [vmem:[#allocation10 + $0x3e8] ss:$16 sps:$4 sm:$0xff]   ;;  %v9103_v42 = vld [vmem:[#allocation10 + $0x5a4] ss:$16 sps:$4 sm:$0xff]  }
 0x6d4   :  { %7191 = vmatprep.subr.bf16.mxu1 %v8996_v56  ;;  %v9051_v56 = vld [vmem:[#allocation10 + $0x404] ss:$16 sps:$4 sm:$0xff]  }
 0x6d6   :  { %7028 = vmatpush1.bf16.msra.mxu0 %v8997_v11  ;;  %v9052_v11 = vld [vmem:[#allocation10 + $0x40c] ss:$16 sps:$4 sm:$0xff]  }
 0x6d7   :  { %7192 = vmatpush1.bf16.msra.mxu1 %v8998_v57  ;;  %7029 = vmatprep.subr.bf16.mxu0 %v8999_v58  ;;  %v9053_v57 = vld [vmem:[#allocation10 + $0x400] ss:$16 sps:$4 sm:$0xff]   ;;  %v9055_v58 = vld [vmem:[#allocation10 + $0x424] ss:$16 sps:$4 sm:$0xff]  }
 0x6d8   :  { %7193 = vmatprep.subr.bf16.mxu1 %v9000_v60  ;;  %v9056_v60 = vld [vmem:[#allocation10 + $0x42c] ss:$16 sps:$4 sm:$0xff]  }
 0x6da   :  { %7030 = vmatpush1.bf16.msra.mxu0 %v9001_v2  ;;  %v9057_v2 = vld [vmem:[#allocation10 + $0x420] ss:$16 sps:$4 sm:$0xff]  }
 0x6db   :  { %7194 = vmatpush1.bf16.msra.mxu1 %v9002_v6  ;;  %7031 = vmatprep.subr.bf16.mxu0 %v9003_v34  ;;  %v9058_v6 = vld [vmem:[#allocation10 + $0x428] ss:$16 sps:$4 sm:$0xff]   ;;  %v9059_v34 = vld [vmem:[#allocation10 + $0x444] ss:$16 sps:$4 sm:$0xff]  }
 0x6dc   :  { %7195 = vmatprep.subr.bf16.mxu1 %v9004_v7  ;;  %v9060_v7 = vld [vmem:[#allocation10 + $0x44c] ss:$16 sps:$4 sm:$0xff]  }
 0x6de   :  { %7032 = vmatpush1.bf16.msra.mxu0 %v9005_v22  ;;  %v9061_v22 = vld [vmem:[#allocation10 + $0x440] ss:$16 sps:$4 sm:$0xff]  }
 0x6df   :  { %7196 = vmatpush1.bf16.msra.mxu1 %v9006_v23  ;;  %7033 = vmatprep.subr.bf16.mxu0 %v9007_v24  ;;  %v9062_v23 = vld [vmem:[#allocation10 + $0x448] ss:$16 sps:$4 sm:$0xff]   ;;  %v9063_v24 = vld [vmem:[#allocation10 + $0x464] ss:$16 sps:$4 sm:$0xff]  }
 0x6e0   :  { %7197 = vmatprep.subr.bf16.mxu1 %v9008_v25  ;;  %v9064_v25 = vld [vmem:[#allocation10 + $0x46c] ss:$16 sps:$4 sm:$0xff]  }
 0x6e2   :  { %7034 = vmatpush1.bf16.msra.mxu0 %v9009_v46  ;;  %v9065_v46 = vld [vmem:[#allocation10 + $0x460] ss:$16 sps:$4 sm:$0xff]  }
 0x6e3   :  { %7198 = vmatpush1.bf16.msra.mxu1 %v9010_v0  ;;  %7035 = vmatprep.subr.bf16.mxu0 %v9011_v32  ;;  %v9066_v0 = vld [vmem:[#allocation10 + $0x468] ss:$16 sps:$4 sm:$0xff]   ;;  %v9067_v32 = vld [vmem:[#allocation10 + $0x484] ss:$16 sps:$4 sm:$0xff]  }
 0x6e4   :  { %7199 = vmatprep.subr.bf16.mxu1 %v9012_v43  ;;  %v9068_v43 = vld [vmem:[#allocation10 + $0x48c] ss:$16 sps:$4 sm:$0xff]  }
 0x6e6   :  { %7036 = vmatpush1.bf16.msra.mxu0 %v9013_v51  ;;  %v9069_v51 = vld [vmem:[#allocation10 + $0x480] ss:$16 sps:$4 sm:$0xff]  }
 0x6e7   :  { %7200 = vmatpush1.bf16.msra.mxu1 %v9014_v61  ;;  %7037 = vmatprep.subr.bf16.mxu0 %v9015_v62  ;;  %v9070_v61 = vld [vmem:[#allocation10 + $0x488] ss:$16 sps:$4 sm:$0xff]   ;;  %v9071_v62 = vld [vmem:[#allocation10 + $0x4a4] ss:$16 sps:$4 sm:$0xff]  }
 0x6e8   :  { %7201 = vmatprep.subr.bf16.mxu1 %v9016_v44  ;;  %v9072_v44 = vld [vmem:[#allocation10 + $0x4ac] ss:$16 sps:$4 sm:$0xff]  }
 0x6ea   :  { %7038 = vmatpush1.bf16.msra.mxu0 %v9017_v54  ;;  %v9073_v54 = vld [vmem:[#allocation10 + $0x4a0] ss:$16 sps:$4 sm:$0xff]  }
 0x6eb   :  { %7202 = vmatpush1.bf16.msra.mxu1 %v9018_v35  ;;  %7039 = vmatprep.subr.bf16.mxu0 %v9019_v63  ;;  %v9074_v35 = vld [vmem:[#allocation10 + $0x4a8] ss:$16 sps:$4 sm:$0xff]   ;;  %v9075_v63 = vld [vmem:[#allocation10 + $0x4c4] ss:$16 sps:$4 sm:$0xff]  }
 0x6ec   :  { %7203 = vmatprep.subr.bf16.mxu1 %v9020_v55  ;;  %v9076_v55 = vld [vmem:[#allocation10 + $0x4cc] ss:$16 sps:$4 sm:$0xff]  }
 0x6ee   :  { %7040 = vmatpush1.bf16.msra.mxu0 %v9021_v17  ;;  %v9077_v17 = vld [vmem:[#allocation10 + $0x4c0] ss:$16 sps:$4 sm:$0xff]  }
 0x6ef   :  { %7204 = vmatpush1.bf16.msra.mxu1 %v9022_v13  ;;  %7041 = vmatprep.subr.bf16.mxu0 %v9023_v29  ;;  %v9078_v13 = vld [vmem:[#allocation10 + $0x4c8] ss:$16 sps:$4 sm:$0xff]   ;;  %v9079_v29 = vld [vmem:[#allocation10 + $0x4e4] ss:$16 sps:$4 sm:$0xff]  }
 0x6f0   :  { %7205 = vmatprep.subr.bf16.mxu1 %v9024_v59  ;;  %v9080_v59 = vld [vmem:[#allocation10 + $0x4ec] ss:$16 sps:$4 sm:$0xff]  }
 0x6f2   :  { %7042 = vmatpush1.bf16.msra.mxu0 %v9025_v45  ;;  %v9081_v45 = vld [vmem:[#allocation10 + $0x4e0] ss:$16 sps:$4 sm:$0xff]  }
 0x6f3   :  { %7206 = vmatpush1.bf16.msra.mxu1 %v9026_v41  ;;  %7043 = vmatprep.subr.bf16.mxu0 %v9027_v5  ;;  %v9082_v41 = vld [vmem:[#allocation10 + $0x4e8] ss:$16 sps:$4 sm:$0xff]   ;;  %v9083_v5 = vld [vmem:[#allocation10 + $0x504] ss:$16 sps:$4 sm:$0xff]  }
 0x6f4   :  { %7207 = vmatprep.subr.bf16.mxu1 %v9028_v9  ;;  %v9084_v9 = vld [vmem:[#allocation10 + $0x50c] ss:$16 sps:$4 sm:$0xff]  }
 0x6f6   :  { %7044 = vmatpush1.bf16.msra.mxu0 %v9029_v47  ;;  %v9085_v47 = vld [vmem:[#allocation10 + $0x500] ss:$16 sps:$4 sm:$0xff]  }
 0x6f7   :  { %7208 = vmatpush1.bf16.msra.mxu1 %v9030_v1  ;;  %7045 = vmatprep.subr.bf16.mxu0 %v9031_v16  ;;  %v9086_v1 = vld [vmem:[#allocation10 + $0x508] ss:$16 sps:$4 sm:$0xff]   ;;  %v9087_v16 = vld [vmem:[#allocation10 + $0x524] ss:$16 sps:$4 sm:$0xff]  }
 0x6f8   :  { %7209 = vmatprep.subr.bf16.mxu1 %v9032_v31  ;;  %v9088_v31 = vld [vmem:[#allocation10 + $0x52c] ss:$16 sps:$4 sm:$0xff]  }
 0x6fa   :  { %7046 = vmatpush1.bf16.msra.mxu0 %v9033_v10  ;;  %v9089_v10 = vld [vmem:[#allocation10 + $0x520] ss:$16 sps:$4 sm:$0xff]  }
 0x6fb   :  { %7210 = vmatpush1.bf16.msra.mxu1 %v9034_v14  ;;  %7047 = vmatprep.subr.bf16.mxu0 %v9035_v18  ;;  %v9090_v14 = vld [vmem:[#allocation10 + $0x528] ss:$16 sps:$4 sm:$0xff]   ;;  %v9091_v18 = vld [vmem:[#allocation10 + $0x544] ss:$16 sps:$4 sm:$0xff]  }
 0x6fc   :  { %7211 = vmatprep.subr.bf16.mxu1 %v9036_v52  ;;  %v9092_v52 = vld [vmem:[#allocation10 + $0x54c] ss:$16 sps:$4 sm:$0xff]  }
 0x6fe   :  { %7048 = vmatpush1.bf16.msra.mxu0 %v9037_v19  ;;  %v9093_v19 = vld [vmem:[#allocation10 + $0x540] ss:$16 sps:$4 sm:$0xff]  }
 0x6ff   :  { %7212 = vmatpush1.bf16.msra.mxu1 %v9038_v26  ;;  %7049 = vmatprep.subr.bf16.mxu0 %v9039_v28  ;;  %v9094_v26 = vld [vmem:[#allocation10 + $0x548] ss:$16 sps:$4 sm:$0xff]   ;;  %v9095_v28 = vld [vmem:[#allocation10 + $0x564] ss:$16 sps:$4 sm:$0xff]  }
 0x700   :  { %7213 = vmatprep.subr.bf16.mxu1 %v9040_v37  ;;  %v9096_v37 = vld [vmem:[#allocation10 + $0x56c] ss:$16 sps:$4 sm:$0xff]  }
 0x702   :  { %7050 = vmatpush1.bf16.msra.mxu0 %v9041_v36  ;;  %v9097_v36 = vld [vmem:[#allocation10 + $0x560] ss:$16 sps:$4 sm:$0xff]  }
 0x703   :  { %7214 = vmatpush1.bf16.msra.mxu1 %v9042_v33  ;;  %7051 = vmatprep.subr.bf16.mxu0 %v9043_v38  ;;  %v9098_v33 = vld [vmem:[#allocation10 + $0x568] ss:$16 sps:$4 sm:$0xff]   ;;  %v9099_v38 = vld [vmem:[#allocation10 + $0x584] ss:$16 sps:$4 sm:$0xff]  }
 0x704   :  { %7215 = vmatprep.subr.bf16.mxu1 %v9044_v39  ;;  %v9100_v39 = vld [vmem:[#allocation10 + $0x58c] ss:$16 sps:$4 sm:$0xff]  }
 0x706   :  { %7052 = vmatpush1.bf16.msra.mxu0 %v9045_v40  ;;  %v9101_v40 = vld [vmem:[#allocation10 + $0x580] ss:$16 sps:$4 sm:$0xff]  }
 0x707   :  { %7216 = vmatpush1.bf16.msra.mxu1 %v9046_v20  ;;  %7053 = vmatprep.subr.bf16.mxu0 %v9047_v53  ;;  %v9104_v20 = vld [vmem:[#allocation10 + $0x5ac] ss:$16 sps:$4 sm:$0xff]   ;;  %v9105_v53 = vld [vmem:[#allocation10 + $0x5a0] ss:$16 sps:$4 sm:$0xff]  }
 0x708   :  { %7217 = vmatprep.subr.bf16.mxu1 %v9048_v27  ;;  %v9106_v27 = vld [vmem:[#allocation10 + $0x5a8] ss:$16 sps:$4 sm:$0xff]  }
 0x70a   :  { %7054 = vmatpush1.bf16.msra.mxu0 %v9049_v12  ;;  %v9107_v12 = vld [vmem:[#allocation10 + $0x5c4] ss:$16 sps:$4 sm:$0xff]  }
 0x70b   :  { %7218 = vmatpush1.bf16.msra.mxu1 %v9050_v50  ;;  %7064 = vmatprep.subr.bf16.mxu0 %v9051_v56  ;;  %v9109_v50 = vld [vmem:[#allocation10 + $0x5c0] ss:$16 sps:$4 sm:$0xff]   ;;  %v9110_v56 = vld [vmem:[#allocation10 + $0x5c8] ss:$16 sps:$4 sm:$0xff]  }
 0x70c   :  { %7228 = vmatprep.subr.bf16.mxu1 %v9052_v11  ;;  %v9111_v11 = vld [vmem:[#allocation10 + $0x5e4] ss:$16 sps:$4 sm:$0xff]  }
 0x70d   :  { %7056 = vmatmul.mubr.bf16.vlgmr.msra.gmra.mrb[24].mxu0 %v6976_v49 }
 0x70e   :  { %7220 = vmatmul.mubr.bf16.vlgmr.msra.gmra.mrb[24].mxu1 %v6976_v49  ;;  %7065 = vmatpush1.bf16.msra.mxu0 %v9053_v57  ;;  %v9108_v49 = vld [vmem:[#allocation10 + $0x5cc] ss:$16 sps:$4 sm:$0xff]  }
 0x70f   :  { %7229 = vmatpush1.bf16.msra.mxu1 %v9054_v21  ;;  %7066 = vmatprep.subr.bf16.mxu0 %v9055_v58  ;;  %v9112_v57 = vld [vmem:[#allocation10 + $0x5ec] ss:$16 sps:$4 sm:$0xff]   ;;  %v9113_v21 = vld [vmem:[#allocation10 + $0x5e0] ss:$16 sps:$4 sm:$0xff]   ;;  %v9114_v58 = vld [vmem:[#allocation10 + $0x5e8] ss:$16 sps:$4 sm:$0xff]  }
 0x710   :  { %7230 = vmatprep.subr.bf16.mxu1 %v9056_v60  ;;  %v9115_v60 = vld [vmem:[#allocation10 + $0x604] ss:$16 sps:$4 sm:$0xff]  }
 0x712   :  { %7067 = vmatpush1.bf16.msra.mxu0 %v9057_v2  ;;  %v9116_v2 = vld [vmem:[#allocation10 + $0x60c] ss:$16 sps:$4 sm:$0xff]  }
 0x713   :  { %7231 = vmatpush1.bf16.msra.mxu1 %v9058_v6  ;;  %7068 = vmatprep.subr.bf16.mxu0 %v9059_v34 }
 0x714   :  { %7232 = vmatprep.subr.bf16.mxu1 %v9060_v7  ;;  %v13420_v7 = vld [vmem:[#allocation503_spill] sm:$0xff] }
 0x716   :  { %7069 = vmatpush1.bf16.msra.mxu0 %v9061_v22 }
 0x717   :  { %7233 = vmatpush1.bf16.msra.mxu1 %v9062_v23  ;;  %7070 = vmatprep.subr.bf16.mxu0 %v9063_v24 }
 0x718   :  { %7234 = vmatprep.subr.bf16.mxu1 %v9064_v25 }
 0x71a   :  { %7071 = vmatpush1.bf16.msra.mxu0 %v9065_v46 }
 0x71b   :  { %7235 = vmatpush1.bf16.msra.mxu1 %v9066_v0  ;;  %7072 = vmatprep.subr.bf16.mxu0 %v9067_v32 }
 0x71c   :  { %7236 = vmatprep.subr.bf16.mxu1 %v9068_v43 }
 0x71e   :  { %7073 = vmatpush1.bf16.msra.mxu0 %v9069_v51 }
 0x71f   :  { %7237 = vmatpush1.bf16.msra.mxu1 %v9070_v61  ;;  %7074 = vmatprep.subr.bf16.mxu0 %v9071_v62 }
 0x720   :  { %7238 = vmatprep.subr.bf16.mxu1 %v9072_v44 }
 0x722   :  { %7075 = vmatpush1.bf16.msra.mxu0 %v9073_v54  ;;  %v9117_v54 = vld [vmem:[#allocation10 + $0x600] ss:$16 sps:$4 sm:$0xff]  }
 0x723   :  { %7239 = vmatpush1.bf16.msra.mxu1 %v9074_v35  ;;  %7076 = vmatprep.subr.bf16.mxu0 %v9075_v63  ;;  %v9118_v35 = vld [vmem:[#allocation10 + $0x608] ss:$16 sps:$4 sm:$0xff]   ;;  %v9120_v63 = vld [vmem:[#allocation10 + $0x62c] ss:$16 sps:$4 sm:$0xff]  }
 0x724   :  { %7240 = vmatprep.subr.bf16.mxu1 %v9076_v55  ;;  %v9122_v55 = vld [vmem:[#allocation10 + $0x628] ss:$16 sps:$4 sm:$0xff]  }
 0x726   :  { %7077 = vmatpush1.bf16.msra.mxu0 %v9077_v17  ;;  %v9123_v17 = vld [vmem:[#allocation10 + $0x644] ss:$16 sps:$4 sm:$0xff]  }
 0x727   :  { %7241 = vmatpush1.bf16.msra.mxu1 %v9078_v13  ;;  %7078 = vmatprep.subr.bf16.mxu0 %v9079_v29  ;;  %v9124_v13 = vld [vmem:[#allocation10 + $0x64c] ss:$16 sps:$4 sm:$0xff]   ;;  %v9125_v29 = vld [vmem:[#allocation10 + $0x640] ss:$16 sps:$4 sm:$0xff]  }
 0x728   :  { %7242 = vmatprep.subr.bf16.mxu1 %v9080_v59  ;;  %v9126_v59 = vld [vmem:[#allocation10 + $0x648] ss:$16 sps:$4 sm:$0xff]  }
 0x72a   :  { %7079 = vmatpush1.bf16.msra.mxu0 %v9081_v45  ;;  %v9127_v45 = vld [vmem:[#allocation10 + $0x664] ss:$16 sps:$4 sm:$0xff]  }
 0x72b   :  { %7243 = vmatpush1.bf16.msra.mxu1 %v9082_v41  ;;  %7080 = vmatprep.subr.bf16.mxu0 %v9083_v5  ;;  %v9128_v41 = vld [vmem:[#allocation10 + $0x66c] ss:$16 sps:$4 sm:$0xff]   ;;  %v9129_v5 = vld [vmem:[#allocation10 + $0x660] ss:$16 sps:$4 sm:$0xff]  }
 0x72c   :  { %7244 = vmatprep.subr.bf16.mxu1 %v9084_v9  ;;  %v9130_v9 = vld [vmem:[#allocation10 + $0x668] ss:$16 sps:$4 sm:$0xff]  }
 0x72e   :  { %7081 = vmatpush1.bf16.msra.mxu0 %v9085_v47  ;;  %v9131_v47 = vld [vmem:[#allocation10 + $0x684] ss:$16 sps:$4 sm:$0xff]  }
 0x72f   :  { %7245 = vmatpush1.bf16.msra.mxu1 %v9086_v1  ;;  %7082 = vmatprep.subr.bf16.mxu0 %v9087_v16  ;;  %v9132_v1 = vld [vmem:[#allocation10 + $0x68c] ss:$16 sps:$4 sm:$0xff]   ;;  %v9133_v16 = vld [vmem:[#allocation10 + $0x680] ss:$16 sps:$4 sm:$0xff]  }
 0x730   :  { %7246 = vmatprep.subr.bf16.mxu1 %v9088_v31  ;;  %v9134_v31 = vld [vmem:[#allocation10 + $0x688] ss:$16 sps:$4 sm:$0xff]  }
 0x732   :  { %7083 = vmatpush1.bf16.msra.mxu0 %v9089_v10  ;;  %v9135_v10 = vld [vmem:[#allocation10 + $0x6a4] ss:$16 sps:$4 sm:$0xff]  }
 0x733   :  { %7247 = vmatpush1.bf16.msra.mxu1 %v9090_v14  ;;  %7084 = vmatprep.subr.bf16.mxu0 %v9091_v18  ;;  %v9136_v14 = vld [vmem:[#allocation10 + $0x6ac] ss:$16 sps:$4 sm:$0xff]   ;;  %v9137_v18 = vld [vmem:[#allocation10 + $0x6a0] ss:$16 sps:$4 sm:$0xff]  }
 0x734   :  { %7248 = vmatprep.subr.bf16.mxu1 %v9092_v52  ;;  %v9138_v52 = vld [vmem:[#allocation10 + $0x6a8] ss:$16 sps:$4 sm:$0xff]  }
 0x736   :  { %7085 = vmatpush1.bf16.msra.mxu0 %v9093_v19  ;;  %v9139_v19 = vld [vmem:[#allocation10 + $0x6c4] ss:$16 sps:$4 sm:$0xff]  }
 0x737   :  { %7249 = vmatpush1.bf16.msra.mxu1 %v9094_v26  ;;  %7086 = vmatprep.subr.bf16.mxu0 %v9095_v28  ;;  %v9140_v26 = vld [vmem:[#allocation10 + $0x6cc] ss:$16 sps:$4 sm:$0xff]   ;;  %v9141_v28 = vld [vmem:[#allocation10 + $0x6c0] ss:$16 sps:$4 sm:$0xff]  }
 0x738   :  { %7250 = vmatprep.subr.bf16.mxu1 %v9096_v37  ;;  %v9142_v37 = vld [vmem:[#allocation10 + $0x6c8] ss:$16 sps:$4 sm:$0xff]  }
 0x73a   :  { %7087 = vmatpush1.bf16.msra.mxu0 %v9097_v36  ;;  %v9143_v36 = vld [vmem:[#allocation10 + $0x6e4] ss:$16 sps:$4 sm:$0xff]  }
 0x73b   :  { %7251 = vmatpush1.bf16.msra.mxu1 %v9098_v33  ;;  %7088 = vmatprep.subr.bf16.mxu0 %v9099_v38  ;;  %v9144_v33 = vld [vmem:[#allocation10 + $0x6ec] ss:$16 sps:$4 sm:$0xff]   ;;  %v9145_v38 = vld [vmem:[#allocation10 + $0x6e0] ss:$16 sps:$4 sm:$0xff]  }
 0x73c   :  { %7252 = vmatprep.subr.bf16.mxu1 %v9100_v39  ;;  %v9146_v39 = vld [vmem:[#allocation10 + $0x6e8] ss:$16 sps:$4 sm:$0xff]  }
 0x73e   :  { %7089 = vmatpush1.bf16.msra.mxu0 %v9101_v40  ;;  %v9147_v40 = vld [vmem:[#allocation10 + $0x704] ss:$16 sps:$4 sm:$0xff]  }
 0x73f   :  { %7253 = vmatpush1.bf16.msra.mxu1 %v9102_v48  ;;  %7090 = vmatprep.subr.bf16.mxu0 %v9103_v42  ;;  %v9148_v48 = vld [vmem:[#allocation10 + $0x70c] ss:$16 sps:$4 sm:$0xff]   ;;  %v9149_v42 = vld [vmem:[#allocation10 + $0x700] ss:$16 sps:$4 sm:$0xff]  }
 0x740   :  { %7254 = vmatprep.subr.bf16.mxu1 %v9104_v20  ;;  %v9150_v20 = vld [vmem:[#allocation10 + $0x708] ss:$16 sps:$4 sm:$0xff]  }
 0x742   :  { %7091 = vmatpush1.bf16.msra.mxu0 %v9105_v53  ;;  %v9151_v53 = vld [vmem:[#allocation10 + $0x724] ss:$16 sps:$4 sm:$0xff]  }
 0x743   :  { %7255 = vmatpush1.bf16.msra.mxu1 %v9106_v27  ;;  %7092 = vmatprep.subr.bf16.mxu0 %v9107_v12  ;;  %v9152_v27 = vld [vmem:[#allocation10 + $0x72c] ss:$16 sps:$4 sm:$0xff]   ;;  %v9153_v12 = vld [vmem:[#allocation10 + $0x720] ss:$16 sps:$4 sm:$0xff]  }
 0x744   :  { %7256 = vmatprep.subr.bf16.mxu1 %v9108_v49  ;;  %v9154_v49 = vld [vmem:[#allocation10 + $0x728] ss:$16 sps:$4 sm:$0xff]  }
 0x746   :  { %7093 = vmatpush1.bf16.msra.mxu0 %v9109_v50  ;;  %v9155_v50 = vld [vmem:[#allocation10 + $0x744] ss:$16 sps:$4 sm:$0xff]  }
 0x747   :  { %7257 = vmatpush1.bf16.msra.mxu1 %v9110_v56  ;;  %7094 = vmatprep.subr.bf16.mxu0 %v9111_v11  ;;  %v9156_v56 = vld [vmem:[#allocation10 + $0x74c] ss:$16 sps:$4 sm:$0xff]   ;;  %v9157_v11 = vld [vmem:[#allocation10 + $0x740] ss:$16 sps:$4 sm:$0xff]  }
 0x748   :  { %7258 = vmatprep.subr.bf16.mxu1 %v9112_v57  ;;  %v9158_v57 = vld [vmem:[#allocation10 + $0x748] ss:$16 sps:$4 sm:$0xff]  }
 0x74a   :  { %7095 = vmatpush1.bf16.msra.mxu0 %v9113_v21  ;;  %v9159_v21 = vld [vmem:[#allocation10 + $0x764] ss:$16 sps:$4 sm:$0xff]  }
 0x74b   :  { %7259 = vmatpush1.bf16.msra.mxu1 %v9114_v58  ;;  %7105 = vmatprep.subr.bf16.mxu0 %v9115_v60  ;;  %v9160_v58 = vld [vmem:[#allocation10 + $0x76c] ss:$16 sps:$4 sm:$0xff]   ;;  %v9161_v60 = vld [vmem:[#allocation10 + $0x760] ss:$16 sps:$4 sm:$0xff]  }
 0x74c   :  { %7269 = vmatprep.subr.bf16.mxu1 %v9116_v2  ;;  %v9162_v2 = vld [vmem:[#allocation10 + $0x768] ss:$16 sps:$4 sm:$0xff]  }
 0x760   :  { %v6803_v6 = vpop.f32.mrb[20].mxu0  ;;  %v11935_v34 = vpop.f32.mrb[20].mxu1 }
 0x761   :  { %v8336_v22 = vadd.f32 %v6803_v6, %v13420_v7  ;;  %v6805_v23 = vpop.f32.mrb[21].mxu0  ;;  %v6969_v24 = vpop.f32.mrb[21].mxu1  ;;  %v9163_v6 = vld [vmem:[#allocation10 + $0x784] ss:$16 sps:$4 sm:$0xff]   ;;  %v9164_v7 = vld [vmem:[#allocation10 + $0x78c] ss:$16 sps:$4 sm:$0xff]  }
 0x762   :  { %v8337_v25 = vadd.f32 %v6805_v23, %v11292_v15  ;;  %v6807_v46 = vpop.f32.mrb[22].mxu0  ;;  %v6971_v0 = vpop.f32.mrb[22].mxu1  ;;  %v8339_v32 = vadd.f32 %v6969_v24, %v11295_v4  ;;  %v9119_v15 = vld [vmem:[#allocation10 + $0x624] ss:$16 sps:$4 sm:$0xff]   ;;  %v9121_v4 = vld [vmem:[#allocation10 + $0x620] ss:$16 sps:$4 sm:$0xff]  }
 0x763   :  { %v6808_v43 = vpop.f32.mrb[23].mxu0  ;;  %v6972_v51 = vpop.f32.mrb[23].mxu1  ;;  %v6978_v62 = vpack.c.bf16 %v8336_v22, %v8336_v22  ;;  %v9165_v22 = vld [vmem:[#allocation10 + $0x780] ss:$16 sps:$4 sm:$0xff]   ;;  %v9166_v23 = vld [vmem:[#allocation10 + $0x788] ss:$16 sps:$4 sm:$0xff]  }
 0x764   :  { %v6979_v61 = vpack.c.bf16 %v8337_v25, %v8337_v25  ;;  %v6981_v44 = vpack.c.bf16 %v8339_v32, %v8339_v32  ;;  %v9167_v24 = vld [vmem:[#allocation10 + $0x7a4] ss:$16 sps:$4 sm:$0xff]   ;;  %v9168_v25 = vld [vmem:[#allocation10 + $0x7ac] ss:$16 sps:$4 sm:$0xff]   ;;  %v9169_v46 = vld [vmem:[#allocation10 + $0x7a0] ss:$16 sps:$4 sm:$0xff]  }
 0x765   :  { %v9170_v0 = vld [vmem:[#allocation10 + $0x7a8] ss:$16 sps:$4 sm:$0xff]   ;;  %v9171_v32 = vld [vmem:[#allocation10 + $0x7c4] ss:$16 sps:$4 sm:$0xff]   ;;  %v9172_v43 = vld [vmem:[#allocation10 + $0x7cc] ss:$16 sps:$4 sm:$0xff]  }
 0x766   :  { %7096 = vmatprep.mubr.bf16.mxu0 %v6979_v61  ;;  %7260 = vmatprep.mubr.bf16.mxu1 %v6979_v61  ;;  %v9173_v51 = vld [vmem:[#allocation10 + $0x7c0] ss:$16 sps:$4 sm:$0xff]   ;;  %v9174_v61 = vld [vmem:[#allocation10 + $0x7c8] ss:$16 sps:$4 sm:$0xff]  }
 0x767   :  { %7097 = vmatmul.mubr.bf16.vlgmr.msra.gmra.mrb[24].mxu0 %v6978_v62  ;;  %7261 = vmatmul.mubr.bf16.vlgmr.msra.gmra.mrb[24].mxu1 %v6978_v62  ;;  %v13421_v62 = vld [vmem:[#allocation504_spill] sm:$0xff] }
 0x768   :  { %7106 = vmatpush1.bf16.msra.mxu0 %v9117_v54  ;;  %7270 = vmatpush1.bf16.msra.mxu1 %v9118_v35  ;;  %v9175_v54 = vld [vmem:[#allocation10 + $0x7e4] ss:$16 sps:$4 sm:$0xff]   ;;  %v9176_v35 = vld [vmem:[#allocation10 + $0x7ec] ss:$16 sps:$4 sm:$0xff]  }
 0x769   :  { %7137 = vmatprep.mubr.bf16.mxu0 %v6981_v44  ;;  %7301 = vmatprep.mubr.bf16.mxu1 %v6981_v44  ;;  %v8338_v44 = vadd.f32 %v11935_v34, %v13421_v62  ;;  %v9183_v34 = vld [vmem:[#allocation13 + $0x48] sm:$0xff]  }
 0x76a   :  { %7107 = vmatprep.subr.bf16.mxu0 %v9119_v15  ;;  %7271 = vmatprep.subr.bf16.mxu1 %v9120_v63  ;;  %v9177_v15 = vld [vmem:[#allocation10 + $0x7e0] ss:$16 sps:$4 sm:$0xff]   ;;  %v9178_v63 = vld [vmem:[#allocation10 + $0x7e8] ss:$16 sps:$4 sm:$0xff]  }
 0x76c   :  { %7108 = vmatpush1.bf16.msra.mxu0 %v9121_v4  ;;  %7272 = vmatpush1.bf16.msra.mxu1 %v9122_v55  ;;  %v6980_v4 = vpack.c.bf16 %v8338_v44, %v8338_v44  ;;  %v9179_v55 = vld [vmem:[#allocation13 + $0x40] sm:$0xff]  }
 0x76d   :  { %7109 = vmatprep.subr.bf16.mxu0 %v9123_v17  ;;  %7273 = vmatprep.subr.bf16.mxu1 %v9124_v13  ;;  %v9180_v17 = vld [vmem:[#allocation13 + $0xc0] sm:$0xff]  }
 0x76e   :  { %v9181_v13 = vld [vmem:[#allocation13] sm:$0xff]  }
 0x770   :  { %7110 = vmatpush1.bf16.msra.mxu0 %v9125_v29  ;;  %7274 = vmatpush1.bf16.msra.mxu1 %v9126_v59  ;;  %v9182_v29 = vld [vmem:[#allocation13 + $0x80] sm:$0xff]   ;;  %v9184_v59 = vld [vmem:[#allocation13 + $0xc8] sm:$0xff]  }
 0x771   :  { %7111 = vmatprep.subr.bf16.mxu0 %v9127_v45  ;;  %7275 = vmatprep.subr.bf16.mxu1 %v9128_v41  ;;  %v9185_v45 = vld [vmem:[#allocation13 + $0x8] sm:$0xff]  }
 0x772   :  { %v9186_v41 = vld [vmem:[#allocation13 + $0x88] sm:$0xff]  }
 0x774   :  { %7112 = vmatpush1.bf16.msra.mxu0 %v9129_v5  ;;  %7276 = vmatpush1.bf16.msra.mxu1 %v9130_v9  ;;  %v9187_v5 = vld [vmem:[#allocation13 + $0x50] sm:$0xff]  }
 0x775   :  { %7113 = vmatprep.subr.bf16.mxu0 %v9131_v47  ;;  %7277 = vmatprep.subr.bf16.mxu1 %v9132_v1  ;;  %v9188_v9 = vld [vmem:[#allocation13 + $0xd0] sm:$0xff]  }
 0x776   :  { %v9189_v47 = vld [vmem:[#allocation13 + $0x10] sm:$0xff]  }
 0x777   :  { %v9190_v1 = vld [vmem:[#allocation13 + $0x90] sm:$0xff]  }
 0x778   :  { %7114 = vmatpush1.bf16.msra.mxu0 %v9133_v16  ;;  %7278 = vmatpush1.bf16.msra.mxu1 %v9134_v31  ;;  %v9191_v16 = vld [vmem:[#allocation13 + $0x58] sm:$0xff]  }
 0x779   :  { %7115 = vmatprep.subr.bf16.mxu0 %v9135_v10  ;;  %7279 = vmatprep.subr.bf16.mxu1 %v9136_v14  ;;  %v9192_v31 = vld [vmem:[#allocation13 + $0xd8] sm:$0xff]  }
 0x77a   :  { %v9193_v10 = vld [vmem:[#allocation13 + $0x18] sm:$0xff]  }
 0x77b   :  { %v9194_v14 = vld [vmem:[#allocation13 + $0x98] sm:$0xff]  }
 0x77c   :  { %7116 = vmatpush1.bf16.msra.mxu0 %v9137_v18  ;;  %7280 = vmatpush1.bf16.msra.mxu1 %v9138_v52  ;;  %v9195_v18 = vld [vmem:[#allocation13 + $0x60] sm:$0xff]  }
 0x77d   :  { %7117 = vmatprep.subr.bf16.mxu0 %v9139_v19  ;;  %7281 = vmatprep.subr.bf16.mxu1 %v9140_v26  ;;  %v9196_v52 = vld [vmem:[#allocation13 + $0xe0] sm:$0xff]  }
 0x77e   :  { %v9197_v19 = vld [vmem:[#allocation13 + $0x20] sm:$0xff]  }
 0x77f   :  { %v9198_v26 = vld [vmem:[#allocation13 + $0xa0] sm:$0xff]  }
 0x780   :  { %7118 = vmatpush1.bf16.msra.mxu0 %v9141_v28  ;;  %7282 = vmatpush1.bf16.msra.mxu1 %v9142_v37  ;;  %v9199_v28 = vld [vmem:[#allocation13 + $0x68] sm:$0xff]  }
 0x781   :  { %7119 = vmatprep.subr.bf16.mxu0 %v9143_v36  ;;  %7283 = vmatprep.subr.bf16.mxu1 %v9144_v33  ;;  %v9200_v37 = vld [vmem:[#allocation13 + $0xe8] sm:$0xff]  }
 0x782   :  { %v9201_v36 = vld [vmem:[#allocation13 + $0x28] sm:$0xff]  }
 0x783   :  { %v9202_v33 = vld [vmem:[#allocation13 + $0xa8] sm:$0xff]  }
 0x784   :  { %7120 = vmatpush1.bf16.msra.mxu0 %v9145_v38  ;;  %7284 = vmatpush1.bf16.msra.mxu1 %v9146_v39  ;;  %v9203_v38 = vld [vmem:[#allocation13 + $0x70] sm:$0xff]  }
 0x785   :  { %7121 = vmatprep.subr.bf16.mxu0 %v9147_v40  ;;  %7285 = vmatprep.subr.bf16.mxu1 %v9148_v48  ;;  %v9204_v39 = vld [vmem:[#allocation13 + $0xf0] sm:$0xff]  }
 0x786   :  { %v9205_v40 = vld [vmem:[#allocation13 + $0x30] sm:$0xff]  }
 0x787   :  { %v9206_v48 = vld [vmem:[#allocation13 + $0xb0] sm:$0xff]  }
 0x788   :  { %7122 = vmatpush1.bf16.msra.mxu0 %v9149_v42  ;;  %7286 = vmatpush1.bf16.msra.mxu1 %v9150_v20  ;;  %v9207_v42 = vld [vmem:[#allocation13 + $0x78] sm:$0xff]  }
 0x789   :  { %7123 = vmatprep.subr.bf16.mxu0 %v9151_v53  ;;  %7287 = vmatprep.subr.bf16.mxu1 %v9152_v27  ;;  %v9208_v20 = vld [vmem:[#allocation13 + $0xf8] sm:$0xff]  }
 0x78a   :  { %v9209_v53 = vld [vmem:[#allocation13 + $0x38] sm:$0xff]  }
 0x78b   :  { %v9210_v27 = vld [vmem:[#allocation13 + $0xb8] sm:$0xff]  }
 0x78c   :  { %7124 = vmatpush1.bf16.msra.mxu0 %v9153_v12  ;;  %7288 = vmatpush1.bf16.msra.mxu1 %v9154_v49 }
 0x78d   :  { %7125 = vmatprep.subr.bf16.mxu0 %v9155_v50  ;;  %7289 = vmatprep.subr.bf16.mxu1 %v9156_v56  ;;  %v13422_v50 = vld [vmem:[#allocation505_spill] sm:$0xff] }
 0x790   :  { %7126 = vmatpush1.bf16.msra.mxu0 %v9157_v11  ;;  %7290 = vmatpush1.bf16.msra.mxu1 %v9158_v57  ;;  %v13423_v11 = vld [vmem:[#allocation506_spill] sm:$0xff] }
 0x791   :  { %7127 = vmatprep.subr.bf16.mxu0 %v9159_v21  ;;  %7291 = vmatprep.subr.bf16.mxu1 %v9160_v58 }
 0x794   :  { %7128 = vmatpush1.bf16.msra.mxu0 %v9161_v60  ;;  %7292 = vmatpush1.bf16.msra.mxu1 %v9162_v2 }
 0x795   :  { %7129 = vmatprep.subr.bf16.mxu0 %v9163_v6  ;;  %7293 = vmatprep.subr.bf16.mxu1 %v9164_v7 }
 0x798   :  { %7130 = vmatpush1.bf16.msra.mxu0 %v9165_v22  ;;  %7294 = vmatpush1.bf16.msra.mxu1 %v9166_v23 }
 0x799   :  { %7131 = vmatprep.subr.bf16.mxu0 %v9167_v24  ;;  %7295 = vmatprep.subr.bf16.mxu1 %v9168_v25 }
 0x79c   :  { %7132 = vmatpush1.bf16.msra.mxu0 %v9169_v46  ;;  %7296 = vmatpush1.bf16.msra.mxu1 %v9170_v0 }
 0x79d   :  { %7133 = vmatprep.subr.bf16.mxu0 %v9171_v32  ;;  %7297 = vmatprep.subr.bf16.mxu1 %v9172_v43 }
 0x7a0   :  { %7134 = vmatpush1.bf16.msra.mxu0 %v9173_v51  ;;  %7298 = vmatpush1.bf16.msra.mxu1 %v9174_v61 }
 0x7a1   :  { %7135 = vmatprep.subr.bf16.mxu0 %v9175_v54  ;;  %7299 = vmatprep.subr.bf16.mxu1 %v9176_v35 }
 0x7a4   :  { %7136 = vmatpush1.bf16.msra.mxu0 %v9177_v15  ;;  %7300 = vmatpush1.bf16.msra.mxu1 %v9178_v63 }
 0x7a5   :  { %8276 = vmatprep.subr.bf16.mxu0 %v9179_v55  ;;  %8298 = vmatprep.subr.bf16.mxu1 %v9180_v17 }
 0x7a7   :  { %7138 = vmatmul.mubr.bf16.vlgmr.msra.gmra.mrb[24].mxu0 %v6980_v4  ;;  %7302 = vmatmul.mubr.bf16.vlgmr.msra.gmra.mrb[24].mxu1 %v6980_v4 }
 0x7a8   :  { %8277 = vmatpush3.bf16.msra.mxu0 %v9181_v13  ;;  %8299 = vmatpush3.bf16.msra.mxu1 %v9182_v29 }
 0x7a9   :  { %8278 = vmatprep.subr.bf16.mxu0 %v9183_v34  ;;  %8300 = vmatprep.subr.bf16.mxu1 %v9184_v59 }
 0x7ac   :  { %8279 = vmatpush3.bf16.msra.mxu0 %v9185_v45  ;;  %8301 = vmatpush3.bf16.msra.mxu1 %v9186_v41 }
 0x7ad   :  { %8280 = vmatprep.subr.bf16.mxu0 %v9187_v5  ;;  %8302 = vmatprep.subr.bf16.mxu1 %v9188_v9 }
 0x7b0   :  { %8281 = vmatpush3.bf16.msra.mxu0 %v9189_v47  ;;  %8303 = vmatpush3.bf16.msra.mxu1 %v9190_v1 }
 0x7b1   :  { %8282 = vmatprep.subr.bf16.mxu0 %v9191_v16  ;;  %8304 = vmatprep.subr.bf16.mxu1 %v9192_v31 }
 0x7b4   :  { %8283 = vmatpush3.bf16.msra.mxu0 %v9193_v10  ;;  %8305 = vmatpush3.bf16.msra.mxu1 %v9194_v14 }
 0x7b5   :  { %8284 = vmatprep.subr.bf16.mxu0 %v9195_v18  ;;  %8306 = vmatprep.subr.bf16.mxu1 %v9196_v52 }
 0x7b8   :  { %8285 = vmatpush3.bf16.msra.mxu0 %v9197_v19  ;;  %8307 = vmatpush3.bf16.msra.mxu1 %v9198_v26 }
 0x7b9   :  { %8286 = vmatprep.subr.bf16.mxu0 %v9199_v28  ;;  %8308 = vmatprep.subr.bf16.mxu1 %v9200_v37 }
 0x7bc   :  { %8287 = vmatpush3.bf16.msra.mxu0 %v9201_v36  ;;  %8309 = vmatpush3.bf16.msra.mxu1 %v9202_v33 }
 0x7bd   :  { %8288 = vmatprep.subr.bf16.mxu0 %v9203_v38  ;;  %8310 = vmatprep.subr.bf16.mxu1 %v9204_v39 }
 0x7c0   :  { %8289 = vmatpush3.bf16.msra.mxu0 %v9205_v40  ;;  %8311 = vmatpush3.bf16.msra.mxu1 %v9206_v48 }
 0x7c1   :  { %8290 = vmatprep.subr.bf16.mxu0 %v9207_v42  ;;  %8312 = vmatprep.subr.bf16.mxu1 %v9208_v20 }
 0x7c4   :  { %8291 = vmatpush3.bf16.msra.mxu0 %v9209_v53  ;;  %8313 = vmatpush3.bf16.msra.mxu1 %v9210_v27 }
 0x87a   :  { %v7139_v12 = vpop.f32.mrb[24].mxu0  ;;  %v7303_v49 = vpop.f32.mrb[24].mxu1 }
 0x87b   :  { %v8340_v56 = vadd.f32 %v7139_v12, %v13422_v50  ;;  %v8342_v57 = vadd.f32 %v7303_v49, %v13423_v11  ;;  %v7141_v21 = vpop.f32.mrb[25].mxu0  ;;  %v7305_v58 = vpop.f32.mrb[25].mxu1 }
 0x87c   :  { %v8341_v60 = vadd.f32 %v7141_v21, %v11324_v3  ;;  %v8343_v2 = vadd.f32 %v7305_v58, %v11327_v8  ;;  %v7143_v6 = vpop.f32.mrb[26].mxu0  ;;  %v7307_v7 = vpop.f32.mrb[26].mxu1 }
 0x87d   :  { %v7310_v22 = vmax.f32 %v8340_v56, 0.0  ;;  %v7312_v23 = vmax.f32 %v8342_v57, 0.0  ;;  %v7144_v24 = vpop.f32.mrb[27].mxu0  ;;  %v7308_v25 = vpop.f32.mrb[27].mxu1 }
 0x87e   :  { %v7311_v46 = vmax.f32 %v8341_v60, 0.0  ;;  %v7313_v0 = vmax.f32 %v8343_v2, 0.0 }
 0x87f   :  { %v7314_v51 = vpack.c.bf16 %v7310_v22, %v7310_v22  ;;  %v7316_v61 = vpack.c.bf16 %v7312_v23, %v7312_v23 }
 0x880   :  { %v7315_v32 = vpack.c.bf16 %v7311_v46, %v7311_v46  ;;  %v7317_v43 = vpack.c.bf16 %v7313_v0, %v7313_v0 }
 0x882   :  { %7350 = vmatprep.mubr.bf16.mxu0 %v7315_v32  ;;  %7390 = vmatprep.mubr.bf16.mxu1 %v7317_v43 }
 0x883   :  { %7351 = vmatmul.mubr.bf16.vlgmr.msra.gmra.mrb[28].mxu0 %v7314_v51  ;;  %7391 = vmatmul.mubr.bf16.vlgmr.msra.gmra.mrb[28].mxu1 %v7316_v61 }
 0x884   :  { %9398 = shalt.err (!%p9395_p12)
}
 0x885   :  { %s9399_s18 = scalar_lea.hbm %s11979_s8, 32 }
 0x886   :  { %p9400_p13 = scmp.ne.s32.totalorder %s11979_s8, %s9399_s18  ;;  %p9403_p0 = scmp.lt.u32.totalorder %s9399_s18, %s11979_s8 }
 0x888   :  { %p9405_p1 = pnand %p9403_p0, %p9400_p13 }
 0x88a   :  { %9408 = shalt.err (!%p9405_p1)
}
 0x88b   :  { %7408 = dma.vmem_to_hbm [thread:$0]  %s7406_s13, 32, %s11979_s8, [#allocation4]  }
 0x88c   :  { %s9461_s4 = smov [#allocation17]  }
 0x88d   :  { %s7415_s3 = sshll.u32 %s9461_s4, 4  ;;  %s7416_s3 = int_to_ptr.vmem [resolvable:$true] %s7415_s3 }
 0x88e   :  { %s9409_s12 = scalar_lea.vmem %s7416_s3, 32  ;;  %p9414_p3 = scmp.lt.s32.totalorder %s7416_s3, %s7416_s3 }
 0x88f   :  { %p9410_p2 = scmp.ne.s32.totalorder %s7416_s3, %s9409_s12  ;;  %p9415_p4 = scmp.lt.s32.totalorder %s9409_s12, %s9409_s12 }
 0x891   :  { %p9416_p5 = por %p9415_p4, %p9414_p3 }
 0x893   :  { %p9417_p6 = pnand %p9416_p5, %p9410_p2 }
 0x956   :  { %v8292_v3 = vpop.f32.mrb[28].mxu0  ;;  %v8314_v8 = vpop.f32.mrb[28].mxu1 }
 0x957   :  { %v8293_v62 = vpop.f32.mrb[29].mxu0  ;;  %v8315_v44 = vpop.f32.mrb[29].mxu1 }
 0x958   :  { %v8294_v54 = vadd.f32 %v8293_v62, %v8292_v3  ;;  %v8316_v35 = vadd.f32 %v8315_v44, %v8314_v8  ;;  %v8295_v15 = vpop.f32.mrb[30].mxu0  ;;  %v8317_v63 = vpop.f32.mrb[30].mxu1 }
 0x959   :  { %v8296_v4 = vpop.f32.mrb[31].mxu0  ;;  %v8318_v55 = vpop.f32.mrb[31].mxu1 }
 0x95a   :  { %v7353_v17 = vadd.f32 %v8294_v54, %v11599_v30 }
 0x95c   :  { %v7393_v13 = vadd.f32 %v8316_v35, %v7353_v17 }
 0x95e   :  { %7398 = vst [vmem:[#allocation17] sm:$0x3] %v7393_v13 }
 0x95f   :  { %9420 = shalt.err (!%p9417_p6)
}
 0x960   :  { %s9421_s24 = scalar_lea.hbm %s11980_s9, 32 }
 0x961   :  { %p9422_p7 = scmp.ne.s32.totalorder %s11980_s9, %s9421_s24  ;;  %p9425_p8 = scmp.lt.u32.totalorder %s9421_s24, %s11980_s9 }
 0x963   :  { %p9427_p9 = pnand %p9425_p8, %p9422_p7 }
 0x965   :  { %9430 = shalt.err (!%p9427_p9)
}
 0x966   :  { %7418 = dma.vmem_to_hbm [thread:$0]  %s7416_s3, 32, %s11980_s9, [#allocation18]  }
 0x967   :  { %9441 = dma.done.wait [#allocation4], 32  }
 0x968   :  { %9442 = vsyncadd [#allocation4], 4294967264 }
 0x969   :  { %9443 = dma.done.wait [#allocation18], 32  }
 0x96a   :  { %9444 = vsyncadd [#allocation18], 4294967264 }
 0x96b   :  { %7425 = vsyncpa [#allocation3], 1 }
 0x96c   :  { %7426 = vsyncpa [#allocation6], 1 }
 0x96d   :  { %7427 = vsyncpa [#allocation9], 1 }
 0x96e   :  { %7428 = vsyncpa [#allocation12], 1 }
 0x96f   :  { %7429 = vsyncpa [#allocation15], 1 }
 0x970   :  { %7430 = vsyncpa [#allocation4], 1 }
 0x971   :  { %7431 = vsyncpa [#allocation18], 1 }

</bundles_post_ra>
